<compile_context>
chip_gen: v6e
topology: v6e:2x2x1
jax: 0.10.0
libtpu: 0.0.40
codegen_flags: <defaults>
</compile_context>

<pallas_src>
import jax
import jax.numpy as jnp
from jax.experimental import pallas as pl
from jax.experimental.pallas import tpu as pltpu

# ----------------------------- model dims (small, module-consistent) --------
N = 2            # batch size
SEQ_LEN = 3      # sequence_length (words before / after)
E = 128          # embedding_size
H = 128          # hidden_state_size (module default is 256; small here)
DENSE = 256      # dense_layer_size (module default is 1024; small here)
CORPUS = 64      # corpus size for the synthetic embedding table

H2 = 2 * H       # fused [before | after] state width
G8 = 8 * H       # fused gate width: [i_b, i_a, f_b, f_a, g_b, g_a, o_b, o_a]
TAIL_ROWS = max(2 * H, DENSE)

# row offsets inside the packed LSTM weight buffer
_OFF_WIH0 = 0
_OFF_WHH0 = 2 * E
_OFF_W1 = 2 * E + 2 * H
_LSTM_W_ROWS = 2 * E + 6 * H


# ----------------------------------------------------------------------------
# Fused Pallas kernel (grid = (), everything resident in VMEM)
# ----------------------------------------------------------------------------
def words_batch_kernel(tokens_ref, emb_ref, lstm_w_ref, tail_w_ref, bias_ref,
                       out_ref, x_ref):
    # ---- in-kernel embedding gather --------------------------------------
    # x_ref rows are time-major (row = t*N + n); lanes [0:E] = before word t,
    # lanes [E:2E] = after word t.  tokens live in SMEM -> cheap scalar reads
    # feeding dynamic leading-axis loads from the VMEM table.
    for t in range(SEQ_LEN):
        for n in range(N):
            row = t * N + n
            tok_b = tokens_ref[n, t]
            tok_a = tokens_ref[n, SEQ_LEN + t]
            x_ref[row:row + 1, 0:E] = emb_ref[tok_b]
            x_ref[row:row + 1, E:2 * E] = emb_ref[tok_a]

    # ---- hoisted layer-0 input projection for BOTH LSTMs (bias folded once) --
    xp = jnp.dot(x_ref[...].astype(jnp.bfloat16),
                 lstm_w_ref[_OFF_WIH0:_OFF_WHH0, :],
                 preferred_element_type=jnp.float32) + bias_ref[0:1, :]   # (T*N, 8H)

    # hoisted (1, 8H) -> (N, 8H) broadcast of the layer-1 bias
    b1_rows = jnp.broadcast_to(bias_ref[1:2, :], (N, G8))

    def gates(g):  # g: (N, 8H) in interleaved layout -> per-gate (N, 2H) slices
        i = jax.nn.sigmoid(g[:, 0 * H2:1 * H2])
        f = jax.nn.sigmoid(g[:, 1 * H2:2 * H2])
        gg = jnp.tanh(g[:, 2 * H2:3 * H2])
        o = jax.nn.sigmoid(g[:, 3 * H2:4 * H2])
        return i, f, gg, o

    # fused states: (N, 2H) = [before | after]
    h0 = jnp.zeros((N, H2), jnp.float32)
    c0 = jnp.zeros((N, H2), jnp.float32)
    h1 = jnp.zeros((N, H2), jnp.float32)
    c1 = jnp.zeros((N, H2), jnp.float32)

    for t in range(SEQ_LEN):  # tiny static trip count -> unrolled
        # layer 0 of both LSTMs: ONE matmul on the recurrent path
        g0 = xp[t * N:(t + 1) * N, :] + jnp.dot(
            h0.astype(jnp.bfloat16), lstm_w_ref[_OFF_WHH0:_OFF_W1, :],
            preferred_element_type=jnp.float32)
        i0, f0, gg0, o0 = gates(g0)
        c0 = f0 * c0 + i0 * gg0
        h0 = o0 * jnp.tanh(c0)
        # TODO(synk): nn.LSTM applies dropout to h0 between layers in training
        # mode only; inference semantics (identity) are implemented here.

        # layer 1 of both LSTMs: ONE matmul over [h0_t | h1_{t-1}] (256-deep per LSTM)
        z1 = jnp.concatenate([h0, h1], axis=-1).astype(jnp.bfloat16)      # (N, 4H)
        g1 = jnp.dot(z1, lstm_w_ref[_OFF_W1:_LSTM_W_ROWS, :],
                     preferred_element_type=jnp.float32) + b1_rows
        i1, f1, gg1, o1 = gates(g1)
        c1 = f1 * c1 + i1 * gg1
        h1 = o1 * jnp.tanh(c1)

    # h1 is already [h1_before | h1_after] == the tail input (no concat needed)
    hid = jnp.dot(h1.astype(jnp.bfloat16), tail_w_ref[0:2 * H, 0:DENSE],
                  preferred_element_type=jnp.float32) + bias_ref[2:3, 0:DENSE]
    hid = jnp.maximum(hid, 0.0)                                           # ReLU
    # TODO(synk): tail Dropout(p) is identity at inference; not modeled here.
    out_ref[...] = (jnp.dot(hid.astype(jnp.bfloat16),
                            tail_w_ref[0:DENSE, DENSE:DENSE + E],
                            preferred_element_type=jnp.float32)
                    + bias_ref[3:4, 0:E])


# ----------------------------------------------------------------------------
# Host-side parameter init + packing
# ----------------------------------------------------------------------------
def init_params(key):
    """Deterministic parameter init (shapes follow nn.LSTM / nn.Linear, pre-transposed)."""
    keys = jax.random.split(key, 20)
    k = iter(keys)
    scale = 0.1

    def mat(rk, shape):
        return (scale * jax.random.normal(rk, shape)).astype(jnp.float32)

    def lstm_params():
        wih0 = mat(next(k), (E, 4 * H))
        whh0 = mat(next(k), (H, 4 * H))
        b0 = mat(next(k), (1, 4 * H))        # b_ih + b_hh folded together
        wih1 = mat(next(k), (H, 4 * H))
        whh1 = mat(next(k), (H, 4 * H))
        b1 = mat(next(k), (1, 4 * H))
        return (wih0, whh0, b0, wih1, whh1, b1)

    lstm_before = lstm_params()
    lstm_after = lstm_params()
    tail = (mat(next(k), (2 * H, DENSE)),    # Linear(2H -> DENSE), transposed
            mat(next(k), (1, DENSE)),
            mat(next(k), (DENSE, E)),        # Linear(DENSE -> E), transposed
            mat(next(k), (1, E)))
    emb_table = mat(next(k), (CORPUS, E))
    return lstm_before, lstm_after, tail, emb_table


def _interleave_gate_cols(w_b, w_a):
    """Block-diagonal fusion of 'before'/'after' weights (in_b,4H)/(in_a,4H) ->
    (in_b+in_a, 8H) with gate-interleaved output columns [i_b,i_a,f_b,f_a,g_b,g_a,o_b,o_a]."""
    in_b, in_a = w_b.shape[0], w_a.shape[0]
    out = jnp.zeros((in_b + in_a, G8), jnp.float32)
    for g in range(4):
        out = out.at[:in_b, (2 * g) * H:(2 * g + 1) * H].set(w_b[:, g * H:(g + 1) * H])
        out = out.at[in_b:, (2 * g + 1) * H:(2 * g + 2) * H].set(w_a[:, g * H:(g + 1) * H])
    return out


def _interleave_gate_bias(b_b, b_a):
    out = jnp.zeros((1, G8), jnp.float32)
    for g in range(4):
        out = out.at[:, (2 * g) * H:(2 * g + 1) * H].set(b_b[:, g * H:(g + 1) * H])
        out = out.at[:, (2 * g + 1) * H:(2 * g + 2) * H].set(b_a[:, g * H:(g + 1) * H])
    return out


def pack_params(lstm_before, lstm_after, tail, emb_table):
    """Packs the 16 original tensors into 3 buffers (bf16 weights, f32 biases)."""
    assert DENSE <= G8 and E <= G8
    (bwih0, bwhh0, bb0, bwih1, bwhh1, bb1) = lstm_before
    (awih0, awhh0, ab0, awih1, awhh1, ab1) = lstm_after
    tw1, tb1, tw2, tb2 = tail

    wih0_big = _interleave_gate_cols(bwih0, awih0)                    # (2E, 8H)
    whh0_big = _interleave_gate_cols(bwhh0, awhh0)                    # (2H, 8H)
    w1_big = jnp.concatenate([_interleave_gate_cols(bwih1, awih1),    # rows [h0_b | h0_a]
                              _interleave_gate_cols(bwhh1, awhh1)],   # rows [h1_b | h1_a]
                             axis=0)                                  # (4H, 8H)
    lstm_w = jnp.concatenate([wih0_big, whh0_big, w1_big],
                             axis=0).astype(jnp.bfloat16)             # (2E+6H, 8H)

    tail_w = jnp.zeros((TAIL_ROWS, DENSE + E), jnp.float32)
    tail_w = tail_w.at[:2 * H, :DENSE].set(tw1)
    tail_w = tail_w.at[:DENSE, DENSE:].set(tw2)
    tail_w = tail_w.astype(jnp.bfloat16)                              # (256, 384)

    biases = jnp.zeros((4, G8), jnp.float32)
    biases = biases.at[0:1, :].set(_interleave_gate_bias(bb0, ab0))
    biases = biases.at[1:2, :].set(_interleave_gate_bias(bb1, ab1))
    biases = biases.at[2, :DENSE].set(tb1[0])
    biases = biases.at[3, :E].set(tb2[0])

    # leading-axis layout so the kernel can do dynamic per-token row loads
    emb3 = emb_table.reshape(CORPUS, 1, E)
    return emb3, lstm_w, tail_w, biases


# ----------------------------------------------------------------------------
# Forward wrapper
# ----------------------------------------------------------------------------
@jax.jit
def words_batch_forward(tokens, emb3, lstm_w, tail_w, biases):
    # TODO(synk): the original Embedding class internals ('sizes' MLP) are not
    # specified; a plain lookup table stands in for to_dense().
    return pl.pallas_call(
        words_batch_kernel,
        out_shape=jax.ShapeDtypeStruct((N, E), jnp.float32),
        in_specs=[
            pl.BlockSpec(memory_space=pltpu.MemorySpace.SMEM),   # tokens (int32 scalars)
            pl.BlockSpec(memory_space=pltpu.MemorySpace.VMEM),   # embedding table
            pl.BlockSpec(memory_space=pltpu.MemorySpace.VMEM),   # packed LSTM weights (bf16)
            pl.BlockSpec(memory_space=pltpu.MemorySpace.VMEM),   # packed tail weights (bf16)
            pl.BlockSpec(memory_space=pltpu.MemorySpace.VMEM),   # packed biases (f32)
        ],
        out_specs=pl.BlockSpec(memory_space=pltpu.MemorySpace.VMEM),
        scratch_shapes=[pltpu.VMEM((SEQ_LEN * N, 2 * E), jnp.float32)],  # gathered inputs
    )(tokens, emb3, lstm_w, tail_w, biases)


# ----------------------------------------------------------------------------
# Pure-JAX f32 reference (independent code path from the fused kernel)
# ----------------------------------------------------------------------------
def _lstm2_final_hidden(x, wih0, whh0, b0, wih1, whh1, b1, hidden):
    n, t_steps, _ = x.shape
    h0 = jnp.zeros((n, hidden), jnp.float32)
    c0 = jnp.zeros((n, hidden), jnp.float32)
    h1 = jnp.zeros((n, hidden), jnp.float32)
    c1 = jnp.zeros((n, hidden), jnp.float32)
    for t in range(t_steps):
        x_t = x[:, t, :]
        g_all = x_t @ wih0 + h0 @ whh0 + b0
        i_g = jax.nn.sigmoid(g_all[:, 0 * hidden:1 * hidden])
        f_g = jax.nn.sigmoid(g_all[:, 1 * hidden:2 * hidden])
        g_g = jnp.tanh(g_all[:, 2 * hidden:3 * hidden])
        o_g = jax.nn.sigmoid(g_all[:, 3 * hidden:4 * hidden])
        c0 = f_g * c0 + i_g * g_g
        h0 = o_g * jnp.tanh(c0)
        g_all = h0 @ wih1 + h1 @ whh1 + b1
        i_g = jax.nn.sigmoid(g_all[:, 0 * hidden:1 * hidden])
        f_g = jax.nn.sigmoid(g_all[:, 1 * hidden:2 * hidden])
        g_g = jnp.tanh(g_all[:, 2 * hidden:3 * hidden])
        o_g = jax.nn.sigmoid(g_all[:, 3 * hidden:4 * hidden])
        c1 = f_g * c1 + i_g * g_g
        h1 = o_g * jnp.tanh(c1)
    return h1


def words_batch_reference(tokens, emb_table, lstm_before, lstm_after, tail):
    dense = jnp.take(emb_table, tokens, axis=0)
    hb = _lstm2_final_hidden(dense[:, :SEQ_LEN, :], *lstm_before, H)
    ha = _lstm2_final_hidden(dense[:, SEQ_LEN:, :], *lstm_after, H)
    z = jnp.concatenate([hb, ha], axis=-1)
    tw1, tb1, tw2, tb2 = tail
    hid = jnp.maximum(z @ tw1 + tb1, 0.0)
    return hid @ tw2 + tb2


if __name__ == "__main__":
    key = jax.random.PRNGKey(0)
    kp, kt = jax.random.split(key)
    lstm_before, lstm_after, tail, emb_table = init_params(kp)

    # tokens: (N, 2*sequence_length) -- first half words-before, second half words-after
    tokens = jax.random.randint(kt, (N, 2 * SEQ_LEN), 0, CORPUS, dtype=jnp.int32)

    emb3, lstm_w, tail_w, biases = pack_params(lstm_before, lstm_after, tail, emb_table)

    out = words_batch_forward(tokens, emb3, lstm_w, tail_w, biases)
    out = jax.block_until_ready(out)

    ref = words_batch_reference(tokens, emb_table, lstm_before, lstm_after, tail)
    assert out.shape == (N, E), out.shape
    # bf16 weights + bf16 MXU operands vs. f32 reference -> loosened tolerance.
    max_err = float(jnp.max(jnp.abs(out - ref)))
    assert jnp.allclose(out, ref, atol=3e-2, rtol=3e-2), f"mismatch vs reference: {max_err}"
    print("KERNEL_OK")
</pallas_src>

<mosaic_0001>
module attributes {stable_mosaic.version = 11 : i64} {
  func.func @words_batch_kernel(%arg0: memref<2x6xi32, #tpu.memory_space<smem>>, %arg1: memref<64x1x128xf32, #tpu.memory_space<vmem>>, %arg2: memref<1024x1024xbf16, #tpu.memory_space<vmem>>, %arg3: memref<256x384xbf16, #tpu.memory_space<vmem>>, %arg4: memref<4x1024xf32, #tpu.memory_space<vmem>>, %arg5: memref<2x128xf32, #tpu.memory_space<vmem>>, %arg6: memref<6x256xf32, #tpu.memory_space<vmem>>) attributes {dimension_semantics = [], scalar_prefetch = 0 : i64, scratch_operands = 1 : i64, tpu.core_type = #tpu.core_type<tc>} {
    %c0 = arith.constant 0 : index
    %c0_0 = arith.constant 0 : index
    %0 = memref.load %arg0[%c0, %c0_0] : memref<2x6xi32, #tpu.memory_space<smem>>
    %c0_1 = arith.constant 0 : index
    %c3 = arith.constant 3 : index
    %1 = memref.load %arg0[%c0_1, %c3] : memref<2x6xi32, #tpu.memory_space<smem>>
    %2 = arith.index_cast %0 : i32 to index
    %c0_2 = arith.constant 0 : index
    %c0_3 = arith.constant 0 : index
    %3 = vector.load %arg1[%2, %c0_2, %c0_3] : memref<64x1x128xf32, #tpu.memory_space<vmem>>, vector<1x1x128xf32>
    %4 = vector.shape_cast %3 : vector<1x1x128xf32> to vector<1x128xf32>
    %c0_4 = arith.constant 0 : index
    %c0_5 = arith.constant 0 : index
    %5 = vector.load %arg6[%c0_4, %c0_5] : memref<6x256xf32, #tpu.memory_space<vmem>>, vector<1x128xf32>
    tpu.vector_store %arg6[%c0_4, %c0_5], %4 {strides = array<i32>} : memref<6x256xf32, #tpu.memory_space<vmem>>, vector<1x128xf32>,
    %6 = arith.index_cast %1 : i32 to index
    %c0_6 = arith.constant 0 : index
    %c0_7 = arith.constant 0 : index
    %7 = vector.load %arg1[%6, %c0_6, %c0_7] : memref<64x1x128xf32, #tpu.memory_space<vmem>>, vector<1x1x128xf32>
    %8 = vector.shape_cast %7 : vector<1x1x128xf32> to vector<1x128xf32>
    %c0_8 = arith.constant 0 : index
    %c128 = arith.constant 128 : index
    %9 = vector.load %arg6[%c0_8, %c128] : memref<6x256xf32, #tpu.memory_space<vmem>>, vector<1x128xf32>
    tpu.vector_store %arg6[%c0_8, %c128], %8 {strides = array<i32>} : memref<6x256xf32, #tpu.memory_space<vmem>>, vector<1x128xf32>,
    %c1 = arith.constant 1 : index
    %c0_9 = arith.constant 0 : index
    %10 = memref.load %arg0[%c1, %c0_9] : memref<2x6xi32, #tpu.memory_space<smem>>
    %c1_10 = arith.constant 1 : index
    %c3_11 = arith.constant 3 : index
    %11 = memref.load %arg0[%c1_10, %c3_11] : memref<2x6xi32, #tpu.memory_space<smem>>
    %12 = arith.index_cast %10 : i32 to index
    %c0_12 = arith.constant 0 : index
    %c0_13 = arith.constant 0 : index
    %13 = vector.load %arg1[%12, %c0_12, %c0_13] : memref<64x1x128xf32, #tpu.memory_space<vmem>>, vector<1x1x128xf32>
    %14 = vector.shape_cast %13 : vector<1x1x128xf32> to vector<1x128xf32>
    %c1_14 = arith.constant 1 : index
    %c0_15 = arith.constant 0 : index
    %15 = vector.load %arg6[%c1_14, %c0_15] : memref<6x256xf32, #tpu.memory_space<vmem>>, vector<1x128xf32>
    tpu.vector_store %arg6[%c1_14, %c0_15], %14 {strides = array<i32>} : memref<6x256xf32, #tpu.memory_space<vmem>>, vector<1x128xf32>,
    %16 = arith.index_cast %11 : i32 to index
    %c0_16 = arith.constant 0 : index
    %c0_17 = arith.constant 0 : index
    %17 = vector.load %arg1[%16, %c0_16, %c0_17] : memref<64x1x128xf32, #tpu.memory_space<vmem>>, vector<1x1x128xf32>
    %18 = vector.shape_cast %17 : vector<1x1x128xf32> to vector<1x128xf32>
    %c1_18 = arith.constant 1 : index
    %c128_19 = arith.constant 128 : index
    %19 = vector.load %arg6[%c1_18, %c128_19] : memref<6x256xf32, #tpu.memory_space<vmem>>, vector<1x128xf32>
    tpu.vector_store %arg6[%c1_18, %c128_19], %18 {strides = array<i32>} : memref<6x256xf32, #tpu.memory_space<vmem>>, vector<1x128xf32>,
    %c0_20 = arith.constant 0 : index
    %c1_21 = arith.constant 1 : index
    %20 = memref.load %arg0[%c0_20, %c1_21] : memref<2x6xi32, #tpu.memory_space<smem>>
    %c0_22 = arith.constant 0 : index
    %c4 = arith.constant 4 : index
    %21 = memref.load %arg0[%c0_22, %c4] : memref<2x6xi32, #tpu.memory_space<smem>>
    %22 = arith.index_cast %20 : i32 to index
    %c0_23 = arith.constant 0 : index
    %c0_24 = arith.constant 0 : index
    %23 = vector.load %arg1[%22, %c0_23, %c0_24] : memref<64x1x128xf32, #tpu.memory_space<vmem>>, vector<1x1x128xf32>
    %24 = vector.shape_cast %23 : vector<1x1x128xf32> to vector<1x128xf32>
    %c2 = arith.constant 2 : index
    %c0_25 = arith.constant 0 : index
    %25 = vector.load %arg6[%c2, %c0_25] : memref<6x256xf32, #tpu.memory_space<vmem>>, vector<1x128xf32>
    tpu.vector_store %arg6[%c2, %c0_25], %24 {strides = array<i32>} : memref<6x256xf32, #tpu.memory_space<vmem>>, vector<1x128xf32>,
    %26 = arith.index_cast %21 : i32 to index
    %c0_26 = arith.constant 0 : index
    %c0_27 = arith.constant 0 : index
    %27 = vector.load %arg1[%26, %c0_26, %c0_27] : memref<64x1x128xf32, #tpu.memory_space<vmem>>, vector<1x1x128xf32>
    %28 = vector.shape_cast %27 : vector<1x1x128xf32> to vector<1x128xf32>
    %c2_28 = arith.constant 2 : index
    %c128_29 = arith.constant 128 : index
    %29 = vector.load %arg6[%c2_28, %c128_29] : memref<6x256xf32, #tpu.memory_space<vmem>>, vector<1x128xf32>
    tpu.vector_store %arg6[%c2_28, %c128_29], %28 {strides = array<i32>} : memref<6x256xf32, #tpu.memory_space<vmem>>, vector<1x128xf32>,
    %c1_30 = arith.constant 1 : index
    %c1_31 = arith.constant 1 : index
    %30 = memref.load %arg0[%c1_30, %c1_31] : memref<2x6xi32, #tpu.memory_space<smem>>
    %c1_32 = arith.constant 1 : index
    %c4_33 = arith.constant 4 : index
    %31 = memref.load %arg0[%c1_32, %c4_33] : memref<2x6xi32, #tpu.memory_space<smem>>
    %32 = arith.index_cast %30 : i32 to index
    %c0_34 = arith.constant 0 : index
    %c0_35 = arith.constant 0 : index
    %33 = vector.load %arg1[%32, %c0_34, %c0_35] : memref<64x1x128xf32, #tpu.memory_space<vmem>>, vector<1x1x128xf32>
    %34 = vector.shape_cast %33 : vector<1x1x128xf32> to vector<1x128xf32>
    %c3_36 = arith.constant 3 : index
    %c0_37 = arith.constant 0 : index
    %35 = vector.load %arg6[%c3_36, %c0_37] : memref<6x256xf32, #tpu.memory_space<vmem>>, vector<1x128xf32>
    tpu.vector_store %arg6[%c3_36, %c0_37], %34 {strides = array<i32>} : memref<6x256xf32, #tpu.memory_space<vmem>>, vector<1x128xf32>,
    %36 = arith.index_cast %31 : i32 to index
    %c0_38 = arith.constant 0 : index
    %c0_39 = arith.constant 0 : index
    %37 = vector.load %arg1[%36, %c0_38, %c0_39] : memref<64x1x128xf32, #tpu.memory_space<vmem>>, vector<1x1x128xf32>
    %38 = vector.shape_cast %37 : vector<1x1x128xf32> to vector<1x128xf32>
    %c3_40 = arith.constant 3 : index
    %c128_41 = arith.constant 128 : index
    %39 = vector.load %arg6[%c3_40, %c128_41] : memref<6x256xf32, #tpu.memory_space<vmem>>, vector<1x128xf32>
    tpu.vector_store %arg6[%c3_40, %c128_41], %38 {strides = array<i32>} : memref<6x256xf32, #tpu.memory_space<vmem>>, vector<1x128xf32>,
    %c0_42 = arith.constant 0 : index
    %c2_43 = arith.constant 2 : index
    %40 = memref.load %arg0[%c0_42, %c2_43] : memref<2x6xi32, #tpu.memory_space<smem>>
    %c0_44 = arith.constant 0 : index
    %c5 = arith.constant 5 : index
    %41 = memref.load %arg0[%c0_44, %c5] : memref<2x6xi32, #tpu.memory_space<smem>>
    %42 = arith.index_cast %40 : i32 to index
    %c0_45 = arith.constant 0 : index
    %c0_46 = arith.constant 0 : index
    %43 = vector.load %arg1[%42, %c0_45, %c0_46] : memref<64x1x128xf32, #tpu.memory_space<vmem>>, vector<1x1x128xf32>
    %44 = vector.shape_cast %43 : vector<1x1x128xf32> to vector<1x128xf32>
    %c4_47 = arith.constant 4 : index
    %c0_48 = arith.constant 0 : index
    %45 = vector.load %arg6[%c4_47, %c0_48] : memref<6x256xf32, #tpu.memory_space<vmem>>, vector<1x128xf32>
    tpu.vector_store %arg6[%c4_47, %c0_48], %44 {strides = array<i32>} : memref<6x256xf32, #tpu.memory_space<vmem>>, vector<1x128xf32>,
    %46 = arith.index_cast %41 : i32 to index
    %c0_49 = arith.constant 0 : index
    %c0_50 = arith.constant 0 : index
    %47 = vector.load %arg1[%46, %c0_49, %c0_50] : memref<64x1x128xf32, #tpu.memory_space<vmem>>, vector<1x1x128xf32>
    %48 = vector.shape_cast %47 : vector<1x1x128xf32> to vector<1x128xf32>
    %c4_51 = arith.constant 4 : index
    %c128_52 = arith.constant 128 : index
    %49 = vector.load %arg6[%c4_51, %c128_52] : memref<6x256xf32, #tpu.memory_space<vmem>>, vector<1x128xf32>
    tpu.vector_store %arg6[%c4_51, %c128_52], %48 {strides = array<i32>} : memref<6x256xf32, #tpu.memory_space<vmem>>, vector<1x128xf32>,
    %c1_53 = arith.constant 1 : index
    %c2_54 = arith.constant 2 : index
    %50 = memref.load %arg0[%c1_53, %c2_54] : memref<2x6xi32, #tpu.memory_space<smem>>
    %c1_55 = arith.constant 1 : index
    %c5_56 = arith.constant 5 : index
    %51 = memref.load %arg0[%c1_55, %c5_56] : memref<2x6xi32, #tpu.memory_space<smem>>
    %52 = arith.index_cast %50 : i32 to index
    %c0_57 = arith.constant 0 : index
    %c0_58 = arith.constant 0 : index
    %53 = vector.load %arg1[%52, %c0_57, %c0_58] : memref<64x1x128xf32, #tpu.memory_space<vmem>>, vector<1x1x128xf32>
    %54 = vector.shape_cast %53 : vector<1x1x128xf32> to vector<1x128xf32>
    %c5_59 = arith.constant 5 : index
    %c0_60 = arith.constant 0 : index
    %55 = vector.load %arg6[%c5_59, %c0_60] : memref<6x256xf32, #tpu.memory_space<vmem>>, vector<1x128xf32>
    tpu.vector_store %arg6[%c5_59, %c0_60], %54 {strides = array<i32>} : memref<6x256xf32, #tpu.memory_space<vmem>>, vector<1x128xf32>,
    %56 = arith.index_cast %51 : i32 to index
    %c0_61 = arith.constant 0 : index
    %c0_62 = arith.constant 0 : index
    %57 = vector.load %arg1[%56, %c0_61, %c0_62] : memref<64x1x128xf32, #tpu.memory_space<vmem>>, vector<1x1x128xf32>
    %58 = vector.shape_cast %57 : vector<1x1x128xf32> to vector<1x128xf32>
    %c5_63 = arith.constant 5 : index
    %c128_64 = arith.constant 128 : index
    %59 = vector.load %arg6[%c5_63, %c128_64] : memref<6x256xf32, #tpu.memory_space<vmem>>, vector<1x128xf32>
    tpu.vector_store %arg6[%c5_63, %c128_64], %58 {strides = array<i32>} : memref<6x256xf32, #tpu.memory_space<vmem>>, vector<1x128xf32>,
    %c0_65 = arith.constant 0 : index
    %c0_66 = arith.constant 0 : index
    %60 = vector.load %arg6[%c0_65, %c0_66] : memref<6x256xf32, #tpu.memory_space<vmem>>, vector<6x256xf32>
    %61 = arith.truncf %60 : vector<6x256xf32> to vector<6x256xbf16>
    %c0_67 = arith.constant 0 : index
    %c0_68 = arith.constant 0 : index
    %62 = vector.load %arg2[%c0_67, %c0_68] : memref<1024x1024xbf16, #tpu.memory_space<vmem>>, vector<256x1024xbf16>
    %cst = arith.constant dense<0.000000e+00> : vector<6x1024xf32>
    %63 = tpu.matmul %61, %62, %cst {dimension_numbers = #tpu.dot_dimension_numbers<[1], [0], [0], [1], [0, 0, 1, 1], [], []>} : vector<6x256xbf16>, vector<256x1024xbf16>, vector<6x1024xf32> -> vector<6x1024xf32>
    %c0_69 = arith.constant 0 : index
    %c0_70 = arith.constant 0 : index
    %64 = vector.load %arg4[%c0_69, %c0_70] : memref<4x1024xf32, #tpu.memory_space<vmem>>, vector<1x1024xf32>
    %65 = vector.broadcast %64 : vector<1x1024xf32> to vector<6x1024xf32>
    %66 = arith.addf %63, %65 : vector<6x1024xf32>
    %c1_71 = arith.constant 1 : index
    %c0_72 = arith.constant 0 : index
    %67 = vector.load %arg4[%c1_71, %c0_72] : memref<4x1024xf32, #tpu.memory_space<vmem>>, vector<1x1024xf32>
    %68 = vector.shape_cast %67 : vector<1x1024xf32> to vector<1x1024xf32>
    %69 = vector.broadcast %68 : vector<1x1024xf32> to vector<2x1024xf32>
    %cst_73 = arith.constant 0.000000e+00 : f32
    %70 = vector.broadcast %cst_73 : f32 to vector<2x256xf32>
    %cst_74 = arith.constant 0.000000e+00 : f32
    %71 = vector.broadcast %cst_74 : f32 to vector<2x256xf32>
    %cst_75 = arith.constant 0.000000e+00 : f32
    %72 = vector.broadcast %cst_75 : f32 to vector<2x256xf32>
    %cst_76 = arith.constant 0.000000e+00 : f32
    %73 = vector.broadcast %cst_76 : f32 to vector<2x256xf32>
    %74 = vector.extract_strided_slice %66 {offsets = [0, 0], sizes = [2, 1024], strides = [1, 1]} : vector<6x1024xf32> to vector<2x1024xf32>
    %75 = arith.truncf %70 : vector<2x256xf32> to vector<2x256xbf16>
    %c256 = arith.constant 256 : index
    %c0_77 = arith.constant 0 : index
    %76 = vector.load %arg2[%c256, %c0_77] : memref<1024x1024xbf16, #tpu.memory_space<vmem>>, vector<256x1024xbf16>
    %cst_78 = arith.constant dense<0.000000e+00> : vector<2x1024xf32>
    %77 = tpu.matmul %75, %76, %cst_78 {dimension_numbers = #tpu.dot_dimension_numbers<[1], [0], [0], [1], [0, 0, 1, 1], [], []>} : vector<2x256xbf16>, vector<256x1024xbf16>, vector<2x1024xf32> -> vector<2x1024xf32>
    %78 = arith.addf %74, %77 : vector<2x1024xf32>
    %79 = vector.extract_strided_slice %78 {offsets = [0, 0], sizes = [2, 256], strides = [1, 1]} : vector<2x1024xf32> to vector<2x256xf32>
    %80 = arith.negf %79 : vector<2x256xf32>
    %81 = math.exp %80 : vector<2x256xf32>
    %cst_79 = arith.constant 1.000000e+00 : f32
    %82 = vector.broadcast %cst_79 : f32 to vector<2x256xf32>
    %83 = arith.addf %82, %81 : vector<2x256xf32>
    %84 = arith.divf %82, %83 : vector<2x256xf32>
    %85 = vector.extract_strided_slice %78 {offsets = [0, 256], sizes = [2, 256], strides = [1, 1]} : vector<2x1024xf32> to vector<2x256xf32>
    %86 = arith.negf %85 : vector<2x256xf32>
    %87 = math.exp %86 : vector<2x256xf32>
    %cst_80 = arith.constant 1.000000e+00 : f32
    %88 = vector.broadcast %cst_80 : f32 to vector<2x256xf32>
    %89 = arith.addf %88, %87 : vector<2x256xf32>
    %90 = arith.divf %88, %89 : vector<2x256xf32>
    %91 = vector.extract_strided_slice %78 {offsets = [0, 512], sizes = [2, 256], strides = [1, 1]} : vector<2x1024xf32> to vector<2x256xf32>
    %92 = math.tanh %91 : vector<2x256xf32>
    %93 = vector.extract_strided_slice %78 {offsets = [0, 768], sizes = [2, 256], strides = [1, 1]} : vector<2x1024xf32> to vector<2x256xf32>
    %94 = arith.negf %93 : vector<2x256xf32>
    %95 = math.exp %94 : vector<2x256xf32>
    %cst_81 = arith.constant 1.000000e+00 : f32
    %96 = vector.broadcast %cst_81 : f32 to vector<2x256xf32>
    %97 = arith.addf %96, %95 : vector<2x256xf32>
    %98 = arith.divf %96, %97 : vector<2x256xf32>
    %99 = arith.mulf %90, %71 : vector<2x256xf32>
    %100 = arith.mulf %84, %92 : vector<2x256xf32>
    %101 = arith.addf %99, %100 : vector<2x256xf32>
    %102 = math.tanh %101 : vector<2x256xf32>
    %103 = arith.mulf %98, %102 : vector<2x256xf32>
    %104 = tpu.concatenate %103, %72 in 1 : vector<2x256xf32>, vector<2x256xf32> -> vector<2x512xf32>
    %105 = arith.truncf %104 : vector<2x512xf32> to vector<2x512xbf16>
    %c512 = arith.constant 512 : index
    %c0_82 = arith.constant 0 : index
    %106 = vector.load %arg2[%c512, %c0_82] : memref<1024x1024xbf16, #tpu.memory_space<vmem>>, vector<512x1024xbf16>
    %cst_83 = arith.constant dense<0.000000e+00> : vector<2x1024xf32>
    %107 = tpu.matmul %105, %106, %cst_83 {dimension_numbers = #tpu.dot_dimension_numbers<[1], [0], [0], [1], [0, 0, 1, 1], [], []>} : vector<2x512xbf16>, vector<512x1024xbf16>, vector<2x1024xf32> -> vector<2x1024xf32>
    %108 = arith.addf %107, %69 : vector<2x1024xf32>
    %109 = vector.extract_strided_slice %108 {offsets = [0, 0], sizes = [2, 256], strides = [1, 1]} : vector<2x1024xf32> to vector<2x256xf32>
    %110 = arith.negf %109 : vector<2x256xf32>
    %111 = math.exp %110 : vector<2x256xf32>
    %cst_84 = arith.constant 1.000000e+00 : f32
    %112 = vector.broadcast %cst_84 : f32 to vector<2x256xf32>
    %113 = arith.addf %112, %111 : vector<2x256xf32>
    %114 = arith.divf %112, %113 : vector<2x256xf32>
    %115 = vector.extract_strided_slice %108 {offsets = [0, 256], sizes = [2, 256], strides = [1, 1]} : vector<2x1024xf32> to vector<2x256xf32>
    %116 = arith.negf %115 : vector<2x256xf32>
    %117 = math.exp %116 : vector<2x256xf32>
    %cst_85 = arith.constant 1.000000e+00 : f32
    %118 = vector.broadcast %cst_85 : f32 to vector<2x256xf32>
    %119 = arith.addf %118, %117 : vector<2x256xf32>
    %120 = arith.divf %118, %119 : vector<2x256xf32>
    %121 = vector.extract_strided_slice %108 {offsets = [0, 512], sizes = [2, 256], strides = [1, 1]} : vector<2x1024xf32> to vector<2x256xf32>
    %122 = math.tanh %121 : vector<2x256xf32>
    %123 = vector.extract_strided_slice %108 {offsets = [0, 768], sizes = [2, 256], strides = [1, 1]} : vector<2x1024xf32> to vector<2x256xf32>
    %124 = arith.negf %123 : vector<2x256xf32>
    %125 = math.exp %124 : vector<2x256xf32>
    %cst_86 = arith.constant 1.000000e+00 : f32
    %126 = vector.broadcast %cst_86 : f32 to vector<2x256xf32>
    %127 = arith.addf %126, %125 : vector<2x256xf32>
    %128 = arith.divf %126, %127 : vector<2x256xf32>
    %129 = arith.mulf %120, %73 : vector<2x256xf32>
    %130 = arith.mulf %114, %122 : vector<2x256xf32>
    %131 = arith.addf %129, %130 : vector<2x256xf32>
    %132 = math.tanh %131 : vector<2x256xf32>
    %133 = arith.mulf %128, %132 : vector<2x256xf32>
    %134 = vector.extract_strided_slice %66 {offsets = [2, 0], sizes = [2, 1024], strides = [1, 1]} : vector<6x1024xf32> to vector<2x1024xf32>
    %135 = arith.truncf %103 : vector<2x256xf32> to vector<2x256xbf16>
    %c256_87 = arith.constant 256 : index
    %c0_88 = arith.constant 0 : index
    %136 = vector.load %arg2[%c256_87, %c0_88] : memref<1024x1024xbf16, #tpu.memory_space<vmem>>, vector<256x1024xbf16>
    %cst_89 = arith.constant dense<0.000000e+00> : vector<2x1024xf32>
    %137 = tpu.matmul %135, %136, %cst_89 {dimension_numbers = #tpu.dot_dimension_numbers<[1], [0], [0], [1], [0, 0, 1, 1], [], []>} : vector<2x256xbf16>, vector<256x1024xbf16>, vector<2x1024xf32> -> vector<2x1024xf32>
    %138 = arith.addf %134, %137 : vector<2x1024xf32>
    %139 = vector.extract_strided_slice %138 {offsets = [0, 0], sizes = [2, 256], strides = [1, 1]} : vector<2x1024xf32> to vector<2x256xf32>
    %140 = arith.negf %139 : vector<2x256xf32>
    %141 = math.exp %140 : vector<2x256xf32>
    %cst_90 = arith.constant 1.000000e+00 : f32
    %142 = vector.broadcast %cst_90 : f32 to vector<2x256xf32>
    %143 = arith.addf %142, %141 : vector<2x256xf32>
    %144 = arith.divf %142, %143 : vector<2x256xf32>
    %145 = vector.extract_strided_slice %138 {offsets = [0, 256], sizes = [2, 256], strides = [1, 1]} : vector<2x1024xf32> to vector<2x256xf32>
    %146 = arith.negf %145 : vector<2x256xf32>
    %147 = math.exp %146 : vector<2x256xf32>
    %cst_91 = arith.constant 1.000000e+00 : f32
    %148 = vector.broadcast %cst_91 : f32 to vector<2x256xf32>
    %149 = arith.addf %148, %147 : vector<2x256xf32>
    %150 = arith.divf %148, %149 : vector<2x256xf32>
    %151 = vector.extract_strided_slice %138 {offsets = [0, 512], sizes = [2, 256], strides = [1, 1]} : vector<2x1024xf32> to vector<2x256xf32>
    %152 = math.tanh %151 : vector<2x256xf32>
    %153 = vector.extract_strided_slice %138 {offsets = [0, 768], sizes = [2, 256], strides = [1, 1]} : vector<2x1024xf32> to vector<2x256xf32>
    %154 = arith.negf %153 : vector<2x256xf32>
    %155 = math.exp %154 : vector<2x256xf32>
    %cst_92 = arith.constant 1.000000e+00 : f32
    %156 = vector.broadcast %cst_92 : f32 to vector<2x256xf32>
    %157 = arith.addf %156, %155 : vector<2x256xf32>
    %158 = arith.divf %156, %157 : vector<2x256xf32>
    %159 = arith.mulf %150, %101 : vector<2x256xf32>
    %160 = arith.mulf %144, %152 : vector<2x256xf32>
    %161 = arith.addf %159, %160 : vector<2x256xf32>
    %162 = math.tanh %161 : vector<2x256xf32>
    %163 = arith.mulf %158, %162 : vector<2x256xf32>
    %164 = tpu.concatenate %163, %133 in 1 : vector<2x256xf32>, vector<2x256xf32> -> vector<2x512xf32>
    %165 = arith.truncf %164 : vector<2x512xf32> to vector<2x512xbf16>
    %c512_93 = arith.constant 512 : index
    %c0_94 = arith.constant 0 : index
    %166 = vector.load %arg2[%c512_93, %c0_94] : memref<1024x1024xbf16, #tpu.memory_space<vmem>>, vector<512x1024xbf16>
    %cst_95 = arith.constant dense<0.000000e+00> : vector<2x1024xf32>
    %167 = tpu.matmul %165, %166, %cst_95 {dimension_numbers = #tpu.dot_dimension_numbers<[1], [0], [0], [1], [0, 0, 1, 1], [], []>} : vector<2x512xbf16>, vector<512x1024xbf16>, vector<2x1024xf32> -> vector<2x1024xf32>
    %168 = arith.addf %167, %69 : vector<2x1024xf32>
    %169 = vector.extract_strided_slice %168 {offsets = [0, 0], sizes = [2, 256], strides = [1, 1]} : vector<2x1024xf32> to vector<2x256xf32>
    %170 = arith.negf %169 : vector<2x256xf32>
    %171 = math.exp %170 : vector<2x256xf32>
    %cst_96 = arith.constant 1.000000e+00 : f32
    %172 = vector.broadcast %cst_96 : f32 to vector<2x256xf32>
    %173 = arith.addf %172, %171 : vector<2x256xf32>
    %174 = arith.divf %172, %173 : vector<2x256xf32>
    %175 = vector.extract_strided_slice %168 {offsets = [0, 256], sizes = [2, 256], strides = [1, 1]} : vector<2x1024xf32> to vector<2x256xf32>
    %176 = arith.negf %175 : vector<2x256xf32>
    %177 = math.exp %176 : vector<2x256xf32>
    %cst_97 = arith.constant 1.000000e+00 : f32
    %178 = vector.broadcast %cst_97 : f32 to vector<2x256xf32>
    %179 = arith.addf %178, %177 : vector<2x256xf32>
    %180 = arith.divf %178, %179 : vector<2x256xf32>
    %181 = vector.extract_strided_slice %168 {offsets = [0, 512], sizes = [2, 256], strides = [1, 1]} : vector<2x1024xf32> to vector<2x256xf32>
    %182 = math.tanh %181 : vector<2x256xf32>
    %183 = vector.extract_strided_slice %168 {offsets = [0, 768], sizes = [2, 256], strides = [1, 1]} : vector<2x1024xf32> to vector<2x256xf32>
    %184 = arith.negf %183 : vector<2x256xf32>
    %185 = math.exp %184 : vector<2x256xf32>
    %cst_98 = arith.constant 1.000000e+00 : f32
    %186 = vector.broadcast %cst_98 : f32 to vector<2x256xf32>
    %187 = arith.addf %186, %185 : vector<2x256xf32>
    %188 = arith.divf %186, %187 : vector<2x256xf32>
    %189 = arith.mulf %180, %131 : vector<2x256xf32>
    %190 = arith.mulf %174, %182 : vector<2x256xf32>
    %191 = arith.addf %189, %190 : vector<2x256xf32>
    %192 = math.tanh %191 : vector<2x256xf32>
    %193 = arith.mulf %188, %192 : vector<2x256xf32>
    %194 = vector.extract_strided_slice %66 {offsets = [4, 0], sizes = [2, 1024], strides = [1, 1]} : vector<6x1024xf32> to vector<2x1024xf32>
    %195 = arith.truncf %163 : vector<2x256xf32> to vector<2x256xbf16>
    %c256_99 = arith.constant 256 : index
    %c0_100 = arith.constant 0 : index
    %196 = vector.load %arg2[%c256_99, %c0_100] : memref<1024x1024xbf16, #tpu.memory_space<vmem>>, vector<256x1024xbf16>
    %cst_101 = arith.constant dense<0.000000e+00> : vector<2x1024xf32>
    %197 = tpu.matmul %195, %196, %cst_101 {dimension_numbers = #tpu.dot_dimension_numbers<[1], [0], [0], [1], [0, 0, 1, 1], [], []>} : vector<2x256xbf16>, vector<256x1024xbf16>, vector<2x1024xf32> -> vector<2x1024xf32>
    %198 = arith.addf %194, %197 : vector<2x1024xf32>
    %199 = vector.extract_strided_slice %198 {offsets = [0, 0], sizes = [2, 256], strides = [1, 1]} : vector<2x1024xf32> to vector<2x256xf32>
    %200 = arith.negf %199 : vector<2x256xf32>
    %201 = math.exp %200 : vector<2x256xf32>
    %cst_102 = arith.constant 1.000000e+00 : f32
    %202 = vector.broadcast %cst_102 : f32 to vector<2x256xf32>
    %203 = arith.addf %202, %201 : vector<2x256xf32>
    %204 = arith.divf %202, %203 : vector<2x256xf32>
    %205 = vector.extract_strided_slice %198 {offsets = [0, 256], sizes = [2, 256], strides = [1, 1]} : vector<2x1024xf32> to vector<2x256xf32>
    %206 = arith.negf %205 : vector<2x256xf32>
    %207 = math.exp %206 : vector<2x256xf32>
    %cst_103 = arith.constant 1.000000e+00 : f32
    %208 = vector.broadcast %cst_103 : f32 to vector<2x256xf32>
    %209 = arith.addf %208, %207 : vector<2x256xf32>
    %210 = arith.divf %208, %209 : vector<2x256xf32>
    %211 = vector.extract_strided_slice %198 {offsets = [0, 512], sizes = [2, 256], strides = [1, 1]} : vector<2x1024xf32> to vector<2x256xf32>
    %212 = math.tanh %211 : vector<2x256xf32>
    %213 = vector.extract_strided_slice %198 {offsets = [0, 768], sizes = [2, 256], strides = [1, 1]} : vector<2x1024xf32> to vector<2x256xf32>
    %214 = arith.negf %213 : vector<2x256xf32>
    %215 = math.exp %214 : vector<2x256xf32>
    %cst_104 = arith.constant 1.000000e+00 : f32
    %216 = vector.broadcast %cst_104 : f32 to vector<2x256xf32>
    %217 = arith.addf %216, %215 : vector<2x256xf32>
    %218 = arith.divf %216, %217 : vector<2x256xf32>
    %219 = arith.mulf %210, %161 : vector<2x256xf32>
    %220 = arith.mulf %204, %212 : vector<2x256xf32>
    %221 = arith.addf %219, %220 : vector<2x256xf32>
    %222 = math.tanh %221 : vector<2x256xf32>
    %223 = arith.mulf %218, %222 : vector<2x256xf32>
    %224 = tpu.concatenate %223, %193 in 1 : vector<2x256xf32>, vector<2x256xf32> -> vector<2x512xf32>
    %225 = arith.truncf %224 : vector<2x512xf32> to vector<2x512xbf16>
    %c512_105 = arith.constant 512 : index
    %c0_106 = arith.constant 0 : index
    %226 = vector.load %arg2[%c512_105, %c0_106] : memref<1024x1024xbf16, #tpu.memory_space<vmem>>, vector<512x1024xbf16>
    %cst_107 = arith.constant dense<0.000000e+00> : vector<2x1024xf32>
    %227 = tpu.matmul %225, %226, %cst_107 {dimension_numbers = #tpu.dot_dimension_numbers<[1], [0], [0], [1], [0, 0, 1, 1], [], []>} : vector<2x512xbf16>, vector<512x1024xbf16>, vector<2x1024xf32> -> vector<2x1024xf32>
    %228 = arith.addf %227, %69 : vector<2x1024xf32>
    %229 = vector.extract_strided_slice %228 {offsets = [0, 0], sizes = [2, 256], strides = [1, 1]} : vector<2x1024xf32> to vector<2x256xf32>
    %230 = arith.negf %229 : vector<2x256xf32>
    %231 = math.exp %230 : vector<2x256xf32>
    %cst_108 = arith.constant 1.000000e+00 : f32
    %232 = vector.broadcast %cst_108 : f32 to vector<2x256xf32>
    %233 = arith.addf %232, %231 : vector<2x256xf32>
    %234 = arith.divf %232, %233 : vector<2x256xf32>
    %235 = vector.extract_strided_slice %228 {offsets = [0, 256], sizes = [2, 256], strides = [1, 1]} : vector<2x1024xf32> to vector<2x256xf32>
    %236 = arith.negf %235 : vector<2x256xf32>
    %237 = math.exp %236 : vector<2x256xf32>
    %cst_109 = arith.constant 1.000000e+00 : f32
    %238 = vector.broadcast %cst_109 : f32 to vector<2x256xf32>
    %239 = arith.addf %238, %237 : vector<2x256xf32>
    %240 = arith.divf %238, %239 : vector<2x256xf32>
    %241 = vector.extract_strided_slice %228 {offsets = [0, 512], sizes = [2, 256], strides = [1, 1]} : vector<2x1024xf32> to vector<2x256xf32>
    %242 = math.tanh %241 : vector<2x256xf32>
    %243 = vector.extract_strided_slice %228 {offsets = [0, 768], sizes = [2, 256], strides = [1, 1]} : vector<2x1024xf32> to vector<2x256xf32>
    %244 = arith.negf %243 : vector<2x256xf32>
    %245 = math.exp %244 : vector<2x256xf32>
    %cst_110 = arith.constant 1.000000e+00 : f32
    %246 = vector.broadcast %cst_110 : f32 to vector<2x256xf32>
    %247 = arith.addf %246, %245 : vector<2x256xf32>
    %248 = arith.divf %246, %247 : vector<2x256xf32>
    %249 = arith.mulf %240, %191 : vector<2x256xf32>
    %250 = arith.mulf %234, %242 : vector<2x256xf32>
    %251 = arith.addf %249, %250 : vector<2x256xf32>
    %252 = math.tanh %251 : vector<2x256xf32>
    %253 = arith.mulf %248, %252 : vector<2x256xf32>
    %254 = arith.truncf %253 : vector<2x256xf32> to vector<2x256xbf16>
    %c0_111 = arith.constant 0 : index
    %c0_112 = arith.constant 0 : index
    %255 = vector.load %arg3[%c0_111, %c0_112] : memref<256x384xbf16, #tpu.memory_space<vmem>>, vector<256x256xbf16>
    %cst_113 = arith.constant dense<0.000000e+00> : vector<2x256xf32>
    %256 = tpu.matmul %254, %255, %cst_113 {dimension_numbers = #tpu.dot_dimension_numbers<[1], [0], [0], [1], [0, 0, 1, 1], [], []>} : vector<2x256xbf16>, vector<256x256xbf16>, vector<2x256xf32> -> vector<2x256xf32>
    %c2_114 = arith.constant 2 : index
    %c0_115 = arith.constant 0 : index
    %257 = vector.load %arg4[%c2_114, %c0_115] : memref<4x1024xf32, #tpu.memory_space<vmem>>, vector<1x256xf32>
    %258 = vector.broadcast %257 : vector<1x256xf32> to vector<2x256xf32>
    %259 = arith.addf %256, %258 : vector<2x256xf32>
    %cst_116 = arith.constant 0.000000e+00 : f32
    %260 = vector.broadcast %cst_116 : f32 to vector<2x256xf32>
    %261 = arith.maximumf %259, %260 : vector<2x256xf32>
    %262 = arith.truncf %261 : vector<2x256xf32> to vector<2x256xbf16>
    %c0_117 = arith.constant 0 : index
    %c256_118 = arith.constant 256 : index
    %263 = vector.load %arg3[%c0_117, %c256_118] : memref<256x384xbf16, #tpu.memory_space<vmem>>, vector<256x128xbf16>
    %cst_119 = arith.constant dense<0.000000e+00> : vector<2x128xf32>
    %264 = tpu.matmul %262, %263, %cst_119 {dimension_numbers = #tpu.dot_dimension_numbers<[1], [0], [0], [1], [0, 0, 1, 1], [], []>} : vector<2x256xbf16>, vector<256x128xbf16>, vector<2x128xf32> -> vector<2x128xf32>
    %c3_120 = arith.constant 3 : index
    %c0_121 = arith.constant 0 : index
    %265 = vector.load %arg4[%c3_120, %c0_121] : memref<4x1024xf32, #tpu.memory_space<vmem>>, vector<1x128xf32>
    %266 = vector.broadcast %265 : vector<1x128xf32> to vector<2x128xf32>
    %267 = arith.addf %264, %266 : vector<2x128xf32>
    %c0_122 = arith.constant 0 : index
    %c0_123 = arith.constant 0 : index
    %268 = vector.load %arg5[%c0_122, %c0_123] : memref<2x128xf32, #tpu.memory_space<vmem>>, vector<2x128xf32>
    tpu.vector_store %arg5[%c0_122, %c0_123], %267 {strides = array<i32>} : memref<2x128xf32, #tpu.memory_space<vmem>>, vector<2x128xf32>,
    return
  }
}

</mosaic_0001>

<bundles_post_ra>
// kernel: words_batch_forward.1
= control target key start
LH: loop header
LB: loop body
LE: loop exit
PB: predicated region body
PF: predicated region fallthrough
CT: control target
= control target key end

     0   :  { %10 = vsyncpa [#allocation6], 0  ;;  %s9308_s0 = inlined_call_operand.hbm [shape: s32[2,6], index: 0, kind: input, shape index: {}]   ;;  %s9309_s1 = inlined_call_operand.hbm [shape: f32[64,1,128], index: 1, kind: input, shape index: {}]   ;;  %s9310_s2 = inlined_call_operand.hbm [shape: bf16[1024,1024], index: 2, kind: input, shape index: {}]   ;;  %s9311_s3 = inlined_call_operand.hbm [shape: bf16[256,384], index: 3, kind: input, shape index: {}]   ;;  %s9312_s4 = inlined_call_operand.hbm [shape: f32[4,1024], index: 4, kind: input, shape index: {}]   ;;  %s9313_s5 = inlined_call_operand.hbm [shape: f32[2,128], index: 5, kind: output, shape index: {}]  }
   0x1   :  { %11 = vsyncpa [#allocation4], 0 }
   0x2   :  { %12 = vsyncpa [#allocation9], 0 }
   0x3   :  { %13 = vsyncpa [#allocation12], 0 }
   0x4   :  { %14 = vsyncpa [#allocation5], 0  ;;  %s6828_s18 = smov [#allocation8]  }
   0x5   :  { %s40_s19 = sshll.u32 %s6828_s18, 4  ;;  %s41_s19 = int_to_ptr.vmem [resolvable:$true] %s40_s19 }
   0x6   :  { %s6718_s20 = scalar_lea.vmem %s41_s19, 65536  ;;  %p6723_p1 = scmp.lt.s32.totalorder %s41_s19, %s41_s19 }
   0x7   :  { %p6719_p0 = scmp.ne.s32.totalorder %s41_s19, %s6718_s20  ;;  %p6724_p2 = scmp.lt.s32.totalorder %s6718_s20, %s6718_s20 }
   0x9   :  { %p6725_p3 = por %p6724_p2, %p6723_p1 }
   0xb   :  { %p6726_p4 = pnand %p6725_p3, %p6719_p0 }
   0xd   :  { %6729 = shalt.err (!%p6726_p4)
}
   0xe   :  { %s6829_s21 = smov 512   ;;  %s6830_s22 = smov 32  }
   0xf   :  { %46 = dma.hbm_to_vmem [thread:$0]  %s9310_s2, 65536, %s41_s19, [#allocation9], %s6829_s21, %s6829_s21, %s6830_s22  }
  0x10   :  { %s6831_s25 = smov [#allocation3]   ;;  %s6832_s28 = smov [#allocation7]  }
  0x11   :  { %22 = dma.hbm_to_smem %s9308_s0, 32, %s6831_s25, [#allocation6]  }
  0x12   :  { %s28_s29 = sshll.u32 %s6832_s28, 4  ;;  %s29_s29 = int_to_ptr.vmem [resolvable:$true] %s28_s29 }
  0x13   :  { %s6746_s30 = scalar_lea.vmem %s29_s29, 1024  ;;  %p6751_p6 = scmp.lt.s32.totalorder %s29_s29, %s29_s29 }
  0x14   :  { %p6747_p5 = scmp.ne.s32.totalorder %s29_s29, %s6746_s30  ;;  %p6752_p7 = scmp.lt.s32.totalorder %s6746_s30, %s6746_s30 }
  0x16   :  { %p6753_p8 = por %p6752_p7, %p6751_p6 }
  0x18   :  { %p6754_p9 = pnand %p6753_p8, %p6747_p5 }
  0x1a   :  { %6757 = shalt.err (!%p6754_p9)
}
  0x1b   :  { %s6833_s6 = smov 16   ;;  %s6834_s7 = smov 1  }
  0x1c   :  { %34 = dma.hbm_to_vmem [thread:$0]  %s9309_s1, 1024, %s29_s29, [#allocation4], %s6833_s6, %s6833_s6, %s6834_s7  }
  0x1d   :  { %s6835_s2 = smov [#allocation10]  }
  0x1e   :  { %s52_s10 = sshll.u32 %s6835_s2, 4  ;;  %s53_s10 = int_to_ptr.vmem [resolvable:$true] %s52_s10 }
  0x1f   :  { %s6766_s0 = scalar_lea.vmem %s53_s10, 6144  ;;  %p6771_p11 = scmp.lt.s32.totalorder %s53_s10, %s53_s10 }
  0x20   :  { %p6767_p10 = scmp.ne.s32.totalorder %s53_s10, %s6766_s0  ;;  %p6772_p12 = scmp.lt.s32.totalorder %s6766_s0, %s6766_s0 }
  0x22   :  { %p6773_p13 = por %p6772_p12, %p6771_p11 }
  0x24   :  { %p6774_p0 = pnand %p6773_p13, %p6767_p10 }
  0x26   :  { %6777 = shalt.err (!%p6774_p0)
}
  0x27   :  { %s6836_s11 = smov 192   ;;  %s6837_s12 = smov 12  }
  0x28   :  { %58 = dma.hbm_to_vmem [thread:$0]  %s9311_s3, 6144, %s53_s10, [#allocation9], %s6836_s11, %s6836_s11, %s6837_s12  }
  0x29   :  { %s6838_s15 = smov [#allocation11]  }
  0x2a   :  { %s65_s16 = sshll.u32 %s6838_s15, 4  ;;  %s66_s16 = int_to_ptr.vmem [resolvable:$true] %s65_s16 }
  0x2b   :  { %s6786_s1 = scalar_lea.vmem %s66_s16, 512  ;;  %p6791_p2 = scmp.lt.s32.totalorder %s66_s16, %s66_s16 }
  0x2c   :  { %p6787_p1 = scmp.ne.s32.totalorder %s66_s16, %s6786_s1  ;;  %p6792_p3 = scmp.lt.s32.totalorder %s6786_s1, %s6786_s1 }
  0x2e   :  { %p6793_p4 = por %p6792_p3, %p6791_p2 }
  0x30   :  { %p6794_p5 = pnand %p6793_p4, %p6787_p1 }
  0x32   :  { %6797 = shalt.err (!%p6794_p5)
}
  0x33   :  { %68 = dma.hbm_to_vmem [thread:$0]  %s9312_s4, 512, %s66_s16, [#allocation12]  }
  0x34   :  { %6818 = dma.done.wait [#allocation6], 32  }
  0x35   :  { %6819 = vsyncadd [#allocation6], 4294967264 }
  0x36   :  { %6820 = dma.done.wait [#allocation4], 1024  }
  0x37   :  { %6821 = vsyncadd [#allocation4], 4294966272 }
  0x38   :  { %6822 = dma.done.wait [#allocation9], 71680  }
  0x39   :  { %6823 = vsyncadd [#allocation9], 4294895616 }
  0x3a   :  { %6824 = dma.done.wait [#allocation12], 512  }
  0x3b   :  { %6825 = vsyncadd [#allocation12], 4294966784 }
  0x3c   :  { %84 = sfence }
  0x3d   :  { %v194_v0 = vld [vmem:[#allocation8 + $0x1c0] sm:$0xff]  ;;  %v195_v2 = vld [vmem:[#allocation8 + $0x1c8] sm:$0xff]  ;;  %s6887_s3 = sld [smem:[#allocation3 + $0x3]]  ;;  %s6841_s14 = smov [#allocation13]  }
  0x3e   :  { %v198_v1 = vld [vmem:[#allocation8 + $0x1e0] sm:$0xff]  ;;  %v199_v4 = vld [vmem:[#allocation8 + $0x1e8] sm:$0xff]  ;;  %s6889_s4 = sld [smem:[#allocation3 + $0x83]]  ;;  %s5786_s15 = sshll.u32 %s6841_s14, 4  ;;  %s5787_s15 = int_to_ptr.vmem [resolvable:$true] %s5786_s15 }
  0x3f   :  { %v5878_v3 = vcombine.high %v194_v0, %v198_v1  ;;  %v5877_v5 = vcombine.low %v194_v0, %v198_v1  ;;  %v186_v6 = vld [vmem:[#allocation8 + $0x180] sm:$0xff]  ;;  %v5880_v8 = vcombine.high %v195_v2, %v199_v4  ;;  %v5879_v9 = vcombine.low %v195_v2, %v199_v4  ;;  %v187_v11 = vld [vmem:[#allocation8 + $0x188] sm:$0xff]  ;;  %s6891_s19 = sld [smem:[#allocation3 + $0x4]]  ;;  %s6798_s16 = scalar_lea.vmem %s5787_s15, 32 }
  0x40   :  { %v190_v7 = vld [vmem:[#allocation8 + $0x1a0] sm:$0xff]  ;;  %v191_v12 = vld [vmem:[#allocation8 + $0x1a8] sm:$0xff]  ;;  %s6893_s20 = sld [smem:[#allocation3 + $0x84]]  ;;  %p6799_p6 = scmp.ne.s32.totalorder %s5787_s15, %s6798_s16 }
  0x41   :  { %v5870_v10 = vcombine.high %v186_v6, %v190_v7  ;;  %v178_v13 = vld [vmem:[#allocation8 + $0x140] sm:$0xff]  ;;  %948 = vmatprep.subr.bf16.mxu0 %v5878_v3  ;;  %v5872_v14 = vcombine.high %v187_v11, %v191_v12  ;;  %v179_v16 = vld [vmem:[#allocation8 + $0x148] sm:$0xff]  ;;  %989 = vmatprep.subr.bf16.mxu1 %v5880_v8  ;;  %v5869_v18 = vcombine.low %v186_v6, %v190_v7  ;;  %s6895_s21 = sld [smem:[#allocation3 + $0x5]]  ;;  %p6803_p7 = scmp.lt.s32.totalorder %s5787_s15, %s5787_s15 }
  0x42   :  { %v182_v15 = vld [vmem:[#allocation8 + $0x160] sm:$0xff]  ;;  %v183_v17 = vld [vmem:[#allocation8 + $0x168] sm:$0xff]  ;;  %949 = vmatpush1.bf16.msra.mxu0 %v5877_v5  ;;  %990 = vmatpush1.bf16.msra.mxu1 %v5879_v9  ;;  %v5871_v19 = vcombine.low %v187_v11, %v191_v12  ;;  %s6897_s22 = sld [smem:[#allocation3 + $0x85]]  ;;  %p6804_p8 = scmp.lt.s32.totalorder %s6798_s16, %s6798_s16 }
  0x43   :  { %950 = vmatprep.subr.bf16.mxu0 %v5870_v10  ;;  %v5862_v20 = vcombine.high %v178_v13, %v182_v15  ;;  %991 = vmatprep.subr.bf16.mxu1 %v5872_v14  ;;  %v5864_v21 = vcombine.high %v179_v16, %v183_v17  ;;  %v170_v22 = vld [vmem:[#allocation8 + $0x100] sm:$0xff]  ;;  %v171_v24 = vld [vmem:[#allocation8 + $0x108] sm:$0xff]  ;;  %v5861_v26 = vcombine.low %v178_v13, %v182_v15  ;;  %s6899_s23 = sld [smem:[#allocation3]]  ;;  %s91_s29 = scalar_lea.vmem [#allocation7], %s6887_s3 }
  0x44   :  { %v174_v23 = vld [vmem:[#allocation8 + $0x120] sm:$0xff]  ;;  %v175_v25 = vld [vmem:[#allocation8 + $0x128] sm:$0xff]  ;;  %v5863_v27 = vcombine.low %v179_v16, %v183_v17  ;;  %s6901_s24 = sld [smem:[#allocation3 + $0x80]]  ;;  %v92_v57 = vld [vmem:[%s91_s29] sm:$0x1]  ;;  %s99_s30 = scalar_lea.vmem [#allocation7], %s6889_s4 }
  0x45   :  { %v5854_v28 = vcombine.high %v170_v22, %v174_v23  ;;  %v5856_v29 = vcombine.high %v171_v24, %v175_v25  ;;  %v162_v30 = vld [vmem:[#allocation8 + $0xc0] sm:$0xff]  ;;  %s6903_s25 = sld [smem:[#allocation3 + $0x1]]  ;;  %v163_v32 = vld [vmem:[#allocation8 + $0xc8] sm:$0xff]  ;;  %v5853_v34 = vcombine.low %v170_v22, %v174_v23  ;;  %v5855_v35 = vcombine.low %v171_v24, %v175_v25  ;;  %v100_v58 = vld [vmem:[%s99_s30] sm:$0x1]  ;;  %s107_s6 = scalar_lea.vmem [#allocation7], %s6891_s19 }
  0x46   :  { %951 = vmatpush1.bf16.msra.mxu0 %v5869_v18  ;;  %992 = vmatpush1.bf16.msra.mxu1 %v5871_v19  ;;  %v166_v31 = vld [vmem:[#allocation8 + $0xe0] sm:$0xff]  ;;  %v167_v33 = vld [vmem:[#allocation8 + $0xe8] sm:$0xff]  ;;  %s6905_s26 = sld [smem:[#allocation3 + $0x81]]  ;;  %93 = vst [vmem:[#allocation2 + $0x8] sm:$0x1] %v92_v57  ;;  %s115_s7 = scalar_lea.vmem [#allocation7], %s6893_s20 }
  0x47   :  { %952 = vmatprep.subr.bf16.mxu0 %v5862_v20  ;;  %993 = vmatprep.subr.bf16.mxu1 %v5864_v21  ;;  %s6907_s27 = sld [smem:[#allocation3 + $0x2]]  ;;  %v5846_v36 = vcombine.high %v162_v30, %v166_v31  ;;  %v5848_v37 = vcombine.high %v163_v32, %v167_v33  ;;  %v154_v38 = vld [vmem:[#allocation8 + $0x80] sm:$0xff]  ;;  %v155_v40 = vld [vmem:[#allocation8 + $0x88] sm:$0xff]  ;;  %v5845_v42 = vcombine.low %v162_v30, %v166_v31  ;;  %v108_v60 = vld [vmem:[%s107_s6] sm:$0x1]  ;;  %s123_s8 = scalar_lea.vmem [#allocation7], %s6895_s21 }
  0x48   :  { %s6909_s28 = sld [smem:[#allocation3 + $0x82]]  ;;  %v158_v39 = vld [vmem:[#allocation8 + $0xa0] sm:$0xff]  ;;  %v159_v41 = vld [vmem:[#allocation8 + $0xa8] sm:$0xff]  ;;  %v5847_v43 = vcombine.low %v163_v32, %v167_v33  ;;  %101 = vst [vmem:[#allocation2 + $0x9] sm:$0x1] %v100_v58  ;;  %s131_s9 = scalar_lea.vmem [#allocation7], %s6897_s22 }
  0x49   :  { %v5838_v44 = vcombine.high %v154_v38, %v158_v39  ;;  %v5840_v45 = vcombine.high %v155_v40, %v159_v41  ;;  %v6911_v46 = vld [vmem:[#allocation8 + $0x40] sm:$0xff]  ;;  %v6915_v48 = vld [vmem:[#allocation8 + $0x48] sm:$0xff]  ;;  %v5837_v50 = vcombine.low %v154_v38, %v158_v39  ;;  %v5839_v53 = vcombine.low %v155_v40, %v159_v41  ;;  %v116_v61 = vld [vmem:[%s115_s7] sm:$0x1]  ;;  %109 = vst [vmem:[#allocation2 + $0xa] sm:$0x1] %v108_v60  ;;  %p6805_p9 = por %p6804_p8, %p6803_p7 }
  0x4a   :  { %953 = vmatpush1.bf16.msra.mxu0 %v5861_v26  ;;  %994 = vmatpush1.bf16.msra.mxu1 %v5863_v27  ;;  %v6913_v47 = vld [vmem:[#allocation8 + $0x60] sm:$0xff]  ;;  %v6917_v49 = vld [vmem:[#allocation8 + $0x68] sm:$0xff]  ;;  %v124_v62 = vld [vmem:[%s123_s8] sm:$0x1]  ;;  %117 = vst [vmem:[#allocation2 + $0xb] sm:$0x1] %v116_v61 }
  0x4b   :  { %954 = vmatprep.subr.bf16.mxu0 %v5854_v28  ;;  %995 = vmatprep.subr.bf16.mxu1 %v5856_v29  ;;  %v6919_v51 = vld [vmem:[#allocation8] sm:$0xff]  ;;  %v5830_v54 = vcombine.high %v6911_v46, %v6913_v47  ;;  %v6925_v55 = vld [vmem:[#allocation8 + $0x8] sm:$0xff]  ;;  %v5832_v59 = vcombine.high %v6915_v48, %v6917_v49  ;;  %125 = vst [vmem:[#allocation2 + $0xc] sm:$0x1] %v124_v62  ;;  %v132_v63 = vld [vmem:[%s131_s9] sm:$0x1]  ;;  %p6806_p10 = pnand %p6805_p9, %p6799_p6 }
  0x4c   :  { %v6921_v52 = vld [vmem:[#allocation8 + $0x20] sm:$0xff]  ;;  %v6927_v56 = vld [vmem:[#allocation8 + $0x28] sm:$0xff]  ;;  %s88_s2 = scalar_lea.vmem [#allocation7], %s6899_s23  ;;  %s96_s10 = scalar_lea.vmem [#allocation7], %s6901_s24  ;;  %v5829_v2 = vcombine.low %v6911_v46, %v6913_v47  ;;  %133 = vst [vmem:[#allocation2 + $0xd] sm:$0x1] %v132_v63  ;;  %v5831_v6 = vcombine.low %v6915_v48, %v6917_v49 }
  0x4d   :  { %v89_v0 = vld [vmem:[%s88_s2] sm:$0x1]  ;;  %s104_s0 = scalar_lea.vmem [#allocation7], %s6903_s25  ;;  %s112_s11 = scalar_lea.vmem [#allocation7], %s6905_s26  ;;  %v5822_v7 = vcombine.high %v6919_v51, %v6921_v52  ;;  %v5824_v9 = vcombine.high %v6925_v55, %v6927_v56  ;;  %v258_v10 = vld [vmem:[#allocation8 + $0x3c0] sm:$0xff]  ;;  %v259_v12 = vld [vmem:[#allocation8 + $0x3c8] sm:$0xff]  ;;  %v5821_v14 = vcombine.low %v6919_v51, %v6921_v52  ;;  %v5823_v15 = vcombine.low %v6925_v55, %v6927_v56 }
  0x4e   :  { %955 = vmatpush1.bf16.msra.mxu0 %v5853_v34  ;;  %996 = vmatpush1.bf16.msra.mxu1 %v5855_v35  ;;  %v97_v1 = vld [vmem:[%s96_s10] sm:$0x1]  ;;  %90 = vst [vmem:[#allocation2] sm:$0x1] %v89_v0  ;;  %s120_s12 = scalar_lea.vmem [#allocation7], %s6907_s27  ;;  %s128_s13 = scalar_lea.vmem [#allocation7], %s6909_s28 }
  0x4f   :  { %956 = vmatprep.subr.bf16.mxu0 %v5846_v36  ;;  %997 = vmatprep.subr.bf16.mxu1 %v5848_v37  ;;  %98 = vst [vmem:[#allocation2 + $0x1] sm:$0x1] %v97_v1  ;;  %v105_v3 = vld [vmem:[%s104_s0] sm:$0x1]  ;;  %v262_v11 = vld [vmem:[#allocation8 + $0x3e0] sm:$0xff]  ;;  %v263_v13 = vld [vmem:[#allocation8 + $0x3e8] sm:$0xff] }
  0x50   :  { %v113_v4 = vld [vmem:[%s112_s11] sm:$0x1]  ;;  %106 = vst [vmem:[#allocation2 + $0x2] sm:$0x1] %v105_v3  ;;  %v5942_v16 = vcombine.high %v258_v10, %v262_v11  ;;  %v5944_v17 = vcombine.high %v259_v12, %v263_v13  ;;  %v250_v18 = vld [vmem:[#allocation8 + $0x380] sm:$0xff]  ;;  %v251_v20 = vld [vmem:[#allocation8 + $0x388] sm:$0xff]  ;;  %v5941_v23 = vcombine.low %v258_v10, %v262_v11  ;;  %v5943_v25 = vcombine.low %v259_v12, %v263_v13 }
  0x51   :  { %v121_v5 = vld [vmem:[%s120_s12] sm:$0x1]  ;;  %114 = vst [vmem:[#allocation2 + $0x3] sm:$0x1] %v113_v4  ;;  %v254_v19 = vld [vmem:[#allocation8 + $0x3a0] sm:$0xff]  ;;  %v255_v21 = vld [vmem:[#allocation8 + $0x3a8] sm:$0xff] }
  0x52   :  { %957 = vmatpush1.bf16.msra.mxu0 %v5845_v42  ;;  %998 = vmatpush1.bf16.msra.mxu1 %v5847_v43  ;;  %122 = vst [vmem:[#allocation2 + $0x4] sm:$0x1] %v121_v5  ;;  %v129_v8 = vld [vmem:[%s128_s13] sm:$0x1]  ;;  %v5934_v26 = vcombine.high %v250_v18, %v254_v19  ;;  %v5936_v27 = vcombine.high %v251_v20, %v255_v21  ;;  %v242_v28 = vld [vmem:[#allocation8 + $0x340] sm:$0xff]  ;;  %v243_v30 = vld [vmem:[#allocation8 + $0x348] sm:$0xff] }
  0x53   :  { %958 = vmatprep.subr.bf16.mxu0 %v5838_v44  ;;  %999 = vmatprep.subr.bf16.mxu1 %v5840_v45  ;;  %130 = vst [vmem:[#allocation2 + $0x5] sm:$0x1] %v129_v8  ;;  %v135_v22 = vld [vmem:[#allocation2 + $0x8] sm:$0x3f]  ;;  %v246_v29 = vld [vmem:[#allocation8 + $0x360] sm:$0xff]  ;;  %v247_v31 = vld [vmem:[#allocation8 + $0x368] sm:$0xff]  ;;  %v5933_v32 = vcombine.low %v250_v18, %v254_v19  ;;  %v5935_v33 = vcombine.low %v251_v20, %v255_v21 }
  0x54   :  { %v6955_v24 = vpack.c.bf16 %v135_v22, %v135_v22  ;;  %v5926_v34 = vcombine.high %v242_v28, %v246_v29  ;;  %v5928_v35 = vcombine.high %v243_v30, %v247_v31  ;;  %v234_v36 = vld [vmem:[#allocation8 + $0x300] sm:$0xff]  ;;  %v235_v38 = vld [vmem:[#allocation8 + $0x308] sm:$0xff]  ;;  %v5925_v40 = vcombine.low %v242_v28, %v246_v29  ;;  %v196_v12 = vld [vmem:[#allocation8 + $0x1d0] sm:$0xff] }
  0x55   :  { %v238_v37 = vld [vmem:[#allocation8 + $0x320] sm:$0xff]  ;;  %v239_v39 = vld [vmem:[#allocation8 + $0x328] sm:$0xff]  ;;  %v5927_v41 = vcombine.low %v243_v30, %v247_v31  ;;  %v200_v13 = vld [vmem:[#allocation8 + $0x1f0] sm:$0xff] }
  0x56   :  { %959 = vmatpush1.bf16.msra.mxu0 %v5837_v50  ;;  %1000 = vmatpush1.bf16.msra.mxu1 %v5839_v53  ;;  %v5918_v42 = vcombine.high %v234_v36, %v238_v37  ;;  %v5920_v43 = vcombine.high %v235_v38, %v239_v39  ;;  %v226_v44 = vld [vmem:[#allocation8 + $0x2c0] sm:$0xff]  ;;  %v227_v46 = vld [vmem:[#allocation8 + $0x2c8] sm:$0xff]  ;;  %v5917_v48 = vcombine.low %v234_v36, %v238_v37  ;;  %v188_v21 = vld [vmem:[#allocation8 + $0x190] sm:$0xff] }
  0x57   :  { %960 = vmatprep.subr.bf16.mxu0 %v5830_v54  ;;  %1001 = vmatprep.subr.bf16.mxu1 %v5832_v59  ;;  %v230_v45 = vld [vmem:[#allocation8 + $0x2e0] sm:$0xff]  ;;  %v231_v47 = vld [vmem:[#allocation8 + $0x2e8] sm:$0xff]  ;;  %v5919_v49 = vcombine.low %v235_v38, %v239_v39  ;;  %v5882_v19 = vcombine.high %v196_v12, %v200_v13  ;;  %v192_v22 = vld [vmem:[#allocation8 + $0x1b0] sm:$0xff] }
  0x58   :  { %980 = vmatprep.mubr.bf16.mxu0 %v6955_v24  ;;  %1021 = vmatprep.mubr.bf16.mxu1 %v6955_v24  ;;  %v5910_v50 = vcombine.high %v226_v44, %v230_v45  ;;  %v5912_v51 = vcombine.high %v227_v46, %v231_v47  ;;  %v218_v52 = vld [vmem:[#allocation8 + $0x280] sm:$0xff]  ;;  %v219_v54 = vld [vmem:[#allocation8 + $0x288] sm:$0xff]  ;;  %v5909_v56 = vcombine.low %v226_v44, %v230_v45  ;;  %v180_v31 = vld [vmem:[#allocation8 + $0x150] sm:$0xff] }
  0x59   :  { %v222_v53 = vld [vmem:[#allocation8 + $0x2a0] sm:$0xff]  ;;  %v223_v55 = vld [vmem:[#allocation8 + $0x2a8] sm:$0xff]  ;;  %v5911_v57 = vcombine.low %v227_v46, %v231_v47  ;;  %v5874_v29 = vcombine.high %v188_v21, %v192_v22  ;;  %v172_v39 = vld [vmem:[#allocation8 + $0x110] sm:$0xff] }
  0x5a   :  { %961 = vmatpush1.bf16.msra.mxu0 %v5829_v2  ;;  %1002 = vmatpush1.bf16.msra.mxu1 %v5831_v6  ;;  %v5902_v58 = vcombine.high %v218_v52, %v222_v53  ;;  %v5904_v59 = vcombine.high %v219_v54, %v223_v55  ;;  %v210_v60 = vld [vmem:[#allocation8 + $0x240] sm:$0xff]  ;;  %v211_v62 = vld [vmem:[#allocation8 + $0x248] sm:$0xff]  ;;  %v5901_v0 = vcombine.low %v218_v52, %v222_v53  ;;  %v164_v46 = vld [vmem:[#allocation8 + $0xd0] sm:$0xff] }
  0x5b   :  { %962 = vmatprep.subr.bf16.mxu0 %v5822_v7  ;;  %1003 = vmatprep.subr.bf16.mxu1 %v5824_v9  ;;  %v214_v61 = vld [vmem:[#allocation8 + $0x260] sm:$0xff]  ;;  %v215_v63 = vld [vmem:[#allocation8 + $0x268] sm:$0xff]  ;;  %v5903_v1 = vcombine.low %v219_v54, %v223_v55  ;;  %v168_v47 = vld [vmem:[#allocation8 + $0xf0] sm:$0xff] }
  0x5c   :  { %v5894_v2 = vcombine.high %v210_v60, %v214_v61  ;;  %v5896_v3 = vcombine.high %v211_v62, %v215_v63  ;;  %v202_v4 = vld [vmem:[#allocation8 + $0x200] sm:$0xff]  ;;  %v203_v6 = vld [vmem:[#allocation8 + $0x208] sm:$0xff]  ;;  %v5893_v8 = vcombine.low %v210_v60, %v214_v61  ;;  %v5895_v9 = vcombine.low %v211_v62, %v215_v63  ;;  %v156_v54 = vld [vmem:[#allocation8 + $0x90] sm:$0xff] }
  0x5d   :  { %v206_v5 = vld [vmem:[#allocation8 + $0x220] sm:$0xff]  ;;  %v207_v7 = vld [vmem:[#allocation8 + $0x228] sm:$0xff]  ;;  %v5850_v53 = vcombine.high %v164_v46, %v168_v47  ;;  %v157_v55 = vld [vmem:[#allocation8 + $0x98] sm:$0xff] }
  0x5e   :  { %963 = vmatpush1.bf16.msra.mxu0 %v5821_v14  ;;  %1004 = vmatpush1.bf16.msra.mxu1 %v5823_v15  ;;  %v5886_v10 = vcombine.high %v202_v4, %v206_v5  ;;  %v5888_v11 = vcombine.high %v203_v6, %v207_v7  ;;  %v197_v14 = vld [vmem:[#allocation8 + $0x1d8] sm:$0xff]  ;;  %v5887_v18 = vcombine.low %v203_v6, %v207_v7  ;;  %v148_v61 = vld [vmem:[#allocation8 + $0x50] sm:$0xff] }
  0x5f   :  { %964 = vmatprep.subr.bf16.mxu0 %v5942_v16  ;;  %1005 = vmatprep.subr.bf16.mxu1 %v5944_v17  ;;  %v201_v15 = vld [vmem:[#allocation8 + $0x1f8] sm:$0xff]  ;;  %v5885_v16 = vcombine.low %v202_v4, %v206_v5  ;;  %v134_v17 = vld [vmem:[#allocation2] sm:$0x3f] }
  0x60   :  { %v5884_v20 = vcombine.high %v197_v14, %v201_v15  ;;  %v5883_v28 = vcombine.low %v197_v14, %v201_v15  ;;  %v152_v62 = vld [vmem:[#allocation8 + $0x70] sm:$0xff]  ;;  %v149_v63 = vld [vmem:[#allocation8 + $0x58] sm:$0xff] }
  0x61   :  { %v5834_v4 = vcombine.high %v148_v61, %v152_v62  ;;  %v140_v5 = vld [vmem:[#allocation8 + $0x10] sm:$0xff]  ;;  %v141_v7 = vld [vmem:[#allocation8 + $0x18] sm:$0xff] }
  0x62   :  { %965 = vmatpush2.bf16.msra.mxu0 %v5941_v23  ;;  %1006 = vmatpush2.bf16.msra.mxu1 %v5943_v25  ;;  %v6959_v23 = vpack.c.bf16 %v134_v17, %v134_v17  ;;  %v189_v25 = vld [vmem:[#allocation8 + $0x198] sm:$0xff]  ;;  %v144_v6 = vld [vmem:[#allocation8 + $0x30] sm:$0xff] }
  0x63   :  { %966 = vmatprep.subr.bf16.mxu0 %v5934_v26  ;;  %1007 = vmatprep.subr.bf16.mxu1 %v5936_v27  ;;  %v193_v26 = vld [vmem:[#allocation8 + $0x1b8] sm:$0xff]  ;;  %v5881_v27 = vcombine.low %v196_v12, %v200_v13  ;;  %v5826_v12 = vcombine.high %v140_v5, %v144_v6  ;;  %v260_v13 = vld [vmem:[#allocation8 + $0x3d0] sm:$0xff] }
  0x64   :  { %v5876_v30 = vcombine.high %v189_v25, %v193_v26  ;;  %v5875_v36 = vcombine.low %v189_v25, %v193_v26  ;;  %v264_v14 = vld [vmem:[#allocation8 + $0x3f0] sm:$0xff]  ;;  %v261_v15 = vld [vmem:[#allocation8 + $0x3d8] sm:$0xff] }
  0x65   :  { %v265_v17 = vld [vmem:[#allocation8 + $0x3f8] sm:$0xff] }
  0x66   :  { %967 = vmatpush2.bf16.msra.mxu0 %v5933_v32  ;;  %1008 = vmatpush2.bf16.msra.mxu1 %v5935_v33  ;;  %v184_v32 = vld [vmem:[#allocation8 + $0x170] sm:$0xff]  ;;  %v181_v33 = vld [vmem:[#allocation8 + $0x158] sm:$0xff]  ;;  %v5948_v26 = vcombine.high %v261_v15, %v265_v17 }
  0x67   :  { %968 = vmatprep.subr.bf16.mxu0 %v5926_v34  ;;  %1009 = vmatprep.subr.bf16.mxu1 %v5928_v35  ;;  %v185_v34 = vld [vmem:[#allocation8 + $0x178] sm:$0xff]  ;;  %v5873_v35 = vcombine.low %v188_v21, %v192_v22  ;;  %v5866_v37 = vcombine.high %v180_v31, %v184_v32  ;;  %v252_v21 = vld [vmem:[#allocation8 + $0x390] sm:$0xff] }
  0x68   :  { %v5868_v38 = vcombine.high %v181_v33, %v185_v34  ;;  %v5867_v44 = vcombine.low %v181_v33, %v185_v34  ;;  %v256_v22 = vld [vmem:[#allocation8 + $0x3b0] sm:$0xff]  ;;  %v253_v25 = vld [vmem:[#allocation8 + $0x398] sm:$0xff] }
  0x69   :  { %v245_v33 = vld [vmem:[#allocation8 + $0x358] sm:$0xff] }
  0x6a   :  { %969 = vmatpush2.bf16.msra.mxu0 %v5925_v40  ;;  %1010 = vmatpush2.bf16.msra.mxu1 %v5927_v41  ;;  %v176_v40 = vld [vmem:[#allocation8 + $0x130] sm:$0xff]  ;;  %v173_v41 = vld [vmem:[#allocation8 + $0x118] sm:$0xff] }
  0x6b   :  { %970 = vmatprep.subr.bf16.mxu0 %v5918_v42  ;;  %1011 = vmatprep.subr.bf16.mxu1 %v5920_v43  ;;  %v177_v42 = vld [vmem:[#allocation8 + $0x138] sm:$0xff]  ;;  %v5865_v43 = vcombine.low %v180_v31, %v184_v32  ;;  %v5858_v45 = vcombine.high %v172_v39, %v176_v40  ;;  %v244_v31 = vld [vmem:[#allocation8 + $0x350] sm:$0xff] }
  0x6c   :  { %v5859_v52 = vcombine.low %v173_v41, %v177_v42  ;;  %v248_v32 = vld [vmem:[#allocation8 + $0x370] sm:$0xff] }
  0x6e   :  { %971 = vmatpush2.bf16.msra.mxu0 %v5917_v48  ;;  %1012 = vmatpush2.bf16.msra.mxu1 %v5919_v49  ;;  %v165_v48 = vld [vmem:[#allocation8 + $0xd8] sm:$0xff]  ;;  %v5860_v49 = vcombine.high %v173_v41, %v177_v42  ;;  %v240_v41 = vld [vmem:[#allocation8 + $0x330] sm:$0xff] }
  0x6f   :  { %972 = vmatprep.subr.bf16.mxu0 %v5910_v50  ;;  %1013 = vmatprep.subr.bf16.mxu1 %v5912_v51  ;;  %v169_v50 = vld [vmem:[#allocation8 + $0xf8] sm:$0xff]  ;;  %v5857_v51 = vcombine.low %v172_v39, %v176_v40  ;;  %v236_v39 = vld [vmem:[#allocation8 + $0x310] sm:$0xff] }
  0x70   :  { %v237_v42 = vld [vmem:[#allocation8 + $0x318] sm:$0xff] }
  0x72   :  { %973 = vmatpush2.bf16.msra.mxu0 %v5909_v56  ;;  %1014 = vmatpush2.bf16.msra.mxu1 %v5911_v57  ;;  %v5852_v56 = vcombine.high %v165_v48, %v169_v50  ;;  %v161_v57 = vld [vmem:[#allocation8 + $0xb8] sm:$0xff] }
  0x73   :  { %974 = vmatprep.subr.bf16.mxu0 %v5902_v58  ;;  %1015 = vmatprep.subr.bf16.mxu1 %v5904_v59  ;;  %v5849_v58 = vcombine.low %v164_v46, %v168_v47  ;;  %v5851_v59 = vcombine.low %v165_v48, %v169_v50  ;;  %v5922_v46 = vcombine.high %v236_v39, %v240_v41  ;;  %v228_v48 = vld [vmem:[#allocation8 + $0x2d0] sm:$0xff]  ;;  %v229_v50 = vld [vmem:[#allocation8 + $0x2d8] sm:$0xff] }
  0x76   :  { %975 = vmatpush2.bf16.msra.mxu0 %v5901_v0  ;;  %1016 = vmatpush2.bf16.msra.mxu1 %v5903_v1  ;;  %v5844_v0 = vcombine.high %v157_v55, %v161_v57  ;;  %v153_v1 = vld [vmem:[#allocation8 + $0x78] sm:$0xff] }
  0x77   :  { %976 = vmatprep.subr.bf16.mxu0 %v5894_v2  ;;  %1017 = vmatprep.subr.bf16.mxu1 %v5896_v3  ;;  %v5843_v3 = vcombine.low %v157_v55, %v161_v57  ;;  %v220_v55 = vld [vmem:[#allocation8 + $0x290] sm:$0xff]  ;;  %v221_v57 = vld [vmem:[#allocation8 + $0x298] sm:$0xff] }
  0x7a   :  { %977 = vmatpush2.bf16.msra.mxu0 %v5893_v8  ;;  %1018 = vmatpush2.bf16.msra.mxu1 %v5895_v9  ;;  %v5836_v8 = vcombine.high %v149_v63, %v153_v1  ;;  %v145_v9 = vld [vmem:[#allocation8 + $0x38] sm:$0xff] }
  0x7b   :  { %978 = vmatprep.subr.bf16.mxu0 %v5886_v10  ;;  %1019 = vmatprep.subr.bf16.mxu1 %v5888_v11  ;;  %v5833_v10 = vcombine.low %v148_v61, %v152_v62  ;;  %v5835_v11 = vcombine.low %v149_v63, %v153_v1  ;;  %v212_v63 = vld [vmem:[#allocation8 + $0x250] sm:$0xff]  ;;  %v213_v1 = vld [vmem:[#allocation8 + $0x258] sm:$0xff] }
  0x7e   :  { %979 = vmatpush2.bf16.msra.mxu0 %v5885_v16  ;;  %1020 = vmatpush2.bf16.msra.mxu1 %v5887_v18  ;;  %v5828_v16 = vcombine.high %v141_v7, %v145_v9  ;;  %v5825_v18 = vcombine.low %v140_v5, %v144_v6 }
  0x7f   :  { %1030 = vmatprep.subr.bf16.mxu0 %v5882_v19  ;;  %1071 = vmatprep.subr.bf16.mxu1 %v5884_v20  ;;  %v5827_v19 = vcombine.low %v141_v7, %v145_v9  ;;  %v5946_v20 = vcombine.high %v260_v13, %v264_v14  ;;  %v204_v7 = vld [vmem:[#allocation8 + $0x210] sm:$0xff]  ;;  %v205_v9 = vld [vmem:[#allocation8 + $0x218] sm:$0xff] }
  0x81   :  { %981 = vmatmul.mubr.bf16.vlgmr.msra.gmra.mxu0 %v6959_v23  ;;  %1022 = vmatmul.mubr.bf16.vlgmr.msra.gmra.mxu1 %v6959_v23 }
  0x82   :  { %1031 = vmatpush1.bf16.msra.mxu0 %v5881_v27  ;;  %1072 = vmatpush1.bf16.msra.mxu1 %v5883_v28  ;;  %v257_v27 = vld [vmem:[#allocation8 + $0x3b8] sm:$0xff]  ;;  %v5945_v28 = vcombine.low %v260_v13, %v264_v14 }
  0x83   :  { %1032 = vmatprep.subr.bf16.mxu0 %v5874_v29  ;;  %1073 = vmatprep.subr.bf16.mxu1 %v5876_v30  ;;  %v5947_v29 = vcombine.low %v261_v15, %v265_v17  ;;  %v5938_v30 = vcombine.high %v252_v21, %v256_v22  ;;  %v5940_v34 = vcombine.high %v253_v25, %v257_v27  ;;  %v1211_v15 = vld [vmem:[#allocation8 + $0x5c0] sm:$0xff]  ;;  %v1212_v17 = vld [vmem:[#allocation8 + $0x5c8] sm:$0xff] }
  0x84   :  { %1062 = vmatprep.mubr.bf16.mxu0 %v6955_v24  ;;  %1103 = vmatprep.mubr.bf16.mxu1 %v6955_v24  ;;  %v160_v24 = vld [vmem:[#allocation8 + $0xb0] sm:$0xff] }
  0x85   :  { %v5842_v60 = vcombine.high %v156_v54, %v160_v24  ;;  %v5841_v2 = vcombine.low %v156_v54, %v160_v24 }
  0x86   :  { %1033 = vmatpush1.bf16.msra.mxu0 %v5873_v35  ;;  %1074 = vmatpush1.bf16.msra.mxu1 %v5875_v36  ;;  %v249_v35 = vld [vmem:[#allocation8 + $0x378] sm:$0xff]  ;;  %v5937_v36 = vcombine.low %v252_v21, %v256_v22 }
  0x87   :  { %1034 = vmatprep.subr.bf16.mxu0 %v5866_v37  ;;  %1075 = vmatprep.subr.bf16.mxu1 %v5868_v38  ;;  %v5939_v37 = vcombine.low %v253_v25, %v257_v27  ;;  %v5930_v38 = vcombine.high %v244_v31, %v248_v32  ;;  %v5932_v40 = vcombine.high %v245_v33, %v249_v35  ;;  %v1203_v25 = vld [vmem:[#allocation8 + $0x580] sm:$0xff]  ;;  %v1204_v27 = vld [vmem:[#allocation8 + $0x588] sm:$0xff] }
  0x8a   :  { %1035 = vmatpush1.bf16.msra.mxu0 %v5865_v43  ;;  %1076 = vmatpush1.bf16.msra.mxu1 %v5867_v44  ;;  %v241_v43 = vld [vmem:[#allocation8 + $0x338] sm:$0xff]  ;;  %v5929_v44 = vcombine.low %v244_v31, %v248_v32 }
  0x8b   :  { %1036 = vmatprep.subr.bf16.mxu0 %v5858_v45  ;;  %1077 = vmatprep.subr.bf16.mxu1 %v5860_v49  ;;  %v5931_v45 = vcombine.low %v245_v33, %v249_v35  ;;  %v5924_v47 = vcombine.high %v237_v42, %v241_v43  ;;  %v232_v49 = vld [vmem:[#allocation8 + $0x2f0] sm:$0xff]  ;;  %v1195_v33 = vld [vmem:[#allocation8 + $0x540] sm:$0xff]  ;;  %v1196_v35 = vld [vmem:[#allocation8 + $0x548] sm:$0xff] }
  0x8c   :  { %v5914_v54 = vcombine.high %v228_v48, %v232_v49 }
  0x8e   :  { %1037 = vmatpush1.bf16.msra.mxu0 %v5857_v51  ;;  %1078 = vmatpush1.bf16.msra.mxu1 %v5859_v52  ;;  %v233_v51 = vld [vmem:[#allocation8 + $0x2f8] sm:$0xff]  ;;  %v5921_v52 = vcombine.low %v236_v39, %v240_v41  ;;  %v1187_v41 = vld [vmem:[#allocation8 + $0x500] sm:$0xff] }
  0x8f   :  { %1038 = vmatprep.subr.bf16.mxu0 %v5850_v53  ;;  %1079 = vmatprep.subr.bf16.mxu1 %v5852_v56  ;;  %v5923_v53 = vcombine.low %v237_v42, %v241_v43  ;;  %v5916_v24 = vcombine.high %v229_v50, %v233_v51  ;;  %v224_v56 = vld [vmem:[#allocation8 + $0x2b0] sm:$0xff]  ;;  %v1191_v42 = vld [vmem:[#allocation8 + $0x520] sm:$0xff]  ;;  %v9314_v43 = vmov 0  }
  0x90   :  { %v5906_v61 = vcombine.high %v220_v55, %v224_v56 }
  0x92   :  { %1039 = vmatpush1.bf16.msra.mxu0 %v5849_v58  ;;  %1080 = vmatpush1.bf16.msra.mxu1 %v5851_v59  ;;  %v225_v58 = vld [vmem:[#allocation8 + $0x2b8] sm:$0xff]  ;;  %v5913_v59 = vcombine.low %v228_v48, %v232_v49  ;;  %v1179_v49 = vld [vmem:[#allocation8 + $0x4c0] sm:$0xff] }
  0x93   :  { %1040 = vmatprep.subr.bf16.mxu0 %v5842_v60  ;;  %1081 = vmatprep.subr.bf16.mxu1 %v5844_v0  ;;  %v5915_v60 = vcombine.low %v229_v50, %v233_v51  ;;  %v5908_v62 = vcombine.high %v221_v57, %v225_v58  ;;  %v216_v0 = vld [vmem:[#allocation8 + $0x270] sm:$0xff]  ;;  %v1183_v50 = vld [vmem:[#allocation8 + $0x4e0] sm:$0xff]  ;;  %v1180_v51 = vld [vmem:[#allocation8 + $0x4c8] sm:$0xff] }
  0x94   :  { %v5898_v5 = vcombine.high %v212_v63, %v216_v0 }
  0x96   :  { %1041 = vmatpush1.bf16.msra.mxu0 %v5841_v2  ;;  %1082 = vmatpush1.bf16.msra.mxu1 %v5843_v3  ;;  %v217_v2 = vld [vmem:[#allocation8 + $0x278] sm:$0xff]  ;;  %v5905_v3 = vcombine.low %v220_v55, %v224_v56  ;;  %v1171_v56 = vld [vmem:[#allocation8 + $0x480] sm:$0xff] }
  0x97   :  { %1042 = vmatprep.subr.bf16.mxu0 %v5834_v4  ;;  %1083 = vmatprep.subr.bf16.mxu1 %v5836_v8  ;;  %v5907_v4 = vcombine.low %v221_v57, %v225_v58  ;;  %v5900_v6 = vcombine.high %v213_v1, %v217_v2  ;;  %v208_v8 = vld [vmem:[#allocation8 + $0x230] sm:$0xff]  ;;  %v1175_v57 = vld [vmem:[#allocation8 + $0x4a0] sm:$0xff]  ;;  %v1172_v58 = vld [vmem:[#allocation8 + $0x488] sm:$0xff] }
  0x98   :  { %v5890_v13 = vcombine.high %v204_v7, %v208_v8 }
  0x9a   :  { %1043 = vmatpush1.bf16.msra.mxu0 %v5833_v10  ;;  %1084 = vmatpush1.bf16.msra.mxu1 %v5835_v11  ;;  %v209_v10 = vld [vmem:[#allocation8 + $0x238] sm:$0xff]  ;;  %v5897_v11 = vcombine.low %v212_v63, %v216_v0  ;;  %v1163_v0 = vld [vmem:[#allocation8 + $0x440] sm:$0xff] }
  0x9b   :  { %1044 = vmatprep.subr.bf16.mxu0 %v5826_v12  ;;  %1085 = vmatprep.subr.bf16.mxu1 %v5828_v16  ;;  %v5899_v12 = vcombine.low %v213_v1, %v217_v2  ;;  %v5892_v14 = vcombine.high %v205_v9, %v209_v10  ;;  %v1215_v16 = vld [vmem:[#allocation8 + $0x5e0] sm:$0xff]  ;;  %v1164_v2 = vld [vmem:[#allocation8 + $0x448] sm:$0xff] }
  0x9c   :  { %v6965_v21 = vcombine.high %v1211_v15, %v1215_v16  ;;  %v1167_v1 = vld [vmem:[#allocation8 + $0x460] sm:$0xff] }
  0x9e   :  { %1045 = vmatpush1.bf16.msra.mxu0 %v5825_v18  ;;  %1086 = vmatpush1.bf16.msra.mxu1 %v5827_v19  ;;  %v1216_v18 = vld [vmem:[#allocation8 + $0x5e8] sm:$0xff]  ;;  %v5889_v19 = vcombine.low %v204_v7, %v208_v8  ;;  %10053 = vst [vmem:[#allocation19_spill] sm:$0xff] %v6965_v21  ;;  %v1155_v8 = vld [vmem:[#allocation8 + $0x400] sm:$0xff] }
  0x9f   :  { %1046 = vmatprep.subr.bf16.mxu0 %v5946_v20  ;;  %1087 = vmatprep.subr.bf16.mxu1 %v5948_v26  ;;  %v5891_v20 = vcombine.low %v205_v9, %v209_v10  ;;  %v6967_v22 = vcombine.high %v1212_v17, %v1216_v18  ;;  %v1207_v26 = vld [vmem:[#allocation8 + $0x5a0] sm:$0xff]  ;;  %v1156_v10 = vld [vmem:[#allocation8 + $0x408] sm:$0xff] }
  0xa0   :  { %v6974_v31 = vcombine.high %v1203_v25, %v1207_v26  ;;  %v1159_v9 = vld [vmem:[#allocation8 + $0x420] sm:$0xff] }
  0xa1   :  { %10054 = vst [vmem:[#allocation20_spill] sm:$0xff] %v6967_v22 }
  0xa2   :  { %1047 = vmatpush2.bf16.msra.mxu0 %v5945_v28  ;;  %1088 = vmatpush2.bf16.msra.mxu1 %v5947_v29  ;;  %v1208_v28 = vld [vmem:[#allocation8 + $0x5a8] sm:$0xff]  ;;  %v6969_v29 = vcombine.low %v1211_v15, %v1215_v16  ;;  %10057 = vst [vmem:[#allocation23_spill] sm:$0xff] %v6974_v31  ;;  %v1275_v16 = vld [vmem:[#allocation8 + $0x7c0] sm:$0xff] }
  0xa3   :  { %1048 = vmatprep.subr.bf16.mxu0 %v5938_v30  ;;  %1089 = vmatprep.subr.bf16.mxu1 %v5940_v34  ;;  %v6972_v30 = vcombine.low %v1212_v17, %v1216_v18  ;;  %v6977_v32 = vcombine.high %v1204_v27, %v1208_v28  ;;  %v1199_v34 = vld [vmem:[#allocation8 + $0x560] sm:$0xff]  ;;  %v1276_v18 = vld [vmem:[#allocation8 + $0x7c8] sm:$0xff] }
  0xa4   :  { %10055 = vst [vmem:[#allocation21_spill] sm:$0xff] %v6969_v29  ;;  %v6988_v39 = vcombine.high %v1195_v33, %v1199_v34  ;;  %v1279_v17 = vld [vmem:[#allocation8 + $0x7e0] sm:$0xff] }
  0xa5   :  { %10056 = vst [vmem:[#allocation22_spill] sm:$0xff] %v6972_v30  ;;  %10058 = vst [vmem:[#allocation24_spill] sm:$0xff] %v6977_v32 }
  0xa6   :  { %1049 = vmatpush2.bf16.msra.mxu0 %v5937_v36  ;;  %1090 = vmatpush2.bf16.msra.mxu1 %v5939_v37  ;;  %v1200_v36 = vld [vmem:[#allocation8 + $0x568] sm:$0xff]  ;;  %v6982_v37 = vcombine.low %v1203_v25, %v1207_v26  ;;  %10061 = vst [vmem:[#allocation27_spill] sm:$0xff] %v6988_v39  ;;  %v7062_v26 = vcombine.high %v1275_v16, %v1279_v17 }
  0xa7   :  { %1050 = vmatprep.subr.bf16.mxu0 %v5930_v38  ;;  %1091 = vmatprep.subr.bf16.mxu1 %v5932_v40  ;;  %v6986_v38 = vcombine.low %v1204_v27, %v1208_v28  ;;  %v6991_v40 = vcombine.high %v1196_v35, %v1200_v36  ;;  %v1267_v28 = vld [vmem:[#allocation8 + $0x780] sm:$0xff] }
  0xa8   :  { %10059 = vst [vmem:[#allocation25_spill] sm:$0xff] %v6982_v37  ;;  %10085 = vst [vmem:[#allocation51_spill] sm:$0xff] %v7062_v26 }
  0xa9   :  { %10060 = vst [vmem:[#allocation26_spill] sm:$0xff] %v6986_v38  ;;  %10062 = vst [vmem:[#allocation28_spill] sm:$0xff] %v6991_v40 }
  0xaa   :  { %1051 = vmatpush2.bf16.msra.mxu0 %v5929_v44  ;;  %1092 = vmatpush2.bf16.msra.mxu1 %v5931_v45  ;;  %v1192_v44 = vld [vmem:[#allocation8 + $0x528] sm:$0xff]  ;;  %v6996_v45 = vcombine.low %v1195_v33, %v1199_v34  ;;  %v1271_v33 = vld [vmem:[#allocation8 + $0x7a0] sm:$0xff] }
  0xab   :  { %1052 = vmatprep.subr.bf16.mxu0 %v5922_v46  ;;  %1093 = vmatprep.subr.bf16.mxu1 %v5924_v47  ;;  %v7000_v46 = vcombine.low %v1196_v35, %v1200_v36  ;;  %v7002_v47 = vcombine.high %v1187_v41, %v1191_v42  ;;  %v1268_v34 = vld [vmem:[#allocation8 + $0x788] sm:$0xff]  ;;  %v7068_v36 = vcombine.low %v1275_v16, %v1279_v17  ;;  %v1247_v16 = vld [vmem:[#allocation8 + $0x6e0] sm:$0xff] }
  0xac   :  { %10063 = vst [vmem:[#allocation29_spill] sm:$0xff] %v6996_v45  ;;  %v1272_v35 = vld [vmem:[#allocation8 + $0x7a8] sm:$0xff] }
  0xad   :  { %10064 = vst [vmem:[#allocation30_spill] sm:$0xff] %v7000_v46  ;;  %10065 = vst [vmem:[#allocation31_spill] sm:$0xff] %v7002_v47  ;;  %v1244_v17 = vld [vmem:[#allocation8 + $0x6c8] sm:$0xff] }
  0xae   :  { %1053 = vmatpush2.bf16.msra.mxu0 %v5921_v52  ;;  %1094 = vmatpush2.bf16.msra.mxu1 %v5923_v53  ;;  %v1184_v52 = vld [vmem:[#allocation8 + $0x4e8] sm:$0xff]  ;;  %v7008_v53 = vcombine.low %v1187_v41, %v1191_v42  ;;  %10087 = vst [vmem:[#allocation53_spill] sm:$0xff] %v7068_v36  ;;  %v7074_v42 = vcombine.high %v1267_v28, %v1271_v33 }
  0xaf   :  { %1054 = vmatprep.subr.bf16.mxu0 %v5914_v54  ;;  %1095 = vmatprep.subr.bf16.mxu1 %v5916_v24  ;;  %v7014_v24 = vcombine.high %v1179_v49, %v1183_v50  ;;  %v7017_v55 = vcombine.high %v1180_v51, %v1184_v52 }
  0xb0   :  { %10067 = vst [vmem:[#allocation33_spill] sm:$0xff] %v7008_v53  ;;  %10089 = vst [vmem:[#allocation55_spill] sm:$0xff] %v7074_v42 }
  0xb1   :  { %10069 = vst [vmem:[#allocation35_spill] sm:$0xff] %v7014_v24  ;;  %10070 = vst [vmem:[#allocation36_spill] sm:$0xff] %v7017_v55 }
  0xb2   :  { %1055 = vmatpush2.bf16.msra.mxu0 %v5913_v59  ;;  %1096 = vmatpush2.bf16.msra.mxu1 %v5915_v60  ;;  %v1176_v59 = vld [vmem:[#allocation8 + $0x4a8] sm:$0xff]  ;;  %v7020_v60 = vcombine.low %v1179_v49, %v1183_v50  ;;  %v1263_v49 = vld [vmem:[#allocation8 + $0x760] sm:$0xff] }
  0xb3   :  { %1056 = vmatprep.subr.bf16.mxu0 %v5906_v61  ;;  %1097 = vmatprep.subr.bf16.mxu1 %v5908_v62  ;;  %v7024_v61 = vcombine.low %v1180_v51, %v1184_v52  ;;  %v7026_v62 = vcombine.high %v1171_v56, %v1175_v57  ;;  %v7029_v63 = vcombine.high %v1172_v58, %v1176_v59  ;;  %v1260_v50 = vld [vmem:[#allocation8 + $0x748] sm:$0xff] }
  0xb4   :  { %10071 = vst [vmem:[#allocation37_spill] sm:$0xff] %v7020_v60  ;;  %v1264_v51 = vld [vmem:[#allocation8 + $0x768] sm:$0xff]  ;;  %v7080_v52 = vcombine.low %v1267_v28, %v1271_v33 }
  0xb5   :  { %10072 = vst [vmem:[#allocation38_spill] sm:$0xff] %v7024_v61  ;;  %10073 = vst [vmem:[#allocation39_spill] sm:$0xff] %v7026_v62 }
  0xb6   :  { %1057 = vmatpush2.bf16.msra.mxu0 %v5905_v3  ;;  %1098 = vmatpush2.bf16.msra.mxu1 %v5907_v4  ;;  %10074 = vst [vmem:[#allocation40_spill] sm:$0xff] %v7029_v63  ;;  %v1168_v3 = vld [vmem:[#allocation8 + $0x468] sm:$0xff]  ;;  %v7032_v4 = vcombine.low %v1171_v56, %v1175_v57  ;;  %10091 = vst [vmem:[#allocation57_spill] sm:$0xff] %v7080_v52  ;;  %v7084_v56 = vcombine.low %v1268_v34, %v1272_v35 }
  0xb7   :  { %1058 = vmatprep.subr.bf16.mxu0 %v5898_v5  ;;  %1099 = vmatprep.subr.bf16.mxu1 %v5900_v6  ;;  %v7036_v5 = vcombine.low %v1172_v58, %v1176_v59  ;;  %v7038_v6 = vcombine.high %v1163_v0, %v1167_v1  ;;  %v7041_v7 = vcombine.high %v1164_v2, %v1168_v3  ;;  %v1251_v59 = vld [vmem:[#allocation8 + $0x700] sm:$0xff] }
  0xb8   :  { %10075 = vst [vmem:[#allocation41_spill] sm:$0xff] %v7032_v4  ;;  %10092 = vst [vmem:[#allocation58_spill] sm:$0xff] %v7084_v56  ;;  %v7089_v58 = vcombine.high %v1260_v50, %v1264_v51 }
  0xb9   :  { %10076 = vst [vmem:[#allocation42_spill] sm:$0xff] %v7036_v5  ;;  %10077 = vst [vmem:[#allocation43_spill] sm:$0xff] %v7038_v6 }
  0xba   :  { %1059 = vmatpush2.bf16.msra.mxu0 %v5897_v11  ;;  %1100 = vmatpush2.bf16.msra.mxu1 %v5899_v12  ;;  %10078 = vst [vmem:[#allocation44_spill] sm:$0xff] %v7041_v7  ;;  %v1160_v11 = vld [vmem:[#allocation8 + $0x428] sm:$0xff]  ;;  %v7044_v12 = vcombine.low %v1163_v0, %v1167_v1  ;;  %10094 = vst [vmem:[#allocation60_spill] sm:$0xff] %v7089_v58  ;;  %v1255_v0 = vld [vmem:[#allocation8 + $0x720] sm:$0xff] }
  0xbb   :  { %1060 = vmatprep.subr.bf16.mxu0 %v5890_v13  ;;  %1101 = vmatprep.subr.bf16.mxu1 %v5892_v14  ;;  %v7048_v13 = vcombine.low %v1164_v2, %v1168_v3  ;;  %v7050_v14 = vcombine.high %v1155_v8, %v1159_v9  ;;  %v7053_v15 = vcombine.high %v1156_v10, %v1160_v11  ;;  %v1252_v1 = vld [vmem:[#allocation8 + $0x708] sm:$0xff] }
  0xbc   :  { %10079 = vst [vmem:[#allocation45_spill] sm:$0xff] %v7044_v12  ;;  %v7060_v25 = vcombine.low %v1156_v10, %v1160_v11  ;;  %v1256_v2 = vld [vmem:[#allocation8 + $0x728] sm:$0xff]  ;;  %v1243_v11 = vld [vmem:[#allocation8 + $0x6c0] sm:$0xff] }
  0xbd   :  { %10080 = vst [vmem:[#allocation46_spill] sm:$0xff] %v7048_v13  ;;  %10081 = vst [vmem:[#allocation47_spill] sm:$0xff] %v7050_v14  ;;  %v7101_v10 = vcombine.high %v1252_v1, %v1256_v2  ;;  %v7108_v28 = vcombine.low %v1252_v1, %v1256_v2  ;;  %v7110_v33 = vcombine.high %v1243_v11, %v1247_v16  ;;  %v1227_v2 = vld [vmem:[#allocation8 + $0x640] sm:$0xff] }
  0xbe   :  { %1061 = vmatpush2.bf16.msra.mxu0 %v5889_v19  ;;  %1102 = vmatpush2.bf16.msra.mxu1 %v5891_v20  ;;  %10082 = vst [vmem:[#allocation48_spill] sm:$0xff] %v7053_v15  ;;  %v1280_v19 = vld [vmem:[#allocation8 + $0x7e8] sm:$0xff]  ;;  %v7056_v20 = vcombine.low %v1155_v8, %v1159_v9  ;;  %10084 = vst [vmem:[#allocation50_spill] sm:$0xff] %v7060_v25  ;;  %v7096_v8 = vcombine.low %v1260_v50, %v1264_v51 }
  0xbf   :  { %1923 = vmatprep.subr.bf16.mxu0 %v6965_v21  ;;  %1964 = vmatprep.subr.bf16.mxu1 %v6967_v22  ;;  %v7065_v27 = vcombine.high %v1276_v18, %v1280_v19  ;;  %v7072_v41 = vcombine.low %v1276_v18, %v1280_v19  ;;  %v7098_v9 = vcombine.high %v1251_v59, %v1255_v0  ;;  %v1248_v18 = vld [vmem:[#allocation8 + $0x6e8] sm:$0xff]  ;;  %v1282_v21 = vld [vmem:[#allocation8 + $0x7f8] sm:$0xff] }
  0xc0   :  { %10083 = vst [vmem:[#allocation49_spill] sm:$0xff] %v7056_v20  ;;  %10096 = vst [vmem:[#allocation62_spill] sm:$0xff] %v7096_v8  ;;  %v7104_v19 = vcombine.low %v1251_v59, %v1255_v0  ;;  %v1240_v50 = vld [vmem:[#allocation8 + $0x6a8] sm:$0xff]  ;;  %v7116_v51 = vcombine.low %v1243_v11, %v1247_v16  ;;  %v7120_v59 = vcombine.low %v1244_v17, %v1248_v18 }
  0xc1   :  { %1063 = vmatmul.mubr.bf16.vlgmr.msra.gmra.mxu0 %v6959_v23  ;;  %1104 = vmatmul.mubr.bf16.vlgmr.msra.gmra.mxu1 %v6959_v23  ;;  %v1188_v23 = vld [vmem:[#allocation8 + $0x508] sm:$0xff]  ;;  %10086 = vst [vmem:[#allocation52_spill] sm:$0xff] %v7065_v27  ;;  %10088 = vst [vmem:[#allocation54_spill] sm:$0xff] %v7072_v41 }
  0xc2   :  { %1924 = vmatpush1.bf16.msra.mxu0 %v6969_v29  ;;  %1965 = vmatpush1.bf16.msra.mxu1 %v6972_v30  ;;  %v7005_v48 = vcombine.high %v1188_v23, %v1192_v44  ;;  %v7012_v54 = vcombine.low %v1188_v23, %v1192_v44  ;;  %v7077_v23 = vcombine.high %v1268_v34, %v1272_v35  ;;  %v1259_v44 = vld [vmem:[#allocation8 + $0x740] sm:$0xff]  ;;  %v1278_v29 = vld [vmem:[#allocation8 + $0x7d8] sm:$0xff] }
  0xc3   :  { %1925 = vmatprep.subr.bf16.mxu0 %v6974_v31  ;;  %1966 = vmatprep.subr.bf16.mxu1 %v6977_v32  ;;  %v7086_v57 = vcombine.high %v1259_v44, %v1263_v49  ;;  %v7092_v3 = vcombine.low %v1259_v44, %v1263_v49  ;;  %10097 = vst [vmem:[#allocation63_spill] sm:$0xff] %v7098_v9  ;;  %10098 = vst [vmem:[#allocation64_spill] sm:$0xff] %v7101_v10  ;;  %v1235_v35 = vld [vmem:[#allocation8 + $0x680] sm:$0xff]  ;;  %v1236_v49 = vld [vmem:[#allocation8 + $0x688] sm:$0xff] }
  0xc4   :  { %1955 = vmatprep.mubr.bf16.mxu0 %v9314_v43  ;;  %1996 = vmatprep.mubr.bf16.mxu1 %v9314_v43  ;;  %10066 = vst [vmem:[#allocation32_spill] sm:$0xff] %v7005_v48  ;;  %10068 = vst [vmem:[#allocation34_spill] sm:$0xff] %v7012_v54  ;;  %v7113_v34 = vcombine.high %v1244_v17, %v1248_v18  ;;  %v1239_v44 = vld [vmem:[#allocation8 + $0x6a0] sm:$0xff]  ;;  %v7125_v1 = vcombine.high %v1236_v49, %v1240_v50  ;;  %v1162_v31 = vld [vmem:[#allocation8 + $0x438] sm:$0xff] }
  0xc5   :  { %10090 = vst [vmem:[#allocation56_spill] sm:$0xff] %v7077_v23  ;;  %10093 = vst [vmem:[#allocation59_spill] sm:$0xff] %v7086_v57  ;;  %v7122_v0 = vcombine.high %v1235_v35, %v1239_v44  ;;  %v1231_v43 = vld [vmem:[#allocation8 + $0x660] sm:$0xff]  ;;  %v7128_v11 = vcombine.low %v1235_v35, %v1239_v44  ;;  %v7132_v16 = vcombine.low %v1236_v49, %v1240_v50 }
  0xc6   :  { %1926 = vmatpush1.bf16.msra.mxu0 %v6982_v37  ;;  %1967 = vmatpush1.bf16.msra.mxu1 %v6986_v38  ;;  %10095 = vst [vmem:[#allocation61_spill] sm:$0xff] %v7092_v3  ;;  %10099 = vst [vmem:[#allocation65_spill] sm:$0xff] %v7104_v19  ;;  %v7134_v17 = vcombine.high %v1227_v2, %v1231_v43  ;;  %v7140_v35 = vcombine.low %v1227_v2, %v1231_v43  ;;  %v1158_v37 = vld [vmem:[#allocation8 + $0x418] sm:$0xff] }
  0xc7   :  { %1927 = vmatprep.subr.bf16.mxu0 %v6988_v39  ;;  %1968 = vmatprep.subr.bf16.mxu1 %v6991_v40  ;;  %10100 = vst [vmem:[#allocation66_spill] sm:$0xff] %v7108_v28  ;;  %10101 = vst [vmem:[#allocation67_spill] sm:$0xff] %v7110_v33  ;;  %v1170_v39 = vld [vmem:[#allocation8 + $0x478] sm:$0xff] }
  0xc8   :  { %10102 = vst [vmem:[#allocation68_spill] sm:$0xff] %v7113_v34  ;;  %10103 = vst [vmem:[#allocation69_spill] sm:$0xff] %v7116_v51 }
  0xc9   :  { %10104 = vst [vmem:[#allocation70_spill] sm:$0xff] %v7120_v59  ;;  %10105 = vst [vmem:[#allocation71_spill] sm:$0xff] %v7122_v0 }
  0xca   :  { %1928 = vmatpush1.bf16.msra.mxu0 %v6996_v45  ;;  %1969 = vmatpush1.bf16.msra.mxu1 %v7000_v46  ;;  %10106 = vst [vmem:[#allocation72_spill] sm:$0xff] %v7125_v1  ;;  %10107 = vst [vmem:[#allocation73_spill] sm:$0xff] %v7128_v11  ;;  %v1166_v45 = vld [vmem:[#allocation8 + $0x458] sm:$0xff] }
  0xcb   :  { %1929 = vmatprep.subr.bf16.mxu0 %v7002_v47  ;;  %1970 = vmatprep.subr.bf16.mxu1 %v7005_v48  ;;  %10108 = vst [vmem:[#allocation74_spill] sm:$0xff] %v7132_v16  ;;  %10109 = vst [vmem:[#allocation75_spill] sm:$0xff] %v7134_v17  ;;  %v1178_v47 = vld [vmem:[#allocation8 + $0x4b8] sm:$0xff] }
  0xcc   :  { %10111 = vst [vmem:[#allocation77_spill] sm:$0xff] %v7140_v35 }
  0xce   :  { %1930 = vmatpush1.bf16.msra.mxu0 %v7008_v53  ;;  %1971 = vmatpush1.bf16.msra.mxu1 %v7012_v54  ;;  %v1174_v53 = vld [vmem:[#allocation8 + $0x498] sm:$0xff] }
  0xcf   :  { %1931 = vmatprep.subr.bf16.mxu0 %v7014_v24  ;;  %1972 = vmatprep.subr.bf16.mxu1 %v7017_v55  ;;  %v1186_v24 = vld [vmem:[#allocation8 + $0x4f8] sm:$0xff] }
  0xd2   :  { %1932 = vmatpush1.bf16.msra.mxu0 %v7020_v60  ;;  %1973 = vmatpush1.bf16.msra.mxu1 %v7024_v61  ;;  %v1182_v60 = vld [vmem:[#allocation8 + $0x4d8] sm:$0xff] }
  0xd3   :  { %1933 = vmatprep.subr.bf16.mxu0 %v7026_v62  ;;  %1974 = vmatprep.subr.bf16.mxu1 %v7029_v63  ;;  %v1185_v62 = vld [vmem:[#allocation8 + $0x4f0] sm:$0xff] }
  0xd6   :  { %1934 = vmatpush1.bf16.msra.mxu0 %v7032_v4  ;;  %1975 = vmatpush1.bf16.msra.mxu1 %v7036_v5  ;;  %v1190_v4 = vld [vmem:[#allocation8 + $0x518] sm:$0xff] }
  0xd7   :  { %1935 = vmatprep.subr.bf16.mxu0 %v7038_v6  ;;  %1976 = vmatprep.subr.bf16.mxu1 %v7041_v7  ;;  %v1193_v6 = vld [vmem:[#allocation8 + $0x530] sm:$0xff] }
  0xda   :  { %1936 = vmatpush1.bf16.msra.mxu0 %v7044_v12  ;;  %1977 = vmatpush1.bf16.msra.mxu1 %v7048_v13  ;;  %v1198_v12 = vld [vmem:[#allocation8 + $0x558] sm:$0xff] }
  0xdb   :  { %1937 = vmatprep.subr.bf16.mxu0 %v7050_v14  ;;  %1978 = vmatprep.subr.bf16.mxu1 %v7053_v15  ;;  %v10123_v14 = vmov 0  }
  0xde   :  { %1938 = vmatpush1.bf16.msra.mxu0 %v7056_v20  ;;  %1979 = vmatpush1.bf16.msra.mxu1 %v7060_v25  ;;  %v1210_v20 = vld [vmem:[#allocation8 + $0x5b8] sm:$0xff] }
  0xdf   :  { %1939 = vmatprep.subr.bf16.mxu0 %v7062_v26  ;;  %1980 = vmatprep.subr.bf16.mxu1 %v7065_v27  ;;  %v1206_v26 = vld [vmem:[#allocation8 + $0x598] sm:$0xff] }
  0xe2   :  { %1940 = vmatpush2.bf16.msra.mxu0 %v7068_v36  ;;  %1981 = vmatpush2.bf16.msra.mxu1 %v7072_v41  ;;  %v1218_v36 = vld [vmem:[#allocation8 + $0x5f8] sm:$0xff] }
  0xe3   :  { %1941 = vmatprep.subr.bf16.mxu0 %v7074_v42  ;;  %1982 = vmatprep.subr.bf16.mxu1 %v7077_v23  ;;  %v1214_v42 = vld [vmem:[#allocation8 + $0x5d8] sm:$0xff] }
  0xe4   :  { %v7161_v2 = vcombine.high %v1214_v42, %v1218_v36 }
  0xe6   :  { %1942 = vmatpush2.bf16.msra.mxu0 %v7080_v52  ;;  %1983 = vmatpush2.bf16.msra.mxu1 %v7084_v56  ;;  %v1224_v52 = vld [vmem:[#allocation8 + $0x628] sm:$0xff]  ;;  %10118 = vst [vmem:[#allocation84_spill] sm:$0xff] %v7161_v2 }
  0xe7   :  { %1943 = vmatprep.subr.bf16.mxu0 %v7086_v57  ;;  %1984 = vmatprep.subr.bf16.mxu1 %v7089_v58  ;;  %v1220_v57 = vld [vmem:[#allocation8 + $0x608] sm:$0xff] }
  0xe8   :  { %v7149_v50 = vcombine.high %v1220_v57, %v1224_v52 }
  0xea   :  { %1944 = vmatpush2.bf16.msra.mxu0 %v7092_v3  ;;  %1985 = vmatpush2.bf16.msra.mxu1 %v7096_v8  ;;  %v1232_v3 = vld [vmem:[#allocation8 + $0x668] sm:$0xff]  ;;  %10114 = vst [vmem:[#allocation80_spill] sm:$0xff] %v7149_v50 }
  0xeb   :  { %1945 = vmatprep.subr.bf16.mxu0 %v7098_v9  ;;  %1986 = vmatprep.subr.bf16.mxu1 %v7101_v10  ;;  %v1228_v9 = vld [vmem:[#allocation8 + $0x648] sm:$0xff] }
  0xec   :  { %v7137_v18 = vcombine.high %v1228_v9, %v1232_v3  ;;  %v7144_v44 = vcombine.low %v1228_v9, %v1232_v3  ;;  %v7156_v3 = vcombine.low %v1220_v57, %v1224_v52  ;;  %v7168_v52 = vcombine.low %v1214_v42, %v1218_v36 }
  0xed   :  { %v7182_v36 = vcombine.low %v1206_v26, %v1210_v20 }
  0xee   :  { %1946 = vmatpush2.bf16.msra.mxu0 %v7104_v19  ;;  %1987 = vmatpush2.bf16.msra.mxu1 %v7108_v28  ;;  %10110 = vst [vmem:[#allocation76_spill] sm:$0xff] %v7137_v18  ;;  %v1223_v19 = vld [vmem:[#allocation8 + $0x620] sm:$0xff]  ;;  %10112 = vst [vmem:[#allocation78_spill] sm:$0xff] %v7144_v44 }
  0xef   :  { %1947 = vmatprep.subr.bf16.mxu0 %v7110_v33  ;;  %1988 = vmatprep.subr.bf16.mxu1 %v7113_v34  ;;  %v1219_v33 = vld [vmem:[#allocation8 + $0x600] sm:$0xff]  ;;  %10116 = vst [vmem:[#allocation82_spill] sm:$0xff] %v7156_v3  ;;  %10120 = vst [vmem:[#allocation86_spill] sm:$0xff] %v7168_v52 }
  0xf0   :  { %v7146_v49 = vcombine.high %v1219_v33, %v1223_v19  ;;  %v7152_v43 = vcombine.low %v1219_v33, %v1223_v19  ;;  %v7173_v33 = vcombine.high %v1206_v26, %v1210_v20  ;;  %10125 = vst [vmem:[#allocation90_spill] sm:$0xff] %v7182_v36 }
  0xf2   :  { %1948 = vmatpush2.bf16.msra.mxu0 %v7116_v51  ;;  %1989 = vmatpush2.bf16.msra.mxu1 %v7120_v59  ;;  %10113 = vst [vmem:[#allocation79_spill] sm:$0xff] %v7146_v49  ;;  %v1217_v51 = vld [vmem:[#allocation8 + $0x5f0] sm:$0xff]  ;;  %10115 = vst [vmem:[#allocation81_spill] sm:$0xff] %v7152_v43 }
  0xf3   :  { %1949 = vmatprep.subr.bf16.mxu0 %v7122_v0  ;;  %1990 = vmatprep.subr.bf16.mxu1 %v7125_v1  ;;  %v1213_v0 = vld [vmem:[#allocation8 + $0x5d0] sm:$0xff]  ;;  %10122 = vst [vmem:[#allocation88_spill] sm:$0xff] %v7173_v33 }
  0xf4   :  { %v7158_v9 = vcombine.high %v1213_v0, %v1217_v51  ;;  %v7164_v19 = vcombine.low %v1213_v0, %v1217_v51 }
  0xf6   :  { %1950 = vmatpush2.bf16.msra.mxu0 %v7128_v11  ;;  %1991 = vmatpush2.bf16.msra.mxu1 %v7132_v16  ;;  %10117 = vst [vmem:[#allocation83_spill] sm:$0xff] %v7158_v9  ;;  %v1209_v11 = vld [vmem:[#allocation8 + $0x5b0] sm:$0xff]  ;;  %10119 = vst [vmem:[#allocation85_spill] sm:$0xff] %v7164_v19 }
  0xf7   :  { %1951 = vmatprep.subr.bf16.mxu0 %v7134_v17  ;;  %1992 = vmatprep.subr.bf16.mxu1 %v7137_v18  ;;  %v1205_v17 = vld [vmem:[#allocation8 + $0x590] sm:$0xff] }
  0xf8   :  { %v7170_v57 = vcombine.high %v1205_v17, %v1209_v11  ;;  %v7178_v51 = vcombine.low %v1205_v17, %v1209_v11 }
  0xfa   :  { %1952 = vmatpush2.bf16.msra.mxu0 %v7140_v35  ;;  %1993 = vmatpush2.bf16.msra.mxu1 %v7144_v44  ;;  %10121 = vst [vmem:[#allocation87_spill] sm:$0xff] %v7170_v57  ;;  %v1201_v35 = vld [vmem:[#allocation8 + $0x570] sm:$0xff]  ;;  %10124 = vst [vmem:[#allocation89_spill] sm:$0xff] %v7178_v51 }
  0xfb   :  { %1953 = vmatprep.subr.bf16.mxu0 %v7146_v49  ;;  %1994 = vmatprep.subr.bf16.mxu1 %v7149_v50  ;;  %v1197_v49 = vld [vmem:[#allocation8 + $0x550] sm:$0xff] }
  0xfc   :  { %v7184_v42 = vcombine.high %v1197_v49, %v1201_v35  ;;  %v7192_v11 = vcombine.low %v1197_v49, %v1201_v35 }
  0xfe   :  { %1954 = vmatpush2.bf16.msra.mxu0 %v7152_v43  ;;  %1995 = vmatpush2.bf16.msra.mxu1 %v7156_v3  ;;  %v1202_v43 = vld [vmem:[#allocation8 + $0x578] sm:$0xff]  ;;  %10126 = vst [vmem:[#allocation91_spill] sm:$0xff] %v7184_v42  ;;  %10128 = vst [vmem:[#allocation93_spill] sm:$0xff] %v7192_v11 }
  0xff   :  { %2005 = vmatprep.subr.bf16.mxu0 %v7158_v9  ;;  %2046 = vmatprep.subr.bf16.mxu1 %v7161_v2  ;;  %v7187_v0 = vcombine.high %v1198_v12, %v1202_v43  ;;  %v1189_v9 = vld [vmem:[#allocation8 + $0x510] sm:$0xff]  ;;  %v7196_v20 = vcombine.low %v1198_v12, %v1202_v43  ;;  %v7213_v43 = vcombine.high %v1182_v60, %v1186_v24 }
 0x100   :  { %v7198_v26 = vcombine.high %v1189_v9, %v1193_v6  ;;  %v7204_v35 = vcombine.low %v1189_v9, %v1193_v6  ;;  %v2384_v2 = vld [vmem:[#allocation8 + $0xf70] sm:$0xff] }
 0x101   :  { %1956 = vmatmul.mubr.bf16.vlgmr.msra.gmra.mxu0 %v10123_v14  ;;  %1997 = vmatmul.mubr.bf16.vlgmr.msra.gmra.mxu1 %v10123_v14  ;;  %10127 = vst [vmem:[#allocation92_spill] sm:$0xff] %v7187_v0  ;;  %10129 = vst [vmem:[#allocation94_spill] sm:$0xff] %v7196_v20 }
 0x102   :  { %2006 = vmatpush1.bf16.msra.mxu0 %v7164_v19  ;;  %2047 = vmatpush1.bf16.msra.mxu1 %v7168_v52  ;;  %v1194_v19 = vld [vmem:[#allocation8 + $0x538] sm:$0xff]  ;;  %10130 = vst [vmem:[#allocation95_spill] sm:$0xff] %v7198_v26  ;;  %10132 = vst [vmem:[#allocation97_spill] sm:$0xff] %v7204_v35 }
 0x103   :  { %2007 = vmatprep.subr.bf16.mxu0 %v7170_v57  ;;  %2048 = vmatprep.subr.bf16.mxu1 %v7173_v33  ;;  %v7201_v17 = vcombine.high %v1190_v4, %v1194_v19  ;;  %v1181_v57 = vld [vmem:[#allocation8 + $0x4d0] sm:$0xff]  ;;  %v7208_v12 = vcombine.low %v1190_v4, %v1194_v19  ;;  %10135 = vst [vmem:[#allocation100_spill] sm:$0xff] %v7213_v43 }
 0x104   :  { %2037 = vmatprep.mubr.bf16.mxu0 %v10123_v14  ;;  %2078 = vmatprep.mubr.bf16.mxu1 %v10123_v14  ;;  %v7210_v49 = vcombine.high %v1181_v57, %v1185_v62  ;;  %v7216_v6 = vcombine.low %v1181_v57, %v1185_v62  ;;  %v7220_v4 = vcombine.low %v1182_v60, %v1186_v24 }
 0x105   :  { %10131 = vst [vmem:[#allocation96_spill] sm:$0xff] %v7201_v17  ;;  %10133 = vst [vmem:[#allocation98_spill] sm:$0xff] %v7208_v12  ;;  %v7225_v19 = vcombine.high %v1174_v53, %v1178_v47  ;;  %v7232_v24 = vcombine.low %v1174_v53, %v1178_v47  ;;  %v7237_v57 = vcombine.high %v1166_v45, %v1170_v39 }
 0x106   :  { %2008 = vmatpush1.bf16.msra.mxu0 %v7178_v51  ;;  %2049 = vmatpush1.bf16.msra.mxu1 %v7182_v36  ;;  %10134 = vst [vmem:[#allocation99_spill] sm:$0xff] %v7210_v49  ;;  %v1177_v51 = vld [vmem:[#allocation8 + $0x4b0] sm:$0xff]  ;;  %10136 = vst [vmem:[#allocation101_spill] sm:$0xff] %v7216_v6  ;;  %v7244_v47 = vcombine.low %v1166_v45, %v1170_v39  ;;  %v7256_v39 = vcombine.low %v1158_v37, %v1162_v31 }
 0x107   :  { %2009 = vmatprep.subr.bf16.mxu0 %v7184_v42  ;;  %2050 = vmatprep.subr.bf16.mxu1 %v7187_v0  ;;  %v1173_v42 = vld [vmem:[#allocation8 + $0x490] sm:$0xff]  ;;  %10137 = vst [vmem:[#allocation102_spill] sm:$0xff] %v7220_v4  ;;  %10139 = vst [vmem:[#allocation104_spill] sm:$0xff] %v7225_v19  ;;  %v2303_v0 = vld [vmem:[#allocation8 + $0xce8] sm:$0xff] }
 0x108   :  { %v7222_v9 = vcombine.high %v1173_v42, %v1177_v51  ;;  %v7228_v62 = vcombine.low %v1173_v42, %v1177_v51  ;;  %10141 = vst [vmem:[#allocation106_spill] sm:$0xff] %v7232_v24  ;;  %10143 = vst [vmem:[#allocation108_spill] sm:$0xff] %v7237_v57  ;;  %v7249_v42 = vcombine.high %v1158_v37, %v1162_v31  ;;  %v2304_v36 = vld [vmem:[#allocation8 + $0xcf0] sm:$0xff] }
 0x109   :  { %10145 = vst [vmem:[#allocation110_spill] sm:$0xff] %v7244_v47  ;;  %10149 = vst [vmem:[#allocation114_spill] sm:$0xff] %v7256_v39  ;;  %v7268_v31 = vcombine.low %v1278_v29, %v1282_v21 }
 0x10a   :  { %2010 = vmatpush1.bf16.msra.mxu0 %v7192_v11  ;;  %2051 = vmatpush1.bf16.msra.mxu1 %v7196_v20  ;;  %10138 = vst [vmem:[#allocation103_spill] sm:$0xff] %v7222_v9  ;;  %v1169_v11 = vld [vmem:[#allocation8 + $0x470] sm:$0xff]  ;;  %10140 = vst [vmem:[#allocation105_spill] sm:$0xff] %v7228_v62  ;;  %v2270_v20 = vld [vmem:[#allocation8 + $0xbe0] sm:$0xff] }
 0x10b   :  { %2011 = vmatprep.subr.bf16.mxu0 %v7198_v26  ;;  %2052 = vmatprep.subr.bf16.mxu1 %v7201_v17  ;;  %v1165_v26 = vld [vmem:[#allocation8 + $0x450] sm:$0xff]  ;;  %10147 = vst [vmem:[#allocation112_spill] sm:$0xff] %v7249_v42  ;;  %10153 = vst [vmem:[#allocation118_spill] sm:$0xff] %v7268_v31  ;;  %v2266_v17 = vld [vmem:[#allocation8 + $0xbc0] sm:$0xff] }
 0x10c   :  { %v7234_v60 = vcombine.high %v1165_v26, %v1169_v11  ;;  %v7240_v51 = vcombine.low %v1165_v26, %v1169_v11  ;;  %v7261_v26 = vcombine.high %v1278_v29, %v1282_v21 }
 0x10e   :  { %2012 = vmatpush1.bf16.msra.mxu0 %v7204_v35  ;;  %2053 = vmatpush1.bf16.msra.mxu1 %v7208_v12  ;;  %10142 = vst [vmem:[#allocation107_spill] sm:$0xff] %v7234_v60  ;;  %v1161_v35 = vld [vmem:[#allocation8 + $0x430] sm:$0xff]  ;;  %10144 = vst [vmem:[#allocation109_spill] sm:$0xff] %v7240_v51 }
 0x10f   :  { %2013 = vmatprep.subr.bf16.mxu0 %v7210_v49  ;;  %2054 = vmatprep.subr.bf16.mxu1 %v7213_v43  ;;  %v1157_v49 = vld [vmem:[#allocation8 + $0x410] sm:$0xff]  ;;  %10151 = vst [vmem:[#allocation116_spill] sm:$0xff] %v7261_v26  ;;  %v2311_v43 = vld [vmem:[#allocation8 + $0xd28] sm:$0xff] }
 0x110   :  { %v7246_v53 = vcombine.high %v1157_v49, %v1161_v35  ;;  %v7252_v11 = vcombine.low %v1157_v49, %v1161_v35 }
 0x112   :  { %2014 = vmatpush1.bf16.msra.mxu0 %v7216_v6  ;;  %2055 = vmatpush1.bf16.msra.mxu1 %v7220_v4  ;;  %10146 = vst [vmem:[#allocation111_spill] sm:$0xff] %v7246_v53  ;;  %v1281_v6 = vld [vmem:[#allocation8 + $0x7f0] sm:$0xff]  ;;  %10148 = vst [vmem:[#allocation113_spill] sm:$0xff] %v7252_v11  ;;  %v2150_v4 = vld [vmem:[#allocation8 + $0x820] sm:$0xff] }
 0x113   :  { %2015 = vmatprep.subr.bf16.mxu0 %v7222_v9  ;;  %2056 = vmatprep.subr.bf16.mxu1 %v7225_v19  ;;  %v1277_v9 = vld [vmem:[#allocation8 + $0x7d0] sm:$0xff]  ;;  %v2146_v19 = vld [vmem:[#allocation8 + $0x800] sm:$0xff] }
 0x114   :  { %v7258_v45 = vcombine.high %v1277_v9, %v1281_v6  ;;  %v7264_v35 = vcombine.low %v1277_v9, %v1281_v6 }
 0x116   :  { %2016 = vmatpush1.bf16.msra.mxu0 %v7228_v62  ;;  %2057 = vmatpush1.bf16.msra.mxu1 %v7232_v24  ;;  %10150 = vst [vmem:[#allocation115_spill] sm:$0xff] %v7258_v45  ;;  %v1273_v62 = vld [vmem:[#allocation8 + $0x7b0] sm:$0xff]  ;;  %v1274_v24 = vld [vmem:[#allocation8 + $0x7b8] sm:$0xff]  ;;  %10152 = vst [vmem:[#allocation117_spill] sm:$0xff] %v7264_v35 }
 0x117   :  { %2017 = vmatprep.subr.bf16.mxu0 %v7234_v60  ;;  %2058 = vmatprep.subr.bf16.mxu1 %v7237_v57  ;;  %v1269_v60 = vld [vmem:[#allocation8 + $0x790] sm:$0xff]  ;;  %v1270_v57 = vld [vmem:[#allocation8 + $0x798] sm:$0xff] }
 0x118   :  { %v7270_v37 = vcombine.high %v1269_v60, %v1273_v62  ;;  %v7273_v49 = vcombine.high %v1270_v57, %v1274_v24  ;;  %v7276_v6 = vcombine.low %v1269_v60, %v1273_v62  ;;  %v7280_v21 = vcombine.low %v1270_v57, %v1274_v24 }
 0x11a   :  { %2018 = vmatpush1.bf16.msra.mxu0 %v7240_v51  ;;  %2059 = vmatpush1.bf16.msra.mxu1 %v7244_v47  ;;  %10154 = vst [vmem:[#allocation119_spill] sm:$0xff] %v7270_v37  ;;  %10155 = vst [vmem:[#allocation120_spill] sm:$0xff] %v7273_v49  ;;  %v1265_v51 = vld [vmem:[#allocation8 + $0x770] sm:$0xff]  ;;  %v1266_v47 = vld [vmem:[#allocation8 + $0x778] sm:$0xff] }
 0x11b   :  { %2019 = vmatprep.subr.bf16.mxu0 %v7246_v53  ;;  %2060 = vmatprep.subr.bf16.mxu1 %v7249_v42  ;;  %v1261_v53 = vld [vmem:[#allocation8 + $0x750] sm:$0xff]  ;;  %v1262_v42 = vld [vmem:[#allocation8 + $0x758] sm:$0xff]  ;;  %10156 = vst [vmem:[#allocation121_spill] sm:$0xff] %v7276_v6  ;;  %10157 = vst [vmem:[#allocation122_spill] sm:$0xff] %v7280_v21 }
 0x11c   :  { %v7282_v29 = vcombine.high %v1261_v53, %v1265_v51  ;;  %v7285_v9 = vcombine.high %v1262_v42, %v1266_v47  ;;  %v7288_v62 = vcombine.low %v1261_v53, %v1265_v51  ;;  %v7292_v24 = vcombine.low %v1262_v42, %v1266_v47 }
 0x11e   :  { %2020 = vmatpush1.bf16.msra.mxu0 %v7252_v11  ;;  %2061 = vmatpush1.bf16.msra.mxu1 %v7256_v39  ;;  %10158 = vst [vmem:[#allocation123_spill] sm:$0xff] %v7282_v29  ;;  %10159 = vst [vmem:[#allocation124_spill] sm:$0xff] %v7285_v9  ;;  %v1257_v11 = vld [vmem:[#allocation8 + $0x730] sm:$0xff]  ;;  %v1258_v39 = vld [vmem:[#allocation8 + $0x738] sm:$0xff] }
 0x11f   :  { %2021 = vmatprep.subr.bf16.mxu0 %v7258_v45  ;;  %2062 = vmatprep.subr.bf16.mxu1 %v7261_v26  ;;  %v1253_v45 = vld [vmem:[#allocation8 + $0x710] sm:$0xff]  ;;  %v1254_v26 = vld [vmem:[#allocation8 + $0x718] sm:$0xff]  ;;  %10160 = vst [vmem:[#allocation125_spill] sm:$0xff] %v7288_v62  ;;  %10161 = vst [vmem:[#allocation126_spill] sm:$0xff] %v7292_v24 }
 0x120   :  { %v7294_v60 = vcombine.high %v1253_v45, %v1257_v11  ;;  %v7297_v57 = vcombine.high %v1254_v26, %v1258_v39  ;;  %v7300_v51 = vcombine.low %v1253_v45, %v1257_v11  ;;  %v7304_v47 = vcombine.low %v1254_v26, %v1258_v39 }
 0x122   :  { %2022 = vmatpush2.bf16.msra.mxu0 %v7264_v35  ;;  %2063 = vmatpush2.bf16.msra.mxu1 %v7268_v31  ;;  %10162 = vst [vmem:[#allocation127_spill] sm:$0xff] %v7294_v60  ;;  %10163 = vst [vmem:[#allocation128_spill] sm:$0xff] %v7297_v57  ;;  %v1249_v35 = vld [vmem:[#allocation8 + $0x6f0] sm:$0xff]  ;;  %v1250_v31 = vld [vmem:[#allocation8 + $0x6f8] sm:$0xff] }
 0x123   :  { %2023 = vmatprep.subr.bf16.mxu0 %v7270_v37  ;;  %2064 = vmatprep.subr.bf16.mxu1 %v7273_v49  ;;  %v1245_v37 = vld [vmem:[#allocation8 + $0x6d0] sm:$0xff]  ;;  %v1246_v49 = vld [vmem:[#allocation8 + $0x6d8] sm:$0xff]  ;;  %10164 = vst [vmem:[#allocation129_spill] sm:$0xff] %v7300_v51  ;;  %10165 = vst [vmem:[#allocation130_spill] sm:$0xff] %v7304_v47 }
 0x124   :  { %v7306_v53 = vcombine.high %v1245_v37, %v1249_v35  ;;  %v7309_v42 = vcombine.high %v1246_v49, %v1250_v31  ;;  %v7312_v11 = vcombine.low %v1245_v37, %v1249_v35  ;;  %v7316_v39 = vcombine.low %v1246_v49, %v1250_v31 }
 0x126   :  { %2024 = vmatpush2.bf16.msra.mxu0 %v7276_v6  ;;  %2065 = vmatpush2.bf16.msra.mxu1 %v7280_v21  ;;  %10166 = vst [vmem:[#allocation131_spill] sm:$0xff] %v7306_v53  ;;  %10167 = vst [vmem:[#allocation132_spill] sm:$0xff] %v7309_v42  ;;  %v1241_v6 = vld [vmem:[#allocation8 + $0x6b0] sm:$0xff]  ;;  %v1242_v21 = vld [vmem:[#allocation8 + $0x6b8] sm:$0xff] }
 0x127   :  { %2025 = vmatprep.subr.bf16.mxu0 %v7282_v29  ;;  %2066 = vmatprep.subr.bf16.mxu1 %v7285_v9  ;;  %v1237_v29 = vld [vmem:[#allocation8 + $0x690] sm:$0xff]  ;;  %v1238_v9 = vld [vmem:[#allocation8 + $0x698] sm:$0xff]  ;;  %10168 = vst [vmem:[#allocation133_spill] sm:$0xff] %v7312_v11  ;;  %10169 = vst [vmem:[#allocation134_spill] sm:$0xff] %v7316_v39 }
 0x128   :  { %v7318_v45 = vcombine.high %v1237_v29, %v1241_v6  ;;  %v7321_v26 = vcombine.high %v1238_v9, %v1242_v21  ;;  %v7324_v35 = vcombine.low %v1237_v29, %v1241_v6  ;;  %v7328_v31 = vcombine.low %v1238_v9, %v1242_v21 }
 0x12a   :  { %2026 = vmatpush2.bf16.msra.mxu0 %v7288_v62  ;;  %2067 = vmatpush2.bf16.msra.mxu1 %v7292_v24  ;;  %10170 = vst [vmem:[#allocation135_spill] sm:$0xff] %v7318_v45  ;;  %10171 = vst [vmem:[#allocation136_spill] sm:$0xff] %v7321_v26  ;;  %v1233_v62 = vld [vmem:[#allocation8 + $0x670] sm:$0xff]  ;;  %v1234_v24 = vld [vmem:[#allocation8 + $0x678] sm:$0xff] }
 0x12b   :  { %2027 = vmatprep.subr.bf16.mxu0 %v7294_v60  ;;  %2068 = vmatprep.subr.bf16.mxu1 %v7297_v57  ;;  %v1229_v60 = vld [vmem:[#allocation8 + $0x650] sm:$0xff]  ;;  %v1230_v57 = vld [vmem:[#allocation8 + $0x658] sm:$0xff]  ;;  %10172 = vst [vmem:[#allocation137_spill] sm:$0xff] %v7324_v35  ;;  %10173 = vst [vmem:[#allocation138_spill] sm:$0xff] %v7328_v31 }
 0x12c   :  { %v7330_v37 = vcombine.high %v1229_v60, %v1233_v62  ;;  %v7333_v49 = vcombine.high %v1230_v57, %v1234_v24  ;;  %v7336_v6 = vcombine.low %v1229_v60, %v1233_v62  ;;  %v7340_v21 = vcombine.low %v1230_v57, %v1234_v24  ;;  %v2322_v60 = vld [vmem:[#allocation8 + $0xd80] sm:$0xff] }
 0x12d   :  { %v2326_v57 = vld [vmem:[#allocation8 + $0xda0] sm:$0xff] }
 0x12e   :  { %2028 = vmatpush2.bf16.msra.mxu0 %v7300_v51  ;;  %2069 = vmatpush2.bf16.msra.mxu1 %v7304_v47  ;;  %10174 = vst [vmem:[#allocation139_spill] sm:$0xff] %v7330_v37  ;;  %10175 = vst [vmem:[#allocation140_spill] sm:$0xff] %v7333_v49  ;;  %v1225_v51 = vld [vmem:[#allocation8 + $0x630] sm:$0xff]  ;;  %v1226_v47 = vld [vmem:[#allocation8 + $0x638] sm:$0xff] }
 0x12f   :  { %2029 = vmatprep.subr.bf16.mxu0 %v7306_v53  ;;  %2070 = vmatprep.subr.bf16.mxu1 %v7309_v42  ;;  %v1221_v53 = vld [vmem:[#allocation8 + $0x610] sm:$0xff]  ;;  %v1222_v42 = vld [vmem:[#allocation8 + $0x618] sm:$0xff]  ;;  %10176 = vst [vmem:[#allocation141_spill] sm:$0xff] %v7336_v6  ;;  %10177 = vst [vmem:[#allocation142_spill] sm:$0xff] %v7340_v21 }
 0x130   :  { %v7342_v29 = vcombine.high %v1221_v53, %v1225_v51  ;;  %v7345_v9 = vcombine.high %v1222_v42, %v1226_v47  ;;  %v7352_v62 = vcombine.low %v1222_v42, %v1226_v47  ;;  %v2314_v47 = vld [vmem:[#allocation8 + $0xd40] sm:$0xff] }
 0x131   :  { %v2318_v42 = vld [vmem:[#allocation8 + $0xd60] sm:$0xff] }
 0x132   :  { %2030 = vmatpush2.bf16.msra.mxu0 %v7312_v11  ;;  %2071 = vmatpush2.bf16.msra.mxu1 %v7316_v39  ;;  %10178 = vst [vmem:[#allocation143_spill] sm:$0xff] %v7342_v29  ;;  %10179 = vst [vmem:[#allocation144_spill] sm:$0xff] %v7345_v9  ;;  %v2334_v11 = vld [vmem:[#allocation8 + $0xde0] sm:$0xff] }
 0x133   :  { %2031 = vmatprep.subr.bf16.mxu0 %v7318_v45  ;;  %2072 = vmatprep.subr.bf16.mxu1 %v7321_v26  ;;  %v2330_v45 = vld [vmem:[#allocation8 + $0xdc0] sm:$0xff]  ;;  %v7348_v26 = vcombine.low %v1221_v53, %v1225_v51  ;;  %10181 = vst [vmem:[#allocation146_spill] sm:$0xff] %v7352_v62  ;;  %v7362_v51 = vcombine.high %v2322_v60, %v2326_v57 }
 0x134   :  { %v7355_v24 = vcombine.high %v2330_v45, %v2334_v11 }
 0x135   :  { %10180 = vst [vmem:[#allocation145_spill] sm:$0xff] %v7348_v26  ;;  %10184 = vst [vmem:[#allocation149_spill] sm:$0xff] %v7362_v51 }
 0x136   :  { %2032 = vmatpush2.bf16.msra.mxu0 %v7324_v35  ;;  %2073 = vmatpush2.bf16.msra.mxu1 %v7328_v31  ;;  %10182 = vst [vmem:[#allocation147_spill] sm:$0xff] %v7355_v24  ;;  %v7379_v35 = vcombine.high %v2314_v47, %v2318_v42  ;;  %v2358_v31 = vld [vmem:[#allocation8 + $0xea0] sm:$0xff] }
 0x137   :  { %2033 = vmatprep.subr.bf16.mxu0 %v7330_v37  ;;  %2074 = vmatprep.subr.bf16.mxu1 %v7333_v49  ;;  %v7359_v37 = vcombine.low %v2330_v45, %v2334_v11  ;;  %v7373_v11 = vcombine.low %v2322_v60, %v2326_v57  ;;  %v9484_v45 = vmov 0.0|0.0   ;;  %v2302_v49 = vld [vmem:[#allocation8 + $0xce0] sm:$0xff] }
 0x138   :  { %10186 = vst [vmem:[#allocation151_spill] sm:$0xff] %v7379_v35 }
 0x139   :  { %10183 = vst [vmem:[#allocation148_spill] sm:$0xff] %v7359_v37  ;;  %10185 = vst [vmem:[#allocation150_spill] sm:$0xff] %v7373_v11 }
 0x13a   :  { %2034 = vmatpush2.bf16.msra.mxu0 %v7336_v6  ;;  %2075 = vmatpush2.bf16.msra.mxu1 %v7340_v21 }
 0x13b   :  { %2035 = vmatprep.subr.bf16.mxu0 %v7342_v29  ;;  %2076 = vmatprep.subr.bf16.mxu1 %v7345_v9  ;;  %v2310_v9 = vld [vmem:[#allocation8 + $0xd20] sm:$0xff] }
 0x13e   :  { %2036 = vmatpush2.bf16.msra.mxu0 %v7348_v26  ;;  %2077 = vmatpush2.bf16.msra.mxu1 %v7352_v62  ;;  %v2306_v62 = vld [vmem:[#allocation8 + $0xd00] sm:$0xff] }
 0x13f   :  { %3723 = vmatprep.subr.bf16.mxu1 %v7355_v24  ;;  %v7385_v57 = vcombine.high %v2306_v62, %v2310_v9 }
 0x141   :  { %v7364_v53 = vpop.f32.mrf.mxu0  ;;  %2038 = vmatmul.mubr.bf16.vlgmr.msra.gmra.mxu0 %v10123_v14  ;;  %v7367_v29 = vpop.f32.mrf.mxu1  ;;  %2079 = vmatmul.mubr.bf16.vlgmr.msra.gmra.mxu1 %v10123_v14  ;;  %10188 = vst [vmem:[#allocation153_spill] sm:$0xff] %v7385_v57 }
 0x142   :  { %3724 = vmatpush1.bf16.msra.mxu1 %v7359_v37  ;;  %3755 = vmatprep.mubr.bf16.mxu1 %v9484_v45  ;;  %v7382_v37 = vcombine.low %v2314_v47, %v2318_v42  ;;  %v2298_v45 = vld [vmem:[#allocation8 + $0xcc0] sm:$0xff] }
 0x143   :  { %v7371_v26 = vpop.f32.mrf.mxu0  ;;  %v7376_v6 = vpop.f32.mrf.mxu1  ;;  %3725 = vmatprep.subr.bf16.mxu1 %v7362_v51  ;;  %v7388_v51 = vcombine.low %v2306_v62, %v2310_v9  ;;  %v7394_v47 = vcombine.low %v2298_v45, %v2302_v49 }
 0x144   :  { %10187 = vst [vmem:[#allocation152_spill] sm:$0xff] %v7382_v37 }
 0x145   :  { %v986_v24 = vpop.f32.mrf.mxu0  ;;  %v1027_v21 = vpop.f32.mrf.mxu1  ;;  %10189 = vst [vmem:[#allocation154_spill] sm:$0xff] %v7388_v51  ;;  %10191 = vst [vmem:[#allocation156_spill] sm:$0xff] %v7394_v47 }
 0x146   :  { %3726 = vmatpush1.bf16.msra.mxu1 %v7373_v11  ;;  %v7391_v24 = vcombine.high %v2298_v45, %v2302_v49  ;;  %v2290_v21 = vld [vmem:[#allocation8 + $0xc80] sm:$0xff] }
 0x147   :  { %v987_v14 = vpop.f32.mrf.mxu0  ;;  %v1028_v60 = vpop.f32.mrf.mxu1  ;;  %3727 = vmatprep.subr.bf16.mxu1 %v7379_v35  ;;  %v2294_v11 = vld [vmem:[#allocation8 + $0xca0] sm:$0xff] }
 0x148   :  { %10190 = vst [vmem:[#allocation155_spill] sm:$0xff] %v7391_v24  ;;  %v7397_v42 = vcombine.high %v2290_v21, %v2294_v11  ;;  %v2282_v14 = vld [vmem:[#allocation8 + $0xc40] sm:$0xff]  ;;  %v7400_v9 = vcombine.low %v2290_v21, %v2294_v11 }
 0x149   :  { %v2286_v60 = vld [vmem:[#allocation8 + $0xc60] sm:$0xff] }
 0x14a   :  { %3728 = vmatpush1.bf16.msra.mxu1 %v7382_v37  ;;  %10192 = vst [vmem:[#allocation157_spill] sm:$0xff] %v7397_v42  ;;  %10193 = vst [vmem:[#allocation158_spill] sm:$0xff] %v7400_v9  ;;  %v7403_v62 = vcombine.high %v2282_v14, %v2286_v60  ;;  %v2278_v37 = vld [vmem:[#allocation8 + $0xc20] sm:$0xff]  ;;  %v7406_v49 = vcombine.low %v2282_v14, %v2286_v60 }
 0x14b   :  { %3729 = vmatprep.subr.bf16.mxu1 %v7385_v57  ;;  %v2274_v57 = vld [vmem:[#allocation8 + $0xc00] sm:$0xff] }
 0x14c   :  { %10194 = vst [vmem:[#allocation159_spill] sm:$0xff] %v7403_v62  ;;  %10195 = vst [vmem:[#allocation160_spill] sm:$0xff] %v7406_v49  ;;  %v7409_v45 = vcombine.high %v2274_v57, %v2278_v37  ;;  %v7412_v11 = vcombine.low %v2274_v57, %v2278_v37  ;;  %v2362_v35 = vld [vmem:[#allocation8 + $0xec0] sm:$0xff] }
 0x14e   :  { %3730 = vmatpush1.bf16.msra.mxu1 %v7388_v51  ;;  %10196 = vst [vmem:[#allocation161_spill] sm:$0xff] %v7409_v45  ;;  %v2398_v51 = vld [vmem:[#allocation8 + $0xfe0] sm:$0xff]  ;;  %10197 = vst [vmem:[#allocation162_spill] sm:$0xff] %v7412_v11 }
 0x14f   :  { %3731 = vmatprep.subr.bf16.mxu1 %v7391_v24  ;;  %v2394_v24 = vld [vmem:[#allocation8 + $0xfc0] sm:$0xff] }
 0x150   :  { %v7415_v21 = vcombine.high %v2394_v24, %v2398_v51  ;;  %v7418_v14 = vcombine.low %v2394_v24, %v2398_v51 }
 0x152   :  { %3732 = vmatpush1.bf16.msra.mxu1 %v7394_v47  ;;  %10198 = vst [vmem:[#allocation163_spill] sm:$0xff] %v7415_v21  ;;  %v2390_v47 = vld [vmem:[#allocation8 + $0xfa0] sm:$0xff]  ;;  %10199 = vst [vmem:[#allocation164_spill] sm:$0xff] %v7418_v14 }
 0x153   :  { %3733 = vmatprep.subr.bf16.mxu1 %v7397_v42  ;;  %v2386_v42 = vld [vmem:[#allocation8 + $0xf80] sm:$0xff] }
 0x154   :  { %v7421_v60 = vcombine.high %v2386_v42, %v2390_v47  ;;  %v7424_v37 = vcombine.low %v2386_v42, %v2390_v47 }
 0x156   :  { %3734 = vmatpush1.bf16.msra.mxu1 %v7400_v9  ;;  %10200 = vst [vmem:[#allocation165_spill] sm:$0xff] %v7421_v60  ;;  %v2382_v9 = vld [vmem:[#allocation8 + $0xf60] sm:$0xff]  ;;  %10201 = vst [vmem:[#allocation166_spill] sm:$0xff] %v7424_v37 }
 0x157   :  { %3735 = vmatprep.subr.bf16.mxu1 %v7403_v62  ;;  %v2378_v62 = vld [vmem:[#allocation8 + $0xf40] sm:$0xff] }
 0x158   :  { %v7427_v57 = vcombine.high %v2378_v62, %v2382_v9  ;;  %v7430_v51 = vcombine.low %v2378_v62, %v2382_v9  ;;  %v2194_v62 = vld [vmem:[#allocation8 + $0x980] sm:$0xff] }
 0x15a   :  { %3736 = vmatpush1.bf16.msra.mxu1 %v7406_v49  ;;  %10202 = vst [vmem:[#allocation167_spill] sm:$0xff] %v7427_v57  ;;  %v2374_v49 = vld [vmem:[#allocation8 + $0xf20] sm:$0xff]  ;;  %10203 = vst [vmem:[#allocation168_spill] sm:$0xff] %v7430_v51 }
 0x15b   :  { %3737 = vmatprep.subr.bf16.mxu1 %v7409_v45  ;;  %v2370_v45 = vld [vmem:[#allocation8 + $0xf00] sm:$0xff] }
 0x15c   :  { %v7433_v24 = vcombine.high %v2370_v45, %v2374_v49 }
 0x15e   :  { %3738 = vmatpush1.bf16.msra.mxu1 %v7412_v11  ;;  %10204 = vst [vmem:[#allocation169_spill] sm:$0xff] %v7433_v24  ;;  %v2206_v11 = vld [vmem:[#allocation8 + $0x9e0] sm:$0xff] }
 0x15f   :  { %3739 = vmatprep.subr.bf16.mxu1 %v7415_v21  ;;  %v2202_v21 = vld [vmem:[#allocation8 + $0x9c0] sm:$0xff] }
 0x160   :  { %v7435_v47 = vcombine.low %v2202_v21, %v2206_v11  ;;  %v7437_v42 = vcombine.high %v2202_v21, %v2206_v11  ;;  %v2186_v21 = vld [vmem:[#allocation8 + $0x940] sm:$0xff] }
 0x162   :  { %3740 = vmatpush2.bf16.msra.mxu1 %v7418_v14  ;;  %v2366_v14 = vld [vmem:[#allocation8 + $0xee0] sm:$0xff]  ;;  %10205 = vst [vmem:[#allocation170_spill] sm:$0xff] %v7435_v47  ;;  %10206 = vst [vmem:[#allocation171_spill] sm:$0xff] %v7437_v42  ;;  %3682 = vmatprep.subr.bf16.mxu0 %v7437_v42 }
 0x163   :  { %3741 = vmatprep.subr.bf16.mxu1 %v7421_v60  ;;  %v7440_v60 = vcombine.low %v2370_v45, %v2374_v49  ;;  %v7444_v9 = vcombine.high %v2362_v35, %v2366_v14  ;;  %3683 = vmatpush1.bf16.msra.mxu0 %v7435_v47  ;;  %v7452_v49 = vcombine.low %v2362_v35, %v2366_v14  ;;  %v2190_v47 = vld [vmem:[#allocation8 + $0x960] sm:$0xff] }
 0x164   :  { %v2346_v42 = vld [vmem:[#allocation8 + $0xe40] sm:$0xff] }
 0x165   :  { %10207 = vst [vmem:[#allocation172_spill] sm:$0xff] %v7440_v60  ;;  %10208 = vst [vmem:[#allocation173_spill] sm:$0xff] %v7444_v9 }
 0x166   :  { %3742 = vmatpush2.bf16.msra.mxu1 %v7424_v37  ;;  %v2354_v37 = vld [vmem:[#allocation8 + $0xe80] sm:$0xff]  ;;  %10211 = vst [vmem:[#allocation176_spill] sm:$0xff] %v7452_v49 }
 0x167   :  { %3743 = vmatprep.subr.bf16.mxu1 %v7427_v57  ;;  %v2198_v57 = vld [vmem:[#allocation8 + $0x9a0] sm:$0xff]  ;;  %v7456_v45 = vcombine.high %v2354_v37, %v2358_v31  ;;  %v7464_v35 = vcombine.low %v2354_v37, %v2358_v31 }
 0x168   :  { %v7447_v39 = vcombine.low %v2194_v62, %v2198_v57  ;;  %v7449_v11 = vcombine.high %v2194_v62, %v2198_v57  ;;  %v7461_v57 = vcombine.high %v2186_v21, %v2190_v47  ;;  %v2178_v62 = vld [vmem:[#allocation8 + $0x900] sm:$0xff] }
 0x169   :  { %10212 = vst [vmem:[#allocation177_spill] sm:$0xff] %v7456_v45  ;;  %10215 = vst [vmem:[#allocation180_spill] sm:$0xff] %v7464_v35 }
 0x16a   :  { %3744 = vmatpush2.bf16.msra.mxu1 %v7430_v51  ;;  %10209 = vst [vmem:[#allocation174_spill] sm:$0xff] %v7447_v39  ;;  %10210 = vst [vmem:[#allocation175_spill] sm:$0xff] %v7449_v11  ;;  %3684 = vmatprep.subr.bf16.mxu0 %v7449_v11  ;;  %v7459_v51 = vcombine.low %v2186_v21, %v2190_v47  ;;  %v2338_v11 = vld [vmem:[#allocation8 + $0xe00] sm:$0xff] }
 0x16b   :  { %3745 = vmatprep.subr.bf16.mxu1 %v7433_v24  ;;  %3685 = vmatpush1.bf16.msra.mxu0 %v7447_v39  ;;  %v2350_v24 = vld [vmem:[#allocation8 + $0xe60] sm:$0xff]  ;;  %10214 = vst [vmem:[#allocation179_spill] sm:$0xff] %v7461_v57 }
 0x16c   :  { %10213 = vst [vmem:[#allocation178_spill] sm:$0xff] %v7459_v51  ;;  %3686 = vmatprep.subr.bf16.mxu0 %v7461_v57  ;;  %v7468_v14 = vcombine.high %v2346_v42, %v2350_v24  ;;  %v2182_v39 = vld [vmem:[#allocation8 + $0x920] sm:$0xff]  ;;  %v7476_v31 = vcombine.low %v2346_v42, %v2350_v24  ;;  %v2331_v57 = vld [vmem:[#allocation8 + $0xdc8] sm:$0xff] }
 0x16d   :  { %v7473_v47 = vcombine.high %v2178_v62, %v2182_v39  ;;  %v2170_v21 = vld [vmem:[#allocation8 + $0x8c0] sm:$0xff] }
 0x16e   :  { %3746 = vmatpush2.bf16.msra.mxu1 %v7440_v60  ;;  %10216 = vst [vmem:[#allocation181_spill] sm:$0xff] %v7468_v14  ;;  %v7471_v60 = vcombine.low %v2178_v62, %v2182_v39  ;;  %10219 = vst [vmem:[#allocation184_spill] sm:$0xff] %v7476_v31  ;;  %v2162_v62 = vld [vmem:[#allocation8 + $0x880] sm:$0xff] }
 0x16f   :  { %3747 = vmatprep.subr.bf16.mxu1 %v7444_v9  ;;  %3687 = vmatpush1.bf16.msra.mxu0 %v7459_v51  ;;  %v2342_v9 = vld [vmem:[#allocation8 + $0xe20] sm:$0xff]  ;;  %10218 = vst [vmem:[#allocation183_spill] sm:$0xff] %v7473_v47 }
 0x170   :  { %10217 = vst [vmem:[#allocation182_spill] sm:$0xff] %v7471_v60  ;;  %3688 = vmatprep.subr.bf16.mxu0 %v7473_v47  ;;  %v7480_v37 = vcombine.high %v2338_v11, %v2342_v9  ;;  %v2174_v51 = vld [vmem:[#allocation8 + $0x8e0] sm:$0xff]  ;;  %v7488_v24 = vcombine.low %v2338_v11, %v2342_v9  ;;  %v2323_v47 = vld [vmem:[#allocation8 + $0xd88] sm:$0xff] }
 0x171   :  { %v7485_v39 = vcombine.high %v2170_v21, %v2174_v51 }
 0x172   :  { %3748 = vmatpush2.bf16.msra.mxu1 %v7452_v49  ;;  %10220 = vst [vmem:[#allocation185_spill] sm:$0xff] %v7480_v37  ;;  %v7483_v49 = vcombine.low %v2170_v21, %v2174_v51  ;;  %10223 = vst [vmem:[#allocation188_spill] sm:$0xff] %v7488_v24  ;;  %v2154_v21 = vld [vmem:[#allocation8 + $0x840] sm:$0xff] }
 0x173   :  { %3749 = vmatprep.subr.bf16.mxu1 %v7456_v45  ;;  %3689 = vmatpush1.bf16.msra.mxu0 %v7471_v60  ;;  %v2335_v45 = vld [vmem:[#allocation8 + $0xde8] sm:$0xff]  ;;  %10222 = vst [vmem:[#allocation187_spill] sm:$0xff] %v7485_v39  ;;  %v2166_v60 = vld [vmem:[#allocation8 + $0x8a0] sm:$0xff] }
 0x174   :  { %10221 = vst [vmem:[#allocation186_spill] sm:$0xff] %v7483_v49  ;;  %3690 = vmatprep.subr.bf16.mxu0 %v7485_v39  ;;  %v7492_v42 = vcombine.high %v2331_v57, %v2335_v45  ;;  %v7497_v51 = vcombine.high %v2162_v62, %v2166_v60  ;;  %v7500_v9 = vcombine.low %v2331_v57, %v2335_v45  ;;  %v10230_v45 = vmov 0.0|0.0  }
 0x176   :  { %3750 = vmatpush2.bf16.msra.mxu1 %v7464_v35  ;;  %10224 = vst [vmem:[#allocation189_spill] sm:$0xff] %v7492_v42  ;;  %v7495_v35 = vcombine.low %v2162_v62, %v2166_v60  ;;  %10226 = vst [vmem:[#allocation191_spill] sm:$0xff] %v7497_v51 }
 0x177   :  { %3751 = vmatprep.subr.bf16.mxu1 %v7468_v14  ;;  %3691 = vmatpush1.bf16.msra.mxu0 %v7483_v49  ;;  %v2327_v14 = vld [vmem:[#allocation8 + $0xda8] sm:$0xff]  ;;  %10227 = vst [vmem:[#allocation192_spill] sm:$0xff] %v7500_v9  ;;  %v2158_v49 = vld [vmem:[#allocation8 + $0x860] sm:$0xff] }
 0x178   :  { %10225 = vst [vmem:[#allocation190_spill] sm:$0xff] %v7495_v35  ;;  %3692 = vmatprep.subr.bf16.mxu0 %v7497_v51  ;;  %v7504_v11 = vcombine.high %v2323_v47, %v2327_v14  ;;  %v7509_v60 = vcombine.high %v2154_v21, %v2158_v49  ;;  %v7514_v57 = vcombine.low %v2154_v21, %v2158_v49  ;;  %v2307_v21 = vld [vmem:[#allocation8 + $0xd08] sm:$0xff] }
 0x17a   :  { %3752 = vmatpush2.bf16.msra.mxu1 %v7476_v31  ;;  %10228 = vst [vmem:[#allocation193_spill] sm:$0xff] %v7504_v11  ;;  %v2319_v31 = vld [vmem:[#allocation8 + $0xd68] sm:$0xff]  ;;  %10229 = vst [vmem:[#allocation194_spill] sm:$0xff] %v7509_v60 }
 0x17b   :  { %3753 = vmatprep.subr.bf16.mxu1 %v7480_v37  ;;  %3693 = vmatpush1.bf16.msra.mxu0 %v7495_v35  ;;  %v2315_v37 = vld [vmem:[#allocation8 + $0xd48] sm:$0xff]  ;;  %10231 = vst [vmem:[#allocation195_spill] sm:$0xff] %v7514_v57 }
 0x17c   :  { %3694 = vmatprep.subr.bf16.mxu0 %v7509_v60 }
 0x17e   :  { %3754 = vmatpush2.bf16.msra.mxu1 %v7488_v24  ;;  %v7525_v24 = vcombine.high %v2315_v37, %v2319_v31 }
 0x17f   :  { %3805 = vmatprep.subr.bf16.mxu1 %v7492_v42  ;;  %v7519_v42 = vcombine.low %v2323_v47, %v2327_v14  ;;  %3695 = vmatpush1.bf16.msra.mxu0 %v7514_v57  ;;  %v7531_v47 = vcombine.low %v2146_v19, %v2150_v4  ;;  %v2299_v57 = vld [vmem:[#allocation8 + $0xcc8] sm:$0xff] }
 0x180   :  { %10233 = vst [vmem:[#allocation197_spill] sm:$0xff] %v7525_v24 }
 0x181   :  { %v7507_v39 = vpop.f32.mrf.mxu0  ;;  %v7511_v62 = vpop.f32.mrf.mxu1  ;;  %3756 = vmatmul.mubr.bf16.vlgmr.msra.gmra.mxu1 %v10230_v45  ;;  %10232 = vst [vmem:[#allocation196_spill] sm:$0xff] %v7519_v42  ;;  %10235 = vst [vmem:[#allocation199_spill] sm:$0xff] %v7531_v47 }
 0x182   :  { %3806 = vmatpush1.bf16.msra.mxu1 %v7500_v9  ;;  %3837 = vmatprep.mubr.bf16.mxu1 %v10230_v45  ;;  %v7529_v9 = vcombine.high %v2146_v19, %v2150_v4  ;;  %v7541_v4 = vcombine.high %v2266_v17, %v2270_v20  ;;  %v7543_v19 = vcombine.low %v2266_v17, %v2270_v20 }
 0x183   :  { %v7517_v51 = vpop.f32.mrf.mxu0  ;;  %v7522_v35 = vpop.f32.mrf.mxu1  ;;  %3807 = vmatprep.subr.bf16.mxu1 %v7504_v11  ;;  %v7534_v11 = vcombine.low %v2315_v37, %v2319_v31  ;;  %v7550_v31 = vcombine.high %v2299_v57, %v2303_v0  ;;  %v2258_v37 = vld [vmem:[#allocation8 + $0xb80] sm:$0xff]  ;;  %v7558_v17 = vcombine.low %v2299_v57, %v2303_v0 }
 0x184   :  { %10234 = vst [vmem:[#allocation198_spill] sm:$0xff] %v7529_v9  ;;  %3696 = vmatprep.subr.bf16.mxu0 %v7529_v9  ;;  %10238 = vst [vmem:[#allocation202_spill] sm:$0xff] %v7541_v4 }
 0x185   :  { %v1068_v49 = vpop.f32.mrf.mxu0  ;;  %v1109_v14 = vpop.f32.mrf.mxu1  ;;  %10236 = vst [vmem:[#allocation200_spill] sm:$0xff] %v7534_v11  ;;  %3697 = vmatpush1.bf16.msra.mxu0 %v7531_v47  ;;  %10239 = vst [vmem:[#allocation203_spill] sm:$0xff] %v7543_v19 }
 0x186   :  { %3808 = vmatpush1.bf16.msra.mxu1 %v7519_v42  ;;  %v7538_v49 = vcombine.high %v2307_v21, %v2311_v43  ;;  %3698 = vmatprep.subr.bf16.mxu0 %v7541_v4  ;;  %10241 = vst [vmem:[#allocation205_spill] sm:$0xff] %v7550_v31  ;;  %v2291_v14 = vld [vmem:[#allocation8 + $0xc88] sm:$0xff]  ;;  %10244 = vst [vmem:[#allocation208_spill] sm:$0xff] %v7558_v17 }
 0x187   :  { %v1069_v12 = vpop.f32.mrf.mxu0  ;;  %v1110_v60 = vpop.f32.mrf.mxu1  ;;  %3809 = vmatprep.subr.bf16.mxu1 %v7525_v24  ;;  %v2295_v24 = vld [vmem:[#allocation8 + $0xca8] sm:$0xff] }
 0x188   :  { %10237 = vst [vmem:[#allocation201_spill] sm:$0xff] %v7538_v49  ;;  %v7546_v12 = vcombine.low %v2307_v21, %v2311_v43  ;;  %v2262_v60 = vld [vmem:[#allocation8 + $0xba0] sm:$0xff]  ;;  %v7562_v43 = vcombine.high %v2291_v14, %v2295_v24  ;;  %v2287_v4 = vld [vmem:[#allocation8 + $0xc68] sm:$0xff]  ;;  %v7570_v0 = vcombine.low %v2291_v14, %v2295_v24 }
 0x189   :  { %3699 = vmatpush2.bf16.msra.mxu0 %v7543_v19  ;;  %v7553_v42 = vcombine.high %v2258_v37, %v2262_v60  ;;  %v7555_v20 = vcombine.low %v2258_v37, %v2262_v60  ;;  %v2250_v21 = vld [vmem:[#allocation8 + $0xb40] sm:$0xff] }
 0x18a   :  { %3810 = vmatpush1.bf16.msra.mxu1 %v7534_v11  ;;  %10240 = vst [vmem:[#allocation204_spill] sm:$0xff] %v7546_v12  ;;  %10245 = vst [vmem:[#allocation209_spill] sm:$0xff] %v7562_v43  ;;  %v2283_v11 = vld [vmem:[#allocation8 + $0xc48] sm:$0xff]  ;;  %v2242_v60 = vld [vmem:[#allocation8 + $0xb00] sm:$0xff] }
 0x18b   :  { %3811 = vmatprep.subr.bf16.mxu1 %v7538_v49  ;;  %10242 = vst [vmem:[#allocation206_spill] sm:$0xff] %v7553_v42  ;;  %10243 = vst [vmem:[#allocation207_spill] sm:$0xff] %v7555_v20  ;;  %3700 = vmatprep.subr.bf16.mxu0 %v7553_v42  ;;  %v2254_v49 = vld [vmem:[#allocation8 + $0xb60] sm:$0xff]  ;;  %v7574_v57 = vcombine.high %v2283_v11, %v2287_v4  ;;  %v2279_v42 = vld [vmem:[#allocation8 + $0xc28] sm:$0xff]  ;;  %v7582_v24 = vcombine.low %v2283_v11, %v2287_v4 }
 0x18c   :  { %v7565_v19 = vcombine.high %v2250_v21, %v2254_v49  ;;  %v7567_v37 = vcombine.low %v2250_v21, %v2254_v49  ;;  %10248 = vst [vmem:[#allocation212_spill] sm:$0xff] %v7570_v0  ;;  %v2234_v21 = vld [vmem:[#allocation8 + $0xac0] sm:$0xff] }
 0x18d   :  { %3701 = vmatpush2.bf16.msra.mxu0 %v7555_v20  ;;  %10249 = vst [vmem:[#allocation213_spill] sm:$0xff] %v7574_v57  ;;  %10252 = vst [vmem:[#allocation216_spill] sm:$0xff] %v7582_v24 }
 0x18e   :  { %3812 = vmatpush1.bf16.msra.mxu1 %v7546_v12  ;;  %10246 = vst [vmem:[#allocation210_spill] sm:$0xff] %v7565_v19  ;;  %10247 = vst [vmem:[#allocation211_spill] sm:$0xff] %v7567_v37  ;;  %3702 = vmatprep.subr.bf16.mxu0 %v7565_v19  ;;  %v2275_v12 = vld [vmem:[#allocation8 + $0xc08] sm:$0xff] }
 0x18f   :  { %3813 = vmatprep.subr.bf16.mxu1 %v7550_v31  ;;  %v2246_v31 = vld [vmem:[#allocation8 + $0xb20] sm:$0xff]  ;;  %v7586_v14 = vcombine.high %v2275_v12, %v2279_v42  ;;  %v2399_v19 = vld [vmem:[#allocation8 + $0xfe8] sm:$0xff]  ;;  %v7594_v11 = vcombine.low %v2275_v12, %v2279_v42 }
 0x190   :  { %v7577_v20 = vcombine.high %v2242_v60, %v2246_v31  ;;  %v7579_v49 = vcombine.low %v2242_v60, %v2246_v31  ;;  %v2226_v60 = vld [vmem:[#allocation8 + $0xa80] sm:$0xff] }
 0x191   :  { %3703 = vmatpush2.bf16.msra.mxu0 %v7567_v37  ;;  %10253 = vst [vmem:[#allocation217_spill] sm:$0xff] %v7586_v14  ;;  %10256 = vst [vmem:[#allocation220_spill] sm:$0xff] %v7594_v11 }
 0x192   :  { %3814 = vmatpush1.bf16.msra.mxu1 %v7558_v17  ;;  %10250 = vst [vmem:[#allocation214_spill] sm:$0xff] %v7577_v20  ;;  %10251 = vst [vmem:[#allocation215_spill] sm:$0xff] %v7579_v49  ;;  %3704 = vmatprep.subr.bf16.mxu0 %v7577_v20  ;;  %v2395_v17 = vld [vmem:[#allocation8 + $0xfc8] sm:$0xff] }
 0x193   :  { %3815 = vmatprep.subr.bf16.mxu1 %v7562_v43  ;;  %v2238_v43 = vld [vmem:[#allocation8 + $0xae0] sm:$0xff]  ;;  %v7598_v4 = vcombine.high %v2395_v17, %v2399_v19  ;;  %v2391_v20 = vld [vmem:[#allocation8 + $0xfa8] sm:$0xff]  ;;  %v7606_v42 = vcombine.low %v2395_v17, %v2399_v19 }
 0x194   :  { %v7589_v37 = vcombine.high %v2234_v21, %v2238_v43  ;;  %v7591_v31 = vcombine.low %v2234_v21, %v2238_v43  ;;  %v2218_v21 = vld [vmem:[#allocation8 + $0xa40] sm:$0xff] }
 0x195   :  { %3705 = vmatpush2.bf16.msra.mxu0 %v7579_v49  ;;  %10257 = vst [vmem:[#allocation221_spill] sm:$0xff] %v7598_v4  ;;  %10260 = vst [vmem:[#allocation224_spill] sm:$0xff] %v7606_v42 }
 0x196   :  { %3816 = vmatpush1.bf16.msra.mxu1 %v7570_v0  ;;  %10254 = vst [vmem:[#allocation218_spill] sm:$0xff] %v7589_v37  ;;  %10255 = vst [vmem:[#allocation219_spill] sm:$0xff] %v7591_v31  ;;  %3706 = vmatprep.subr.bf16.mxu0 %v7589_v37  ;;  %v2387_v0 = vld [vmem:[#allocation8 + $0xf88] sm:$0xff] }
 0x197   :  { %3817 = vmatprep.subr.bf16.mxu1 %v7574_v57  ;;  %v2230_v57 = vld [vmem:[#allocation8 + $0xaa0] sm:$0xff]  ;;  %v7610_v12 = vcombine.high %v2387_v0, %v2391_v20  ;;  %v2383_v37 = vld [vmem:[#allocation8 + $0xf68] sm:$0xff]  ;;  %v7618_v19 = vcombine.low %v2387_v0, %v2391_v20 }
 0x198   :  { %v7601_v49 = vcombine.high %v2226_v60, %v2230_v57  ;;  %v7603_v43 = vcombine.low %v2226_v60, %v2230_v57  ;;  %v2210_v60 = vld [vmem:[#allocation8 + $0xa00] sm:$0xff] }
 0x199   :  { %3707 = vmatpush2.bf16.msra.mxu0 %v7591_v31  ;;  %10261 = vst [vmem:[#allocation225_spill] sm:$0xff] %v7610_v12  ;;  %10264 = vst [vmem:[#allocation228_spill] sm:$0xff] %v7618_v19 }
 0x19a   :  { %3818 = vmatpush1.bf16.msra.mxu1 %v7582_v24  ;;  %10258 = vst [vmem:[#allocation222_spill] sm:$0xff] %v7601_v49  ;;  %10259 = vst [vmem:[#allocation223_spill] sm:$0xff] %v7603_v43  ;;  %3708 = vmatprep.subr.bf16.mxu0 %v7601_v49  ;;  %v2379_v24 = vld [vmem:[#allocation8 + $0xf48] sm:$0xff] }
 0x19b   :  { %3819 = vmatprep.subr.bf16.mxu1 %v7586_v14  ;;  %v2222_v14 = vld [vmem:[#allocation8 + $0xa60] sm:$0xff]  ;;  %v7622_v17 = vcombine.high %v2379_v24, %v2383_v37  ;;  %v2375_v49 = vld [vmem:[#allocation8 + $0xf28] sm:$0xff]  ;;  %v7630_v20 = vcombine.low %v2379_v24, %v2383_v37 }
 0x19c   :  { %v7613_v31 = vcombine.high %v2218_v21, %v2222_v14  ;;  %v7615_v57 = vcombine.low %v2218_v21, %v2222_v14  ;;  %v2203_v21 = vld [vmem:[#allocation8 + $0x9c8] sm:$0xff] }
 0x19d   :  { %3709 = vmatpush2.bf16.msra.mxu0 %v7603_v43  ;;  %10265 = vst [vmem:[#allocation229_spill] sm:$0xff] %v7622_v17  ;;  %10268 = vst [vmem:[#allocation232_spill] sm:$0xff] %v7630_v20 }
 0x19e   :  { %3820 = vmatpush1.bf16.msra.mxu1 %v7594_v11  ;;  %10262 = vst [vmem:[#allocation226_spill] sm:$0xff] %v7613_v31  ;;  %10263 = vst [vmem:[#allocation227_spill] sm:$0xff] %v7615_v57  ;;  %3710 = vmatprep.subr.bf16.mxu0 %v7613_v31  ;;  %v2371_v11 = vld [vmem:[#allocation8 + $0xf08] sm:$0xff] }
 0x19f   :  { %3821 = vmatprep.subr.bf16.mxu1 %v7598_v4  ;;  %v2214_v4 = vld [vmem:[#allocation8 + $0xa20] sm:$0xff]  ;;  %v7634_v0 = vcombine.high %v2371_v11, %v2375_v49  ;;  %v2367_v31 = vld [vmem:[#allocation8 + $0xee8] sm:$0xff]  ;;  %v7642_v37 = vcombine.low %v2371_v11, %v2375_v49 }
 0x1a0   :  { %v7625_v43 = vcombine.high %v2210_v60, %v2214_v4  ;;  %v7627_v14 = vcombine.low %v2210_v60, %v2214_v4  ;;  %v2355_v60 = vld [vmem:[#allocation8 + $0xe88] sm:$0xff] }
 0x1a1   :  { %3711 = vmatpush2.bf16.msra.mxu0 %v7615_v57  ;;  %10269 = vst [vmem:[#allocation233_spill] sm:$0xff] %v7634_v0  ;;  %10271 = vst [vmem:[#allocation235_spill] sm:$0xff] %v7642_v37 }
 0x1a2   :  { %3822 = vmatpush2.bf16.msra.mxu1 %v7606_v42  ;;  %10266 = vst [vmem:[#allocation230_spill] sm:$0xff] %v7625_v43  ;;  %10267 = vst [vmem:[#allocation231_spill] sm:$0xff] %v7627_v14  ;;  %3712 = vmatprep.subr.bf16.mxu0 %v7625_v43  ;;  %v2363_v42 = vld [vmem:[#allocation8 + $0xec8] sm:$0xff] }
 0x1a3   :  { %3823 = vmatprep.subr.bf16.mxu1 %v7610_v12  ;;  %v2207_v12 = vld [vmem:[#allocation8 + $0x9e8] sm:$0xff]  ;;  %v7646_v24 = vcombine.high %v2363_v42, %v2367_v31 }
 0x1a4   :  { %v7637_v57 = vcombine.high %v2203_v21, %v2207_v12  ;;  %v7639_v4 = vcombine.low %v2203_v21, %v2207_v12  ;;  %v2347_v21 = vld [vmem:[#allocation8 + $0xe48] sm:$0xff] }
 0x1a5   :  { %3713 = vmatpush2.bf16.msra.mxu0 %v7627_v14  ;;  %10272 = vst [vmem:[#allocation236_spill] sm:$0xff] %v7646_v24  ;;  %v2312_v14 = vld [vmem:[#allocation8 + $0xd30] sm:$0xff] }
 0x1a6   :  { %3824 = vmatpush2.bf16.msra.mxu1 %v7618_v19  ;;  %10270 = vst [vmem:[#allocation234_spill] sm:$0xff] %v7637_v57  ;;  %3764 = vmatprep.subr.bf16.mxu0 %v7637_v57  ;;  %v7649_v19 = vcombine.low %v2363_v42, %v2367_v31  ;;  %v2343_v57 = vld [vmem:[#allocation8 + $0xe28] sm:$0xff] }
 0x1a7   :  { %3825 = vmatprep.subr.bf16.mxu1 %v7622_v17  ;;  %v2359_v17 = vld [vmem:[#allocation8 + $0xea8] sm:$0xff] }
 0x1a8   :  { %10273 = vst [vmem:[#allocation237_spill] sm:$0xff] %v7649_v19  ;;  %v7652_v12 = vcombine.high %v2355_v60, %v2359_v17  ;;  %v7655_v49 = vcombine.low %v2355_v60, %v2359_v17 }
 0x1aa   :  { %3826 = vmatpush2.bf16.msra.mxu1 %v7630_v20  ;;  %10274 = vst [vmem:[#allocation238_spill] sm:$0xff] %v7652_v12  ;;  %v2351_v20 = vld [vmem:[#allocation8 + $0xe68] sm:$0xff]  ;;  %10275 = vst [vmem:[#allocation239_spill] sm:$0xff] %v7655_v49 }
 0x1ab   :  { %3827 = vmatprep.subr.bf16.mxu1 %v7634_v0  ;;  %v7658_v11 = vcombine.high %v2347_v21, %v2351_v20  ;;  %v2339_v0 = vld [vmem:[#allocation8 + $0xe08] sm:$0xff]  ;;  %v7661_v31 = vcombine.low %v2347_v21, %v2351_v20 }
 0x1ac   :  { %v7664_v42 = vcombine.high %v2339_v0, %v2343_v57  ;;  %v7667_v17 = vcombine.low %v2339_v0, %v2343_v57 }
 0x1ad   :  { %10276 = vst [vmem:[#allocation240_spill] sm:$0xff] %v7658_v11  ;;  %10277 = vst [vmem:[#allocation241_spill] sm:$0xff] %v7661_v31 }
 0x1ae   :  { %3828 = vmatpush2.bf16.msra.mxu1 %v7642_v37  ;;  %10278 = vst [vmem:[#allocation242_spill] sm:$0xff] %v7664_v42  ;;  %v2336_v37 = vld [vmem:[#allocation8 + $0xdf0] sm:$0xff]  ;;  %10279 = vst [vmem:[#allocation243_spill] sm:$0xff] %v7667_v17 }
 0x1af   :  { %3829 = vmatprep.subr.bf16.mxu1 %v7646_v24  ;;  %v2332_v24 = vld [vmem:[#allocation8 + $0xdd0] sm:$0xff] }
 0x1b0   :  { %v7670_v60 = vcombine.high %v2332_v24, %v2336_v37  ;;  %v7673_v20 = vcombine.low %v2332_v24, %v2336_v37 }
 0x1b2   :  { %3830 = vmatpush2.bf16.msra.mxu1 %v7649_v19  ;;  %10280 = vst [vmem:[#allocation244_spill] sm:$0xff] %v7670_v60  ;;  %v2328_v19 = vld [vmem:[#allocation8 + $0xdb0] sm:$0xff]  ;;  %10281 = vst [vmem:[#allocation245_spill] sm:$0xff] %v7673_v20 }
 0x1b3   :  { %3831 = vmatprep.subr.bf16.mxu1 %v7652_v12  ;;  %v2324_v12 = vld [vmem:[#allocation8 + $0xd90] sm:$0xff] }
 0x1b4   :  { %v7676_v21 = vcombine.high %v2324_v12, %v2328_v19 }
 0x1b6   :  { %3832 = vmatpush2.bf16.msra.mxu1 %v7655_v49  ;;  %10282 = vst [vmem:[#allocation246_spill] sm:$0xff] %v7676_v21  ;;  %v2316_v49 = vld [vmem:[#allocation8 + $0xd50] sm:$0xff] }
 0x1b7   :  { %3833 = vmatprep.subr.bf16.mxu1 %v7658_v11 }
 0x1ba   :  { %3834 = vmatpush2.bf16.msra.mxu1 %v7661_v31  ;;  %v2320_v31 = vld [vmem:[#allocation8 + $0xd70] sm:$0xff] }
 0x1bb   :  { %3835 = vmatprep.subr.bf16.mxu1 %v7664_v42  ;;  %v7686_v42 = vcombine.low %v2324_v12, %v2328_v19  ;;  %v7692_v24 = vcombine.high %v2316_v49, %v2320_v31  ;;  %v2300_v12 = vld [vmem:[#allocation8 + $0xcd0] sm:$0xff] }
 0x1bd   :  { %10283 = vst [vmem:[#allocation247_spill] sm:$0xff] %v7686_v42  ;;  %10284 = vst [vmem:[#allocation248_spill] sm:$0xff] %v7692_v24 }
 0x1be   :  { %3836 = vmatpush2.bf16.msra.mxu1 %v7667_v17  ;;  %v2308_v17 = vld [vmem:[#allocation8 + $0xd10] sm:$0xff] }
 0x1bf   :  { %3887 = vmatprep.subr.bf16.mxu1 %v7670_v60  ;;  %v7698_v19 = vcombine.high %v2308_v17, %v2312_v14 }
 0x1c1   :  { %v7678_v11 = vpop.f32.mrf.mxu0  ;;  %v7680_v57 = vpop.f32.mrf.mxu1  ;;  %3838 = vmatmul.mubr.bf16.vlgmr.msra.gmra.mxu1 %v10230_v45  ;;  %10286 = vst [vmem:[#allocation250_spill] sm:$0xff] %v7698_v19 }
 0x1c2   :  { %3888 = vmatpush1.bf16.msra.mxu1 %v7673_v20  ;;  %3919 = vmatprep.mubr.bf16.mxu1 %v10230_v45  ;;  %v7695_v20 = vcombine.low %v2316_v49, %v2320_v31  ;;  %v2284_v49 = vld [vmem:[#allocation8 + $0xc50] sm:$0xff] }
 0x1c3   :  { %v7684_v0 = vpop.f32.mrf.mxu0  ;;  %v7689_v37 = vpop.f32.mrf.mxu1  ;;  %3889 = vmatprep.subr.bf16.mxu1 %v7676_v21  ;;  %v7701_v21 = vcombine.low %v2308_v17, %v2312_v14  ;;  %v2288_v31 = vld [vmem:[#allocation8 + $0xc70] sm:$0xff] }
 0x1c4   :  { %10285 = vst [vmem:[#allocation249_spill] sm:$0xff] %v7695_v20  ;;  %v7716_v17 = vcombine.high %v2284_v49, %v2288_v31 }
 0x1c5   :  { %v1961_v60 = vpop.f32.mrf.mxu0  ;;  %v2002_v43 = vpop.f32.mrf.mxu1  ;;  %10287 = vst [vmem:[#allocation251_spill] sm:$0xff] %v7701_v21 }
 0x1c6   :  { %3890 = vmatpush1.bf16.msra.mxu1 %v7686_v42  ;;  %v7704_v60 = vcombine.high %v2300_v12, %v2304_v36  ;;  %v2292_v43 = vld [vmem:[#allocation8 + $0xc90] sm:$0xff]  ;;  %10292 = vst [vmem:[#allocation256_spill] sm:$0xff] %v7716_v17 }
 0x1c7   :  { %v1962_v47 = vpop.f32.mrf.mxu0  ;;  %v2003_v9 = vpop.f32.mrf.mxu1  ;;  %3891 = vmatprep.subr.bf16.mxu1 %v7692_v24  ;;  %v2296_v42 = vld [vmem:[#allocation8 + $0xcb0] sm:$0xff]  ;;  %v268_v24 = vlaneseq }
 0x1c8   :  { %10288 = vst [vmem:[#allocation252_spill] sm:$0xff] %v7704_v60  ;;  %v7707_v47 = vcombine.low %v2300_v12, %v2304_v36  ;;  %v7710_v9 = vcombine.high %v2292_v43, %v2296_v42  ;;  %v7713_v14 = vcombine.low %v2292_v43, %v2296_v42  ;;  %v7721_v36 = vcombine.low %v2284_v49, %v2288_v31 }
 0x1ca   :  { %3892 = vmatpush1.bf16.msra.mxu1 %v7695_v20  ;;  %10289 = vst [vmem:[#allocation253_spill] sm:$0xff] %v7707_v47  ;;  %10290 = vst [vmem:[#allocation254_spill] sm:$0xff] %v7710_v9  ;;  %v2280_v20 = vld [vmem:[#allocation8 + $0xc30] sm:$0xff] }
 0x1cb   :  { %3893 = vmatprep.subr.bf16.mxu1 %v7698_v19  ;;  %10291 = vst [vmem:[#allocation255_spill] sm:$0xff] %v7713_v14  ;;  %v2276_v19 = vld [vmem:[#allocation8 + $0xc10] sm:$0xff]  ;;  %10293 = vst [vmem:[#allocation257_spill] sm:$0xff] %v7721_v36 }
 0x1cc   :  { %v7724_v12 = vcombine.high %v2276_v19, %v2280_v20  ;;  %v7730_v43 = vcombine.low %v2276_v19, %v2280_v20 }
 0x1ce   :  { %3894 = vmatpush1.bf16.msra.mxu1 %v7701_v21  ;;  %v7718_v21 = vshrl.u32 %v268_v24, 7  ;;  %10294 = vst [vmem:[#allocation258_spill] sm:$0xff] %v7724_v12  ;;  %10296 = vst [vmem:[#allocation260_spill] sm:$0xff] %v7730_v43 }
 0x1cf   :  { %3895 = vmatprep.subr.bf16.mxu1 %v7704_v60  ;;  %v2396_v60 = vld [vmem:[#allocation8 + $0xfd0] sm:$0xff] }
 0x1d0   :  { %v7727_v42 = vsub.s32 0, %v7718_v21  ;;  %v9738_v24 = vsub.s32 2, %v7718_v21  ;;  %v9741_v31 = vsub.s32 3, %v7718_v21  ;;  %v7742_v52 = vsub.s32 1, %v7718_v21 }
 0x1d2   :  { %3896 = vmatpush1.bf16.msra.mxu1 %v7707_v47  ;;  %v2400_v47 = vld [vmem:[#allocation8 + $0xff0] sm:$0xff]  ;;  %10295 = vst [vmem:[#allocation259_spill] sm:$0xff] %v7727_v42  ;;  %10298 = vst [vmem:[#allocation262_spill] sm:$0xff] %v7742_v52 }
 0x1d3   :  { %3897 = vmatprep.subr.bf16.mxu1 %v7710_v9  ;;  %v7732_v9 = vld [vmem:[#allocation11] ss:$4 sm:$0xff]  ;;  %v7736_v49 = vcombine.high %v2396_v60, %v2400_v47  ;;  %v7745_v20 = vcombine.low %v2396_v60, %v2400_v47 }
 0x1d4   :  { %v271_v33 = vrot.slane %v7732_v9, %v7727_v42  ;;  %v279_v19 = vrot.slane %v7732_v9, %v9738_v24  ;;  %v2380_v42 = vld [vmem:[#allocation8 + $0xf50] sm:$0xff]  ;;  %v275_v60 = vrot.slane %v7732_v9, %v7742_v52  ;;  %v2317_v52 = vld [vmem:[#allocation8 + $0xd58] sm:$0xff] }
 0x1d5   :  { %10297 = vst [vmem:[#allocation261_spill] sm:$0xff] %v7736_v49  ;;  %10299 = vst [vmem:[#allocation263_spill] sm:$0xff] %v7745_v20 }
 0x1d6   :  { %3898 = vmatpush1.bf16.msra.mxu1 %v7713_v14  ;;  %v2392_v14 = vld [vmem:[#allocation8 + $0xfb0] sm:$0xff]  ;;  %v7757_v3 = vadd.f32 %v7364_v53, %v271_v33  ;;  %v7765_v24 = vadd.f32 %v7367_v29, %v279_v19 }
 0x1d7   :  { %3899 = vmatprep.subr.bf16.mxu1 %v7716_v17  ;;  %v2388_v17 = vld [vmem:[#allocation8 + $0xf90] sm:$0xff] }
 0x1d8   :  { %10301 = vst [vmem:[#allocation265_spill] sm:$0xff] %v7757_v3  ;;  %v7762_v47 = vcombine.low %v2388_v17, %v2392_v14  ;;  %10303 = vst [vmem:[#allocation267_spill] sm:$0xff] %v7765_v24  ;;  %v2087_v33 = vadd.f32 %v7678_v11, %v7757_v3  ;;  %v2372_v53 = vld [vmem:[#allocation8 + $0xf10] sm:$0xff] }
 0x1d9   :  { %v2364_v19 = vld [vmem:[#allocation8 + $0xed0] sm:$0xff] }
 0x1da   :  { %3900 = vmatpush1.bf16.msra.mxu1 %v7721_v36  ;;  %v283_v36 = vrot.slane %v7732_v9, %v9741_v31  ;;  %10302 = vst [vmem:[#allocation266_spill] sm:$0xff] %v7762_v47  ;;  %v6077_v11 = vmul.f32 -1.442695, %v2087_v33  ;;  %v2352_v33 = vld [vmem:[#allocation8 + $0xe70] sm:$0xff] }
 0x1db   :  { %3901 = vmatprep.subr.bf16.mxu1 %v7724_v12  ;;  %v7751_v12 = vcombine.high %v2388_v17, %v2392_v14  ;;  %v7778_v14 = vadd.f32 %v7371_v26, %v275_v60  ;;  %v7783_v17 = vcombine.low %v2380_v42, %v2384_v2 }
 0x1dc   :  { %v7771_v31 = vadd.f32 %v7376_v6, %v283_v36  ;;  %6518 = vpow2.f32 %v6077_v11  ;;  %v2344_v11 = vld [vmem:[#allocation8 + $0xe30] sm:$0xff] }
 0x1dd   :  { %10300 = vst [vmem:[#allocation264_spill] sm:$0xff] %v7751_v12  ;;  %10306 = vst [vmem:[#allocation270_spill] sm:$0xff] %v7778_v14  ;;  %v2088_v36 = vadd.f32 %v7684_v0, %v7778_v14 }
 0x1de   :  { %3902 = vmatpush1.bf16.msra.mxu1 %v7730_v43  ;;  %10305 = vst [vmem:[#allocation269_spill] sm:$0xff] %v7771_v31  ;;  %v2376_v43 = vld [vmem:[#allocation8 + $0xf30] sm:$0xff]  ;;  %v2090_v29 = vadd.f32 %v7689_v37, %v7771_v31  ;;  %10307 = vst [vmem:[#allocation271_spill] sm:$0xff] %v7783_v17 }
 0x1df   :  { %3903 = vmatprep.subr.bf16.mxu1 %v7736_v49  ;;  %v7768_v49 = vcombine.high %v2380_v42, %v2384_v2  ;;  %v7786_v6 = vcombine.high %v2372_v53, %v2376_v43  ;;  %v7791_v60 = vcombine.low %v2372_v53, %v2376_v43  ;;  %v6078_v37 = vmul.f32 -1.442695, %v2088_v36  ;;  %v2356_v42 = vld [vmem:[#allocation8 + $0xe90] sm:$0xff] }
 0x1e0   :  { %v6080_v26 = vmul.f32 -1.442695, %v2090_v29  ;;  %v2348_v43 = vld [vmem:[#allocation8 + $0xe50] sm:$0xff] }
 0x1e1   :  { %10304 = vst [vmem:[#allocation268_spill] sm:$0xff] %v7768_v49  ;;  %10308 = vst [vmem:[#allocation272_spill] sm:$0xff] %v7786_v6  ;;  %v7806_v29 = vcombine.high %v2348_v43, %v2352_v33  ;;  %v7809_v36 = vcombine.low %v2348_v43, %v2352_v33 }
 0x1e2   :  { %3904 = vmatpush2.bf16.msra.mxu1 %v7745_v20  ;;  %v2089_v20 = vadd.f32 %v7680_v57, %v7765_v24  ;;  %v2368_v57 = vld [vmem:[#allocation8 + $0xef0] sm:$0xff]  ;;  %10309 = vst [vmem:[#allocation273_spill] sm:$0xff] %v7791_v60 }
 0x1e3   :  { %3905 = vmatprep.subr.bf16.mxu1 %v7751_v12  ;;  %v7794_v2 = vcombine.high %v2364_v19, %v2368_v57  ;;  %v7797_v0 = vcombine.low %v2364_v19, %v2368_v57  ;;  %10314 = vst [vmem:[#allocation278_spill] sm:$0xff] %v7806_v29  ;;  %10315 = vst [vmem:[#allocation279_spill] sm:$0xff] %v7809_v36  ;;  %v9770_v19 = vsub.s32 4, %v7718_v21 }
 0x1e4   :  { %v6079_v12 = vmul.f32 -1.442695, %v2089_v20 }
 0x1e5   :  { %10310 = vst [vmem:[#allocation274_spill] sm:$0xff] %v7794_v2  ;;  %10311 = vst [vmem:[#allocation275_spill] sm:$0xff] %v7797_v0 }
 0x1e6   :  { %3906 = vmatpush2.bf16.msra.mxu1 %v7762_v47  ;;  %6520 = vpow2.f32 %v6079_v12  ;;  %v2340_v12 = vld [vmem:[#allocation8 + $0xe10] sm:$0xff]  ;;  %v10321_v47 = vsub.s32 7, %v7718_v21 }
 0x1e7   :  { %3907 = vmatprep.subr.bf16.mxu1 %v7768_v49  ;;  %v2360_v49 = vld [vmem:[#allocation8 + $0xeb0] sm:$0xff]  ;;  %6522 = vpow2.f32 %v6080_v26  ;;  %v7813_v57 = vcombine.high %v2340_v12, %v2344_v11  ;;  %v7819_v43 = vcombine.low %v2340_v12, %v2344_v11  ;;  %v10320_v12 = vsub.s32 5, %v7718_v21 }
 0x1e8   :  { %v7800_v20 = vcombine.high %v2356_v42, %v2360_v49  ;;  %6524 = vpow2.f32 %v6078_v37  ;;  %v7803_v53 = vcombine.low %v2356_v42, %v2360_v49  ;;  %v2333_v49 = vld [vmem:[#allocation8 + $0xdd8] sm:$0xff] }
 0x1e9   :  { %10316 = vst [vmem:[#allocation280_spill] sm:$0xff] %v7813_v57  ;;  %v2337_v37 = vld [vmem:[#allocation8 + $0xdf8] sm:$0xff]  ;;  %v6519_v42 = vpop.eup %6518  ;;  %10317 = vst [vmem:[#allocation281_spill] sm:$0xff] %v7819_v43  ;;  %v291_v11 = vrot.slane %v7732_v9, %v10320_v12 }
 0x1ea   :  { %3908 = vmatpush2.bf16.msra.mxu1 %v7783_v17  ;;  %10312 = vst [vmem:[#allocation276_spill] sm:$0xff] %v7800_v20  ;;  %10313 = vst [vmem:[#allocation277_spill] sm:$0xff] %v7803_v53  ;;  %v7825_v26 = vcombine.high %v2333_v49, %v2337_v37  ;;  %v7837_v14 = vcombine.low %v2333_v49, %v2337_v37  ;;  %v2309_v37 = vld [vmem:[#allocation8 + $0xd18] sm:$0xff] }
 0x1eb   :  { %3909 = vmatprep.subr.bf16.mxu1 %v7786_v6  ;;  %v2325_v6 = vld [vmem:[#allocation8 + $0xd98] sm:$0xff] }
 0x1ec   :  { %10318 = vst [vmem:[#allocation282_spill] sm:$0xff] %v7825_v26  ;;  %10322 = vst [vmem:[#allocation283_spill] sm:$0xff] %v7837_v14 }
 0x1ee   :  { %3910 = vmatpush2.bf16.msra.mxu1 %v7791_v60  ;;  %v2101_v60 = vadd.f32 1.0, %v6519_v42 }
 0x1ef   :  { %3911 = vmatprep.subr.bf16.mxu1 %v7794_v2  ;;  %v2329_v2 = vld [vmem:[#allocation8 + $0xdb8] sm:$0xff] }
 0x1f0   :  { %v7843_v42 = vcombine.high %v2325_v6, %v2329_v2  ;;  %6526 = vrcp.f32 %v2101_v60  ;;  %v7858_v60 = vcombine.low %v2325_v6, %v2329_v2 }
 0x1f2   :  { %3912 = vmatpush2.bf16.msra.mxu1 %v7797_v0  ;;  %10323 = vst [vmem:[#allocation284_spill] sm:$0xff] %v7843_v42  ;;  %10327 = vst [vmem:[#allocation288_spill] sm:$0xff] %v7858_v60 }
 0x1f3   :  { %3913 = vmatprep.subr.bf16.mxu1 %v7800_v20  ;;  %v6521_v0 = vpop.eup %6520 }
 0x1f4   :  { %v6523_v33 = vpop.eup %6522 }
 0x1f5   :  { %v6525_v17 = vpop.eup %6524 }
 0x1f6   :  { %3914 = vmatpush2.bf16.msra.mxu1 %v7803_v53  ;;  %v10319_v53 = vsub.s32 6, %v7718_v21 }
 0x1f7   :  { %3915 = vmatprep.subr.bf16.mxu1 %v7806_v29  ;;  %v287_v29 = vrot.slane %v7732_v9, %v9770_v19  ;;  %v299_v19 = vrot.slane %v7732_v9, %v10321_v47  ;;  %v7849_v47 = vadd.f32 %v7517_v51, %v291_v11 }
 0x1f8   :  { %v295_v20 = vrot.slane %v7732_v9, %v10319_v53  ;;  %v2321_v9 = vld [vmem:[#allocation8 + $0xd78] sm:$0xff] }
 0x1f9   :  { %v7840_v53 = vadd.f32 %v7507_v39, %v287_v29  ;;  %10325 = vst [vmem:[#allocation286_spill] sm:$0xff] %v7849_v47  ;;  %v7854_v29 = vadd.f32 %v7522_v35, %v299_v19 }
 0x1fa   :  { %3916 = vmatpush2.bf16.msra.mxu1 %v7809_v36  ;;  %v2113_v36 = vadd.f32 1.0, %v6521_v0  ;;  %v7846_v3 = vadd.f32 %v7511_v62, %v295_v20  ;;  %v2102_v0 = vadd.f32 1.0, %v6525_v17 }
 0x1fb   :  { %3917 = vmatprep.subr.bf16.mxu1 %v7813_v57  ;;  %v2114_v57 = vadd.f32 1.0, %v6523_v33  ;;  %10326 = vst [vmem:[#allocation287_spill] sm:$0xff] %v7854_v29  ;;  %v2313_v33 = vld [vmem:[#allocation8 + $0xd38] sm:$0xff] }
 0x1fc   :  { %10324 = vst [vmem:[#allocation285_spill] sm:$0xff] %v7846_v3  ;;  %6528 = vrcp.f32 %v2113_v36  ;;  %v7863_v36 = vcombine.high %v2317_v52, %v2321_v9 }
 0x1fd   :  { %6530 = vrcp.f32 %v2114_v57 }
 0x1fe   :  { %3918 = vmatpush2.bf16.msra.mxu1 %v7819_v43  ;;  %10328 = vst [vmem:[#allocation289_spill] sm:$0xff] %v7863_v36 }
 0x1ff   :  { %3969 = vmatprep.subr.bf16.mxu1 %v7825_v26  ;;  %v2281_v26 = vld [vmem:[#allocation8 + $0xc38] sm:$0xff] }
 0x201   :  { %v2039_v12 = vpop.f32.mrf.mxu0  ;;  %v2080_v39 = vpop.f32.mrf.mxu1  ;;  %3920 = vmatmul.mubr.bf16.vlgmr.msra.gmra.mxu1 %v10230_v45 }
 0x202   :  { %v2091_v49 = vadd.f32 %v2039_v12, %v7840_v53  ;;  %v2093_v62 = vadd.f32 %v2080_v39, %v7846_v3  ;;  %3970 = vmatpush1.bf16.msra.mxu1 %v7837_v14  ;;  %4001 = vmatprep.mubr.bf16.mxu1 %v10230_v45  ;;  %v7867_v12 = vcombine.low %v2317_v52, %v2321_v9  ;;  %v6527_v52 = vpop.eup %6526  ;;  %v2277_v14 = vld [vmem:[#allocation8 + $0xc18] sm:$0xff] }
 0x203   :  { %v2041_v17 = vpop.f32.mrf.mxu0  ;;  %v2082_v20 = vpop.f32.mrf.mxu1  ;;  %3971 = vmatprep.subr.bf16.mxu1 %v7843_v42  ;;  %v7870_v39 = vcombine.high %v2309_v37, %v2313_v33 }
 0x204   :  { %6532 = vtanh.f32 %v2091_v49  ;;  %v2092_v51 = vadd.f32 %v2041_v17, %v7849_v47  ;;  %v6081_v35 = vmul.f32 -1.442695, %v2093_v62  ;;  %v2094_v19 = vadd.f32 %v2082_v20, %v7854_v29  ;;  %10329 = vst [vmem:[#allocation290_spill] sm:$0xff] %v7867_v12  ;;  %v2305_v62 = vld [vmem:[#allocation8 + $0xcf8] sm:$0xff] }
 0x205   :  { %6534 = vrcp.f32 %v2102_v0  ;;  %v2043_v57 = vpop.f32.mrf.mxu0  ;;  %v2084_v6 = vpop.f32.mrf.mxu1  ;;  %10330 = vst [vmem:[#allocation291_spill] sm:$0xff] %v7870_v39  ;;  %v2301_v0 = vld [vmem:[#allocation8 + $0xcd8] sm:$0xff]  ;;  %v7873_v17 = vcombine.low %v2309_v37, %v2313_v33 }
 0x206   :  { %6536 = vtanh.f32 %v2092_v51  ;;  %v6082_v2 = vmul.f32 -1.442695, %v2094_v19  ;;  %3972 = vmatpush1.bf16.msra.mxu1 %v7858_v60  ;;  %v7876_v51 = vcombine.high %v2301_v0, %v2305_v62  ;;  %v2293_v20 = vld [vmem:[#allocation8 + $0xc98] sm:$0xff]  ;;  %v7879_v19 = vcombine.low %v2301_v0, %v2305_v62 }
 0x207   :  { %6538 = vpow2.f32 %v6081_v35  ;;  %v2044_v11 = vpop.f32.mrf.mxu0  ;;  %v2085_v49 = vpop.f32.mrf.mxu1  ;;  %3973 = vmatprep.subr.bf16.mxu1 %v7863_v36  ;;  %10331 = vst [vmem:[#allocation292_spill] sm:$0xff] %v7873_v17  ;;  %v2297_v35 = vld [vmem:[#allocation8 + $0xcb8] sm:$0xff] }
 0x208   :  { %6540 = vpow2.f32 %v6082_v2  ;;  %10332 = vst [vmem:[#allocation293_spill] sm:$0xff] %v7876_v51  ;;  %10333 = vst [vmem:[#allocation294_spill] sm:$0xff] %v7879_v19  ;;  %v7882_v6 = vcombine.high %v2293_v20, %v2297_v35  ;;  %v2285_v37 = vld [vmem:[#allocation8 + $0xc58] sm:$0xff]  ;;  %v7885_v36 = vcombine.low %v2293_v20, %v2297_v35 }
 0x209   :  { %v6529_v9 = vpop.eup %6528  ;;  %v2289_v33 = vld [vmem:[#allocation8 + $0xc78] sm:$0xff] }
 0x20a   :  { %3974 = vmatpush1.bf16.msra.mxu1 %v7867_v12  ;;  %v6531_v57 = vpop.eup %6530  ;;  %10334 = vst [vmem:[#allocation295_spill] sm:$0xff] %v7882_v6  ;;  %v2133_v49 = vmul.f32 0.0, %v6529_v9  ;;  %10335 = vst [vmem:[#allocation296_spill] sm:$0xff] %v7885_v36  ;;  %v7896_v35 = vcombine.low %v2285_v37, %v2289_v33  ;;  %v7903_v9 = vcombine.low %v2277_v14, %v2281_v26 }
 0x20b   :  { %3975 = vmatprep.subr.bf16.mxu1 %v7870_v39 }
 0x20c   :  { %10337 = vst [vmem:[#allocation298_spill] sm:$0xff] %v7896_v35  ;;  %10339 = vst [vmem:[#allocation300_spill] sm:$0xff] %v7903_v9 }
 0x20e   :  { %3976 = vmatpush1.bf16.msra.mxu1 %v7873_v17  ;;  %v2134_v17 = vmul.f32 0.0, %v6531_v57 }
 0x20f   :  { %3977 = vmatprep.subr.bf16.mxu1 %v7876_v51  ;;  %v7890_v51 = vcombine.high %v2285_v37, %v2289_v33  ;;  %v2381_v37 = vld [vmem:[#allocation8 + $0xf58] sm:$0xff] }
 0x210   :  { %v2385_v33 = vld [vmem:[#allocation8 + $0xf78] sm:$0xff] }
 0x211   :  { %v6533_v2 = vpop.eup %6532  ;;  %10336 = vst [vmem:[#allocation297_spill] sm:$0xff] %v7890_v51 }
 0x212   :  { %v6535_v11 = vpop.eup %6534  ;;  %v2135_v39 = vmul.f32 %v6533_v2, %v6527_v52  ;;  %3978 = vmatpush1.bf16.msra.mxu1 %v7879_v19  ;;  %v2345_v19 = vld [vmem:[#allocation8 + $0xe38] sm:$0xff] }
 0x213   :  { %v6537_v12 = vpop.eup %6536  ;;  %3979 = vmatprep.subr.bf16.mxu1 %v7882_v6 }
 0x214   :  { %v6539_v60 = vpop.eup %6538  ;;  %v7887_v0 = vadd.f32 %v2135_v39, %v2133_v49  ;;  %v2136_v62 = vmul.f32 %v6537_v12, %v6535_v11  ;;  %v7900_v12 = vcombine.high %v2277_v14, %v2281_v26  ;;  %v2401_v39 = vld [vmem:[#allocation8 + $0xff8] sm:$0xff]  ;;  %v7918_v49 = vcombine.high %v2381_v37, %v2385_v33 }
 0x215   :  { %v2127_v42 = vadd.f32 1.0, %v6539_v60  ;;  %v6541_v43 = vpop.eup %6540  ;;  %v2397_v60 = vld [vmem:[#allocation8 + $0xfd8] sm:$0xff] }
 0x216   :  { %6542 = vtanh.f32 %v7887_v0  ;;  %v7893_v52 = vadd.f32 %v2136_v62, %v2134_v17  ;;  %v2128_v20 = vadd.f32 1.0, %v6541_v43  ;;  %3980 = vmatpush1.bf16.msra.mxu1 %v7885_v36  ;;  %10338 = vst [vmem:[#allocation299_spill] sm:$0xff] %v7900_v12  ;;  %v7906_v43 = vcombine.high %v2397_v60, %v2401_v39  ;;  %v2393_v17 = vld [vmem:[#allocation8 + $0xfb8] sm:$0xff]  ;;  %10344 = vst [vmem:[#allocation305_spill] sm:$0xff] %v7918_v49 }
 0x217   :  { %6544 = vrcp.f32 %v2127_v42  ;;  %3981 = vmatprep.subr.bf16.mxu1 %v7890_v51  ;;  %v2389_v42 = vld [vmem:[#allocation8 + $0xf98] sm:$0xff]  ;;  %v7909_v57 = vcombine.low %v2397_v60, %v2401_v39  ;;  %v2199_v51 = vld [vmem:[#allocation8 + $0x9a8] sm:$0xff] }
 0x218   :  { %6546 = vtanh.f32 %v7893_v52  ;;  %10340 = vst [vmem:[#allocation301_spill] sm:$0xff] %v7906_v43  ;;  %v7912_v2 = vcombine.high %v2389_v42, %v2393_v17  ;;  %v7915_v14 = vcombine.low %v2389_v42, %v2393_v17  ;;  %v2377_v60 = vld [vmem:[#allocation8 + $0xf38] sm:$0xff] }
 0x219   :  { %6548 = vrcp.f32 %v2128_v20  ;;  %10341 = vst [vmem:[#allocation302_spill] sm:$0xff] %v7909_v57  ;;  %v2373_v20 = vld [vmem:[#allocation8 + $0xf18] sm:$0xff] }
 0x21a   :  { %3982 = vmatpush1.bf16.msra.mxu1 %v7896_v35  ;;  %10342 = vst [vmem:[#allocation303_spill] sm:$0xff] %v7912_v2  ;;  %10343 = vst [vmem:[#allocation304_spill] sm:$0xff] %v7915_v14  ;;  %v2195_v35 = vld [vmem:[#allocation8 + $0x988] sm:$0xff]  ;;  %v7924_v42 = vcombine.high %v2373_v20, %v2377_v60 }
 0x21b   :  { %3983 = vmatprep.subr.bf16.mxu1 %v7900_v12  ;;  %v7921_v12 = vcombine.low %v2381_v37, %v2385_v33  ;;  %v7930_v6 = vcombine.high %v2195_v35, %v2199_v51  ;;  %v7934_v37 = vcombine.low %v2373_v20, %v2377_v60  ;;  %v2187_v33 = vld [vmem:[#allocation8 + $0x948] sm:$0xff] }
 0x21c   :  { %10346 = vst [vmem:[#allocation307_spill] sm:$0xff] %v7924_v42 }
 0x21d   :  { %10345 = vst [vmem:[#allocation306_spill] sm:$0xff] %v7921_v12  ;;  %10347 = vst [vmem:[#allocation308_spill] sm:$0xff] %v7930_v6 }
 0x21e   :  { %3984 = vmatpush1.bf16.msra.mxu1 %v7903_v9  ;;  %10348 = vst [vmem:[#allocation309_spill] sm:$0xff] %v7934_v37 }
 0x21f   :  { %3985 = vmatprep.subr.bf16.mxu1 %v7906_v43 }
 0x222   :  { %3986 = vmatpush2.bf16.msra.mxu1 %v7909_v57  ;;  %v2369_v57 = vld [vmem:[#allocation8 + $0xef8] sm:$0xff] }
 0x223   :  { %v6543_v11 = vpop.eup %6542  ;;  %3987 = vmatprep.subr.bf16.mxu1 %v7912_v2  ;;  %v2365_v2 = vld [vmem:[#allocation8 + $0xed8] sm:$0xff] }
 0x224   :  { %v6545_v26 = vpop.eup %6544  ;;  %v7948_v60 = vcombine.low %v2365_v2, %v2369_v57 }
 0x225   :  { %v6547_v62 = vpop.eup %6546  ;;  %v2141_v9 = vmul.f32 %v6545_v26, %v6543_v11  ;;  %v2191_v11 = vld [vmem:[#allocation8 + $0x968] sm:$0xff]  ;;  %v2357_v26 = vld [vmem:[#allocation8 + $0xe98] sm:$0xff] }
 0x226   :  { %v6549_v39 = vpop.eup %6548  ;;  %3988 = vmatpush2.bf16.msra.mxu1 %v7915_v14  ;;  %v7945_v20 = vcombine.high %v2187_v33, %v2191_v11  ;;  %10352 = vst [vmem:[#allocation313_spill] sm:$0xff] %v7948_v60 }
 0x227   :  { %v2142_v43 = vmul.f32 %v6549_v39, %v6547_v62  ;;  %3989 = vmatprep.subr.bf16.mxu1 %v7918_v49  ;;  %v7928_v36 = vpack.c.bf16 %v2141_v9, %v2141_v9  ;;  %v7942_v9 = vcombine.low %v2195_v35, %v2199_v51  ;;  %v2361_v62 = vld [vmem:[#allocation8 + $0xeb8] sm:$0xff]  ;;  %v2179_v39 = vld [vmem:[#allocation8 + $0x908] sm:$0xff]  ;;  %v7954_v51 = vcombine.low %v2187_v33, %v2191_v11 }
 0x228   :  { %10351 = vst [vmem:[#allocation312_spill] sm:$0xff] %v7945_v20  ;;  %v2349_v35 = vld [vmem:[#allocation8 + $0xe58] sm:$0xff] }
 0x229   :  { %v7926_v17 = vpack.c.bf16 %v2142_v43, %v2142_v43  ;;  %v7938_v43 = vcombine.high %v2365_v2, %v2369_v57  ;;  %10350 = vst [vmem:[#allocation311_spill] sm:$0xff] %v7942_v9  ;;  %10354 = vst [vmem:[#allocation315_spill] sm:$0xff] %v7954_v51  ;;  %v2353_v49 = vld [vmem:[#allocation8 + $0xe78] sm:$0xff]  ;;  %v7960_v57 = vcombine.low %v2357_v26, %v2361_v62  ;;  %v2171_v2 = vld [vmem:[#allocation8 + $0x8c8] sm:$0xff] }
 0x22a   :  { %3990 = vmatpush2.bf16.msra.mxu1 %v7921_v12  ;;  %v7951_v12 = vcombine.high %v2357_v26, %v2361_v62  ;;  %v2341_v11 = vld [vmem:[#allocation8 + $0xe18] sm:$0xff]  ;;  %v7972_v26 = vcombine.low %v2349_v35, %v2353_v49  ;;  %v2163_v62 = vld [vmem:[#allocation8 + $0x888] sm:$0xff] }
 0x22b   :  { %3714 = vmatprep.mubr.bf16.mxu0 %v7926_v17  ;;  %3991 = vmatprep.subr.bf16.mxu1 %v7924_v42  ;;  %10349 = vst [vmem:[#allocation310_spill] sm:$0xff] %v7938_v43  ;;  %v2183_v42 = vld [vmem:[#allocation8 + $0x928] sm:$0xff]  ;;  %10356 = vst [vmem:[#allocation317_spill] sm:$0xff] %v7960_v57 }
 0x22c   :  { %3715 = vmatmul.mubr.bf16.vlgmr.msra.gmra.mxu0 %v7928_v36  ;;  %10353 = vst [vmem:[#allocation314_spill] sm:$0xff] %v7951_v12  ;;  %v7957_v14 = vcombine.high %v2179_v39, %v2183_v42  ;;  %v7966_v33 = vcombine.low %v2179_v39, %v2183_v42  ;;  %10359 = vst [vmem:[#allocation320_spill] sm:$0xff] %v7972_v26 }
 0x22d   :  { %3765 = vmatpush1.bf16.msra.mxu0 %v7639_v4  ;;  %3796 = vmatprep.mubr.bf16.mxu0 %v7926_v17 }
 0x22e   :  { %3766 = vmatprep.subr.bf16.mxu0 %v7930_v6  ;;  %3992 = vmatpush2.bf16.msra.mxu1 %v7934_v37  ;;  %10355 = vst [vmem:[#allocation316_spill] sm:$0xff] %v7957_v14  ;;  %v2175_v37 = vld [vmem:[#allocation8 + $0x8e8] sm:$0xff]  ;;  %10358 = vst [vmem:[#allocation319_spill] sm:$0xff] %v7966_v33 }
 0x22f   :  { %3993 = vmatprep.subr.bf16.mxu1 %v7938_v43  ;;  %v7963_v43 = vcombine.high %v2349_v35, %v2353_v49  ;;  %v7978_v42 = vcombine.low %v2171_v2, %v2175_v37  ;;  %v2155_v49 = vld [vmem:[#allocation8 + $0x848] sm:$0xff] }
 0x230   :  { %v2159_v35 = vld [vmem:[#allocation8 + $0x868] sm:$0xff] }
 0x231   :  { %3767 = vmatpush1.bf16.msra.mxu0 %v7942_v9  ;;  %10357 = vst [vmem:[#allocation318_spill] sm:$0xff] %v7963_v43  ;;  %10361 = vst [vmem:[#allocation322_spill] sm:$0xff] %v7978_v42 }
 0x232   :  { %3768 = vmatprep.subr.bf16.mxu0 %v7945_v20  ;;  %3994 = vmatpush2.bf16.msra.mxu1 %v7948_v60  ;;  %v7969_v20 = vcombine.high %v2171_v2, %v2175_v37  ;;  %v2167_v60 = vld [vmem:[#allocation8 + $0x8a8] sm:$0xff]  ;;  %v7991_v37 = vcombine.high %v2155_v49, %v2159_v35 }
 0x233   :  { %3995 = vmatprep.subr.bf16.mxu1 %v7951_v12  ;;  %v7975_v12 = vcombine.high %v2341_v11, %v2345_v19  ;;  %v7981_v39 = vcombine.high %v2163_v62, %v2167_v60  ;;  %v2147_v2 = vld [vmem:[#allocation8 + $0x808] sm:$0xff] }
 0x235   :  { %3769 = vmatpush1.bf16.msra.mxu0 %v7954_v51  ;;  %10360 = vst [vmem:[#allocation321_spill] sm:$0xff] %v7975_v12 }
 0x236   :  { %3770 = vmatprep.subr.bf16.mxu0 %v7957_v14  ;;  %3996 = vmatpush2.bf16.msra.mxu1 %v7960_v57  ;;  %v7984_v14 = vcombine.low %v2341_v11, %v2345_v19  ;;  %v2151_v57 = vld [vmem:[#allocation8 + $0x828] sm:$0xff]  ;;  %v7996_v19 = vcombine.low %v2155_v49, %v2159_v35 }
 0x237   :  { %3997 = vmatprep.subr.bf16.mxu1 %v7963_v43  ;;  %v7988_v43 = vcombine.low %v2163_v62, %v2167_v60  ;;  %v8000_v60 = vcombine.high %v2147_v2, %v2151_v57  ;;  %v2267_v11 = vld [vmem:[#allocation8 + $0xbc8] sm:$0xff] }
 0x238   :  { %10362 = vst [vmem:[#allocation323_spill] sm:$0xff] %v7984_v14  ;;  %10364 = vst [vmem:[#allocation325_spill] sm:$0xff] %v7996_v19  ;;  %v2271_v62 = vld [vmem:[#allocation8 + $0xbe8] sm:$0xff] }
 0x239   :  { %3771 = vmatpush1.bf16.msra.mxu0 %v7966_v33  ;;  %10363 = vst [vmem:[#allocation324_spill] sm:$0xff] %v7988_v43  ;;  %10365 = vst [vmem:[#allocation326_spill] sm:$0xff] %v8000_v60  ;;  %v8009_v49 = vcombine.high %v2267_v11, %v2271_v62  ;;  %v2263_v35 = vld [vmem:[#allocation8 + $0xba8] sm:$0xff] }
 0x23a   :  { %3772 = vmatprep.subr.bf16.mxu0 %v7969_v20  ;;  %3998 = vmatpush2.bf16.msra.mxu1 %v7972_v26  ;;  %v2192_v26 = vld [vmem:[#allocation8 + $0x970] sm:$0xff] }
 0x23b   :  { %3999 = vmatprep.subr.bf16.mxu1 %v7975_v12  ;;  %10367 = vst [vmem:[#allocation328_spill] sm:$0xff] %v8009_v49 }
 0x23d   :  { %3773 = vmatpush1.bf16.msra.mxu0 %v7978_v42 }
 0x23e   :  { %3774 = vmatprep.subr.bf16.mxu0 %v7981_v39  ;;  %4000 = vmatpush2.bf16.msra.mxu1 %v7984_v14 }
 0x23f   :  { %4099 = vmatprep.subr.bf16.mxu1 %v6967_v22  ;;  %v8006_v22 = vcombine.low %v2147_v2, %v2151_v57  ;;  %v2251_v57 = vld [vmem:[#allocation8 + $0xb48] sm:$0xff] }
 0x240   :  { %v2255_v2 = vld [vmem:[#allocation8 + $0xb68] sm:$0xff] }
 0x241   :  { %3775 = vmatpush1.bf16.msra.mxu0 %v7988_v43  ;;  %4002 = vmatmul.mubr.bf16.vlgmr.msra.gmra.mxu1 %v10230_v45  ;;  %10366 = vst [vmem:[#allocation327_spill] sm:$0xff] %v8006_v22  ;;  %v2259_v45 = vld [vmem:[#allocation8 + $0xb88] sm:$0xff]  ;;  %v8072_v14 = vpop.f32.mrf.mxu1 }
 0x242   :  { %3776 = vmatprep.subr.bf16.mxu0 %v7991_v37  ;;  %4100 = vmatpush1.bf16.msra.mxu1 %v6972_v30  ;;  %v8014_v30 = vcombine.low %v2267_v11, %v2271_v62  ;;  %v2243_v11 = vld [vmem:[#allocation8 + $0xb08] sm:$0xff] }
 0x243   :  { %4131 = vmatprep.mubr.bf16.mxu1 %v7926_v17  ;;  %4101 = vmatprep.subr.bf16.mxu1 %v6977_v32  ;;  %v8017_v32 = vcombine.high %v2259_v45, %v2263_v35  ;;  %v2247_v62 = vld [vmem:[#allocation8 + $0xb28] sm:$0xff]  ;;  %v8078_v12 = vpop.f32.mrf.mxu1 }
 0x244   :  { %10368 = vst [vmem:[#allocation329_spill] sm:$0xff] %v8014_v30 }
 0x245   :  { %3777 = vmatpush1.bf16.msra.mxu0 %v7996_v19  ;;  %10369 = vst [vmem:[#allocation330_spill] sm:$0xff] %v8017_v32 }
 0x246   :  { %3778 = vmatprep.subr.bf16.mxu0 %v8000_v60  ;;  %4102 = vmatpush1.bf16.msra.mxu1 %v6986_v38  ;;  %v8022_v38 = vcombine.low %v2259_v45, %v2263_v35  ;;  %v2235_v45 = vld [vmem:[#allocation8 + $0xac8] sm:$0xff] }
 0x247   :  { %4103 = vmatprep.subr.bf16.mxu1 %v6991_v40  ;;  %v8025_v40 = vcombine.high %v2251_v57, %v2255_v2  ;;  %v2239_v35 = vld [vmem:[#allocation8 + $0xae8] sm:$0xff] }
 0x248   :  { %10370 = vst [vmem:[#allocation331_spill] sm:$0xff] %v8022_v38 }
 0x249   :  { %3779 = vmatpush1.bf16.msra.mxu0 %v8006_v22  ;;  %10371 = vst [vmem:[#allocation332_spill] sm:$0xff] %v8025_v40 }
 0x24a   :  { %3780 = vmatprep.subr.bf16.mxu0 %v8009_v49  ;;  %4104 = vmatpush1.bf16.msra.mxu1 %v7000_v46  ;;  %v8030_v46 = vcombine.low %v2251_v57, %v2255_v2  ;;  %v2227_v57 = vld [vmem:[#allocation8 + $0xa88] sm:$0xff] }
 0x24b   :  { %4105 = vmatprep.subr.bf16.mxu1 %v7005_v48  ;;  %v8033_v48 = vcombine.high %v2243_v11, %v2247_v62  ;;  %v2231_v2 = vld [vmem:[#allocation8 + $0xaa8] sm:$0xff] }
 0x24c   :  { %10372 = vst [vmem:[#allocation333_spill] sm:$0xff] %v8030_v46 }
 0x24d   :  { %3781 = vmatpush2.bf16.msra.mxu0 %v8014_v30  ;;  %10373 = vst [vmem:[#allocation334_spill] sm:$0xff] %v8033_v48 }
 0x24e   :  { %3782 = vmatprep.subr.bf16.mxu0 %v8017_v32  ;;  %4106 = vmatpush1.bf16.msra.mxu1 %v7012_v54  ;;  %v8038_v54 = vcombine.low %v2243_v11, %v2247_v62  ;;  %v2219_v11 = vld [vmem:[#allocation8 + $0xa48] sm:$0xff] }
 0x24f   :  { %4107 = vmatprep.subr.bf16.mxu1 %v7017_v55  ;;  %v8041_v55 = vcombine.high %v2235_v45, %v2239_v35  ;;  %v2223_v62 = vld [vmem:[#allocation8 + $0xa68] sm:$0xff] }
 0x250   :  { %10374 = vst [vmem:[#allocation335_spill] sm:$0xff] %v8038_v54 }
 0x251   :  { %3783 = vmatpush2.bf16.msra.mxu0 %v8022_v38  ;;  %10375 = vst [vmem:[#allocation336_spill] sm:$0xff] %v8041_v55 }
 0x252   :  { %3784 = vmatprep.subr.bf16.mxu0 %v8025_v40  ;;  %4108 = vmatpush1.bf16.msra.mxu1 %v7024_v61  ;;  %v8046_v61 = vcombine.low %v2235_v45, %v2239_v35  ;;  %v2211_v45 = vld [vmem:[#allocation8 + $0xa08] sm:$0xff] }
 0x253   :  { %4109 = vmatprep.subr.bf16.mxu1 %v7029_v63  ;;  %v8049_v63 = vcombine.high %v2227_v57, %v2231_v2  ;;  %v2215_v35 = vld [vmem:[#allocation8 + $0xa28] sm:$0xff] }
 0x254   :  { %10376 = vst [vmem:[#allocation337_spill] sm:$0xff] %v8046_v61 }
 0x255   :  { %3785 = vmatpush2.bf16.msra.mxu0 %v8030_v46  ;;  %10377 = vst [vmem:[#allocation338_spill] sm:$0xff] %v8049_v63 }
 0x256   :  { %3786 = vmatprep.subr.bf16.mxu0 %v8033_v48  ;;  %4110 = vmatpush1.bf16.msra.mxu1 %v7036_v5  ;;  %v8054_v5 = vcombine.low %v2227_v57, %v2231_v2  ;;  %v2204_v57 = vld [vmem:[#allocation8 + $0x9d0] sm:$0xff] }
 0x257   :  { %4111 = vmatprep.subr.bf16.mxu1 %v7041_v7  ;;  %v8057_v7 = vcombine.high %v2219_v11, %v2223_v62  ;;  %v2208_v2 = vld [vmem:[#allocation8 + $0x9f0] sm:$0xff] }
 0x258   :  { %10378 = vst [vmem:[#allocation339_spill] sm:$0xff] %v8054_v5 }
 0x259   :  { %3787 = vmatpush2.bf16.msra.mxu0 %v8038_v54  ;;  %10379 = vst [vmem:[#allocation340_spill] sm:$0xff] %v8057_v7 }
 0x25a   :  { %3788 = vmatprep.subr.bf16.mxu0 %v8041_v55  ;;  %4112 = vmatpush1.bf16.msra.mxu1 %v7048_v13  ;;  %v8062_v13 = vcombine.low %v2219_v11, %v2223_v62  ;;  %v8075_v11 = vcombine.high %v2204_v57, %v2208_v2  ;;  %v2196_v62 = vld [vmem:[#allocation8 + $0x990] sm:$0xff] }
 0x25b   :  { %4113 = vmatprep.subr.bf16.mxu1 %v7053_v15  ;;  %v8065_v15 = vcombine.high %v2211_v45, %v2215_v35 }
 0x25c   :  { %10380 = vst [vmem:[#allocation341_spill] sm:$0xff] %v8062_v13  ;;  %10383 = vst [vmem:[#allocation344_spill] sm:$0xff] %v8075_v11 }
 0x25d   :  { %3789 = vmatpush2.bf16.msra.mxu0 %v8046_v61  ;;  %10381 = vst [vmem:[#allocation342_spill] sm:$0xff] %v8065_v15 }
 0x25e   :  { %3790 = vmatprep.subr.bf16.mxu0 %v8049_v63  ;;  %4114 = vmatpush1.bf16.msra.mxu1 %v7060_v25  ;;  %v8070_v25 = vcombine.low %v2211_v45, %v2215_v35  ;;  %v3761_v45 = vpop.f32.mrf.mxu1 }
 0x25f   :  { %4115 = vmatprep.subr.bf16.mxu1 %v7065_v27  ;;  %v2200_v27 = vld [vmem:[#allocation8 + $0x9b0] sm:$0xff] }
 0x260   :  { %10382 = vst [vmem:[#allocation343_spill] sm:$0xff] %v8070_v25  ;;  %v8085_v35 = vcombine.high %v2196_v62, %v2200_v27  ;;  %v2180_v45 = vld [vmem:[#allocation8 + $0x910] sm:$0xff] }
 0x261   :  { %3791 = vmatpush2.bf16.msra.mxu0 %v8054_v5 }
 0x262   :  { %3792 = vmatprep.subr.bf16.mxu0 %v8057_v7  ;;  %4116 = vmatpush2.bf16.msra.mxu1 %v7072_v41  ;;  %10385 = vst [vmem:[#allocation346_spill] sm:$0xff] %v8085_v35  ;;  %v2188_v41 = vld [vmem:[#allocation8 + $0x950] sm:$0xff] }
 0x263   :  { %4117 = vmatprep.subr.bf16.mxu1 %v7077_v23  ;;  %v8082_v23 = vcombine.low %v2204_v57, %v2208_v2  ;;  %v8092_v57 = vcombine.low %v2196_v62, %v2200_v27  ;;  %v8095_v2 = vcombine.high %v2188_v41, %v2192_v26  ;;  %v2172_v27 = vld [vmem:[#allocation8 + $0x8d0] sm:$0xff] }
 0x264   :  { %v2176_v62 = vld [vmem:[#allocation8 + $0x8f0] sm:$0xff] }
 0x265   :  { %3793 = vmatpush2.bf16.msra.mxu0 %v8062_v13  ;;  %10384 = vst [vmem:[#allocation345_spill] sm:$0xff] %v8082_v23  ;;  %10386 = vst [vmem:[#allocation347_spill] sm:$0xff] %v8092_v57 }
 0x266   :  { %3794 = vmatprep.subr.bf16.mxu0 %v8065_v15  ;;  %4118 = vmatpush2.bf16.msra.mxu1 %v7084_v56  ;;  %v3762_v56 = vpop.f32.mrf.mxu1  ;;  %10387 = vst [vmem:[#allocation348_spill] sm:$0xff] %v8095_v2  ;;  %v10562_v15 = vld [vmem:[#allocation113_spill] sm:$0xff] }
 0x267   :  { %4119 = vmatprep.subr.bf16.mxu1 %v7089_v58  ;;  %v8100_v56 = vcombine.low %v2188_v41, %v2192_v26  ;;  %v2164_v41 = vld [vmem:[#allocation8 + $0x890] sm:$0xff] }
 0x268   :  { %v2168_v26 = vld [vmem:[#allocation8 + $0x8b0] sm:$0xff] }
 0x269   :  { %3795 = vmatpush2.bf16.msra.mxu0 %v8070_v25  ;;  %10388 = vst [vmem:[#allocation349_spill] sm:$0xff] %v8100_v56  ;;  %v2152_v58 = vld [vmem:[#allocation8 + $0x830] sm:$0xff]  ;;  %v10560_v25 = vld [vmem:[#allocation259_spill] sm:$0xff] }
 0x26a   :  { %3846 = vmatprep.subr.bf16.mxu0 %v8075_v11  ;;  %4120 = vmatpush2.bf16.msra.mxu1 %v7096_v8  ;;  %v2184_v8 = vld [vmem:[#allocation8 + $0x930] sm:$0xff] }
 0x26b   :  { %4121 = vmatprep.subr.bf16.mxu1 %v7101_v10  ;;  %v8103_v10 = vcombine.high %v2180_v45, %v2184_v8  ;;  %v10558_v11 = vld [vmem:[#allocation109_spill] sm:$0xff] }
 0x26c   :  { %3797 = vmatmul.mubr.bf16.vlgmr.msra.gmra.mxu0 %v7928_v36 }
 0x26d   :  { %3847 = vmatpush1.bf16.msra.mxu0 %v8082_v23  ;;  %3878 = vmatprep.mubr.bf16.mxu0 %v7926_v17  ;;  %10389 = vst [vmem:[#allocation350_spill] sm:$0xff] %v8103_v10  ;;  %v10556_v23 = vld [vmem:[#allocation105_spill] sm:$0xff] }
 0x26e   :  { %3848 = vmatprep.subr.bf16.mxu0 %v8085_v35  ;;  %4122 = vmatpush2.bf16.msra.mxu1 %v7108_v28  ;;  %v8108_v28 = vcombine.low %v2180_v45, %v2184_v8  ;;  %v2156_v8 = vld [vmem:[#allocation8 + $0x850] sm:$0xff]  ;;  %v10469_v35 = vld [vmem:[#allocation151_spill] sm:$0xff] }
 0x26f   :  { %4123 = vmatprep.subr.bf16.mxu1 %v7113_v34  ;;  %v8111_v34 = vcombine.high %v2172_v27, %v2176_v62  ;;  %v2160_v45 = vld [vmem:[#allocation8 + $0x870] sm:$0xff] }
 0x270   :  { %10390 = vst [vmem:[#allocation351_spill] sm:$0xff] %v8108_v28 }
 0x271   :  { %3849 = vmatpush1.bf16.msra.mxu0 %v8092_v57  ;;  %10391 = vst [vmem:[#allocation352_spill] sm:$0xff] %v8111_v34 }
 0x272   :  { %3850 = vmatprep.subr.bf16.mxu0 %v8095_v2  ;;  %4124 = vmatpush2.bf16.msra.mxu1 %v7120_v59  ;;  %v8116_v59 = vcombine.low %v2172_v27, %v2176_v62  ;;  %v10396_v27 = vld [vmem:[#allocation82_spill] sm:$0xff]  ;;  %v2148_v62 = vld [vmem:[#allocation8 + $0x810] sm:$0xff] }
 0x273   :  { %4125 = vmatprep.subr.bf16.mxu1 %v7125_v1  ;;  %v8119_v1 = vcombine.high %v2164_v41, %v2168_v26  ;;  %v10468_v2 = vld [vmem:[#allocation150_spill] sm:$0xff] }
 0x274   :  { %10392 = vst [vmem:[#allocation353_spill] sm:$0xff] %v8116_v59 }
 0x275   :  { %3851 = vmatpush1.bf16.msra.mxu0 %v8100_v56  ;;  %10393 = vst [vmem:[#allocation354_spill] sm:$0xff] %v8119_v1  ;;  %v10441_v56 = vld [vmem:[#allocation128_spill] sm:$0xff] }
 0x276   :  { %3852 = vmatprep.subr.bf16.mxu0 %v8103_v10  ;;  %4126 = vmatpush2.bf16.msra.mxu1 %v7132_v16  ;;  %v8124_v16 = vcombine.low %v2164_v41, %v2168_v26  ;;  %v8136_v41 = vcombine.high %v2148_v62, %v2152_v58  ;;  %v10400_v26 = vld [vmem:[#allocation86_spill] sm:$0xff] }
 0x277   :  { %4127 = vmatprep.subr.bf16.mxu1 %v7137_v18  ;;  %v8127_v18 = vcombine.high %v2156_v8, %v2160_v45  ;;  %v2193_v10 = vld [vmem:[#allocation8 + $0x978] sm:$0xff] }
 0x278   :  { %10394 = vst [vmem:[#allocation355_spill] sm:$0xff] %v8124_v16  ;;  %10399 = vst [vmem:[#allocation358_spill] sm:$0xff] %v8136_v41 }
 0x279   :  { %3853 = vmatpush1.bf16.msra.mxu0 %v8108_v28  ;;  %10395 = vst [vmem:[#allocation356_spill] sm:$0xff] %v8127_v18 }
 0x27a   :  { %3854 = vmatprep.subr.bf16.mxu0 %v8111_v34  ;;  %4128 = vmatpush2.bf16.msra.mxu1 %v7144_v44  ;;  %v10397_v34 = vld [vmem:[#allocation84_spill] sm:$0xff]  ;;  %v8132_v44 = vcombine.low %v2156_v8, %v2160_v45  ;;  %v10404_v45 = vld [vmem:[#allocation90_spill] sm:$0xff] }
 0x27b   :  { %4129 = vmatprep.subr.bf16.mxu1 %v7149_v50  ;;  %v2268_v50 = vld [vmem:[#allocation8 + $0xbd0] sm:$0xff] }
 0x27c   :  { %10398 = vst [vmem:[#allocation357_spill] sm:$0xff] %v8132_v44 }
 0x27d   :  { %3855 = vmatpush1.bf16.msra.mxu0 %v8116_v59  ;;  %v10405_v59 = vld [vmem:[#allocation92_spill] sm:$0xff] }
 0x27e   :  { %3856 = vmatprep.subr.bf16.mxu0 %v8119_v1  ;;  %4130 = vmatpush2.bf16.msra.mxu1 %v10396_v27  ;;  %v2272_v27 = vld [vmem:[#allocation8 + $0xbf0] sm:$0xff] }
 0x27f   :  { %4181 = vmatprep.subr.bf16.mxu1 %v10397_v34  ;;  %v10401_v1 = vld [vmem:[#allocation88_spill] sm:$0xff]  ;;  %v8142_v34 = vcombine.low %v2148_v62, %v2152_v58  ;;  %v8145_v8 = vcombine.high %v2268_v50, %v2272_v27  ;;  %v10408_v58 = vld [vmem:[#allocation94_spill] sm:$0xff] }
 0x280   :  { %v2252_v62 = vld [vmem:[#allocation8 + $0xb50] sm:$0xff] }
 0x281   :  { %3857 = vmatpush1.bf16.msra.mxu0 %v8124_v16  ;;  %4132 = vmatmul.mubr.bf16.vlgmr.msra.gmra.mxu1 %v7928_v36  ;;  %10402 = vst [vmem:[#allocation359_spill] sm:$0xff] %v8142_v34  ;;  %10403 = vst [vmem:[#allocation360_spill] sm:$0xff] %v8145_v8  ;;  %v2264_v16 = vld [vmem:[#allocation8 + $0xbb0] sm:$0xff]  ;;  %v8208_v28 = vpop.f32.mrf.mxu1 }
 0x282   :  { %3858 = vmatprep.subr.bf16.mxu0 %v8127_v18  ;;  %4182 = vmatpush1.bf16.msra.mxu1 %v10400_v26  ;;  %v2260_v18 = vld [vmem:[#allocation8 + $0xb90] sm:$0xff]  ;;  %v8150_v26 = vcombine.low %v2268_v50, %v2272_v27  ;;  %v10412_v50 = vld [vmem:[#allocation98_spill] sm:$0xff] }
 0x283   :  { %4213 = vmatprep.mubr.bf16.mxu1 %v7926_v17  ;;  %4183 = vmatprep.subr.bf16.mxu1 %v10401_v1  ;;  %v8153_v1 = vcombine.high %v2260_v18, %v2264_v16  ;;  %v2244_v27 = vld [vmem:[#allocation8 + $0xb10] sm:$0xff] }
 0x284   :  { %10406 = vst [vmem:[#allocation361_spill] sm:$0xff] %v8150_v26 }
 0x285   :  { %3859 = vmatpush1.bf16.msra.mxu0 %v8132_v44  ;;  %10407 = vst [vmem:[#allocation362_spill] sm:$0xff] %v8153_v1  ;;  %v10409_v44 = vld [vmem:[#allocation96_spill] sm:$0xff] }
 0x286   :  { %3860 = vmatprep.subr.bf16.mxu0 %v8136_v41  ;;  %4184 = vmatpush1.bf16.msra.mxu1 %v10404_v45  ;;  %v2256_v41 = vld [vmem:[#allocation8 + $0xb70] sm:$0xff]  ;;  %v8158_v45 = vcombine.low %v2260_v18, %v2264_v16  ;;  %v10416_v16 = vld [vmem:[#allocation102_spill] sm:$0xff] }
 0x287   :  { %4185 = vmatprep.subr.bf16.mxu1 %v10405_v59  ;;  %v8161_v59 = vcombine.high %v2252_v62, %v2256_v41  ;;  %v2236_v18 = vld [vmem:[#allocation8 + $0xad0] sm:$0xff] }
 0x288   :  { %10410 = vst [vmem:[#allocation363_spill] sm:$0xff] %v8158_v45 }
 0x289   :  { %3861 = vmatpush1.bf16.msra.mxu0 %v8142_v34  ;;  %10411 = vst [vmem:[#allocation364_spill] sm:$0xff] %v8161_v59  ;;  %v10413_v34 = vld [vmem:[#allocation100_spill] sm:$0xff] }
 0x28a   :  { %3862 = vmatprep.subr.bf16.mxu0 %v8145_v8  ;;  %4186 = vmatpush1.bf16.msra.mxu1 %v10408_v58  ;;  %v2248_v8 = vld [vmem:[#allocation8 + $0xb30] sm:$0xff]  ;;  %v8166_v58 = vcombine.low %v2252_v62, %v2256_v41  ;;  %v10420_v41 = vld [vmem:[#allocation106_spill] sm:$0xff] }
 0x28b   :  { %4187 = vmatprep.subr.bf16.mxu1 %v10409_v44  ;;  %v8169_v44 = vcombine.high %v2244_v27, %v2248_v8  ;;  %v2228_v62 = vld [vmem:[#allocation8 + $0xa90] sm:$0xff] }
 0x28c   :  { %10414 = vst [vmem:[#allocation365_spill] sm:$0xff] %v8166_v58 }
 0x28d   :  { %3863 = vmatpush2.bf16.msra.mxu0 %v8150_v26  ;;  %10415 = vst [vmem:[#allocation366_spill] sm:$0xff] %v8169_v44  ;;  %v10417_v26 = vld [vmem:[#allocation104_spill] sm:$0xff] }
 0x28e   :  { %3864 = vmatprep.subr.bf16.mxu0 %v8153_v1  ;;  %4188 = vmatpush1.bf16.msra.mxu1 %v10412_v50  ;;  %v2240_v1 = vld [vmem:[#allocation8 + $0xaf0] sm:$0xff]  ;;  %v8174_v50 = vcombine.low %v2244_v27, %v2248_v8  ;;  %v10424_v8 = vld [vmem:[#allocation110_spill] sm:$0xff] }
 0x28f   :  { %4189 = vmatprep.subr.bf16.mxu1 %v10413_v34  ;;  %v8177_v34 = vcombine.high %v2236_v18, %v2240_v1  ;;  %v2220_v27 = vld [vmem:[#allocation8 + $0xa50] sm:$0xff] }
 0x290   :  { %10418 = vst [vmem:[#allocation367_spill] sm:$0xff] %v8174_v50 }
 0x291   :  { %3865 = vmatpush2.bf16.msra.mxu0 %v8158_v45  ;;  %10419 = vst [vmem:[#allocation368_spill] sm:$0xff] %v8177_v34  ;;  %v10421_v45 = vld [vmem:[#allocation108_spill] sm:$0xff] }
 0x292   :  { %3866 = vmatprep.subr.bf16.mxu0 %v8161_v59  ;;  %4190 = vmatpush1.bf16.msra.mxu1 %v10416_v16  ;;  %v2232_v59 = vld [vmem:[#allocation8 + $0xab0] sm:$0xff]  ;;  %v8182_v16 = vcombine.low %v2236_v18, %v2240_v1  ;;  %v10428_v1 = vld [vmem:[#allocation114_spill] sm:$0xff] }
 0x293   :  { %4191 = vmatprep.subr.bf16.mxu1 %v10417_v26  ;;  %v8185_v26 = vcombine.high %v2228_v62, %v2232_v59  ;;  %v2212_v18 = vld [vmem:[#allocation8 + $0xa10] sm:$0xff] }
 0x294   :  { %10422 = vst [vmem:[#allocation369_spill] sm:$0xff] %v8182_v16 }
 0x295   :  { %3867 = vmatpush2.bf16.msra.mxu0 %v8166_v58  ;;  %10423 = vst [vmem:[#allocation370_spill] sm:$0xff] %v8185_v26  ;;  %v10425_v58 = vld [vmem:[#allocation112_spill] sm:$0xff] }
 0x296   :  { %3868 = vmatprep.subr.bf16.mxu0 %v8169_v44  ;;  %4192 = vmatpush1.bf16.msra.mxu1 %v10420_v41  ;;  %v2224_v44 = vld [vmem:[#allocation8 + $0xa70] sm:$0xff]  ;;  %v8190_v41 = vcombine.low %v2228_v62, %v2232_v59  ;;  %v10432_v59 = vld [vmem:[#allocation118_spill] sm:$0xff] }
 0x297   :  { %4193 = vmatprep.subr.bf16.mxu1 %v10421_v45  ;;  %v8193_v45 = vcombine.high %v2220_v27, %v2224_v44  ;;  %v2205_v62 = vld [vmem:[#allocation8 + $0x9d8] sm:$0xff] }
 0x298   :  { %10426 = vst [vmem:[#allocation371_spill] sm:$0xff] %v8190_v41 }
 0x299   :  { %3869 = vmatpush2.bf16.msra.mxu0 %v8174_v50  ;;  %10427 = vst [vmem:[#allocation372_spill] sm:$0xff] %v8193_v45  ;;  %v10429_v50 = vld [vmem:[#allocation116_spill] sm:$0xff] }
 0x29a   :  { %3870 = vmatprep.subr.bf16.mxu0 %v8177_v34  ;;  %4194 = vmatpush1.bf16.msra.mxu1 %v10424_v8  ;;  %v2216_v34 = vld [vmem:[#allocation8 + $0xa30] sm:$0xff]  ;;  %v8198_v8 = vcombine.low %v2220_v27, %v2224_v44  ;;  %v10436_v27 = vld [vmem:[#allocation122_spill] sm:$0xff] }
 0x29b   :  { %4195 = vmatprep.subr.bf16.mxu1 %v10425_v58  ;;  %v8201_v58 = vcombine.high %v2212_v18, %v2216_v34 }
 0x29c   :  { %10430 = vst [vmem:[#allocation373_spill] sm:$0xff] %v8198_v8 }
 0x29d   :  { %3871 = vmatpush2.bf16.msra.mxu0 %v8182_v16  ;;  %10431 = vst [vmem:[#allocation374_spill] sm:$0xff] %v8201_v58  ;;  %v10433_v16 = vld [vmem:[#allocation120_spill] sm:$0xff] }
 0x29e   :  { %3872 = vmatprep.subr.bf16.mxu0 %v8185_v26  ;;  %4196 = vmatpush1.bf16.msra.mxu1 %v10428_v1  ;;  %v2209_v26 = vld [vmem:[#allocation8 + $0x9f8] sm:$0xff]  ;;  %v8206_v1 = vcombine.low %v2212_v18, %v2216_v34 }
 0x29f   :  { %4197 = vmatprep.subr.bf16.mxu1 %v10429_v50  ;;  %v8211_v44 = vcombine.high %v2205_v62, %v2209_v26  ;;  %v2197_v50 = vld [vmem:[#allocation8 + $0x998] sm:$0xff] }
 0x2a0   :  { %10434 = vst [vmem:[#allocation375_spill] sm:$0xff] %v8206_v1 }
 0x2a1   :  { %3873 = vmatpush2.bf16.msra.mxu0 %v8190_v41  ;;  %10435 = vst [vmem:[#allocation376_spill] sm:$0xff] %v8211_v44  ;;  %v8214_v41 = vpop.f32.mrf.mxu1 }
 0x2a2   :  { %3874 = vmatprep.subr.bf16.mxu0 %v8193_v45  ;;  %4198 = vmatpush2.bf16.msra.mxu1 %v10432_v59  ;;  %v2201_v45 = vld [vmem:[#allocation8 + $0x9b8] sm:$0xff]  ;;  %v10437_v59 = vld [vmem:[#allocation124_spill] sm:$0xff] }
 0x2a3   :  { %4199 = vmatprep.subr.bf16.mxu1 %v10433_v16  ;;  %v8218_v16 = vcombine.low %v2205_v62, %v2209_v26  ;;  %v3843_v34 = vpop.f32.mrf.mxu1  ;;  %v8221_v18 = vcombine.high %v2197_v50, %v2201_v45  ;;  %v8228_v26 = vcombine.low %v2197_v50, %v2201_v45  ;;  %v10448_v45 = vld [vmem:[#allocation134_spill] sm:$0xff] }
 0x2a4   :  { %v10444_v34 = vld [vmem:[#allocation130_spill] sm:$0xff] }
 0x2a5   :  { %3875 = vmatpush2.bf16.msra.mxu0 %v8198_v8  ;;  %10438 = vst [vmem:[#allocation377_spill] sm:$0xff] %v8218_v16  ;;  %10439 = vst [vmem:[#allocation378_spill] sm:$0xff] %v8221_v18  ;;  %v2189_v8 = vld [vmem:[#allocation8 + $0x958] sm:$0xff] }
 0x2a6   :  { %3876 = vmatprep.subr.bf16.mxu0 %v8201_v58  ;;  %4200 = vmatpush2.bf16.msra.mxu1 %v10436_v27  ;;  %v10440_v58 = vld [vmem:[#allocation126_spill] sm:$0xff]  ;;  %v3844_v27 = vpop.f32.mrf.mxu1  ;;  %10442 = vst [vmem:[#allocation379_spill] sm:$0xff] %v8228_v26  ;;  %v8231_v62 = vcombine.high %v2189_v8, %v2193_v10 }
 0x2a7   :  { %4201 = vmatprep.subr.bf16.mxu1 %v10437_v59  ;;  %v2185_v59 = vld [vmem:[#allocation8 + $0x938] sm:$0xff]  ;;  %v8236_v27 = vcombine.low %v2189_v8, %v2193_v10 }
 0x2a8   :  { %10443 = vst [vmem:[#allocation380_spill] sm:$0xff] %v8231_v62  ;;  %v2173_v50 = vld [vmem:[#allocation8 + $0x8d8] sm:$0xff] }
 0x2a9   :  { %3877 = vmatpush2.bf16.msra.mxu0 %v8206_v1  ;;  %10446 = vst [vmem:[#allocation381_spill] sm:$0xff] %v8236_v27  ;;  %v10452_v10 = vld [vmem:[#allocation138_spill] sm:$0xff]  ;;  %v10465_v1 = vld [vmem:[#allocation149_spill] sm:$0xff] }
 0x2aa   :  { %3928 = vmatprep.subr.bf16.mxu0 %v8211_v44  ;;  %4202 = vmatpush2.bf16.msra.mxu1 %v10440_v58  ;;  %v2181_v58 = vld [vmem:[#allocation8 + $0x918] sm:$0xff]  ;;  %v10445_v44 = vld [vmem:[#allocation132_spill] sm:$0xff] }
 0x2ab   :  { %4203 = vmatprep.subr.bf16.mxu1 %v10441_v56  ;;  %v8239_v56 = vcombine.high %v2181_v58, %v2185_v59  ;;  %v2165_v8 = vld [vmem:[#allocation8 + $0x898] sm:$0xff] }
 0x2ac   :  { %3879 = vmatmul.mubr.bf16.vlgmr.msra.gmra.mxu0 %v7928_v36 }
 0x2ad   :  { %3929 = vmatpush1.bf16.msra.mxu0 %v8218_v16  ;;  %3960 = vmatprep.mubr.bf16.mxu0 %v7926_v17  ;;  %10447 = vst [vmem:[#allocation382_spill] sm:$0xff] %v8239_v56  ;;  %v10449_v16 = vld [vmem:[#allocation136_spill] sm:$0xff] }
 0x2ae   :  { %3930 = vmatprep.subr.bf16.mxu0 %v8221_v18  ;;  %4204 = vmatpush2.bf16.msra.mxu1 %v10444_v34  ;;  %v2177_v18 = vld [vmem:[#allocation8 + $0x8f8] sm:$0xff]  ;;  %v8244_v34 = vcombine.low %v2181_v58, %v2185_v59 }
 0x2af   :  { %4205 = vmatprep.subr.bf16.mxu1 %v10445_v44  ;;  %v8247_v44 = vcombine.high %v2173_v50, %v2177_v18  ;;  %v10456_v58 = vld [vmem:[#allocation142_spill] sm:$0xff] }
 0x2b0   :  { %10450 = vst [vmem:[#allocation383_spill] sm:$0xff] %v8244_v34  ;;  %v2157_v59 = vld [vmem:[#allocation8 + $0x858] sm:$0xff] }
 0x2b1   :  { %3931 = vmatpush1.bf16.msra.mxu0 %v8228_v26  ;;  %10451 = vst [vmem:[#allocation384_spill] sm:$0xff] %v8247_v44  ;;  %v10453_v26 = vld [vmem:[#allocation140_spill] sm:$0xff] }
 0x2b2   :  { %3932 = vmatprep.subr.bf16.mxu0 %v8231_v62  ;;  %4206 = vmatpush2.bf16.msra.mxu1 %v10448_v45  ;;  %v2169_v62 = vld [vmem:[#allocation8 + $0x8b8] sm:$0xff]  ;;  %v8252_v45 = vcombine.low %v2173_v50, %v2177_v18 }
 0x2b3   :  { %4207 = vmatprep.subr.bf16.mxu1 %v10449_v16  ;;  %v8255_v16 = vcombine.high %v2165_v8, %v2169_v62  ;;  %v10460_v18 = vld [vmem:[#allocation146_spill] sm:$0xff] }
 0x2b4   :  { %10454 = vst [vmem:[#allocation385_spill] sm:$0xff] %v8252_v45  ;;  %v2149_v50 = vld [vmem:[#allocation8 + $0x818] sm:$0xff] }
 0x2b5   :  { %3933 = vmatpush1.bf16.msra.mxu0 %v8236_v27  ;;  %10455 = vst [vmem:[#allocation386_spill] sm:$0xff] %v8255_v16  ;;  %v10457_v27 = vld [vmem:[#allocation144_spill] sm:$0xff] }
 0x2b6   :  { %3934 = vmatprep.subr.bf16.mxu0 %v8239_v56  ;;  %4208 = vmatpush2.bf16.msra.mxu1 %v10452_v10  ;;  %v2161_v56 = vld [vmem:[#allocation8 + $0x878] sm:$0xff]  ;;  %v8260_v10 = vcombine.low %v2165_v8, %v2169_v62 }
 0x2b7   :  { %4209 = vmatprep.subr.bf16.mxu1 %v10453_v26  ;;  %v8263_v26 = vcombine.high %v2157_v59, %v2161_v56 }
 0x2b8   :  { %10458 = vst [vmem:[#allocation387_spill] sm:$0xff] %v8260_v10 }
 0x2b9   :  { %3935 = vmatpush1.bf16.msra.mxu0 %v8244_v34  ;;  %10459 = vst [vmem:[#allocation388_spill] sm:$0xff] %v8263_v26  ;;  %v10461_v34 = vld [vmem:[#allocation147_spill] sm:$0xff] }
 0x2ba   :  { %3936 = vmatprep.subr.bf16.mxu0 %v8247_v44  ;;  %4210 = vmatpush2.bf16.msra.mxu1 %v10456_v58  ;;  %v2153_v44 = vld [vmem:[#allocation8 + $0x838] sm:$0xff]  ;;  %v8268_v58 = vcombine.low %v2157_v59, %v2161_v56 }
 0x2bb   :  { %4211 = vmatprep.subr.bf16.mxu1 %v10457_v27  ;;  %v8272_v62 = vcombine.high %v2149_v50, %v2153_v44  ;;  %v2269_v27 = vld [vmem:[#allocation8 + $0xbd8] sm:$0xff]  ;;  %v8281_v56 = vcombine.low %v2149_v50, %v2153_v44 }
 0x2bc   :  { %10462 = vst [vmem:[#allocation389_spill] sm:$0xff] %v8268_v58  ;;  %v2253_v50 = vld [vmem:[#allocation8 + $0xb58] sm:$0xff] }
 0x2bd   :  { %3937 = vmatpush1.bf16.msra.mxu0 %v8252_v45  ;;  %10463 = vst [vmem:[#allocation390_spill] sm:$0xff] %v8272_v62  ;;  %v10464_v45 = vld [vmem:[#allocation148_spill] sm:$0xff]  ;;  %10466 = vst [vmem:[#allocation391_spill] sm:$0xff] %v8281_v56 }
 0x2be   :  { %3938 = vmatprep.subr.bf16.mxu0 %v8255_v16  ;;  %4212 = vmatpush2.bf16.msra.mxu1 %v10460_v18  ;;  %v2273_v16 = vld [vmem:[#allocation8 + $0xbf8] sm:$0xff] }
 0x2bf   :  { %4371 = vmatprep.subr.bf16.mxu1 %v10461_v34  ;;  %v8284_v59 = vcombine.high %v2269_v27, %v2273_v16 }
 0x2c1   :  { %3939 = vmatpush1.bf16.msra.mxu0 %v8260_v10  ;;  %4214 = vmatmul.mubr.bf16.vlgmr.msra.gmra.mxu1 %v7928_v36  ;;  %v8274_v8 = vpop.f32.mrf.mxu1  ;;  %10467 = vst [vmem:[#allocation392_spill] sm:$0xff] %v8284_v59  ;;  %v2265_v10 = vld [vmem:[#allocation8 + $0xbb8] sm:$0xff] }
 0x2c2   :  { %3940 = vmatprep.subr.bf16.mxu0 %v8263_v26  ;;  %4372 = vmatpush1.bf16.msra.mxu1 %v10464_v45  ;;  %v2261_v26 = vld [vmem:[#allocation8 + $0xb98] sm:$0xff]  ;;  %v8289_v45 = vcombine.low %v2269_v27, %v2273_v16 }
 0x2c3   :  { %v8277_v18 = vpop.f32.mrf.mxu1  ;;  %4373 = vmatprep.subr.bf16.mxu1 %v10465_v1  ;;  %v8292_v44 = vcombine.high %v2261_v26, %v2265_v10  ;;  %v2257_v1 = vld [vmem:[#allocation8 + $0xb78] sm:$0xff] }
 0x2c4   :  { %10470 = vst [vmem:[#allocation393_spill] sm:$0xff] %v8289_v45  ;;  %v2245_v16 = vld [vmem:[#allocation8 + $0xb18] sm:$0xff] }
 0x2c5   :  { %3941 = vmatpush1.bf16.msra.mxu0 %v8268_v58  ;;  %v3925_v34 = vpop.f32.mrf.mxu1  ;;  %10471 = vst [vmem:[#allocation394_spill] sm:$0xff] %v8292_v44  ;;  %v2249_v27 = vld [vmem:[#allocation8 + $0xb38] sm:$0xff]  ;;  %v10535_v58 = vld [vmem:[#allocation63_spill] sm:$0xff] }
 0x2c6   :  { %3942 = vmatprep.subr.bf16.mxu0 %v8272_v62  ;;  %4374 = vmatpush1.bf16.msra.mxu1 %v10468_v2  ;;  %v10472_v62 = vld [vmem:[#allocation152_spill] sm:$0xff]  ;;  %v10473_v34 = vld [vmem:[#allocation153_spill] sm:$0xff]  ;;  %v8297_v2 = vcombine.low %v2261_v26, %v2265_v10 }
 0x2c7   :  { %v3926_v57 = vpop.f32.mrf.mxu1  ;;  %4375 = vmatprep.subr.bf16.mxu1 %v10469_v35  ;;  %v10476_v35 = vld [vmem:[#allocation154_spill] sm:$0xff] }
 0x2c8   :  { %10474 = vst [vmem:[#allocation395_spill] sm:$0xff] %v8297_v2  ;;  %v8300_v57 = vcombine.high %v2253_v50, %v2257_v1  ;;  %v2237_v26 = vld [vmem:[#allocation8 + $0xad8] sm:$0xff] }
 0x2c9   :  { %3943 = vmatpush1.bf16.msra.mxu0 %v8281_v56  ;;  %v8305_v56 = vcombine.low %v2253_v50, %v2257_v1  ;;  %v2241_v10 = vld [vmem:[#allocation8 + $0xaf8] sm:$0xff] }
 0x2ca   :  { %3944 = vmatprep.subr.bf16.mxu0 %v8284_v59  ;;  %4376 = vmatpush1.bf16.msra.mxu1 %v10472_v62  ;;  %10475 = vst [vmem:[#allocation396_spill] sm:$0xff] %v8300_v57  ;;  %v10477_v59 = vld [vmem:[#allocation155_spill] sm:$0xff]  ;;  %v10480_v62 = vld [vmem:[#allocation156_spill] sm:$0xff]  ;;  %v2229_v1 = vld [vmem:[#allocation8 + $0xa98] sm:$0xff] }
 0x2cb   :  { %4377 = vmatprep.subr.bf16.mxu1 %v10473_v34  ;;  %10478 = vst [vmem:[#allocation397_spill] sm:$0xff] %v8305_v56  ;;  %v8308_v34 = vcombine.high %v2245_v16, %v2249_v27  ;;  %v2233_v50 = vld [vmem:[#allocation8 + $0xab8] sm:$0xff] }
 0x2cd   :  { %3945 = vmatpush2.bf16.msra.mxu0 %v8289_v45  ;;  %10479 = vst [vmem:[#allocation398_spill] sm:$0xff] %v8308_v34  ;;  %v8313_v45 = vcombine.low %v2245_v16, %v2249_v27  ;;  %v2221_v16 = vld [vmem:[#allocation8 + $0xa58] sm:$0xff] }
 0x2ce   :  { %3946 = vmatprep.subr.bf16.mxu0 %v8292_v44  ;;  %4378 = vmatpush1.bf16.msra.mxu1 %v10476_v35  ;;  %v10481_v44 = vld [vmem:[#allocation157_spill] sm:$0xff]  ;;  %v10484_v35 = vld [vmem:[#allocation158_spill] sm:$0xff] }
 0x2cf   :  { %4379 = vmatprep.subr.bf16.mxu1 %v10477_v59  ;;  %10482 = vst [vmem:[#allocation399_spill] sm:$0xff] %v8313_v45  ;;  %v8316_v59 = vcombine.high %v2237_v26, %v2241_v10  ;;  %v2225_v27 = vld [vmem:[#allocation8 + $0xa78] sm:$0xff] }
 0x2d1   :  { %3947 = vmatpush2.bf16.msra.mxu0 %v8297_v2  ;;  %10483 = vst [vmem:[#allocation400_spill] sm:$0xff] %v8316_v59  ;;  %v8321_v2 = vcombine.low %v2237_v26, %v2241_v10  ;;  %v2213_v26 = vld [vmem:[#allocation8 + $0xa18] sm:$0xff] }
 0x2d2   :  { %3948 = vmatprep.subr.bf16.mxu0 %v8300_v57  ;;  %4380 = vmatpush1.bf16.msra.mxu1 %v10480_v62  ;;  %v10485_v57 = vld [vmem:[#allocation159_spill] sm:$0xff]  ;;  %v10488_v62 = vld [vmem:[#allocation160_spill] sm:$0xff]  ;;  %v2217_v10 = vld [vmem:[#allocation8 + $0xa38] sm:$0xff] }
 0x2d3   :  { %4381 = vmatprep.subr.bf16.mxu1 %v10481_v44  ;;  %10486 = vst [vmem:[#allocation401_spill] sm:$0xff] %v8321_v2  ;;  %v8324_v44 = vcombine.high %v2229_v1, %v2233_v50 }
 0x2d5   :  { %3949 = vmatpush2.bf16.msra.mxu0 %v8305_v56  ;;  %10487 = vst [vmem:[#allocation402_spill] sm:$0xff] %v8324_v44  ;;  %v8329_v56 = vcombine.low %v2229_v1, %v2233_v50  ;;  %v10496_v1 = vld [vmem:[#allocation164_spill] sm:$0xff]  ;;  %v10497_v50 = vld [vmem:[#allocation165_spill] sm:$0xff] }
 0x2d6   :  { %3950 = vmatprep.subr.bf16.mxu0 %v8308_v34  ;;  %4382 = vmatpush1.bf16.msra.mxu1 %v10484_v35  ;;  %v10489_v34 = vld [vmem:[#allocation161_spill] sm:$0xff]  ;;  %v10492_v35 = vld [vmem:[#allocation162_spill] sm:$0xff] }
 0x2d7   :  { %4383 = vmatprep.subr.bf16.mxu1 %v10485_v57  ;;  %10490 = vst [vmem:[#allocation403_spill] sm:$0xff] %v8329_v56  ;;  %v8332_v57 = vcombine.high %v2221_v16, %v2225_v27 }
 0x2d9   :  { %3951 = vmatpush2.bf16.msra.mxu0 %v8313_v45  ;;  %10491 = vst [vmem:[#allocation404_spill] sm:$0xff] %v8332_v57  ;;  %v8337_v45 = vcombine.low %v2221_v16, %v2225_v27  ;;  %v10501_v16 = vld [vmem:[#allocation19_spill] sm:$0xff]  ;;  %v10502_v27 = vld [vmem:[#allocation168_spill] sm:$0xff] }
 0x2da   :  { %3952 = vmatprep.subr.bf16.mxu0 %v8316_v59  ;;  %4384 = vmatpush1.bf16.msra.mxu1 %v10488_v62  ;;  %v10493_v59 = vld [vmem:[#allocation163_spill] sm:$0xff]  ;;  %v8345_v62 = vcombine.low %v2213_v26, %v2217_v10 }
 0x2db   :  { %4385 = vmatprep.subr.bf16.mxu1 %v10489_v34  ;;  %10494 = vst [vmem:[#allocation405_spill] sm:$0xff] %v8337_v45  ;;  %v8340_v34 = vcombine.high %v2213_v26, %v2217_v10  ;;  %v10504_v26 = vld [vmem:[#allocation21_spill] sm:$0xff] }
 0x2dc   :  { %10498 = vst [vmem:[#allocation407_spill] sm:$0xff] %v8345_v62 }
 0x2dd   :  { %3953 = vmatpush2.bf16.msra.mxu0 %v8321_v2  ;;  %10495 = vst [vmem:[#allocation406_spill] sm:$0xff] %v8340_v34  ;;  %v10534_v2 = vld [vmem:[#allocation61_spill] sm:$0xff] }
 0x2de   :  { %3954 = vmatprep.subr.bf16.mxu0 %v8324_v44  ;;  %4386 = vmatpush1.bf16.msra.mxu1 %v10492_v35  ;;  %v10499_v35 = vld [vmem:[#allocation166_spill] sm:$0xff]  ;;  %v10514_v44 = vld [vmem:[#allocation180_spill] sm:$0xff] }
 0x2df   :  { %4387 = vmatprep.subr.bf16.mxu1 %v10493_v59  ;;  %v10500_v59 = vld [vmem:[#allocation167_spill] sm:$0xff] }
 0x2e1   :  { %3955 = vmatpush2.bf16.msra.mxu0 %v8329_v56  ;;  %v10513_v56 = vld [vmem:[#allocation31_spill] sm:$0xff] }
 0x2e2   :  { %3956 = vmatprep.subr.bf16.mxu0 %v8332_v57  ;;  %4388 = vmatpush2.bf16.msra.mxu1 %v10496_v1  ;;  %v10510_v57 = vld [vmem:[#allocation176_spill] sm:$0xff] }
 0x2e3   :  { %4389 = vmatprep.subr.bf16.mxu1 %v10497_v50  ;;  %v10503_v50 = vld [vmem:[#allocation169_spill] sm:$0xff] }
 0x2e5   :  { %3957 = vmatpush2.bf16.msra.mxu0 %v8337_v45  ;;  %v10509_v45 = vld [vmem:[#allocation27_spill] sm:$0xff] }
 0x2e6   :  { %3958 = vmatprep.subr.bf16.mxu0 %v8340_v34  ;;  %4390 = vmatpush2.bf16.msra.mxu1 %v10499_v35  ;;  %v10505_v35 = vld [vmem:[#allocation23_spill] sm:$0xff] }
 0x2e7   :  { %4391 = vmatprep.subr.bf16.mxu1 %v10500_v59  ;;  %v10506_v59 = vld [vmem:[#allocation172_spill] sm:$0xff] }
 0x2e9   :  { %3959 = vmatpush2.bf16.msra.mxu0 %v8345_v62 }
 0x2ea   :  { %4058 = vmatprep.subr.bf16.mxu0 %v10501_v16  ;;  %4392 = vmatpush2.bf16.msra.mxu1 %v10502_v27  ;;  %v10507_v16 = vld [vmem:[#allocation173_spill] sm:$0xff] }
 0x2eb   :  { %4393 = vmatprep.subr.bf16.mxu1 %v10503_v50  ;;  %v10508_v27 = vld [vmem:[#allocation25_spill] sm:$0xff] }
 0x2ec   :  { %3961 = vmatmul.mubr.bf16.vlgmr.msra.gmra.mxu0 %v7928_v36  ;;  %v8354_v1 = vpop.f32.mrf.mxu0  ;;  %v10511_v50 = vld [vmem:[#allocation177_spill] sm:$0xff] }
 0x2ed   :  { %4059 = vmatpush1.bf16.msra.mxu0 %v10504_v26  ;;  %4090 = vmatprep.mubr.bf16.mxu0 %v7926_v17  ;;  %v10512_v26 = vld [vmem:[#allocation29_spill] sm:$0xff] }
 0x2ee   :  { %v8359_v10 = vpop.f32.mrf.mxu0  ;;  %4060 = vmatprep.subr.bf16.mxu0 %v10505_v35  ;;  %4394 = vmatpush2.bf16.msra.mxu1 %v10506_v59  ;;  %v10515_v35 = vld [vmem:[#allocation181_spill] sm:$0xff]  ;;  %v10518_v59 = vld [vmem:[#allocation184_spill] sm:$0xff] }
 0x2ef   :  { %4395 = vmatprep.subr.bf16.mxu1 %v10507_v16  ;;  %v10517_v16 = vld [vmem:[#allocation35_spill] sm:$0xff] }
 0x2f0   :  { %v3720_v62 = vpop.f32.mrf.mxu0 }
 0x2f1   :  { %4061 = vmatpush1.bf16.msra.mxu0 %v10508_v27  ;;  %v10516_v62 = vld [vmem:[#allocation33_spill] sm:$0xff] }
 0x2f2   :  { %v3721_v34 = vpop.f32.mrf.mxu0  ;;  %4062 = vmatprep.subr.bf16.mxu0 %v10509_v45  ;;  %4396 = vmatpush2.bf16.msra.mxu1 %v10510_v57  ;;  %v10520_v45 = vld [vmem:[#allocation37_spill] sm:$0xff]  ;;  %v10521_v57 = vld [vmem:[#allocation39_spill] sm:$0xff] }
 0x2f3   :  { %4397 = vmatprep.subr.bf16.mxu1 %v10511_v50  ;;  %v10519_v34 = vld [vmem:[#allocation185_spill] sm:$0xff]  ;;  %v10522_v50 = vld [vmem:[#allocation188_spill] sm:$0xff] }
 0x2f4   :  { %v10528_v27 = vld [vmem:[#allocation49_spill] sm:$0xff] }
 0x2f5   :  { %4063 = vmatpush1.bf16.msra.mxu0 %v10512_v26  ;;  %v10523_v26 = vld [vmem:[#allocation189_spill] sm:$0xff] }
 0x2f6   :  { %4064 = vmatprep.subr.bf16.mxu0 %v10513_v56  ;;  %4398 = vmatpush2.bf16.msra.mxu1 %v10514_v44  ;;  %v10524_v56 = vld [vmem:[#allocation41_spill] sm:$0xff]  ;;  %v10525_v44 = vld [vmem:[#allocation43_spill] sm:$0xff] }
 0x2f7   :  { %4399 = vmatprep.subr.bf16.mxu1 %v10515_v35 }
 0x2f9   :  { %4065 = vmatpush1.bf16.msra.mxu0 %v10516_v62 }
 0x2fa   :  { %4066 = vmatprep.subr.bf16.mxu0 %v10517_v16  ;;  %4400 = vmatpush2.bf16.msra.mxu1 %v10518_v59  ;;  %v10526_v16 = vld [vmem:[#allocation45_spill] sm:$0xff]  ;;  %v10527_v59 = vld [vmem:[#allocation47_spill] sm:$0xff] }
 0x2fb   :  { %4401 = vmatprep.subr.bf16.mxu1 %v10519_v34 }
 0x2fd   :  { %4067 = vmatpush1.bf16.msra.mxu0 %v10520_v45 }
 0x2fe   :  { %4068 = vmatprep.subr.bf16.mxu0 %v10521_v57  ;;  %4402 = vmatpush2.bf16.msra.mxu1 %v10522_v50  ;;  %v10529_v57 = vld [vmem:[#allocation51_spill] sm:$0xff]  ;;  %v10530_v50 = vld [vmem:[#allocation53_spill] sm:$0xff] }
 0x2ff   :  { %4453 = vmatprep.subr.bf16.mxu1 %v10523_v26  ;;  %v10531_v26 = vld [vmem:[#allocation55_spill] sm:$0xff] }
 0x301   :  { %4069 = vmatpush1.bf16.msra.mxu0 %v10524_v56  ;;  %v8382_v35 = vpop.f32.mrf.mxu1  ;;  %v10532_v56 = vld [vmem:[#allocation57_spill] sm:$0xff] }
 0x302   :  { %4070 = vmatprep.subr.bf16.mxu0 %v10525_v44  ;;  %v10533_v44 = vld [vmem:[#allocation59_spill] sm:$0xff] }
 0x303   :  { %v8384_v62 = vpop.f32.mrf.mxu1 }
 0x305   :  { %4071 = vmatpush1.bf16.msra.mxu0 %v10526_v16  ;;  %v4007_v34 = vpop.f32.mrf.mxu1  ;;  %v10536_v16 = vld [vmem:[#allocation65_spill] sm:$0xff] }
 0x306   :  { %4072 = vmatprep.subr.bf16.mxu0 %v10527_v59  ;;  %v10537_v34 = vld [vmem:[#allocation67_spill] sm:$0xff] }
 0x307   :  { %v4008_v45 = vpop.f32.mrf.mxu1  ;;  %v10553_v59 = vld [vmem:[#allocation99_spill] sm:$0xff] }
 0x308   :  { %v10538_v45 = vld [vmem:[#allocation69_spill] sm:$0xff] }
 0x309   :  { %4073 = vmatpush1.bf16.msra.mxu0 %v10528_v27  ;;  %v10539_v27 = vld [vmem:[#allocation71_spill] sm:$0xff] }
 0x30a   :  { %4074 = vmatprep.subr.bf16.mxu0 %v10529_v57  ;;  %v10540_v57 = vld [vmem:[#allocation73_spill] sm:$0xff] }
 0x30d   :  { %4075 = vmatpush2.bf16.msra.mxu0 %v10530_v50  ;;  %v10541_v50 = vld [vmem:[#allocation75_spill] sm:$0xff] }
 0x30e   :  { %4076 = vmatprep.subr.bf16.mxu0 %v10531_v26  ;;  %v10542_v26 = vld [vmem:[#allocation77_spill] sm:$0xff] }
 0x311   :  { %4077 = vmatpush2.bf16.msra.mxu0 %v10532_v56  ;;  %v10543_v56 = vld [vmem:[#allocation79_spill] sm:$0xff] }
 0x312   :  { %4078 = vmatprep.subr.bf16.mxu0 %v10533_v44  ;;  %v10544_v44 = vld [vmem:[#allocation81_spill] sm:$0xff] }
 0x315   :  { %4079 = vmatpush2.bf16.msra.mxu0 %v10534_v2  ;;  %v10545_v2 = vld [vmem:[#allocation83_spill] sm:$0xff] }
 0x316   :  { %4080 = vmatprep.subr.bf16.mxu0 %v10535_v58 }
 0x319   :  { %4081 = vmatpush2.bf16.msra.mxu0 %v10536_v16  ;;  %v10549_v16 = vld [vmem:[#allocation91_spill] sm:$0xff] }
 0x31a   :  { %4082 = vmatprep.subr.bf16.mxu0 %v10537_v34  ;;  %v10546_v34 = vld [vmem:[#allocation85_spill] sm:$0xff] }
 0x31d   :  { %4083 = vmatpush2.bf16.msra.mxu0 %v10538_v45  ;;  %v10547_v45 = vld [vmem:[#allocation87_spill] sm:$0xff] }
 0x31e   :  { %4084 = vmatprep.subr.bf16.mxu0 %v10539_v27 }
 0x321   :  { %4085 = vmatpush2.bf16.msra.mxu0 %v10540_v57 }
 0x322   :  { %4086 = vmatprep.subr.bf16.mxu0 %v10541_v50  ;;  %v10548_v50 = vld [vmem:[#allocation89_spill] sm:$0xff] }
 0x325   :  { %4087 = vmatpush2.bf16.msra.mxu0 %v10542_v26 }
 0x326   :  { %4088 = vmatprep.subr.bf16.mxu0 %v10543_v56  ;;  %v10550_v56 = vld [vmem:[#allocation93_spill] sm:$0xff] }
 0x329   :  { %4089 = vmatpush2.bf16.msra.mxu0 %v10544_v44  ;;  %v10551_v44 = vld [vmem:[#allocation95_spill] sm:$0xff] }
 0x32a   :  { %4140 = vmatprep.subr.bf16.mxu0 %v10545_v2  ;;  %v10552_v2 = vld [vmem:[#allocation97_spill] sm:$0xff] }
 0x32c   :  { %v3798_v58 = vpop.f32.mrf.mxu0  ;;  %4091 = vmatmul.mubr.bf16.vlgmr.msra.gmra.mxu0 %v7928_v36 }
 0x32d   :  { %4141 = vmatpush1.bf16.msra.mxu0 %v10546_v34  ;;  %4172 = vmatprep.mubr.bf16.mxu0 %v7926_v17  ;;  %v10554_v34 = vld [vmem:[#allocation101_spill] sm:$0xff]  ;;  %v10555_v17 = vld [vmem:[#allocation103_spill] sm:$0xff] }
 0x32e   :  { %v3800_v27 = vpop.f32.mrf.mxu0  ;;  %4142 = vmatprep.subr.bf16.mxu0 %v10547_v45  ;;  %v10557_v45 = vld [vmem:[#allocation107_spill] sm:$0xff] }
 0x330   :  { %v3802_v57 = vpop.f32.mrf.mxu0 }
 0x331   :  { %4143 = vmatpush1.bf16.msra.mxu0 %v10548_v50 }
 0x332   :  { %v3803_v26 = vpop.f32.mrf.mxu0  ;;  %4144 = vmatprep.subr.bf16.mxu0 %v10549_v16  ;;  %v8420_v16 = vld [vmem:[#allocation11 + $0x1] ss:$4 sm:$0xff] }
 0x335   :  { %4145 = vmatpush1.bf16.msra.mxu0 %v10550_v56 }
 0x336   :  { %4146 = vmatprep.subr.bf16.mxu0 %v10551_v44 }
 0x339   :  { %4147 = vmatpush1.bf16.msra.mxu0 %v10552_v2 }
 0x33a   :  { %4148 = vmatprep.subr.bf16.mxu0 %v10553_v59  ;;  %v10559_v59 = vld [vmem:[#allocation111_spill] sm:$0xff] }
 0x33d   :  { %4149 = vmatpush1.bf16.msra.mxu0 %v10554_v34 }
 0x33e   :  { %4150 = vmatprep.subr.bf16.mxu0 %v10555_v17 }
 0x341   :  { %4151 = vmatpush1.bf16.msra.mxu0 %v10556_v23  ;;  %v4133_v57 = vpop.f32.mrf.mxu1  ;;  %v8428_v23 = vrot.slane %v8420_v16, %v10560_v25 }
 0x342   :  { %4152 = vmatprep.subr.bf16.mxu0 %v10557_v45  ;;  %v4232_v26 = vrot.slane %v4133_v57, 6 }
 0x343   :  { %v4135_v50 = vpop.f32.mrf.mxu1  ;;  %10561 = vst [vmem:[#allocation109_spill] sm:$0xff] %v8428_v23 }
 0x344   :  { %v4248_v56 = vadd.f32 %v4232_v26, %v7765_v24  ;;  %v4233_v44 = vrot.slane %v4135_v50, 6  ;;  %v10563_v26 = vsub.s32 2, %v7718_v21 }
 0x345   :  { %4153 = vmatpush1.bf16.msra.mxu0 %v10558_v11  ;;  %v4137_v2 = vpop.f32.mrf.mxu1 }
 0x346   :  { %4154 = vmatprep.subr.bf16.mxu0 %v10559_v59  ;;  %v6347_v34 = vmul.f32 -1.442695, %v4248_v56  ;;  %v4249_v17 = vadd.f32 %v4233_v44, %v7771_v31  ;;  %v8434_v50 = vrot.slane %v8420_v16, %v10563_v26  ;;  %v10565_v2 = vld [vmem:[#allocation115_spill] sm:$0xff]  ;;  %v3717_v56 = vadd.f32 %v8354_v1, %v8428_v23  ;;  %v10571_v1 = vld [vmem:[#allocation121_spill] sm:$0xff] }
 0x347   :  { %v4138_v45 = vpop.f32.mrf.mxu1  ;;  %v10566_v44 = vsub.s32 3, %v7718_v21  ;;  %v10570_v31 = vld [vmem:[#allocation119_spill] sm:$0xff] }
 0x348   :  { %6550 = vpow2.f32 %v6347_v34  ;;  %v6348_v57 = vmul.f32 -1.442695, %v4249_v17  ;;  %10564 = vst [vmem:[#allocation111_spill] sm:$0xff] %v8434_v50  ;;  %v10568_v34 = vld [vmem:[#allocation117_spill] sm:$0xff]  ;;  %v10569_v45 = vld [vmem:[#allocation262_spill] sm:$0xff]  ;;  %v3799_v26 = vadd.f32 %v3798_v58, %v8434_v50 }
 0x349   :  { %4155 = vmatpush1.bf16.msra.mxu0 %v10562_v15  ;;  %v8442_v25 = vrot.slane %v8420_v16, %v10566_v44  ;;  %v8447_v17 = vrot.slane %v8420_v16, %v10569_v45  ;;  %v10573_v15 = vld [vmem:[#allocation125_spill] sm:$0xff] }
 0x34a   :  { %4156 = vmatprep.subr.bf16.mxu0 %v10565_v2  ;;  %6552 = vpow2.f32 %v6348_v57  ;;  %v3758_v57 = vadd.f32 %v8072_v14, %v3717_v56  ;;  %v3840_v23 = vadd.f32 %v8208_v28, %v3799_v26  ;;  %v10574_v56 = vld [vmem:[#allocation127_spill] sm:$0xff]  ;;  %v10575_v28 = vld [vmem:[#allocation129_spill] sm:$0xff] }
 0x34b   :  { %10567 = vst [vmem:[#allocation408_spill] sm:$0xff] %v8442_v25  ;;  %v3801_v24 = vadd.f32 %v3800_v27, %v8442_v25  ;;  %v3719_v44 = vadd.f32 %v8359_v10, %v8447_v17 }
 0x34c   :  { %v6339_v2 = vmul.f32 -1.442695, %v3758_v57  ;;  %v6341_v14 = vmul.f32 -1.442695, %v3840_v23  ;;  %v10576_v57 = vld [vmem:[#allocation131_spill] sm:$0xff] }
 0x34d   :  { %4157 = vmatpush2.bf16.msra.mxu0 %v10568_v34  ;;  %v10572_v34 = vld [vmem:[#allocation123_spill] sm:$0xff]  ;;  %v3842_v45 = vadd.f32 %v8214_v41, %v3801_v24  ;;  %v3760_v50 = vadd.f32 %v8078_v12, %v3719_v44  ;;  %v10577_v24 = vld [vmem:[#allocation133_spill] sm:$0xff] }
 0x34e   :  { %4158 = vmatprep.subr.bf16.mxu0 %v10570_v31  ;;  %6554 = vpow2.f32 %v6339_v2  ;;  %v10578_v23 = vld [vmem:[#allocation135_spill] sm:$0xff]  ;;  %v10579_v12 = vld [vmem:[#allocation137_spill] sm:$0xff] }
 0x34f   :  { %v6342_v25 = vmul.f32 -1.442695, %v3842_v45  ;;  %v6340_v26 = vmul.f32 -1.442695, %v3760_v50  ;;  %v10580_v41 = vld [vmem:[#allocation139_spill] sm:$0xff]  ;;  %v4294_v45 = vrot.slane %v7887_v0, 6 }
 0x350   :  { %v10582_v44 = vld [vmem:[#allocation143_spill] sm:$0xff] }
 0x351   :  { %4159 = vmatpush2.bf16.msra.mxu0 %v10571_v1 }
 0x352   :  { %4160 = vmatprep.subr.bf16.mxu0 %v10572_v34 }
 0x355   :  { %4161 = vmatpush2.bf16.msra.mxu0 %v10573_v15  ;;  %v6551_v58 = vpop.eup %6550 }
 0x356   :  { %4162 = vmatprep.subr.bf16.mxu0 %v10574_v56  ;;  %v4272_v27 = vadd.f32 1.0, %v6551_v58 }
 0x357   :  { %v6553_v1 = vpop.eup %6552 }
 0x358   :  { %6556 = vrcp.f32 %v4272_v27  ;;  %v4273_v10 = vadd.f32 1.0, %v6553_v1  ;;  %v10581_v1 = vld [vmem:[#allocation141_spill] sm:$0xff] }
 0x359   :  { %4163 = vmatpush2.bf16.msra.mxu0 %v10575_v28  ;;  %6558 = vpow2.f32 %v6341_v14 }
 0x35a   :  { %4164 = vmatprep.subr.bf16.mxu0 %v10576_v57  ;;  %6560 = vrcp.f32 %v4273_v10 }
 0x35b   :  { %6562 = vpow2.f32 %v6342_v25  ;;  %v6555_v2 = vpop.eup %6554  ;;  %v4295_v25 = vrot.slane %v7893_v52, 6  ;;  %v10586_v52 = vsub.s32 5, %v7718_v21 }
 0x35c   :  { %6564 = vpow2.f32 %v6340_v26  ;;  %v10583_v26 = vld [vmem:[#allocation145_spill] sm:$0xff] }
 0x35d   :  { %4165 = vmatpush2.bf16.msra.mxu0 %v10577_v24 }
 0x35e   :  { %4166 = vmatprep.subr.bf16.mxu0 %v10578_v23  ;;  %v10585_v23 = vld [vmem:[#allocation171_spill] sm:$0xff] }
 0x361   :  { %4167 = vmatpush2.bf16.msra.mxu0 %v10579_v12  ;;  %v10584_v12 = vsub.s32 4, %v7718_v21 }
 0x362   :  { %4168 = vmatprep.subr.bf16.mxu0 %v10580_v41 }
 0x363   :  { %v8478_v41 = vrot.slane %v8420_v16, %v10584_v12  ;;  %v10588_v12 = vld [vmem:[#allocation170_spill] sm:$0xff] }
 0x365   :  { %4169 = vmatpush2.bf16.msra.mxu0 %v10581_v1  ;;  %v6557_v50 = vpop.eup %6556  ;;  %v4016_v1 = vadd.f32 1.0, %v6555_v2 }
 0x366   :  { %4170 = vmatprep.subr.bf16.mxu0 %v10582_v44  ;;  %v6559_v58 = vpop.eup %6558  ;;  %v8472_v14 = vmul.f32 %v6557_v50, %v4294_v45  ;;  %v8486_v45 = vrot.slane %v8420_v16, %v10586_v52 }
 0x367   :  { %v6561_v27 = vpop.eup %6560  ;;  %v4028_v24 = vadd.f32 1.0, %v6559_v58  ;;  %6566 = vrcp.f32 %v4016_v1  ;;  %v10592_v1 = vld [vmem:[#allocation178_spill] sm:$0xff] }
 0x368   :  { %v6563_v10 = vpop.eup %6562  ;;  %v8480_v0 = vmul.f32 %v6561_v27, %v4295_v25  ;;  %10587 = vst [vmem:[#allocation119_spill] sm:$0xff] %v8486_v45  ;;  %v10589_v27 = vld [vmem:[#allocation175_spill] sm:$0xff] }
 0x369   :  { %4171 = vmatpush2.bf16.msra.mxu0 %v10583_v26  ;;  %v6565_v44 = vpop.eup %6564  ;;  %v4029_v50 = vadd.f32 1.0, %v6563_v10  ;;  %6568 = vrcp.f32 %v4028_v24  ;;  %v10594_v24 = vld [vmem:[#allocation182_spill] sm:$0xff] }
 0x36a   :  { %4330 = vmatprep.subr.bf16.mxu0 %v10585_v23  ;;  %v4017_v25 = vadd.f32 1.0, %v6565_v44  ;;  %v10593_v44 = vld [vmem:[#allocation183_spill] sm:$0xff] }
 0x36b   :  { %6570 = vrcp.f32 %v4029_v50 }
 0x36c   :  { %v3880_v57 = vpop.f32.mrf.mxu0  ;;  %4173 = vmatmul.mubr.bf16.vlgmr.msra.gmra.mxu0 %v7928_v36  ;;  %v10590_v36 = vld [vmem:[#allocation174_spill] sm:$0xff] }
 0x36d   :  { %v3881_v26 = vadd.f32 %v3880_v57, %v8478_v41  ;;  %4331 = vmatpush1.bf16.msra.mxu0 %v10588_v12  ;;  %v10591_v12 = vld [vmem:[#allocation179_spill] sm:$0xff] }
 0x36e   :  { %v3882_v2 = vpop.f32.mrf.mxu0  ;;  %4332 = vmatprep.subr.bf16.mxu0 %v10589_v27  ;;  %v10601_v27 = vld [vmem:[#allocation195_spill] sm:$0xff] }
 0x36f   :  { %v3922_v58 = vadd.f32 %v8274_v8, %v3881_v26  ;;  %v3883_v23 = vadd.f32 %v3882_v2, %v8486_v45  ;;  %v10595_v8 = vld [vmem:[#allocation187_spill] sm:$0xff] }
 0x370   :  { %v3884_v52 = vpop.f32.mrf.mxu0 }
 0x371   :  { %6572 = vtanh.f32 %v3922_v58  ;;  %v3924_v10 = vadd.f32 %v8277_v18, %v3883_v23  ;;  %4333 = vmatpush1.bf16.msra.mxu0 %v10590_v36  ;;  %v10596_v58 = vld [vmem:[#allocation186_spill] sm:$0xff]  ;;  %v10597_v23 = vld [vmem:[#allocation191_spill] sm:$0xff] }
 0x372   :  { %6574 = vrcp.f32 %v4017_v25  ;;  %v3885_v57 = vpop.f32.mrf.mxu0  ;;  %4334 = vmatprep.subr.bf16.mxu0 %v10591_v12  ;;  %v10598_v36 = vld [vmem:[#allocation190_spill] sm:$0xff] }
 0x373   :  { %6576 = vtanh.f32 %v3924_v10 }
 0x374   :  { %v6567_v26 = vpop.eup %6566 }
 0x375   :  { %4335 = vmatpush1.bf16.msra.mxu0 %v10592_v1 }
 0x376   :  { %4336 = vmatprep.subr.bf16.mxu0 %v10593_v44  ;;  %v6569_v50 = vpop.eup %6568 }
 0x377   :  { %v4048_v52 = vmul.f32 0.0, %v6569_v50  ;;  %v10602_v50 = vld [vmem:[#allocation198_spill] sm:$0xff] }
 0x378   :  { %v6571_v2 = vpop.eup %6570 }
 0x379   :  { %4337 = vmatpush1.bf16.msra.mxu0 %v10594_v24  ;;  %v4049_v12 = vmul.f32 0.0, %v6571_v2  ;;  %v10603_v2 = vld [vmem:[#allocation199_spill] sm:$0xff] }
 0x37a   :  { %4338 = vmatprep.subr.bf16.mxu0 %v10595_v8  ;;  %v10599_v8 = vld [vmem:[#allocation194_spill] sm:$0xff] }
 0x37d   :  { %4339 = vmatpush1.bf16.msra.mxu0 %v10596_v58 }
 0x37e   :  { %v6573_v18 = vpop.eup %6572  ;;  %4340 = vmatprep.subr.bf16.mxu0 %v10597_v23 }
 0x37f   :  { %v6575_v25 = vpop.eup %6574  ;;  %v4050_v57 = vmul.f32 %v6573_v18, %v6567_v26  ;;  %v10604_v18 = vld [vmem:[#allocation202_spill] sm:$0xff] }
 0x380   :  { %v6577_v10 = vpop.eup %6576 }
 0x381   :  { %v8503_v1 = vadd.f32 %v4050_v57, %v4048_v52  ;;  %v4051_v44 = vmul.f32 %v6577_v10, %v6575_v25  ;;  %4341 = vmatpush1.bf16.msra.mxu0 %v10598_v36  ;;  %v8506_v24 = vpop.f32.mrf.mxu1  ;;  %v10605_v25 = vld [vmem:[#allocation203_spill] sm:$0xff]  ;;  %v10606_v52 = vld [vmem:[#allocation206_spill] sm:$0xff] }
 0x382   :  { %4342 = vmatprep.subr.bf16.mxu0 %v10599_v8  ;;  %v10607_v57 = vld [vmem:[#allocation207_spill] sm:$0xff]  ;;  %v10610_v10 = vld [vmem:[#allocation214_spill] sm:$0xff] }
 0x383   :  { %v8509_v45 = vadd.f32 %v4051_v44, %v4049_v12  ;;  %v8511_v58 = vpop.f32.mrf.mxu1  ;;  %v10608_v12 = vld [vmem:[#allocation210_spill] sm:$0xff]  ;;  %v10609_v44 = vld [vmem:[#allocation211_spill] sm:$0xff] }
 0x385   :  { %10600 = vst [vmem:[#allocation123_spill] sm:$0xff] %v8509_v45  ;;  %4343 = vmatpush1.bf16.msra.mxu0 %v10601_v27  ;;  %v4219_v23 = vpop.f32.mrf.mxu1 }
 0x386   :  { %4344 = vmatprep.subr.bf16.mxu0 %v10602_v50  ;;  %v10611_v23 = vld [vmem:[#allocation215_spill] sm:$0xff]  ;;  %v10612_v50 = vld [vmem:[#allocation218_spill] sm:$0xff] }
 0x387   :  { %v4220_v26 = vpop.f32.mrf.mxu1 }
 0x388   :  { %v10613_v26 = vld [vmem:[#allocation219_spill] sm:$0xff] }
 0x389   :  { %4345 = vmatpush1.bf16.msra.mxu0 %v10603_v2  ;;  %v10614_v2 = vld [vmem:[#allocation222_spill] sm:$0xff] }
 0x38a   :  { %4346 = vmatprep.subr.bf16.mxu0 %v10604_v18  ;;  %v10615_v18 = vld [vmem:[#allocation223_spill] sm:$0xff] }
 0x38d   :  { %4347 = vmatpush2.bf16.msra.mxu0 %v10605_v25  ;;  %v10616_v25 = vld [vmem:[#allocation226_spill] sm:$0xff] }
 0x38e   :  { %4348 = vmatprep.subr.bf16.mxu0 %v10606_v52  ;;  %v10617_v52 = vld [vmem:[#allocation227_spill] sm:$0xff] }
 0x391   :  { %4349 = vmatpush2.bf16.msra.mxu0 %v10607_v57  ;;  %v10618_v57 = vld [vmem:[#allocation230_spill] sm:$0xff] }
 0x392   :  { %4350 = vmatprep.subr.bf16.mxu0 %v10608_v12 }
 0x395   :  { %4351 = vmatpush2.bf16.msra.mxu0 %v10609_v44  ;;  %v10619_v44 = vsub.s32 6, %v7718_v21 }
 0x396   :  { %4352 = vmatprep.subr.bf16.mxu0 %v10610_v10 }
 0x397   :  { %v8534_v10 = vrot.slane %v8420_v16, %v10619_v44 }
 0x399   :  { %4353 = vmatpush2.bf16.msra.mxu0 %v10611_v23  ;;  %10620 = vst [vmem:[#allocation125_spill] sm:$0xff] %v8534_v10  ;;  %v10621_v23 = vld [vmem:[#allocation231_spill] sm:$0xff] }
 0x39a   :  { %4354 = vmatprep.subr.bf16.mxu0 %v10612_v50  ;;  %v10622_v50 = vld [vmem:[#allocation234_spill] sm:$0xff] }
 0x39d   :  { %4355 = vmatpush2.bf16.msra.mxu0 %v10613_v26  ;;  %v10623_v26 = vsub.s32 7, %v7718_v21 }
 0x39e   :  { %4356 = vmatprep.subr.bf16.mxu0 %v10614_v2 }
 0x39f   :  { %v8541_v2 = vrot.slane %v8420_v16, %v10623_v26 }
 0x3a1   :  { %4357 = vmatpush2.bf16.msra.mxu0 %v10615_v18  ;;  %10624 = vst [vmem:[#allocation127_spill] sm:$0xff] %v8541_v2 }
 0x3a2   :  { %4358 = vmatprep.subr.bf16.mxu0 %v10616_v25 }
 0x3a5   :  { %4359 = vmatpush2.bf16.msra.mxu0 %v10617_v52 }
 0x3a6   :  { %4360 = vmatprep.subr.bf16.mxu0 %v10618_v57 }
 0x3a9   :  { %4361 = vmatpush2.bf16.msra.mxu0 %v10621_v23 }
 0x3aa   :  { %4412 = vmatprep.subr.bf16.mxu0 %v10622_v50 }
 0x3ac   :  { %v3962_v18 = vpop.f32.mrf.mxu0 }
 0x3ad   :  { %v3963_v25 = vadd.f32 %v3962_v18, %v8534_v10  ;;  %v10656_v10 = vld [vmem:[#allocation242_spill] sm:$0xff] }
 0x3ae   :  { %v3964_v52 = vpop.f32.mrf.mxu0 }
 0x3af   :  { %v4004_v57 = vadd.f32 %v8382_v35, %v3963_v25  ;;  %v3965_v12 = vadd.f32 %v3964_v52, %v8541_v2  ;;  %v10654_v2 = vld [vmem:[#allocation241_spill] sm:$0xff] }
 0x3b0   :  { %v3966_v27 = vpop.f32.mrf.mxu0 }
 0x3b1   :  { %v6343_v44 = vmul.f32 -1.442695, %v4004_v57  ;;  %v4006_v8 = vadd.f32 %v8384_v62, %v3965_v12 }
 0x3b2   :  { %v3967_v23 = vpop.f32.mrf.mxu0 }
 0x3b3   :  { %6578 = vpow2.f32 %v6343_v44  ;;  %v6344_v50 = vmul.f32 -1.442695, %v4006_v8 }
 0x3b5   :  { %6580 = vpow2.f32 %v6344_v50 }
 0x3b6   :  { %6582 = vtanh.f32 %v8503_v1 }
 0x3c0   :  { %v6579_v21 = vpop.eup %6578 }
 0x3c1   :  { %v4042_v36 = vadd.f32 1.0, %v6579_v21  ;;  %v10626_v21 = vld [vmem:[#allocation193_spill] sm:$0xff] }
 0x3c2   :  { %v6581_v16 = vpop.eup %6580 }
 0x3c3   :  { %6584 = vrcp.f32 %v4042_v36  ;;  %v4043_v18 = vadd.f32 1.0, %v6581_v16  ;;  %v6583_v35 = vpop.eup %6582  ;;  %v10625_v36 = vld [vmem:[#allocation192_spill] sm:$0xff] }
 0x3c4   :  { %6586 = vtanh.f32 %v8509_v45  ;;  %v10627_v16 = vld [vmem:[#allocation196_spill] sm:$0xff] }
 0x3c5   :  { %6588 = vrcp.f32 %v4043_v18  ;;  %v10628_v18 = vld [vmem:[#allocation197_spill] sm:$0xff]  ;;  %v10658_v45 = vld [vmem:[#allocation244_spill] sm:$0xff] }
 0x3d0   :  { %v6585_v25 = vpop.eup %6584 }
 0x3d1   :  { %v6587_v27 = vpop.eup %6586  ;;  %v4056_v52 = vmul.f32 %v6585_v25, %v6583_v35  ;;  %v10629_v35 = vld [vmem:[#allocation200_spill] sm:$0xff]  ;;  %v10630_v25 = vld [vmem:[#allocation201_spill] sm:$0xff] }
 0x3d2   :  { %v6589_v57 = vpop.eup %6588 }
 0x3d3   :  { %v4057_v62 = vmul.f32 %v6589_v57, %v6587_v27  ;;  %v4310_v12 = vrot.slane %v4056_v52, 6  ;;  %v10631_v27 = vld [vmem:[#allocation204_spill] sm:$0xff]  ;;  %v10632_v52 = vld [vmem:[#allocation205_spill] sm:$0xff] }
 0x3d5   :  { %v4311_v23 = vrot.slane %v4057_v62, 6  ;;  %v4316_v8 = vpack.c.bf16 %v4310_v12, %v4310_v12  ;;  %v10633_v62 = vld [vmem:[#allocation208_spill] sm:$0xff] }
 0x3d7   :  { %v4317_v50 = vpack.c.bf16 %v4311_v23, %v4311_v23  ;;  %v8551_v44 = vrot.slane %v4316_v8, 1  ;;  %v10634_v23 = vld [vmem:[#allocation209_spill] sm:$0xff] }
 0x3d9   :  { %v8549_v26 = vrot.slane %v4317_v50, 1  ;;  %v10635_v50 = vld [vmem:[#allocation212_spill] sm:$0xff] }
 0x3db   :  { %4403 = vmatprep.mubr.bf16.mxu1 %v8549_v26 }
 0x3dc   :  { %4404 = vmatmul.mubr.bf16.vlgmr.msra.gmra.mxu1 %v8551_v44 }
 0x3dd   :  { %4454 = vmatpush1.bf16.msra.mxu1 %v10625_v36  ;;  %4485 = vmatprep.mubr.bf16.mxu1 %v8549_v26  ;;  %v10643_v36 = vld [vmem:[#allocation228_spill] sm:$0xff] }
 0x3de   :  { %4455 = vmatprep.subr.bf16.mxu1 %v10626_v21  ;;  %v10636_v21 = vld [vmem:[#allocation213_spill] sm:$0xff] }
 0x3e1   :  { %4456 = vmatpush1.bf16.msra.mxu1 %v10627_v16 }
 0x3e2   :  { %4457 = vmatprep.subr.bf16.mxu1 %v10628_v18  ;;  %v10637_v18 = vld [vmem:[#allocation216_spill] sm:$0xff] }
 0x3e5   :  { %4458 = vmatpush1.bf16.msra.mxu1 %v10629_v35  ;;  %v10638_v35 = vld [vmem:[#allocation217_spill] sm:$0xff] }
 0x3e6   :  { %4459 = vmatprep.subr.bf16.mxu1 %v10630_v25  ;;  %v10639_v25 = vld [vmem:[#allocation220_spill] sm:$0xff] }
 0x3e9   :  { %4460 = vmatpush1.bf16.msra.mxu1 %v10631_v27  ;;  %v10640_v27 = vld [vmem:[#allocation221_spill] sm:$0xff] }
 0x3ea   :  { %4461 = vmatprep.subr.bf16.mxu1 %v10632_v52  ;;  %v10641_v52 = vld [vmem:[#allocation224_spill] sm:$0xff] }
 0x3ec   :  { %v4092_v57 = vpop.f32.mrf.mxu0 }
 0x3ed   :  { %4462 = vmatpush1.bf16.msra.mxu1 %v10633_v62  ;;  %v10642_v62 = vld [vmem:[#allocation225_spill] sm:$0xff] }
 0x3ee   :  { %v4094_v12 = vpop.f32.mrf.mxu0  ;;  %4463 = vmatprep.subr.bf16.mxu1 %v10634_v23  ;;  %v10652_v23 = vld [vmem:[#allocation240_spill] sm:$0xff] }
 0x3f0   :  { %v4096_v8 = vpop.f32.mrf.mxu0 }
 0x3f1   :  { %4464 = vmatpush1.bf16.msra.mxu1 %v10635_v50  ;;  %v10644_v8 = vld [vmem:[#allocation229_spill] sm:$0xff]  ;;  %v10645_v50 = vld [vmem:[#allocation232_spill] sm:$0xff] }
 0x3f2   :  { %v4097_v16 = vpop.f32.mrf.mxu0  ;;  %4465 = vmatprep.subr.bf16.mxu1 %v10636_v21  ;;  %v10647_v21 = vld [vmem:[#allocation235_spill] sm:$0xff] }
 0x3f3   :  { %v10646_v16 = vld [vmem:[#allocation233_spill] sm:$0xff] }
 0x3f5   :  { %4466 = vmatpush1.bf16.msra.mxu1 %v10637_v18  ;;  %v10648_v18 = vld [vmem:[#allocation236_spill] sm:$0xff] }
 0x3f6   :  { %4467 = vmatprep.subr.bf16.mxu1 %v10638_v35  ;;  %v10649_v35 = vld [vmem:[#allocation237_spill] sm:$0xff] }
 0x3f9   :  { %4468 = vmatpush1.bf16.msra.mxu1 %v10639_v25  ;;  %v10650_v25 = vld [vmem:[#allocation238_spill] sm:$0xff] }
 0x3fa   :  { %4469 = vmatprep.subr.bf16.mxu1 %v10640_v27  ;;  %v4230_v27 = vrot.slane %v4092_v57, 6  ;;  %v10659_v57 = vld [vmem:[#allocation245_spill] sm:$0xff] }
 0x3fd   :  { %4470 = vmatpush2.bf16.msra.mxu1 %v10641_v52  ;;  %v10651_v52 = vld [vmem:[#allocation239_spill] sm:$0xff] }
 0x3fe   :  { %4471 = vmatprep.subr.bf16.mxu1 %v10642_v62  ;;  %v4231_v62 = vrot.slane %v4094_v12, 6  ;;  %v10661_v12 = vld [vmem:[#allocation247_spill] sm:$0xff] }
 0x401   :  { %4472 = vmatpush2.bf16.msra.mxu1 %v10643_v36  ;;  %v10653_v36 = vld [vmem:[#allocation265_spill] sm:$0xff] }
 0x402   :  { %4473 = vmatprep.subr.bf16.mxu1 %v10644_v8  ;;  %v4246_v8 = vadd.f32 %v4230_v27, %v10653_v36  ;;  %v10660_v27 = vld [vmem:[#allocation246_spill] sm:$0xff] }
 0x405   :  { %4474 = vmatpush2.bf16.msra.mxu1 %v10645_v50  ;;  %v10655_v50 = vld [vmem:[#allocation270_spill] sm:$0xff] }
 0x406   :  { %4475 = vmatprep.subr.bf16.mxu1 %v10646_v16  ;;  %v4247_v16 = vadd.f32 %v4231_v62, %v10655_v50  ;;  %v4236_v62 = vrot.slane %v8506_v24, 6  ;;  %v10666_v50 = vld [vmem:[#allocation252_spill] sm:$0xff] }
 0x409   :  { %4476 = vmatpush2.bf16.msra.mxu1 %v10647_v21  ;;  %v6345_v21 = vmul.f32 -1.442695, %v4246_v8  ;;  %v10662_v8 = vld [vmem:[#allocation248_spill] sm:$0xff] }
 0x40a   :  { %4477 = vmatprep.subr.bf16.mxu1 %v10648_v18  ;;  %v10657_v18 = vld [vmem:[#allocation243_spill] sm:$0xff] }
 0x40b   :  { %6590 = vpow2.f32 %v6345_v21  ;;  %v4252_v21 = vadd.f32 %v4236_v62, %v7846_v3  ;;  %v10668_v3 = vld [vmem:[#allocation254_spill] sm:$0xff] }
 0x40d   :  { %4478 = vmatpush2.bf16.msra.mxu1 %v10649_v35  ;;  %v6346_v35 = vmul.f32 -1.442695, %v4247_v16  ;;  %v4237_v16 = vrot.slane %v8511_v58, 6  ;;  %v10667_v58 = vld [vmem:[#allocation253_spill] sm:$0xff] }
 0x40e   :  { %4479 = vmatprep.subr.bf16.mxu1 %v10650_v25 }
 0x40f   :  { %6592 = vpow2.f32 %v6346_v35  ;;  %v10665_v35 = vld [vmem:[#allocation251_spill] sm:$0xff] }
 0x411   :  { %4480 = vmatpush2.bf16.msra.mxu1 %v10651_v52 }
 0x412   :  { %4481 = vmatprep.subr.bf16.mxu1 %v10652_v23 }
 0x415   :  { %4482 = vmatpush2.bf16.msra.mxu1 %v10654_v2 }
 0x416   :  { %4483 = vmatprep.subr.bf16.mxu1 %v10656_v10 }
 0x418   :  { %v6591_v10 = vpop.eup %6590 }
 0x419   :  { %4484 = vmatpush2.bf16.msra.mxu1 %v10657_v18  ;;  %v10663_v18 = vld [vmem:[#allocation249_spill] sm:$0xff]  ;;  %v4260_v2 = vadd.f32 1.0, %v6591_v10 }
 0x41a   :  { %4535 = vmatprep.subr.bf16.mxu1 %v10658_v45  ;;  %v10664_v45 = vld [vmem:[#allocation250_spill] sm:$0xff] }
 0x41c   :  { %4486 = vmatmul.mubr.bf16.vlgmr.msra.gmra.mxu1 %v8551_v44 }
 0x41d   :  { %4536 = vmatpush1.bf16.msra.mxu1 %v10659_v57  ;;  %4567 = vmatprep.mubr.bf16.mxu1 %v8549_v26  ;;  %v4253_v57 = vadd.f32 %v4237_v16, %v7854_v29 }
 0x41e   :  { %4537 = vmatprep.subr.bf16.mxu1 %v10660_v27  ;;  %v6349_v27 = vmul.f32 -1.442695, %v4252_v21 }
 0x41f   :  { %v6350_v24 = vmul.f32 -1.442695, %v4253_v57  ;;  %v10669_v57 = vld [vmem:[#allocation255_spill] sm:$0xff] }
 0x420   :  { %6594 = vpow2.f32 %v6349_v27  ;;  %v10671_v27 = vld [vmem:[#allocation257_spill] sm:$0xff] }
 0x421   :  { %4538 = vmatpush1.bf16.msra.mxu1 %v10661_v12  ;;  %v6593_v12 = vpop.eup %6592  ;;  %6596 = vpow2.f32 %v6350_v24  ;;  %v10673_v24 = vld [vmem:[#allocation260_spill] sm:$0xff] }
 0x422   :  { %4539 = vmatprep.subr.bf16.mxu1 %v10662_v8  ;;  %6598 = vrcp.f32 %v4260_v2 }
 0x425   :  { %4540 = vmatpush1.bf16.msra.mxu1 %v10663_v18  ;;  %v4261_v18 = vadd.f32 1.0, %v6593_v12  ;;  %v10672_v12 = vld [vmem:[#allocation258_spill] sm:$0xff] }
 0x426   :  { %4541 = vmatprep.subr.bf16.mxu1 %v10664_v45 }
 0x429   :  { %4542 = vmatpush1.bf16.msra.mxu1 %v10665_v35 }
 0x42a   :  { %4543 = vmatprep.subr.bf16.mxu1 %v10666_v50 }
 0x42c   :  { %v4174_v8 = vpop.f32.mrf.mxu0 }
 0x42d   :  { %v4234_v36 = vrot.slane %v4174_v8, 6  ;;  %4544 = vmatpush1.bf16.msra.mxu1 %v10667_v58  ;;  %v10670_v8 = vld [vmem:[#allocation256_spill] sm:$0xff]  ;;  %v6595_v2 = vpop.eup %6594 }
 0x42e   :  { %v4176_v62 = vpop.f32.mrf.mxu0  ;;  %4545 = vmatprep.subr.bf16.mxu1 %v10668_v3 }
 0x42f   :  { %v4250_v16 = vadd.f32 %v4234_v36, %v7840_v53  ;;  %v4235_v29 = vrot.slane %v4176_v62, 6  ;;  %v10674_v36 = vld [vmem:[#allocation261_spill] sm:$0xff]  ;;  %v6597_v62 = vpop.eup %6596 }
 0x430   :  { %v4178_v21 = vpop.f32.mrf.mxu0 }
 0x431   :  { %6600 = vtanh.f32 %v4250_v16  ;;  %v4251_v50 = vadd.f32 %v4235_v29, %v7849_v47  ;;  %4546 = vmatpush1.bf16.msra.mxu1 %v10669_v57  ;;  %v6599_v16 = vpop.eup %6598  ;;  %v10675_v21 = vld [vmem:[#allocation263_spill] sm:$0xff]  ;;  %v4286_v57 = vadd.f32 1.0, %v6595_v2  ;;  %v4287_v47 = vadd.f32 1.0, %v6597_v62  ;;  %v10680_v62 = vld [vmem:[#allocation272_spill] sm:$0xff] }
 0x432   :  { %6602 = vrcp.f32 %v4261_v18  ;;  %v4179_v10 = vpop.f32.mrf.mxu0  ;;  %4547 = vmatprep.subr.bf16.mxu1 %v10670_v8  ;;  %v10676_v18 = vld [vmem:[#allocation264_spill] sm:$0xff]  ;;  %v10679_v2 = vld [vmem:[#allocation271_spill] sm:$0xff] }
 0x433   :  { %6604 = vtanh.f32 %v4251_v50 }
 0x434   :  { %6606 = vrcp.f32 %v4286_v57  ;;  %v10684_v57 = vld [vmem:[#allocation276_spill] sm:$0xff] }
 0x435   :  { %4548 = vmatpush1.bf16.msra.mxu1 %v10671_v27 }
 0x436   :  { %4549 = vmatprep.subr.bf16.mxu1 %v10672_v12 }
 0x439   :  { %4550 = vmatpush1.bf16.msra.mxu1 %v10673_v24  ;;  %v10677_v24 = vld [vmem:[#allocation266_spill] sm:$0xff] }
 0x43a   :  { %4551 = vmatprep.subr.bf16.mxu1 %v10674_v36  ;;  %v10678_v36 = vld [vmem:[#allocation268_spill] sm:$0xff] }
 0x43d   :  { %4552 = vmatpush2.bf16.msra.mxu1 %v10675_v21 }
 0x43e   :  { %v6601_v29 = vpop.eup %6600  ;;  %4553 = vmatprep.subr.bf16.mxu1 %v10676_v18  ;;  %v10688_v18 = vld [vmem:[#allocation280_spill] sm:$0xff] }
 0x43f   :  { %v6603_v10 = vpop.eup %6602  ;;  %v4300_v8 = vmul.f32 %v6601_v29, %v6599_v16  ;;  %v10683_v16 = vld [vmem:[#allocation275_spill] sm:$0xff] }
 0x440   :  { %v6605_v50 = vpop.eup %6604 }
 0x441   :  { %v8617_v27 = vadd.f32 %v4300_v8, %v8472_v14  ;;  %v4301_v12 = vmul.f32 %v6605_v50, %v6603_v10  ;;  %4554 = vmatpush2.bf16.msra.mxu1 %v10677_v24  ;;  %v10681_v14 = vld [vmem:[#allocation273_spill] sm:$0xff]  ;;  %v10682_v8 = vld [vmem:[#allocation274_spill] sm:$0xff]  ;;  %v6607_v29 = vpop.eup %6606 }
 0x442   :  { %4555 = vmatprep.subr.bf16.mxu1 %v10678_v36  ;;  %v10686_v36 = vld [vmem:[#allocation278_spill] sm:$0xff] }
 0x443   :  { %6608 = vtanh.f32 %v8617_v27  ;;  %v8623_v21 = vadd.f32 %v4301_v12, %v8480_v0  ;;  %v10685_v0 = vld [vmem:[#allocation277_spill] sm:$0xff] }
 0x444   :  { %6610 = vrcp.f32 %v4287_v47 }
 0x445   :  { %6612 = vtanh.f32 %v8623_v21  ;;  %4556 = vmatpush2.bf16.msra.mxu1 %v10679_v2 }
 0x446   :  { %4557 = vmatprep.subr.bf16.mxu1 %v10680_v62  ;;  %v10687_v62 = vld [vmem:[#allocation279_spill] sm:$0xff] }
 0x449   :  { %4558 = vmatpush2.bf16.msra.mxu1 %v10681_v14 }
 0x44a   :  { %4559 = vmatprep.subr.bf16.mxu1 %v10682_v8 }
 0x44d   :  { %4560 = vmatpush2.bf16.msra.mxu1 %v10683_v16 }
 0x44e   :  { %4561 = vmatprep.subr.bf16.mxu1 %v10684_v57  ;;  %v10689_v57 = vld [vmem:[#allocation281_spill] sm:$0xff] }
 0x450   :  { %v6609_v10 = vpop.eup %6608 }
 0x451   :  { %v6611_v50 = vpop.eup %6610  ;;  %4562 = vmatpush2.bf16.msra.mxu1 %v10685_v0  ;;  %v4306_v47 = vmul.f32 %v6609_v10, %v6607_v29  ;;  %v10690_v29 = vld [vmem:[#allocation282_spill] sm:$0xff]  ;;  %v10694_v10 = vld [vmem:[#allocation288_spill] sm:$0xff] }
 0x452   :  { %v6613_v12 = vpop.eup %6612  ;;  %4563 = vmatprep.subr.bf16.mxu1 %v10686_v36 }
 0x453   :  { %v4307_v2 = vmul.f32 %v6613_v12, %v6611_v50  ;;  %v4314_v24 = vpack.c.bf16 %v4306_v47, %v4306_v47  ;;  %v10695_v50 = vld [vmem:[#allocation289_spill] sm:$0xff]  ;;  %v10696_v47 = vld [vmem:[#allocation316_spill] sm:$0xff]  ;;  %v10697_v12 = vld [vmem:[#allocation290_spill] sm:$0xff] }
 0x455   :  { %4564 = vmatpush2.bf16.msra.mxu1 %v10687_v62  ;;  %v4315_v14 = vpack.c.bf16 %v4307_v2, %v4307_v2  ;;  %v8638_v16 = vrot.slane %v4314_v24, 1  ;;  %v10691_v2 = vld [vmem:[#allocation283_spill] sm:$0xff]  ;;  %v10692_v24 = vld [vmem:[#allocation284_spill] sm:$0xff] }
 0x456   :  { %4565 = vmatprep.subr.bf16.mxu1 %v10688_v18 }
 0x457   :  { %v8636_v8 = vrot.slane %v4315_v14, 1  ;;  %v10693_v14 = vld [vmem:[#allocation312_spill] sm:$0xff] }
 0x459   :  { %4566 = vmatpush2.bf16.msra.mxu1 %v10689_v57  ;;  %4362 = vmatprep.mubr.bf16.mxu0 %v8636_v8 }
 0x45a   :  { %4363 = vmatmul.mubr.bf16.vlgmr.msra.gmra.mxu0 %v8638_v16  ;;  %4617 = vmatprep.subr.bf16.mxu1 %v10690_v29 }
 0x45b   :  { %4413 = vmatpush1.bf16.msra.mxu0 %v7639_v4  ;;  %4444 = vmatprep.mubr.bf16.mxu0 %v8636_v8 }
 0x45c   :  { %4568 = vmatmul.mubr.bf16.vlgmr.msra.gmra.mxu1 %v8551_v44  ;;  %4414 = vmatprep.subr.bf16.mxu0 %v7930_v6  ;;  %v10698_v6 = vld [vmem:[#allocation291_spill] sm:$0xff] }
 0x45d   :  { %4618 = vmatpush1.bf16.msra.mxu1 %v10691_v2  ;;  %4649 = vmatprep.mubr.bf16.mxu1 %v8549_v26  ;;  %v10699_v26 = vld [vmem:[#allocation292_spill] sm:$0xff] }
 0x45e   :  { %4619 = vmatprep.subr.bf16.mxu1 %v10692_v24 }
 0x45f   :  { %4415 = vmatpush1.bf16.msra.mxu0 %v7942_v9  ;;  %v10700_v9 = vld [vmem:[#allocation293_spill] sm:$0xff] }
 0x460   :  { %4416 = vmatprep.subr.bf16.mxu0 %v10693_v14 }
 0x461   :  { %4620 = vmatpush1.bf16.msra.mxu1 %v10694_v10 }
 0x462   :  { %4621 = vmatprep.subr.bf16.mxu1 %v10695_v50  ;;  %v10701_v50 = vld [vmem:[#allocation294_spill] sm:$0xff] }
 0x463   :  { %4417 = vmatpush1.bf16.msra.mxu0 %v7954_v51  ;;  %v10702_v51 = vld [vmem:[#allocation295_spill] sm:$0xff] }
 0x464   :  { %4418 = vmatprep.subr.bf16.mxu0 %v10696_v47 }
 0x465   :  { %4622 = vmatpush1.bf16.msra.mxu1 %v10697_v12 }
 0x466   :  { %4623 = vmatprep.subr.bf16.mxu1 %v10698_v6  ;;  %v10703_v6 = vld [vmem:[#allocation296_spill] sm:$0xff] }
 0x467   :  { %4419 = vmatpush1.bf16.msra.mxu0 %v7966_v33  ;;  %v10704_v33 = vld [vmem:[#allocation297_spill] sm:$0xff] }
 0x468   :  { %4420 = vmatprep.subr.bf16.mxu0 %v7969_v20 }
 0x469   :  { %4624 = vmatpush1.bf16.msra.mxu1 %v10699_v26 }
 0x46a   :  { %4625 = vmatprep.subr.bf16.mxu1 %v10700_v9  ;;  %v10705_v9 = vld [vmem:[#allocation298_spill] sm:$0xff] }
 0x46b   :  { %4421 = vmatpush1.bf16.msra.mxu0 %v7978_v42  ;;  %v10706_v42 = vld [vmem:[#allocation299_spill] sm:$0xff] }
 0x46c   :  { %4422 = vmatprep.subr.bf16.mxu0 %v7981_v39 }
 0x46d   :  { %4626 = vmatpush1.bf16.msra.mxu1 %v10701_v50 }
 0x46e   :  { %4627 = vmatprep.subr.bf16.mxu1 %v10702_v51  ;;  %v10707_v51 = vld [vmem:[#allocation300_spill] sm:$0xff] }
 0x46f   :  { %4423 = vmatpush1.bf16.msra.mxu0 %v7988_v43  ;;  %v10708_v43 = vld [vmem:[#allocation301_spill] sm:$0xff] }
 0x470   :  { %4424 = vmatprep.subr.bf16.mxu0 %v7991_v37 }
 0x471   :  { %4628 = vmatpush1.bf16.msra.mxu1 %v10703_v6 }
 0x472   :  { %4629 = vmatprep.subr.bf16.mxu1 %v10704_v33  ;;  %v10709_v33 = vld [vmem:[#allocation302_spill] sm:$0xff] }
 0x473   :  { %4425 = vmatpush1.bf16.msra.mxu0 %v7996_v19  ;;  %v10710_v19 = vld [vmem:[#allocation303_spill] sm:$0xff] }
 0x474   :  { %4426 = vmatprep.subr.bf16.mxu0 %v8000_v60  ;;  %v10928_v60 = vld [vmem:[#allocation101_spill] sm:$0xff] }
 0x475   :  { %4630 = vmatpush1.bf16.msra.mxu1 %v10705_v9  ;;  %v10927_v9 = vld [vmem:[#allocation99_spill] sm:$0xff] }
 0x476   :  { %4631 = vmatprep.subr.bf16.mxu1 %v10706_v42  ;;  %v10711_v42 = vld [vmem:[#allocation304_spill] sm:$0xff] }
 0x477   :  { %4427 = vmatpush1.bf16.msra.mxu0 %v8006_v22  ;;  %v10712_v22 = vld [vmem:[#allocation305_spill] sm:$0xff] }
 0x478   :  { %4428 = vmatprep.subr.bf16.mxu0 %v8009_v49 }
 0x479   :  { %4632 = vmatpush1.bf16.msra.mxu1 %v10707_v51  ;;  %v10864_v51 = vld [vmem:[#allocation29_spill] sm:$0xff] }
 0x47a   :  { %4633 = vmatprep.subr.bf16.mxu1 %v10708_v43  ;;  %v10713_v43 = vld [vmem:[#allocation306_spill] sm:$0xff] }
 0x47b   :  { %4429 = vmatpush2.bf16.msra.mxu0 %v8014_v30  ;;  %v10714_v30 = vld [vmem:[#allocation307_spill] sm:$0xff] }
 0x47c   :  { %4430 = vmatprep.subr.bf16.mxu0 %v8017_v32  ;;  %v10863_v32 = vld [vmem:[#allocation151_spill] sm:$0xff] }
 0x47d   :  { %4634 = vmatpush2.bf16.msra.mxu1 %v10709_v33 }
 0x47e   :  { %4635 = vmatprep.subr.bf16.mxu1 %v10710_v19  ;;  %v10715_v19 = vld [vmem:[#allocation309_spill] sm:$0xff] }
 0x47f   :  { %4431 = vmatpush2.bf16.msra.mxu0 %v8022_v38  ;;  %v10716_v38 = vld [vmem:[#allocation310_spill] sm:$0xff] }
 0x480   :  { %4432 = vmatprep.subr.bf16.mxu0 %v8025_v40  ;;  %v10862_v40 = vld [vmem:[#allocation150_spill] sm:$0xff] }
 0x481   :  { %4636 = vmatpush2.bf16.msra.mxu1 %v10711_v42  ;;  %v10804_v42 = vld [vmem:[#allocation383_spill] sm:$0xff] }
 0x482   :  { %4637 = vmatprep.subr.bf16.mxu1 %v10712_v22  ;;  %v10717_v22 = vld [vmem:[#allocation313_spill] sm:$0xff] }
 0x483   :  { %4433 = vmatpush2.bf16.msra.mxu0 %v8030_v46  ;;  %v10718_v46 = vld [vmem:[#allocation314_spill] sm:$0xff] }
 0x484   :  { %4434 = vmatprep.subr.bf16.mxu0 %v8033_v48  ;;  %v10803_v48 = vld [vmem:[#allocation96_spill] sm:$0xff] }
 0x485   :  { %4638 = vmatpush2.bf16.msra.mxu1 %v10713_v43  ;;  %v10740_v43 = vld [vmem:[#allocation351_spill] sm:$0xff] }
 0x486   :  { %4639 = vmatprep.subr.bf16.mxu1 %v10714_v30  ;;  %v10719_v30 = vld [vmem:[#allocation317_spill] sm:$0xff] }
 0x487   :  { %4435 = vmatpush2.bf16.msra.mxu0 %v8038_v54  ;;  %v10720_v54 = vld [vmem:[#allocation318_spill] sm:$0xff] }
 0x488   :  { %4436 = vmatprep.subr.bf16.mxu0 %v8041_v55  ;;  %v10739_v55 = vld [vmem:[#allocation32_spill] sm:$0xff] }
 0x489   :  { %4640 = vmatpush2.bf16.msra.mxu1 %v10715_v19  ;;  %v10721_v19 = vld [vmem:[#allocation342_spill] sm:$0xff] }
 0x48a   :  { %4641 = vmatprep.subr.bf16.mxu1 %v10716_v38  ;;  %v10722_v38 = vld [vmem:[#allocation320_spill] sm:$0xff] }
 0x48b   :  { %4437 = vmatpush2.bf16.msra.mxu0 %v8046_v61  ;;  %v10723_v61 = vld [vmem:[#allocation321_spill] sm:$0xff] }
 0x48c   :  { %4438 = vmatprep.subr.bf16.mxu0 %v8049_v63  ;;  %v10724_v63 = vld [vmem:[#allocation343_spill] sm:$0xff] }
 0x48d   :  { %4642 = vmatpush2.bf16.msra.mxu1 %v10717_v22  ;;  %v10725_v22 = vld [vmem:[#allocation344_spill] sm:$0xff] }
 0x48e   :  { %4643 = vmatprep.subr.bf16.mxu1 %v10718_v46  ;;  %v10726_v46 = vld [vmem:[#allocation323_spill] sm:$0xff] }
 0x48f   :  { %4439 = vmatpush2.bf16.msra.mxu0 %v8054_v5  ;;  %v10736_v5 = vld [vmem:[#allocation349_spill] sm:$0xff] }
 0x490   :  { %4440 = vmatprep.subr.bf16.mxu0 %v8057_v7  ;;  %v10727_v7 = vld [vmem:[#allocation20_spill] sm:$0xff] }
 0x491   :  { %4644 = vmatpush2.bf16.msra.mxu1 %v10719_v30  ;;  %v10728_v30 = vld [vmem:[#allocation345_spill] sm:$0xff] }
 0x492   :  { %4645 = vmatprep.subr.bf16.mxu1 %v10720_v54  ;;  %v10735_v54 = vld [vmem:[#allocation28_spill] sm:$0xff] }
 0x493   :  { %4441 = vmatpush2.bf16.msra.mxu0 %v8062_v13  ;;  %v10734_v13 = vld [vmem:[#allocation26_spill] sm:$0xff] }
 0x494   :  { %4442 = vmatprep.subr.bf16.mxu0 %v10721_v19 }
 0x495   :  { %4646 = vmatpush2.bf16.msra.mxu1 %v10722_v38  ;;  %v10729_v38 = vld [vmem:[#allocation346_spill] sm:$0xff] }
 0x496   :  { %4647 = vmatprep.subr.bf16.mxu1 %v10723_v61  ;;  %v10730_v61 = vld [vmem:[#allocation22_spill] sm:$0xff] }
 0x497   :  { %4443 = vmatpush2.bf16.msra.mxu0 %v10724_v63  ;;  %v10732_v63 = vld [vmem:[#allocation347_spill] sm:$0xff] }
 0x498   :  { %4494 = vmatprep.subr.bf16.mxu0 %v10725_v22 }
 0x499   :  { %4648 = vmatpush2.bf16.msra.mxu1 %v10726_v46  ;;  %v10731_v46 = vld [vmem:[#allocation24_spill] sm:$0xff] }
 0x49a   :  { %4445 = vmatmul.mubr.bf16.vlgmr.msra.gmra.mxu0 %v8638_v16  ;;  %4747 = vmatprep.subr.bf16.mxu1 %v10727_v7 }
 0x49b   :  { %4495 = vmatpush1.bf16.msra.mxu0 %v10728_v30  ;;  %4526 = vmatprep.mubr.bf16.mxu0 %v8636_v8  ;;  %v10733_v30 = vld [vmem:[#allocation348_spill] sm:$0xff] }
 0x49c   :  { %4650 = vmatmul.mubr.bf16.vlgmr.msra.gmra.mxu1 %v8551_v44  ;;  %v8715_v19 = vpop.f32.mrf.mxu1  ;;  %4496 = vmatprep.subr.bf16.mxu0 %v10729_v38  ;;  %v10737_v38 = vld [vmem:[#allocation350_spill] sm:$0xff] }
 0x49d   :  { %4748 = vmatpush1.bf16.msra.mxu1 %v10730_v61  ;;  %4779 = vmatprep.mubr.bf16.mxu1 %v8636_v8  ;;  %v10738_v61 = vld [vmem:[#allocation30_spill] sm:$0xff] }
 0x49e   :  { %v8720_v22 = vpop.f32.mrf.mxu1  ;;  %4749 = vmatprep.subr.bf16.mxu1 %v10731_v46  ;;  %v10741_v46 = vld [vmem:[#allocation352_spill] sm:$0xff] }
 0x49f   :  { %4497 = vmatpush1.bf16.msra.mxu0 %v10732_v63  ;;  %v10800_v63 = vld [vmem:[#allocation381_spill] sm:$0xff] }
 0x4a0   :  { %v4409_v7 = vpop.f32.mrf.mxu1  ;;  %4498 = vmatprep.subr.bf16.mxu0 %v10733_v30  ;;  %v10743_v30 = vld [vmem:[#allocation36_spill] sm:$0xff] }
 0x4a1   :  { %4750 = vmatpush1.bf16.msra.mxu1 %v10734_v13  ;;  %v10742_v7 = vld [vmem:[#allocation34_spill] sm:$0xff]  ;;  %v10744_v13 = vld [vmem:[#allocation353_spill] sm:$0xff] }
 0x4a2   :  { %v4410_v44 = vpop.f32.mrf.mxu1  ;;  %4751 = vmatprep.subr.bf16.mxu1 %v10735_v54  ;;  %v10746_v54 = vld [vmem:[#allocation38_spill] sm:$0xff] }
 0x4a3   :  { %4499 = vmatpush1.bf16.msra.mxu0 %v10736_v5  ;;  %v10745_v44 = vld [vmem:[#allocation354_spill] sm:$0xff]  ;;  %v10747_v5 = vld [vmem:[#allocation40_spill] sm:$0xff] }
 0x4a4   :  { %4500 = vmatprep.subr.bf16.mxu0 %v10737_v38  ;;  %v10748_v38 = vld [vmem:[#allocation355_spill] sm:$0xff] }
 0x4a5   :  { %4752 = vmatpush1.bf16.msra.mxu1 %v10738_v61  ;;  %v10749_v61 = vld [vmem:[#allocation356_spill] sm:$0xff] }
 0x4a6   :  { %4753 = vmatprep.subr.bf16.mxu1 %v10739_v55  ;;  %v10750_v55 = vld [vmem:[#allocation42_spill] sm:$0xff] }
 0x4a7   :  { %4501 = vmatpush1.bf16.msra.mxu0 %v10740_v43  ;;  %v10751_v43 = vld [vmem:[#allocation44_spill] sm:$0xff] }
 0x4a8   :  { %4502 = vmatprep.subr.bf16.mxu0 %v10741_v46  ;;  %v10752_v46 = vld [vmem:[#allocation357_spill] sm:$0xff] }
 0x4a9   :  { %4754 = vmatpush1.bf16.msra.mxu1 %v10742_v7  ;;  %v10753_v7 = vld [vmem:[#allocation358_spill] sm:$0xff] }
 0x4aa   :  { %4755 = vmatprep.subr.bf16.mxu1 %v10743_v30  ;;  %v10754_v30 = vld [vmem:[#allocation46_spill] sm:$0xff] }
 0x4ab   :  { %4503 = vmatpush1.bf16.msra.mxu0 %v10744_v13  ;;  %v10755_v13 = vld [vmem:[#allocation48_spill] sm:$0xff] }
 0x4ac   :  { %4504 = vmatprep.subr.bf16.mxu0 %v10745_v44  ;;  %v10756_v44 = vld [vmem:[#allocation359_spill] sm:$0xff] }
 0x4ad   :  { %4756 = vmatpush1.bf16.msra.mxu1 %v10746_v54  ;;  %v10757_v54 = vld [vmem:[#allocation360_spill] sm:$0xff] }
 0x4ae   :  { %4757 = vmatprep.subr.bf16.mxu1 %v10747_v5  ;;  %v10758_v5 = vld [vmem:[#allocation50_spill] sm:$0xff] }
 0x4af   :  { %4505 = vmatpush1.bf16.msra.mxu0 %v10748_v38  ;;  %v10759_v38 = vld [vmem:[#allocation52_spill] sm:$0xff] }
 0x4b0   :  { %4506 = vmatprep.subr.bf16.mxu0 %v10749_v61  ;;  %v10760_v61 = vld [vmem:[#allocation361_spill] sm:$0xff] }
 0x4b1   :  { %4758 = vmatpush1.bf16.msra.mxu1 %v10750_v55  ;;  %v10761_v55 = vld [vmem:[#allocation362_spill] sm:$0xff] }
 0x4b2   :  { %4759 = vmatprep.subr.bf16.mxu1 %v10751_v43  ;;  %v10762_v43 = vld [vmem:[#allocation54_spill] sm:$0xff] }
 0x4b3   :  { %4507 = vmatpush1.bf16.msra.mxu0 %v10752_v46  ;;  %v10763_v46 = vld [vmem:[#allocation56_spill] sm:$0xff] }
 0x4b4   :  { %4508 = vmatprep.subr.bf16.mxu0 %v10753_v7  ;;  %v10764_v7 = vld [vmem:[#allocation363_spill] sm:$0xff] }
 0x4b5   :  { %4760 = vmatpush1.bf16.msra.mxu1 %v10754_v30  ;;  %v10765_v30 = vld [vmem:[#allocation364_spill] sm:$0xff] }
 0x4b6   :  { %4761 = vmatprep.subr.bf16.mxu1 %v10755_v13  ;;  %v10766_v13 = vld [vmem:[#allocation58_spill] sm:$0xff] }
 0x4b7   :  { %4509 = vmatpush1.bf16.msra.mxu0 %v10756_v44  ;;  %v10767_v44 = vld [vmem:[#allocation60_spill] sm:$0xff] }
 0x4b8   :  { %4510 = vmatprep.subr.bf16.mxu0 %v10757_v54  ;;  %v10768_v54 = vld [vmem:[#allocation365_spill] sm:$0xff] }
 0x4b9   :  { %4762 = vmatpush1.bf16.msra.mxu1 %v10758_v5  ;;  %v10769_v5 = vld [vmem:[#allocation366_spill] sm:$0xff] }
 0x4ba   :  { %4763 = vmatprep.subr.bf16.mxu1 %v10759_v38  ;;  %v10770_v38 = vld [vmem:[#allocation62_spill] sm:$0xff] }
 0x4bb   :  { %4511 = vmatpush2.bf16.msra.mxu0 %v10760_v61  ;;  %v10771_v61 = vld [vmem:[#allocation64_spill] sm:$0xff] }
 0x4bc   :  { %4512 = vmatprep.subr.bf16.mxu0 %v10761_v55  ;;  %v10772_v55 = vld [vmem:[#allocation367_spill] sm:$0xff] }
 0x4bd   :  { %4764 = vmatpush2.bf16.msra.mxu1 %v10762_v43  ;;  %v10773_v43 = vld [vmem:[#allocation368_spill] sm:$0xff] }
 0x4be   :  { %4765 = vmatprep.subr.bf16.mxu1 %v10763_v46  ;;  %v10774_v46 = vld [vmem:[#allocation66_spill] sm:$0xff] }
 0x4bf   :  { %4513 = vmatpush2.bf16.msra.mxu0 %v10764_v7  ;;  %v10775_v7 = vld [vmem:[#allocation68_spill] sm:$0xff] }
 0x4c0   :  { %4514 = vmatprep.subr.bf16.mxu0 %v10765_v30  ;;  %v10776_v30 = vld [vmem:[#allocation369_spill] sm:$0xff] }
 0x4c1   :  { %4766 = vmatpush2.bf16.msra.mxu1 %v10766_v13  ;;  %v10777_v13 = vld [vmem:[#allocation370_spill] sm:$0xff] }
 0x4c2   :  { %4767 = vmatprep.subr.bf16.mxu1 %v10767_v44  ;;  %v10778_v44 = vld [vmem:[#allocation70_spill] sm:$0xff] }
 0x4c3   :  { %4515 = vmatpush2.bf16.msra.mxu0 %v10768_v54  ;;  %v10779_v54 = vld [vmem:[#allocation72_spill] sm:$0xff] }
 0x4c4   :  { %4516 = vmatprep.subr.bf16.mxu0 %v10769_v5  ;;  %v10780_v5 = vld [vmem:[#allocation371_spill] sm:$0xff] }
 0x4c5   :  { %4768 = vmatpush2.bf16.msra.mxu1 %v10770_v38  ;;  %v10781_v38 = vld [vmem:[#allocation372_spill] sm:$0xff] }
 0x4c6   :  { %4769 = vmatprep.subr.bf16.mxu1 %v10771_v61  ;;  %v10782_v61 = vld [vmem:[#allocation74_spill] sm:$0xff] }
 0x4c7   :  { %4517 = vmatpush2.bf16.msra.mxu0 %v10772_v55  ;;  %v10783_v55 = vld [vmem:[#allocation76_spill] sm:$0xff] }
 0x4c8   :  { %4518 = vmatprep.subr.bf16.mxu0 %v10773_v43  ;;  %v10784_v43 = vld [vmem:[#allocation373_spill] sm:$0xff] }
 0x4c9   :  { %4770 = vmatpush2.bf16.msra.mxu1 %v10774_v46  ;;  %v10785_v46 = vld [vmem:[#allocation374_spill] sm:$0xff] }
 0x4ca   :  { %4771 = vmatprep.subr.bf16.mxu1 %v10775_v7  ;;  %v10786_v7 = vld [vmem:[#allocation78_spill] sm:$0xff] }
 0x4cb   :  { %4519 = vmatpush2.bf16.msra.mxu0 %v10776_v30  ;;  %v10787_v30 = vld [vmem:[#allocation80_spill] sm:$0xff] }
 0x4cc   :  { %4520 = vmatprep.subr.bf16.mxu0 %v10777_v13  ;;  %v10788_v13 = vld [vmem:[#allocation375_spill] sm:$0xff] }
 0x4cd   :  { %4772 = vmatpush2.bf16.msra.mxu1 %v10778_v44  ;;  %v10789_v44 = vld [vmem:[#allocation376_spill] sm:$0xff] }
 0x4ce   :  { %4773 = vmatprep.subr.bf16.mxu1 %v10779_v54  ;;  %v10790_v54 = vld [vmem:[#allocation82_spill] sm:$0xff] }
 0x4cf   :  { %4521 = vmatpush2.bf16.msra.mxu0 %v10780_v5  ;;  %v10799_v5 = vld [vmem:[#allocation92_spill] sm:$0xff] }
 0x4d0   :  { %4522 = vmatprep.subr.bf16.mxu0 %v10781_v38  ;;  %v10791_v38 = vld [vmem:[#allocation84_spill] sm:$0xff] }
 0x4d1   :  { %4774 = vmatpush2.bf16.msra.mxu1 %v10782_v61  ;;  %v10792_v61 = vld [vmem:[#allocation377_spill] sm:$0xff] }
 0x4d2   :  { %4775 = vmatprep.subr.bf16.mxu1 %v10783_v55 }
 0x4d3   :  { %4523 = vmatpush2.bf16.msra.mxu0 %v10784_v43 }
 0x4d4   :  { %4524 = vmatprep.subr.bf16.mxu0 %v10785_v46  ;;  %v10798_v46 = vld [vmem:[#allocation90_spill] sm:$0xff] }
 0x4d5   :  { %4776 = vmatpush2.bf16.msra.mxu1 %v10786_v7  ;;  %v10793_v7 = vld [vmem:[#allocation378_spill] sm:$0xff] }
 0x4d6   :  { %4777 = vmatprep.subr.bf16.mxu1 %v10787_v30  ;;  %v10794_v30 = vld [vmem:[#allocation86_spill] sm:$0xff] }
 0x4d7   :  { %4525 = vmatpush2.bf16.msra.mxu0 %v10788_v13  ;;  %v10796_v13 = vld [vmem:[#allocation379_spill] sm:$0xff] }
 0x4d8   :  { %4576 = vmatprep.subr.bf16.mxu0 %v10789_v44 }
 0x4d9   :  { %4778 = vmatpush2.bf16.msra.mxu1 %v10790_v54  ;;  %v10795_v54 = vld [vmem:[#allocation88_spill] sm:$0xff] }
 0x4da   :  { %4527 = vmatmul.mubr.bf16.vlgmr.msra.gmra.mxu0 %v8638_v16  ;;  %4829 = vmatprep.subr.bf16.mxu1 %v10791_v38 }
 0x4db   :  { %4577 = vmatpush1.bf16.msra.mxu0 %v10792_v61  ;;  %4608 = vmatprep.mubr.bf16.mxu0 %v8636_v8  ;;  %v10797_v61 = vld [vmem:[#allocation380_spill] sm:$0xff] }
 0x4dc   :  { %v8786_v55 = vpop.f32.mrf.mxu1  ;;  %4780 = vmatmul.mubr.bf16.vlgmr.msra.gmra.mxu1 %v8638_v16  ;;  %4578 = vmatprep.subr.bf16.mxu0 %v10793_v7  ;;  %v10801_v7 = vld [vmem:[#allocation382_spill] sm:$0xff] }
 0x4dd   :  { %4830 = vmatpush1.bf16.msra.mxu1 %v10794_v30  ;;  %4861 = vmatprep.mubr.bf16.mxu1 %v8636_v8  ;;  %v10802_v30 = vld [vmem:[#allocation94_spill] sm:$0xff] }
 0x4de   :  { %v8792_v44 = vpop.f32.mrf.mxu1  ;;  %4831 = vmatprep.subr.bf16.mxu1 %v10795_v54  ;;  %v10805_v54 = vld [vmem:[#allocation384_spill] sm:$0xff] }
 0x4df   :  { %4579 = vmatpush1.bf16.msra.mxu0 %v10796_v13  ;;  %v10861_v13 = vld [vmem:[#allocation27_spill] sm:$0xff] }
 0x4e0   :  { %v4491_v38 = vpop.f32.mrf.mxu1  ;;  %4580 = vmatprep.subr.bf16.mxu0 %v10797_v61  ;;  %v10807_v61 = vld [vmem:[#allocation100_spill] sm:$0xff] }
 0x4e1   :  { %4832 = vmatpush1.bf16.msra.mxu1 %v10798_v46  ;;  %v10806_v38 = vld [vmem:[#allocation98_spill] sm:$0xff]  ;;  %v10808_v46 = vld [vmem:[#allocation385_spill] sm:$0xff] }
 0x4e2   :  { %v4492_v43 = vpop.f32.mrf.mxu1  ;;  %4833 = vmatprep.subr.bf16.mxu1 %v10799_v5  ;;  %v10810_v5 = vld [vmem:[#allocation102_spill] sm:$0xff] }
 0x4e3   :  { %4581 = vmatpush1.bf16.msra.mxu0 %v10800_v63  ;;  %v10809_v43 = vld [vmem:[#allocation386_spill] sm:$0xff]  ;;  %v10811_v63 = vld [vmem:[#allocation104_spill] sm:$0xff] }
 0x4e4   :  { %4582 = vmatprep.subr.bf16.mxu0 %v10801_v7  ;;  %v10812_v7 = vld [vmem:[#allocation387_spill] sm:$0xff] }
 0x4e5   :  { %4834 = vmatpush1.bf16.msra.mxu1 %v10802_v30  ;;  %v10813_v30 = vld [vmem:[#allocation388_spill] sm:$0xff] }
 0x4e6   :  { %4835 = vmatprep.subr.bf16.mxu1 %v10803_v48  ;;  %v10814_v48 = vld [vmem:[#allocation106_spill] sm:$0xff] }
 0x4e7   :  { %4583 = vmatpush1.bf16.msra.mxu0 %v10804_v42  ;;  %v10815_v42 = vld [vmem:[#allocation108_spill] sm:$0xff] }
 0x4e8   :  { %4584 = vmatprep.subr.bf16.mxu0 %v10805_v54  ;;  %v10816_v54 = vld [vmem:[#allocation389_spill] sm:$0xff] }
 0x4e9   :  { %4836 = vmatpush1.bf16.msra.mxu1 %v10806_v38  ;;  %v10817_v38 = vld [vmem:[#allocation390_spill] sm:$0xff] }
 0x4ea   :  { %4837 = vmatprep.subr.bf16.mxu1 %v10807_v61  ;;  %v10818_v61 = vld [vmem:[#allocation110_spill] sm:$0xff] }
 0x4eb   :  { %4585 = vmatpush1.bf16.msra.mxu0 %v10808_v46  ;;  %v10819_v46 = vld [vmem:[#allocation112_spill] sm:$0xff] }
 0x4ec   :  { %4586 = vmatprep.subr.bf16.mxu0 %v10809_v43  ;;  %v10820_v43 = vld [vmem:[#allocation391_spill] sm:$0xff] }
 0x4ed   :  { %4838 = vmatpush1.bf16.msra.mxu1 %v10810_v5  ;;  %v10821_v5 = vld [vmem:[#allocation392_spill] sm:$0xff] }
 0x4ee   :  { %4839 = vmatprep.subr.bf16.mxu1 %v10811_v63  ;;  %v10822_v63 = vld [vmem:[#allocation114_spill] sm:$0xff] }
 0x4ef   :  { %4587 = vmatpush1.bf16.msra.mxu0 %v10812_v7  ;;  %v10823_v7 = vld [vmem:[#allocation116_spill] sm:$0xff] }
 0x4f0   :  { %4588 = vmatprep.subr.bf16.mxu0 %v10813_v30  ;;  %v10824_v30 = vld [vmem:[#allocation393_spill] sm:$0xff] }
 0x4f1   :  { %4840 = vmatpush1.bf16.msra.mxu1 %v10814_v48  ;;  %v10825_v48 = vld [vmem:[#allocation394_spill] sm:$0xff] }
 0x4f2   :  { %4841 = vmatprep.subr.bf16.mxu1 %v10815_v42  ;;  %v10826_v42 = vld [vmem:[#allocation118_spill] sm:$0xff] }
 0x4f3   :  { %4589 = vmatpush1.bf16.msra.mxu0 %v10816_v54  ;;  %v10827_v54 = vld [vmem:[#allocation120_spill] sm:$0xff] }
 0x4f4   :  { %4590 = vmatprep.subr.bf16.mxu0 %v10817_v38  ;;  %v10828_v38 = vld [vmem:[#allocation395_spill] sm:$0xff] }
 0x4f5   :  { %4842 = vmatpush1.bf16.msra.mxu1 %v10818_v61  ;;  %v10829_v61 = vld [vmem:[#allocation396_spill] sm:$0xff] }
 0x4f6   :  { %4843 = vmatprep.subr.bf16.mxu1 %v10819_v46  ;;  %v10830_v46 = vld [vmem:[#allocation122_spill] sm:$0xff] }
 0x4f7   :  { %4591 = vmatpush1.bf16.msra.mxu0 %v10820_v43  ;;  %v10831_v43 = vld [vmem:[#allocation124_spill] sm:$0xff] }
 0x4f8   :  { %4592 = vmatprep.subr.bf16.mxu0 %v10821_v5  ;;  %v10832_v5 = vld [vmem:[#allocation397_spill] sm:$0xff] }
 0x4f9   :  { %4844 = vmatpush1.bf16.msra.mxu1 %v10822_v63  ;;  %v10833_v63 = vld [vmem:[#allocation398_spill] sm:$0xff] }
 0x4fa   :  { %4845 = vmatprep.subr.bf16.mxu1 %v10823_v7  ;;  %v10834_v7 = vld [vmem:[#allocation126_spill] sm:$0xff] }
 0x4fb   :  { %4593 = vmatpush2.bf16.msra.mxu0 %v10824_v30  ;;  %v10835_v30 = vld [vmem:[#allocation128_spill] sm:$0xff] }
 0x4fc   :  { %4594 = vmatprep.subr.bf16.mxu0 %v10825_v48  ;;  %v10836_v48 = vld [vmem:[#allocation399_spill] sm:$0xff] }
 0x4fd   :  { %4846 = vmatpush2.bf16.msra.mxu1 %v10826_v42  ;;  %v10837_v42 = vld [vmem:[#allocation400_spill] sm:$0xff] }
 0x4fe   :  { %4847 = vmatprep.subr.bf16.mxu1 %v10827_v54  ;;  %v10838_v54 = vld [vmem:[#allocation130_spill] sm:$0xff] }
 0x4ff   :  { %4595 = vmatpush2.bf16.msra.mxu0 %v10828_v38  ;;  %v10839_v38 = vld [vmem:[#allocation132_spill] sm:$0xff] }
 0x500   :  { %4596 = vmatprep.subr.bf16.mxu0 %v10829_v61  ;;  %v10840_v61 = vld [vmem:[#allocation401_spill] sm:$0xff] }
 0x501   :  { %4848 = vmatpush2.bf16.msra.mxu1 %v10830_v46  ;;  %v10841_v46 = vld [vmem:[#allocation402_spill] sm:$0xff] }
 0x502   :  { %4849 = vmatprep.subr.bf16.mxu1 %v10831_v43  ;;  %v10842_v43 = vld [vmem:[#allocation134_spill] sm:$0xff] }
 0x503   :  { %4597 = vmatpush2.bf16.msra.mxu0 %v10832_v5  ;;  %v10843_v5 = vld [vmem:[#allocation136_spill] sm:$0xff] }
 0x504   :  { %4598 = vmatprep.subr.bf16.mxu0 %v10833_v63  ;;  %v10844_v63 = vld [vmem:[#allocation403_spill] sm:$0xff] }
 0x505   :  { %4850 = vmatpush2.bf16.msra.mxu1 %v10834_v7  ;;  %v10845_v7 = vld [vmem:[#allocation404_spill] sm:$0xff] }
 0x506   :  { %4851 = vmatprep.subr.bf16.mxu1 %v10835_v30  ;;  %v10846_v30 = vld [vmem:[#allocation138_spill] sm:$0xff] }
 0x507   :  { %4599 = vmatpush2.bf16.msra.mxu0 %v10836_v48  ;;  %v10847_v48 = vld [vmem:[#allocation140_spill] sm:$0xff] }
 0x508   :  { %4600 = vmatprep.subr.bf16.mxu0 %v10837_v42  ;;  %v10848_v42 = vld [vmem:[#allocation405_spill] sm:$0xff] }
 0x509   :  { %4852 = vmatpush2.bf16.msra.mxu1 %v10838_v54  ;;  %v10849_v54 = vld [vmem:[#allocation406_spill] sm:$0xff] }
 0x50a   :  { %4853 = vmatprep.subr.bf16.mxu1 %v10839_v38  ;;  %v10850_v38 = vld [vmem:[#allocation142_spill] sm:$0xff] }
 0x50b   :  { %4601 = vmatpush2.bf16.msra.mxu0 %v10840_v61  ;;  %v10851_v61 = vld [vmem:[#allocation144_spill] sm:$0xff] }
 0x50c   :  { %4602 = vmatprep.subr.bf16.mxu0 %v10841_v46  ;;  %v10852_v46 = vld [vmem:[#allocation407_spill] sm:$0xff] }
 0x50d   :  { %4854 = vmatpush2.bf16.msra.mxu1 %v10842_v43  ;;  %v10853_v43 = vld [vmem:[#allocation19_spill] sm:$0xff] }
 0x50e   :  { %4855 = vmatprep.subr.bf16.mxu1 %v10843_v5  ;;  %v10854_v5 = vld [vmem:[#allocation146_spill] sm:$0xff] }
 0x50f   :  { %4603 = vmatpush2.bf16.msra.mxu0 %v10844_v63 }
 0x510   :  { %4604 = vmatprep.subr.bf16.mxu0 %v10845_v7 }
 0x511   :  { %4856 = vmatpush2.bf16.msra.mxu1 %v10846_v30  ;;  %v10855_v30 = vld [vmem:[#allocation147_spill] sm:$0xff] }
 0x512   :  { %4857 = vmatprep.subr.bf16.mxu1 %v10847_v48  ;;  %v10856_v48 = vld [vmem:[#allocation21_spill] sm:$0xff] }
 0x513   :  { %4605 = vmatpush2.bf16.msra.mxu0 %v10848_v42  ;;  %v10859_v42 = vld [vmem:[#allocation149_spill] sm:$0xff] }
 0x514   :  { %4606 = vmatprep.subr.bf16.mxu0 %v10849_v54 }
 0x515   :  { %4858 = vmatpush2.bf16.msra.mxu1 %v10850_v38  ;;  %v10857_v38 = vld [vmem:[#allocation23_spill] sm:$0xff] }
 0x516   :  { %4859 = vmatprep.subr.bf16.mxu1 %v10851_v61 }
 0x517   :  { %4607 = vmatpush2.bf16.msra.mxu0 %v10852_v46 }
 0x518   :  { %4706 = vmatprep.subr.bf16.mxu0 %v10853_v43  ;;  %v10858_v43 = vld [vmem:[#allocation148_spill] sm:$0xff] }
 0x519   :  { %4860 = vmatpush2.bf16.msra.mxu1 %v10854_v5 }
 0x51a   :  { %4609 = vmatmul.mubr.bf16.vlgmr.msra.gmra.mxu0 %v8638_v16  ;;  %v8855_v7 = vpop.f32.mrf.mxu0  ;;  %5019 = vmatprep.subr.bf16.mxu1 %v10855_v30  ;;  %v10860_v30 = vld [vmem:[#allocation25_spill] sm:$0xff] }
 0x51b   :  { %4707 = vmatpush1.bf16.msra.mxu0 %v10856_v48  ;;  %4738 = vmatprep.mubr.bf16.mxu0 %v8636_v8 }
 0x51c   :  { %v8860_v54 = vpop.f32.mrf.mxu1  ;;  %4862 = vmatmul.mubr.bf16.vlgmr.msra.gmra.mxu1 %v8638_v16  ;;  %v8863_v61 = vpop.f32.mrf.mxu0  ;;  %4708 = vmatprep.subr.bf16.mxu0 %v10857_v38  ;;  %v10865_v38 = vld [vmem:[#allocation31_spill] sm:$0xff] }
 0x51d   :  { %5020 = vmatpush1.bf16.msra.mxu1 %v10858_v43  ;;  %v10866_v43 = vld [vmem:[#allocation152_spill] sm:$0xff] }
 0x51e   :  { %v8867_v5 = vpop.f32.mrf.mxu1  ;;  %v4368_v46 = vpop.f32.mrf.mxu0  ;;  %5021 = vmatprep.subr.bf16.mxu1 %v10859_v42  ;;  %v10868_v42 = vld [vmem:[#allocation33_spill] sm:$0xff] }
 0x51f   :  { %4709 = vmatpush1.bf16.msra.mxu0 %v10860_v30  ;;  %v10867_v46 = vld [vmem:[#allocation153_spill] sm:$0xff]  ;;  %v10869_v30 = vld [vmem:[#allocation35_spill] sm:$0xff] }
 0x520   :  { %v4573_v48 = vpop.f32.mrf.mxu1  ;;  %v4369_v63 = vpop.f32.mrf.mxu0  ;;  %4710 = vmatprep.subr.bf16.mxu0 %v10861_v13  ;;  %v10871_v13 = vld [vmem:[#allocation155_spill] sm:$0xff] }
 0x521   :  { %5022 = vmatpush1.bf16.msra.mxu1 %v10862_v40  ;;  %v10870_v63 = vld [vmem:[#allocation154_spill] sm:$0xff]  ;;  %v10872_v40 = vld [vmem:[#allocation37_spill] sm:$0xff] }
 0x522   :  { %v4574_v33 = vpop.f32.mrf.mxu1  ;;  %5023 = vmatprep.subr.bf16.mxu1 %v10863_v32  ;;  %v10874_v32 = vld [vmem:[#allocation156_spill] sm:$0xff]  ;;  %v10876_v48 = vld [vmem:[#allocation41_spill] sm:$0xff] }
 0x523   :  { %4711 = vmatpush1.bf16.msra.mxu0 %v10864_v51  ;;  %v10873_v33 = vld [vmem:[#allocation39_spill] sm:$0xff]  ;;  %v10875_v51 = vld [vmem:[#allocation157_spill] sm:$0xff] }
 0x524   :  { %4712 = vmatprep.subr.bf16.mxu0 %v10865_v38  ;;  %v10877_v38 = vld [vmem:[#allocation43_spill] sm:$0xff] }
 0x525   :  { %5024 = vmatpush1.bf16.msra.mxu1 %v10866_v43  ;;  %v10878_v43 = vld [vmem:[#allocation158_spill] sm:$0xff] }
 0x526   :  { %5025 = vmatprep.subr.bf16.mxu1 %v10867_v46  ;;  %v10879_v46 = vld [vmem:[#allocation159_spill] sm:$0xff] }
 0x527   :  { %4713 = vmatpush1.bf16.msra.mxu0 %v10868_v42  ;;  %v10880_v42 = vld [vmem:[#allocation45_spill] sm:$0xff] }
 0x528   :  { %4714 = vmatprep.subr.bf16.mxu0 %v10869_v30  ;;  %v10881_v30 = vld [vmem:[#allocation47_spill] sm:$0xff] }
 0x529   :  { %5026 = vmatpush1.bf16.msra.mxu1 %v10870_v63  ;;  %v10882_v63 = vld [vmem:[#allocation160_spill] sm:$0xff] }
 0x52a   :  { %5027 = vmatprep.subr.bf16.mxu1 %v10871_v13  ;;  %v10883_v13 = vld [vmem:[#allocation161_spill] sm:$0xff] }
 0x52b   :  { %4715 = vmatpush1.bf16.msra.mxu0 %v10872_v40  ;;  %v10884_v40 = vld [vmem:[#allocation49_spill] sm:$0xff] }
 0x52c   :  { %4716 = vmatprep.subr.bf16.mxu0 %v10873_v33  ;;  %v10885_v33 = vld [vmem:[#allocation51_spill] sm:$0xff] }
 0x52d   :  { %5028 = vmatpush1.bf16.msra.mxu1 %v10874_v32  ;;  %v10886_v32 = vld [vmem:[#allocation162_spill] sm:$0xff] }
 0x52e   :  { %5029 = vmatprep.subr.bf16.mxu1 %v10875_v51  ;;  %v10887_v51 = vld [vmem:[#allocation163_spill] sm:$0xff] }
 0x52f   :  { %4717 = vmatpush1.bf16.msra.mxu0 %v10876_v48  ;;  %v10888_v48 = vld [vmem:[#allocation53_spill] sm:$0xff] }
 0x530   :  { %4718 = vmatprep.subr.bf16.mxu0 %v10877_v38  ;;  %v10889_v38 = vld [vmem:[#allocation55_spill] sm:$0xff] }
 0x531   :  { %5030 = vmatpush1.bf16.msra.mxu1 %v10878_v43  ;;  %v10890_v43 = vld [vmem:[#allocation164_spill] sm:$0xff] }
 0x532   :  { %5031 = vmatprep.subr.bf16.mxu1 %v10879_v46  ;;  %v10891_v46 = vld [vmem:[#allocation165_spill] sm:$0xff] }
 0x533   :  { %4719 = vmatpush1.bf16.msra.mxu0 %v10880_v42  ;;  %v10892_v42 = vld [vmem:[#allocation57_spill] sm:$0xff] }
 0x534   :  { %4720 = vmatprep.subr.bf16.mxu0 %v10881_v30  ;;  %v10893_v30 = vld [vmem:[#allocation59_spill] sm:$0xff] }
 0x535   :  { %5032 = vmatpush1.bf16.msra.mxu1 %v10882_v63  ;;  %v10894_v63 = vld [vmem:[#allocation166_spill] sm:$0xff] }
 0x536   :  { %5033 = vmatprep.subr.bf16.mxu1 %v10883_v13  ;;  %v10895_v13 = vld [vmem:[#allocation167_spill] sm:$0xff] }
 0x537   :  { %4721 = vmatpush1.bf16.msra.mxu0 %v10884_v40  ;;  %v10896_v40 = vld [vmem:[#allocation61_spill] sm:$0xff] }
 0x538   :  { %4722 = vmatprep.subr.bf16.mxu0 %v10885_v33  ;;  %v10897_v33 = vld [vmem:[#allocation63_spill] sm:$0xff] }
 0x539   :  { %5034 = vmatpush1.bf16.msra.mxu1 %v10886_v32  ;;  %v10898_v32 = vld [vmem:[#allocation168_spill] sm:$0xff] }
 0x53a   :  { %5035 = vmatprep.subr.bf16.mxu1 %v10887_v51  ;;  %v10899_v51 = vld [vmem:[#allocation169_spill] sm:$0xff] }
 0x53b   :  { %4723 = vmatpush2.bf16.msra.mxu0 %v10888_v48  ;;  %v10900_v48 = vld [vmem:[#allocation65_spill] sm:$0xff] }
 0x53c   :  { %4724 = vmatprep.subr.bf16.mxu0 %v10889_v38  ;;  %v10901_v38 = vld [vmem:[#allocation67_spill] sm:$0xff] }
 0x53d   :  { %5036 = vmatpush2.bf16.msra.mxu1 %v10890_v43  ;;  %v10902_v43 = vld [vmem:[#allocation172_spill] sm:$0xff] }
 0x53e   :  { %5037 = vmatprep.subr.bf16.mxu1 %v10891_v46  ;;  %v10903_v46 = vld [vmem:[#allocation173_spill] sm:$0xff] }
 0x53f   :  { %4725 = vmatpush2.bf16.msra.mxu0 %v10892_v42  ;;  %v10904_v42 = vld [vmem:[#allocation69_spill] sm:$0xff] }
 0x540   :  { %4726 = vmatprep.subr.bf16.mxu0 %v10893_v30  ;;  %v10905_v30 = vld [vmem:[#allocation71_spill] sm:$0xff] }
 0x541   :  { %5038 = vmatpush2.bf16.msra.mxu1 %v10894_v63  ;;  %v10906_v63 = vld [vmem:[#allocation176_spill] sm:$0xff] }
 0x542   :  { %5039 = vmatprep.subr.bf16.mxu1 %v10895_v13  ;;  %v10907_v13 = vld [vmem:[#allocation177_spill] sm:$0xff] }
 0x543   :  { %4727 = vmatpush2.bf16.msra.mxu0 %v10896_v40  ;;  %v10908_v40 = vld [vmem:[#allocation73_spill] sm:$0xff] }
 0x544   :  { %4728 = vmatprep.subr.bf16.mxu0 %v10897_v33  ;;  %v10909_v33 = vld [vmem:[#allocation75_spill] sm:$0xff] }
 0x545   :  { %5040 = vmatpush2.bf16.msra.mxu1 %v10898_v32  ;;  %v10910_v32 = vld [vmem:[#allocation180_spill] sm:$0xff] }
 0x546   :  { %5041 = vmatprep.subr.bf16.mxu1 %v10899_v51  ;;  %v10911_v51 = vld [vmem:[#allocation181_spill] sm:$0xff] }
 0x547   :  { %4729 = vmatpush2.bf16.msra.mxu0 %v10900_v48  ;;  %v10912_v48 = vld [vmem:[#allocation77_spill] sm:$0xff] }
 0x548   :  { %4730 = vmatprep.subr.bf16.mxu0 %v10901_v38  ;;  %v10913_v38 = vld [vmem:[#allocation79_spill] sm:$0xff] }
 0x549   :  { %5042 = vmatpush2.bf16.msra.mxu1 %v10902_v43  ;;  %v10914_v43 = vld [vmem:[#allocation184_spill] sm:$0xff] }
 0x54a   :  { %5043 = vmatprep.subr.bf16.mxu1 %v10903_v46  ;;  %v10915_v46 = vld [vmem:[#allocation185_spill] sm:$0xff] }
 0x54b   :  { %4731 = vmatpush2.bf16.msra.mxu0 %v10904_v42  ;;  %v10916_v42 = vld [vmem:[#allocation81_spill] sm:$0xff] }
 0x54c   :  { %4732 = vmatprep.subr.bf16.mxu0 %v10905_v30  ;;  %v10917_v30 = vld [vmem:[#allocation83_spill] sm:$0xff] }
 0x54d   :  { %5044 = vmatpush2.bf16.msra.mxu1 %v10906_v63  ;;  %v10918_v63 = vld [vmem:[#allocation188_spill] sm:$0xff] }
 0x54e   :  { %5045 = vmatprep.subr.bf16.mxu1 %v10907_v13 }
 0x54f   :  { %4733 = vmatpush2.bf16.msra.mxu0 %v10908_v40  ;;  %v10919_v40 = vld [vmem:[#allocation189_spill] sm:$0xff] }
 0x550   :  { %4734 = vmatprep.subr.bf16.mxu0 %v10909_v33  ;;  %v10920_v33 = vld [vmem:[#allocation85_spill] sm:$0xff] }
 0x551   :  { %5046 = vmatpush2.bf16.msra.mxu1 %v10910_v32 }
 0x552   :  { %5047 = vmatprep.subr.bf16.mxu1 %v10911_v51 }
 0x553   :  { %4735 = vmatpush2.bf16.msra.mxu0 %v10912_v48  ;;  %v10921_v48 = vld [vmem:[#allocation87_spill] sm:$0xff] }
 0x554   :  { %4736 = vmatprep.subr.bf16.mxu0 %v10913_v38 }
 0x555   :  { %5048 = vmatpush2.bf16.msra.mxu1 %v10914_v43 }
 0x556   :  { %5049 = vmatprep.subr.bf16.mxu1 %v10915_v46  ;;  %v10922_v46 = vld [vmem:[#allocation89_spill] sm:$0xff] }
 0x557   :  { %4737 = vmatpush2.bf16.msra.mxu0 %v10916_v42 }
 0x558   :  { %4788 = vmatprep.subr.bf16.mxu0 %v10917_v30 }
 0x559   :  { %5050 = vmatpush2.bf16.msra.mxu1 %v10918_v63  ;;  %v10923_v63 = vld [vmem:[#allocation91_spill] sm:$0xff] }
 0x55a   :  { %v4446_v13 = vpop.f32.mrf.mxu0  ;;  %4739 = vmatmul.mubr.bf16.vlgmr.msra.gmra.mxu0 %v8638_v16  ;;  %5101 = vmatprep.subr.bf16.mxu1 %v10919_v40  ;;  %v10924_v40 = vld [vmem:[#allocation93_spill] sm:$0xff] }
 0x55b   :  { %4789 = vmatpush1.bf16.msra.mxu0 %v10920_v33  ;;  %4820 = vmatprep.mubr.bf16.mxu0 %v8636_v8  ;;  %v10925_v33 = vld [vmem:[#allocation95_spill] sm:$0xff]  ;;  %v10926_v8 = vld [vmem:[#allocation97_spill] sm:$0xff] }
 0x55c   :  { %v4448_v32 = vpop.f32.mrf.mxu0  ;;  %v8933_v51 = vpop.f32.mrf.mxu1  ;;  %4790 = vmatprep.subr.bf16.mxu0 %v10921_v48  ;;  %v10929_v48 = vld [vmem:[#allocation103_spill] sm:$0xff] }
 0x55e   :  { %v4450_v38 = vpop.f32.mrf.mxu0  ;;  %v8936_v43 = vpop.f32.mrf.mxu1 }
 0x55f   :  { %4791 = vmatpush1.bf16.msra.mxu0 %v10922_v46  ;;  %v10930_v38 = vld [vmem:[#allocation105_spill] sm:$0xff]  ;;  %v10931_v46 = vld [vmem:[#allocation107_spill] sm:$0xff] }
 0x560   :  { %v4451_v42 = vpop.f32.mrf.mxu0  ;;  %v4655_v30 = vpop.f32.mrf.mxu1  ;;  %4792 = vmatprep.subr.bf16.mxu0 %v10923_v63  ;;  %v10935_v63 = vld [vmem:[#allocation109_spill] sm:$0xff] }
 0x561   :  { %v10933_v42 = vld [vmem:[#allocation115_spill] sm:$0xff]  ;;  %v10934_v30 = vld [vmem:[#allocation117_spill] sm:$0xff] }
 0x562   :  { %v4656_v49 = vpop.f32.mrf.mxu1 }
 0x563   :  { %4793 = vmatpush1.bf16.msra.mxu0 %v10924_v40  ;;  %v10932_v49 = vld [vmem:[#allocation113_spill] sm:$0xff] }
 0x564   :  { %4794 = vmatprep.subr.bf16.mxu0 %v10925_v33  ;;  %v10937_v33 = vld [vmem:[#allocation408_spill] sm:$0xff] }
 0x567   :  { %4795 = vmatpush1.bf16.msra.mxu0 %v10926_v8  ;;  %v4449_v8 = vadd.f32 %v4448_v32, %v10937_v33 }
 0x568   :  { %4796 = vmatprep.subr.bf16.mxu0 %v10927_v9  ;;  %v4365_v9 = vadd.f32 %v8855_v7, %v10935_v63 }
 0x56b   :  { %4797 = vmatpush1.bf16.msra.mxu0 %v10928_v60  ;;  %v10936_v60 = vld [vmem:[#allocation111_spill] sm:$0xff] }
 0x56c   :  { %4798 = vmatprep.subr.bf16.mxu0 %v10929_v48  ;;  %v4447_v40 = vadd.f32 %v4446_v13, %v10936_v60  ;;  %v10938_v48 = vld [vmem:[#allocation121_spill] sm:$0xff] }
 0x56f   :  { %4799 = vmatpush1.bf16.msra.mxu0 %v10930_v38  ;;  %v4488_v38 = vadd.f32 %v8786_v55, %v4447_v40  ;;  %v10945_v55 = vld [vmem:[#allocation143_spill] sm:$0xff] }
 0x570   :  { %4800 = vmatprep.subr.bf16.mxu0 %v10931_v46  ;;  %v4490_v46 = vadd.f32 %v8792_v44, %v4449_v8  ;;  %v10941_v44 = vld [vmem:[#allocation135_spill] sm:$0xff] }
 0x571   :  { %v6353_v13 = vmul.f32 -1.442695, %v4488_v38  ;;  %v10947_v40 = vld [vmem:[#allocation171_spill] sm:$0xff] }
 0x572   :  { %v6354_v32 = vmul.f32 -1.442695, %v4490_v46  ;;  %v10948_v46 = vld [vmem:[#allocation170_spill] sm:$0xff] }
 0x573   :  { %4801 = vmatpush1.bf16.msra.mxu0 %v10558_v11  ;;  %v4406_v11 = vadd.f32 %v8715_v19, %v4365_v9 }
 0x574   :  { %4802 = vmatprep.subr.bf16.mxu0 %v10559_v59  ;;  %v4367_v59 = vadd.f32 %v8863_v61, %v8447_v17  ;;  %v10939_v61 = vld [vmem:[#allocation131_spill] sm:$0xff] }
 0x576   :  { %v4408_v7 = vadd.f32 %v8720_v22, %v4367_v59  ;;  %v10943_v22 = vld [vmem:[#allocation139_spill] sm:$0xff] }
 0x577   :  { %4803 = vmatpush1.bf16.msra.mxu0 %v10932_v49 }
 0x578   :  { %4804 = vmatprep.subr.bf16.mxu0 %v10933_v42  ;;  %v6352_v19 = vmul.f32 -1.442695, %v4408_v7 }
 0x57b   :  { %4805 = vmatpush2.bf16.msra.mxu0 %v10934_v30  ;;  %v10946_v30 = vld [vmem:[#allocation145_spill] sm:$0xff] }
 0x57c   :  { %4806 = vmatprep.subr.bf16.mxu0 %v10570_v31  ;;  %v6351_v31 = vmul.f32 -1.442695, %v4406_v11 }
 0x57e   :  { %6614 = vpow2.f32 %v6351_v31 }
 0x57f   :  { %4807 = vmatpush2.bf16.msra.mxu0 %v10938_v48  ;;  %6616 = vpow2.f32 %v6353_v13 }
 0x580   :  { %4808 = vmatprep.subr.bf16.mxu0 %v10572_v34  ;;  %6618 = vpow2.f32 %v6354_v32  ;;  %v10940_v34 = vld [vmem:[#allocation133_spill] sm:$0xff]  ;;  %v10949_v32 = vld [vmem:[#allocation175_spill] sm:$0xff] }
 0x581   :  { %6620 = vpow2.f32 %v6352_v19 }
 0x583   :  { %4809 = vmatpush2.bf16.msra.mxu0 %v10573_v15  ;;  %v10942_v15 = vld [vmem:[#allocation137_spill] sm:$0xff] }
 0x584   :  { %4810 = vmatprep.subr.bf16.mxu0 %v10574_v56  ;;  %v10944_v56 = vld [vmem:[#allocation141_spill] sm:$0xff] }
 0x587   :  { %4811 = vmatpush2.bf16.msra.mxu0 %v10575_v28 }
 0x588   :  { %4812 = vmatprep.subr.bf16.mxu0 %v10939_v61  ;;  %v10950_v61 = vld [vmem:[#allocation119_spill] sm:$0xff] }
 0x58b   :  { %4813 = vmatpush2.bf16.msra.mxu0 %v10940_v34  ;;  %v6615_v28 = vpop.eup %6614 }
 0x58c   :  { %4814 = vmatprep.subr.bf16.mxu0 %v10941_v44  ;;  %v6617_v49 = vpop.eup %6616  ;;  %v4664_v9 = vadd.f32 1.0, %v6615_v28 }
 0x58d   :  { %v6619_v42 = vpop.eup %6618  ;;  %v4676_v48 = vadd.f32 1.0, %v6617_v49  ;;  %v10952_v49 = vld [vmem:[#allocation174_spill] sm:$0xff] }
 0x58e   :  { %v6621_v8 = vpop.eup %6620  ;;  %v4677_v11 = vadd.f32 1.0, %v6619_v42  ;;  %6622 = vrcp.f32 %v4664_v9  ;;  %v10953_v9 = vld [vmem:[#allocation179_spill] sm:$0xff] }
 0x58f   :  { %4815 = vmatpush2.bf16.msra.mxu0 %v10942_v15  ;;  %v4665_v31 = vadd.f32 1.0, %v6621_v8  ;;  %6624 = vrcp.f32 %v4676_v48 }
 0x590   :  { %4816 = vmatprep.subr.bf16.mxu0 %v10943_v22  ;;  %6626 = vrcp.f32 %v4677_v11 }
 0x593   :  { %4817 = vmatpush2.bf16.msra.mxu0 %v10944_v56  ;;  %v10951_v56 = vld [vmem:[#allocation267_spill] sm:$0xff] }
 0x594   :  { %4818 = vmatprep.subr.bf16.mxu0 %v10945_v55 }
 0x597   :  { %4819 = vmatpush2.bf16.msra.mxu0 %v10946_v30 }
 0x598   :  { %4978 = vmatprep.subr.bf16.mxu0 %v10947_v40  ;;  %v10954_v40 = vld [vmem:[#allocation269_spill] sm:$0xff] }
 0x59a   :  { %v4528_v59 = vpop.f32.mrf.mxu0  ;;  %4821 = vmatmul.mubr.bf16.vlgmr.msra.gmra.mxu0 %v8638_v16 }
 0x59b   :  { %v4529_v38 = vadd.f32 %v4528_v59, %v8478_v41  ;;  %4979 = vmatpush1.bf16.msra.mxu0 %v10948_v46  ;;  %v10955_v59 = vld [vmem:[#allocation178_spill] sm:$0xff]  ;;  %v10958_v46 = vld [vmem:[#allocation187_spill] sm:$0xff] }
 0x59c   :  { %v4530_v7 = vpop.f32.mrf.mxu0  ;;  %v4781_v13 = vpop.f32.mrf.mxu1  ;;  %4980 = vmatprep.subr.bf16.mxu0 %v10949_v32  ;;  %v10959_v32 = vld [vmem:[#allocation186_spill] sm:$0xff] }
 0x59d   :  { %v4570_v19 = vadd.f32 %v8860_v54, %v4529_v38  ;;  %v4531_v34 = vadd.f32 %v4530_v7, %v10950_v61  ;;  %v4880_v44 = vrot.slane %v4781_v13, 4  ;;  %v10957_v38 = vld [vmem:[#allocation182_spill] sm:$0xff] }
 0x59e   :  { %v4532_v15 = vpop.f32.mrf.mxu0  ;;  %v4783_v22 = vpop.f32.mrf.mxu1 }
 0x59f   :  { %6628 = vtanh.f32 %v4570_v19  ;;  %v4572_v16 = vadd.f32 %v8867_v5, %v4531_v34  ;;  %v4896_v55 = vadd.f32 %v4880_v44, %v10951_v56  ;;  %v4881_v28 = vrot.slane %v4783_v22, 4  ;;  %4981 = vmatpush1.bf16.msra.mxu0 %v10952_v49  ;;  %v10956_v5 = vld [vmem:[#allocation183_spill] sm:$0xff] }
 0x5a0   :  { %6630 = vrcp.f32 %v4665_v31  ;;  %v4533_v42 = vpop.f32.mrf.mxu0  ;;  %v4785_v30 = vpop.f32.mrf.mxu1  ;;  %4982 = vmatprep.subr.bf16.mxu0 %v10953_v9  ;;  %v10960_v34 = vld [vmem:[#allocation191_spill] sm:$0xff]  ;;  %v10963_v9 = vld [vmem:[#allocation194_spill] sm:$0xff] }
 0x5a1   :  { %6632 = vtanh.f32 %v4572_v16  ;;  %v6359_v54 = vmul.f32 -1.442695, %v4896_v55  ;;  %v4897_v8 = vadd.f32 %v4881_v28, %v10954_v40  ;;  %v6623_v31 = vpop.eup %6622  ;;  %v10961_v55 = vld [vmem:[#allocation123_spill] sm:$0xff]  ;;  %v10962_v42 = vld [vmem:[#allocation190_spill] sm:$0xff] }
 0x5a2   :  { %v4786_v48 = vpop.f32.mrf.mxu1  ;;  %v6625_v7 = vpop.eup %6624 }
 0x5a3   :  { %6634 = vpow2.f32 %v6359_v54  ;;  %v6360_v11 = vmul.f32 -1.442695, %v4897_v8  ;;  %4983 = vmatpush1.bf16.msra.mxu0 %v10955_v59  ;;  %v6627_v13 = vpop.eup %6626  ;;  %v4696_v15 = vmul.f32 %v6625_v7, %v8503_v1  ;;  %v10965_v1 = vld [vmem:[#allocation198_spill] sm:$0xff]  ;;  %v10966_v59 = vld [vmem:[#allocation199_spill] sm:$0xff]  ;;  %v4942_v7 = vrot.slane %v8617_v27, 6 }
 0x5a4   :  { %4984 = vmatprep.subr.bf16.mxu0 %v10956_v5  ;;  %v4697_v28 = vmul.f32 %v6627_v13, %v10961_v55  ;;  %v10967_v5 = vld [vmem:[#allocation202_spill] sm:$0xff]  ;;  %v10974_v55 = vld [vmem:[#allocation215_spill] sm:$0xff] }
 0x5a5   :  { %6636 = vpow2.f32 %v6360_v11  ;;  %v10964_v11 = vld [vmem:[#allocation195_spill] sm:$0xff]  ;;  %v10971_v13 = vld [vmem:[#allocation210_spill] sm:$0xff] }
 0x5a6   :  { %v10977_v27 = vld [vmem:[#allocation222_spill] sm:$0xff] }
 0x5a7   :  { %4985 = vmatpush1.bf16.msra.mxu0 %v10957_v38  ;;  %v10968_v38 = vld [vmem:[#allocation203_spill] sm:$0xff] }
 0x5a8   :  { %4986 = vmatprep.subr.bf16.mxu0 %v10958_v46  ;;  %v10969_v46 = vld [vmem:[#allocation206_spill] sm:$0xff] }
 0x5ab   :  { %4987 = vmatpush1.bf16.msra.mxu0 %v10959_v32 }
 0x5ac   :  { %v6629_v19 = vpop.eup %6628  ;;  %4988 = vmatprep.subr.bf16.mxu0 %v10960_v34 }
 0x5ad   :  { %v6631_v44 = vpop.eup %6630  ;;  %v4698_v22 = vmul.f32 %v6629_v19, %v6623_v31  ;;  %v10970_v31 = vld [vmem:[#allocation207_spill] sm:$0xff]  ;;  %v4943_v19 = vrot.slane %v8623_v21, 6  ;;  %v10979_v21 = vld [vmem:[#allocation226_spill] sm:$0xff] }
 0x5ae   :  { %v6633_v16 = vpop.eup %6632 }
 0x5af   :  { %v8996_v56 = vadd.f32 %v4698_v22, %v4696_v15  ;;  %v4699_v49 = vmul.f32 %v6633_v16, %v6631_v44  ;;  %4989 = vmatpush1.bf16.msra.mxu0 %v10962_v42  ;;  %v10972_v22 = vld [vmem:[#allocation211_spill] sm:$0xff]  ;;  %v10973_v16 = vld [vmem:[#allocation214_spill] sm:$0xff] }
 0x5b0   :  { %v6635_v30 = vpop.eup %6634  ;;  %4990 = vmatprep.subr.bf16.mxu0 %v10963_v9  ;;  %v10978_v42 = vld [vmem:[#allocation223_spill] sm:$0xff]  ;;  %v10981_v9 = vld [vmem:[#allocation230_spill] sm:$0xff] }
 0x5b1   :  { %v9001_v54 = vadd.f32 %v4699_v49, %v4697_v28  ;;  %v4920_v40 = vadd.f32 1.0, %v6635_v30  ;;  %v10975_v28 = vld [vmem:[#allocation218_spill] sm:$0xff]  ;;  %v10976_v49 = vld [vmem:[#allocation219_spill] sm:$0xff] }
 0x5b2   :  { %v6637_v8 = vpop.eup %6636  ;;  %v10980_v30 = vld [vmem:[#allocation227_spill] sm:$0xff] }
 0x5b3   :  { %v4921_v48 = vadd.f32 1.0, %v6637_v8  ;;  %4991 = vmatpush1.bf16.msra.mxu0 %v10964_v11  ;;  %6638 = vrcp.f32 %v4920_v40  ;;  %v10982_v40 = vld [vmem:[#allocation231_spill] sm:$0xff]  ;;  %v10983_v8 = vld [vmem:[#allocation234_spill] sm:$0xff]  ;;  %v10984_v11 = vld [vmem:[#allocation125_spill] sm:$0xff] }
 0x5b4   :  { %4992 = vmatprep.subr.bf16.mxu0 %v10965_v1 }
 0x5b5   :  { %6640 = vrcp.f32 %v4921_v48 }
 0x5b7   :  { %4993 = vmatpush1.bf16.msra.mxu0 %v10966_v59 }
 0x5b8   :  { %4994 = vmatprep.subr.bf16.mxu0 %v10967_v5 }
 0x5bb   :  { %4995 = vmatpush2.bf16.msra.mxu0 %v10968_v38 }
 0x5bc   :  { %4996 = vmatprep.subr.bf16.mxu0 %v10969_v46  ;;  %v10985_v46 = vld [vmem:[#allocation127_spill] sm:$0xff] }
 0x5bf   :  { %4997 = vmatpush2.bf16.msra.mxu0 %v10970_v31 }
 0x5c0   :  { %4998 = vmatprep.subr.bf16.mxu0 %v10971_v13  ;;  %v6639_v32 = vpop.eup %6638 }
 0x5c1   :  { %v9013_v44 = vmul.f32 %v6639_v32, %v4942_v7 }
 0x5c2   :  { %v6641_v34 = vpop.eup %6640 }
 0x5c3   :  { %v9015_v15 = vmul.f32 %v6641_v34, %v4943_v19  ;;  %4999 = vmatpush2.bf16.msra.mxu0 %v10972_v22 }
 0x5c4   :  { %5000 = vmatprep.subr.bf16.mxu0 %v10973_v16 }
 0x5c7   :  { %5001 = vmatpush2.bf16.msra.mxu0 %v10974_v55 }
 0x5c8   :  { %5002 = vmatprep.subr.bf16.mxu0 %v10975_v28 }
 0x5cb   :  { %5003 = vmatpush2.bf16.msra.mxu0 %v10976_v49 }
 0x5cc   :  { %5004 = vmatprep.subr.bf16.mxu0 %v10977_v27 }
 0x5cf   :  { %5005 = vmatpush2.bf16.msra.mxu0 %v10978_v42 }
 0x5d0   :  { %5006 = vmatprep.subr.bf16.mxu0 %v10979_v21 }
 0x5d3   :  { %5007 = vmatpush2.bf16.msra.mxu0 %v10980_v30 }
 0x5d4   :  { %5008 = vmatprep.subr.bf16.mxu0 %v10981_v9 }
 0x5d7   :  { %5009 = vmatpush2.bf16.msra.mxu0 %v10982_v40 }
 0x5d8   :  { %5060 = vmatprep.subr.bf16.mxu0 %v10983_v8 }
 0x5da   :  { %v4610_v48 = vpop.f32.mrf.mxu0 }
 0x5db   :  { %v4611_v1 = vadd.f32 %v4610_v48, %v10984_v11 }
 0x5dc   :  { %v4612_v59 = vpop.f32.mrf.mxu0  ;;  %v9030_v5 = vpop.f32.mrf.mxu1 }
 0x5dd   :  { %v4652_v38 = vadd.f32 %v8933_v51, %v4611_v1  ;;  %v4613_v31 = vadd.f32 %v4612_v59, %v10985_v46 }
 0x5de   :  { %v4614_v7 = vpop.f32.mrf.mxu0  ;;  %v9034_v13 = vpop.f32.mrf.mxu1 }
 0x5df   :  { %v6355_v32 = vmul.f32 -1.442695, %v4652_v38  ;;  %v4654_v19 = vadd.f32 %v8936_v43, %v4613_v31  ;;  %v10986_v7 = vld [vmem:[#allocation192_spill] sm:$0xff] }
 0x5e0   :  { %v4615_v34 = vpop.f32.mrf.mxu0  ;;  %v4867_v22 = vpop.f32.mrf.mxu1 }
 0x5e1   :  { %6642 = vpow2.f32 %v6355_v32  ;;  %v6356_v16 = vmul.f32 -1.442695, %v4654_v19  ;;  %v10987_v32 = vld [vmem:[#allocation193_spill] sm:$0xff]  ;;  %v10988_v19 = vld [vmem:[#allocation196_spill] sm:$0xff] }
 0x5e2   :  { %v4868_v55 = vpop.f32.mrf.mxu1  ;;  %v10989_v34 = vld [vmem:[#allocation197_spill] sm:$0xff]  ;;  %v10990_v22 = vld [vmem:[#allocation200_spill] sm:$0xff] }
 0x5e3   :  { %6644 = vpow2.f32 %v6356_v16  ;;  %v10991_v16 = vld [vmem:[#allocation201_spill] sm:$0xff]  ;;  %v10992_v55 = vld [vmem:[#allocation204_spill] sm:$0xff] }
 0x5e4   :  { %6646 = vtanh.f32 %v8996_v56 }
 0x5ee   :  { %v6643_v28 = vpop.eup %6642 }
 0x5ef   :  { %v4690_v49 = vadd.f32 1.0, %v6643_v28  ;;  %v10993_v28 = vld [vmem:[#allocation205_spill] sm:$0xff] }
 0x5f0   :  { %v6645_v27 = vpop.eup %6644 }
 0x5f1   :  { %6648 = vrcp.f32 %v4690_v49  ;;  %v4691_v51 = vadd.f32 1.0, %v6645_v27  ;;  %v6647_v42 = vpop.eup %6646  ;;  %v10994_v27 = vld [vmem:[#allocation208_spill] sm:$0xff] }
 0x5f2   :  { %6650 = vtanh.f32 %v9001_v54 }
 0x5f3   :  { %6652 = vrcp.f32 %v4691_v51 }
 0x5fe   :  { %v6649_v21 = vpop.eup %6648 }
 0x5ff   :  { %v6651_v30 = vpop.eup %6650  ;;  %v4704_v43 = vmul.f32 %v6649_v21, %v6647_v42  ;;  %v10995_v42 = vld [vmem:[#allocation209_spill] sm:$0xff] }
 0x600   :  { %v6653_v9 = vpop.eup %6652 }
 0x601   :  { %v4705_v40 = vmul.f32 %v6653_v9, %v6651_v30  ;;  %v4958_v8 = vrot.slane %v4704_v43, 4  ;;  %v10996_v30 = vld [vmem:[#allocation212_spill] sm:$0xff]  ;;  %v10997_v9 = vld [vmem:[#allocation213_spill] sm:$0xff] }
 0x603   :  { %v4959_v48 = vrot.slane %v4705_v40, 4  ;;  %v4964_v1 = vpack.c.bf16 %v4958_v8, %v4958_v8  ;;  %v10998_v40 = vld [vmem:[#allocation216_spill] sm:$0xff]  ;;  %v10999_v8 = vld [vmem:[#allocation217_spill] sm:$0xff] }
 0x605   :  { %v4965_v59 = vpack.c.bf16 %v4959_v48, %v4959_v48  ;;  %v9041_v31 = vrot.slane %v4964_v1, 2  ;;  %v11000_v48 = vld [vmem:[#allocation220_spill] sm:$0xff]  ;;  %v11001_v1 = vld [vmem:[#allocation221_spill] sm:$0xff] }
 0x607   :  { %v9039_v38 = vrot.slane %v4965_v59, 2  ;;  %v11002_v59 = vld [vmem:[#allocation224_spill] sm:$0xff] }
 0x609   :  { %5051 = vmatprep.mubr.bf16.mxu1 %v9039_v38 }
 0x60a   :  { %5052 = vmatmul.mubr.bf16.vlgmr.msra.gmra.mxu1 %v9041_v31 }
 0x60b   :  { %5102 = vmatpush1.bf16.msra.mxu1 %v10986_v7  ;;  %5133 = vmatprep.mubr.bf16.mxu1 %v9039_v38  ;;  %v11003_v7 = vld [vmem:[#allocation225_spill] sm:$0xff] }
 0x60c   :  { %5103 = vmatprep.subr.bf16.mxu1 %v10987_v32  ;;  %v11004_v32 = vld [vmem:[#allocation228_spill] sm:$0xff] }
 0x60f   :  { %5104 = vmatpush1.bf16.msra.mxu1 %v10988_v19  ;;  %v11005_v19 = vld [vmem:[#allocation229_spill] sm:$0xff] }
 0x610   :  { %5105 = vmatprep.subr.bf16.mxu1 %v10989_v34  ;;  %v11006_v34 = vld [vmem:[#allocation232_spill] sm:$0xff] }
 0x613   :  { %5106 = vmatpush1.bf16.msra.mxu1 %v10990_v22  ;;  %v11007_v22 = vld [vmem:[#allocation233_spill] sm:$0xff] }
 0x614   :  { %5107 = vmatprep.subr.bf16.mxu1 %v10991_v16  ;;  %v11008_v16 = vld [vmem:[#allocation235_spill] sm:$0xff] }
 0x617   :  { %5108 = vmatpush1.bf16.msra.mxu1 %v10992_v55  ;;  %v11009_v55 = vld [vmem:[#allocation236_spill] sm:$0xff] }
 0x618   :  { %5109 = vmatprep.subr.bf16.mxu1 %v10993_v28  ;;  %v11010_v28 = vld [vmem:[#allocation237_spill] sm:$0xff] }
 0x61a   :  { %v4740_v49 = vpop.f32.mrf.mxu0 }
 0x61b   :  { %5110 = vmatpush1.bf16.msra.mxu1 %v10994_v27  ;;  %v4878_v27 = vrot.slane %v4740_v49, 4  ;;  %v4884_v49 = vrot.slane %v9030_v5, 4 }
 0x61c   :  { %v4742_v51 = vpop.f32.mrf.mxu0  ;;  %5111 = vmatprep.subr.bf16.mxu1 %v10995_v42 }
 0x61d   :  { %v4879_v42 = vrot.slane %v4742_v51, 4  ;;  %v11020_v51 = vld [vmem:[#allocation248_spill] sm:$0xff] }
 0x61e   :  { %v4744_v21 = vpop.f32.mrf.mxu0 }
 0x61f   :  { %5112 = vmatpush1.bf16.msra.mxu1 %v10996_v30  ;;  %v11011_v21 = vld [vmem:[#allocation265_spill] sm:$0xff] }
 0x620   :  { %v4745_v43 = vpop.f32.mrf.mxu0  ;;  %5113 = vmatprep.subr.bf16.mxu1 %v10997_v9  ;;  %v4894_v30 = vadd.f32 %v4878_v27, %v11011_v21  ;;  %v11013_v9 = vld [vmem:[#allocation270_spill] sm:$0xff] }
 0x621   :  { %v11012_v43 = vld [vmem:[#allocation241_spill] sm:$0xff] }
 0x623   :  { %5114 = vmatpush1.bf16.msra.mxu1 %v10998_v40  ;;  %v4895_v40 = vadd.f32 %v4879_v42, %v11013_v9  ;;  %v11024_v42 = vld [vmem:[#allocation252_spill] sm:$0xff] }
 0x624   :  { %5115 = vmatprep.subr.bf16.mxu1 %v10999_v8  ;;  %v11014_v8 = vld [vmem:[#allocation242_spill] sm:$0xff] }
 0x627   :  { %5116 = vmatpush1.bf16.msra.mxu1 %v11000_v48  ;;  %v6357_v48 = vmul.f32 -1.442695, %v4894_v30 }
 0x628   :  { %5117 = vmatprep.subr.bf16.mxu1 %v11001_v1  ;;  %v11015_v1 = vld [vmem:[#allocation243_spill] sm:$0xff] }
 0x629   :  { %6654 = vpow2.f32 %v6357_v48  ;;  %v11025_v48 = vld [vmem:[#allocation286_spill] sm:$0xff] }
 0x62b   :  { %5118 = vmatpush2.bf16.msra.mxu1 %v11002_v59  ;;  %v6358_v59 = vmul.f32 -1.442695, %v4895_v40 }
 0x62c   :  { %5119 = vmatprep.subr.bf16.mxu1 %v11003_v7  ;;  %v11016_v7 = vld [vmem:[#allocation244_spill] sm:$0xff] }
 0x62d   :  { %6656 = vpow2.f32 %v6358_v59  ;;  %v11026_v59 = vld [vmem:[#allocation255_spill] sm:$0xff] }
 0x62f   :  { %5120 = vmatpush2.bf16.msra.mxu1 %v11004_v32  ;;  %v4885_v32 = vrot.slane %v9034_v13, 4 }
 0x630   :  { %5121 = vmatprep.subr.bf16.mxu1 %v11005_v19  ;;  %v11021_v19 = vld [vmem:[#allocation249_spill] sm:$0xff] }
 0x633   :  { %5122 = vmatpush2.bf16.msra.mxu1 %v11006_v34  ;;  %v11022_v34 = vld [vmem:[#allocation285_spill] sm:$0xff] }
 0x634   :  { %5123 = vmatprep.subr.bf16.mxu1 %v11007_v22  ;;  %v4900_v22 = vadd.f32 %v4884_v49, %v11022_v34 }
 0x636   :  { %v6361_v27 = vmul.f32 -1.442695, %v4900_v22  ;;  %v11033_v22 = vld [vmem:[#allocation264_spill] sm:$0xff] }
 0x637   :  { %5124 = vmatpush2.bf16.msra.mxu1 %v11008_v16  ;;  %v11023_v16 = vld [vmem:[#allocation287_spill] sm:$0xff] }
 0x638   :  { %5125 = vmatprep.subr.bf16.mxu1 %v11009_v55  ;;  %v4901_v55 = vadd.f32 %v4885_v32, %v11023_v16  ;;  %6658 = vpow2.f32 %v6361_v27  ;;  %v11032_v32 = vld [vmem:[#allocation263_spill] sm:$0xff] }
 0x63a   :  { %v6362_v5 = vmul.f32 -1.442695, %v4901_v55 }
 0x63b   :  { %5126 = vmatpush2.bf16.msra.mxu1 %v11010_v28  ;;  %v6655_v28 = vpop.eup %6654 }
 0x63c   :  { %5127 = vmatprep.subr.bf16.mxu1 %v10650_v25  ;;  %v11017_v25 = vld [vmem:[#allocation245_spill] sm:$0xff]  ;;  %v6657_v21 = vpop.eup %6656  ;;  %v4908_v30 = vadd.f32 1.0, %v6655_v28  ;;  %6660 = vpow2.f32 %v6362_v5  ;;  %v11034_v5 = vld [vmem:[#allocation266_spill] sm:$0xff] }
 0x63d   :  { %v4909_v13 = vadd.f32 1.0, %v6657_v21 }
 0x63e   :  { %6662 = vrcp.f32 %v4908_v30  ;;  %v11035_v30 = vld [vmem:[#allocation268_spill] sm:$0xff] }
 0x63f   :  { %5128 = vmatpush2.bf16.msra.mxu1 %v10651_v52  ;;  %v11018_v52 = vld [vmem:[#allocation246_spill] sm:$0xff] }
 0x640   :  { %5129 = vmatprep.subr.bf16.mxu1 %v10652_v23  ;;  %v11019_v23 = vld [vmem:[#allocation247_spill] sm:$0xff] }
 0x643   :  { %5130 = vmatpush2.bf16.msra.mxu1 %v11012_v43 }
 0x644   :  { %5131 = vmatprep.subr.bf16.mxu1 %v11014_v8 }
 0x647   :  { %5132 = vmatpush2.bf16.msra.mxu1 %v11015_v1 }
 0x648   :  { %5183 = vmatprep.subr.bf16.mxu1 %v11016_v7 }
 0x64a   :  { %5134 = vmatmul.mubr.bf16.vlgmr.msra.gmra.mxu1 %v9041_v31 }
 0x64b   :  { %5184 = vmatpush1.bf16.msra.mxu1 %v11017_v25  ;;  %5215 = vmatprep.mubr.bf16.mxu1 %v9039_v38  ;;  %v11027_v25 = vld [vmem:[#allocation256_spill] sm:$0xff] }
 0x64c   :  { %5185 = vmatprep.subr.bf16.mxu1 %v11018_v52  ;;  %v11029_v52 = vld [vmem:[#allocation258_spill] sm:$0xff] }
 0x64f   :  { %5186 = vmatpush1.bf16.msra.mxu1 %v11019_v23  ;;  %v6659_v23 = vpop.eup %6658 }
 0x650   :  { %5187 = vmatprep.subr.bf16.mxu1 %v11020_v51  ;;  %v6661_v49 = vpop.eup %6660  ;;  %v4934_v34 = vadd.f32 1.0, %v6659_v23  ;;  %v11063_v23 = vld [vmem:[#allocation302_spill] sm:$0xff] }
 0x651   :  { %v6663_v51 = vpop.eup %6662  ;;  %v4935_v27 = vadd.f32 1.0, %v6661_v49  ;;  %v11064_v49 = vld [vmem:[#allocation303_spill] sm:$0xff] }
 0x653   :  { %5188 = vmatpush1.bf16.msra.mxu1 %v11021_v19 }
 0x654   :  { %5189 = vmatprep.subr.bf16.mxu1 %v10664_v45 }
 0x657   :  { %5190 = vmatpush1.bf16.msra.mxu1 %v10665_v35 }
 0x658   :  { %5191 = vmatprep.subr.bf16.mxu1 %v11024_v42 }
 0x65a   :  { %v4822_v43 = vpop.f32.mrf.mxu0 }
 0x65b   :  { %v4882_v9 = vrot.slane %v4822_v43, 4  ;;  %5192 = vmatpush1.bf16.msra.mxu1 %v10667_v58  ;;  %v11028_v58 = vld [vmem:[#allocation257_spill] sm:$0xff] }
 0x65c   :  { %v4824_v40 = vpop.f32.mrf.mxu0  ;;  %5193 = vmatprep.subr.bf16.mxu1 %v10668_v3  ;;  %v11030_v3 = vld [vmem:[#allocation260_spill] sm:$0xff] }
 0x65d   :  { %v4898_v45 = vadd.f32 %v4882_v9, %v7840_v53  ;;  %v4883_v8 = vrot.slane %v4824_v40, 4  ;;  %v11031_v53 = vld [vmem:[#allocation261_spill] sm:$0xff]  ;;  %v11036_v9 = vld [vmem:[#allocation271_spill] sm:$0xff] }
 0x65e   :  { %v4826_v35 = vpop.f32.mrf.mxu0  ;;  %v11038_v40 = vld [vmem:[#allocation273_spill] sm:$0xff] }
 0x65f   :  { %6664 = vtanh.f32 %v4898_v45  ;;  %v4899_v1 = vadd.f32 %v4883_v8, %v11025_v48  ;;  %5194 = vmatpush1.bf16.msra.mxu1 %v11026_v59  ;;  %v11039_v45 = vld [vmem:[#allocation274_spill] sm:$0xff]  ;;  %v11041_v8 = vld [vmem:[#allocation276_spill] sm:$0xff] }
 0x660   :  { %6666 = vrcp.f32 %v4909_v13  ;;  %v4827_v7 = vpop.f32.mrf.mxu0  ;;  %5195 = vmatprep.subr.bf16.mxu1 %v11027_v25  ;;  %v11037_v13 = vld [vmem:[#allocation272_spill] sm:$0xff] }
 0x661   :  { %6668 = vtanh.f32 %v4899_v1 }
 0x662   :  { %6670 = vrcp.f32 %v4934_v34  ;;  %v11068_v34 = vld [vmem:[#allocation305_spill] sm:$0xff] }
 0x663   :  { %5196 = vmatpush1.bf16.msra.mxu1 %v11028_v58 }
 0x664   :  { %5197 = vmatprep.subr.bf16.mxu1 %v11029_v52 }
 0x667   :  { %5198 = vmatpush1.bf16.msra.mxu1 %v11030_v3 }
 0x668   :  { %5199 = vmatprep.subr.bf16.mxu1 %v11031_v53  ;;  %v11060_v53 = vld [vmem:[#allocation301_spill] sm:$0xff] }
 0x66b   :  { %5200 = vmatpush2.bf16.msra.mxu1 %v11032_v32  ;;  %v11066_v32 = vld [vmem:[#allocation332_spill] sm:$0xff] }
 0x66c   :  { %v6665_v19 = vpop.eup %6664  ;;  %5201 = vmatprep.subr.bf16.mxu1 %v11033_v22  ;;  %v11069_v22 = vld [vmem:[#allocation333_spill] sm:$0xff] }
 0x66d   :  { %v6667_v16 = vpop.eup %6666  ;;  %v4948_v55 = vmul.f32 %v6665_v19, %v6663_v51  ;;  %v11065_v51 = vld [vmem:[#allocation331_spill] sm:$0xff]  ;;  %v11067_v19 = vld [vmem:[#allocation304_spill] sm:$0xff] }
 0x66e   :  { %v6669_v28 = vpop.eup %6668 }
 0x66f   :  { %v4950_v42 = vadd.f32 %v4948_v55, %v9013_v44  ;;  %v4949_v21 = vmul.f32 %v6669_v28, %v6667_v16  ;;  %5202 = vmatpush2.bf16.msra.mxu1 %v11034_v5  ;;  %v11040_v44 = vld [vmem:[#allocation275_spill] sm:$0xff]  ;;  %v6671_v35 = vpop.eup %6670  ;;  %v11070_v16 = vld [vmem:[#allocation334_spill] sm:$0xff] }
 0x670   :  { %5203 = vmatprep.subr.bf16.mxu1 %v11035_v30  ;;  %v11071_v55 = vld [vmem:[#allocation306_spill] sm:$0xff]  ;;  %v11072_v28 = vld [vmem:[#allocation307_spill] sm:$0xff]  ;;  %v11077_v30 = vld [vmem:[#allocation337_spill] sm:$0xff] }
 0x671   :  { %6672 = vtanh.f32 %v4950_v42  ;;  %v4951_v43 = vadd.f32 %v4949_v21, %v9015_v15  ;;  %v11074_v42 = vld [vmem:[#allocation336_spill] sm:$0xff]  ;;  %v11075_v21 = vld [vmem:[#allocation309_spill] sm:$0xff]  ;;  %v11076_v5 = vld [vmem:[#allocation310_spill] sm:$0xff] }
 0x672   :  { %6674 = vrcp.f32 %v4935_v27  ;;  %v11073_v27 = vld [vmem:[#allocation335_spill] sm:$0xff] }
 0x673   :  { %6676 = vtanh.f32 %v4951_v43  ;;  %5204 = vmatpush2.bf16.msra.mxu1 %v11036_v9  ;;  %v11078_v43 = vld [vmem:[#allocation338_spill] sm:$0xff]  ;;  %v11079_v9 = vld [vmem:[#allocation313_spill] sm:$0xff] }
 0x674   :  { %5205 = vmatprep.subr.bf16.mxu1 %v11037_v13  ;;  %v11080_v13 = vld [vmem:[#allocation314_spill] sm:$0xff] }
 0x677   :  { %5206 = vmatpush2.bf16.msra.mxu1 %v11038_v40  ;;  %v11081_v40 = vld [vmem:[#allocation339_spill] sm:$0xff] }
 0x678   :  { %5207 = vmatprep.subr.bf16.mxu1 %v11039_v45  ;;  %v11082_v45 = vld [vmem:[#allocation340_spill] sm:$0xff] }
 0x67b   :  { %5208 = vmatpush2.bf16.msra.mxu1 %v11040_v44  ;;  %v11083_v44 = vld [vmem:[#allocation317_spill] sm:$0xff] }
 0x67c   :  { %5209 = vmatprep.subr.bf16.mxu1 %v11041_v8  ;;  %v11084_v8 = vld [vmem:[#allocation318_spill] sm:$0xff] }
 0x67e   :  { %v6673_v48 = vpop.eup %6672 }
 0x67f   :  { %v6675_v1 = vpop.eup %6674  ;;  %5210 = vmatpush2.bf16.msra.mxu1 %v10685_v0  ;;  %v4954_v15 = vmul.f32 %v6673_v48, %v6671_v35  ;;  %v11047_v0 = vld [vmem:[#allocation319_spill] sm:$0xff]  ;;  %v11085_v35 = vld [vmem:[#allocation341_spill] sm:$0xff]  ;;  %v11086_v48 = vld [vmem:[#allocation342_spill] sm:$0xff] }
 0x680   :  { %v6677_v59 = vpop.eup %6676  ;;  %5211 = vmatprep.subr.bf16.mxu1 %v10686_v36  ;;  %v11042_v36 = vld [vmem:[#allocation308_spill] sm:$0xff] }
 0x681   :  { %v4955_v7 = vmul.f32 %v6677_v59, %v6675_v1  ;;  %v4962_v25 = vpack.c.bf16 %v4954_v15, %v4954_v15  ;;  %v11087_v1 = vld [vmem:[#allocation320_spill] sm:$0xff]  ;;  %v11088_v15 = vld [vmem:[#allocation321_spill] sm:$0xff]  ;;  %v11089_v59 = vld [vmem:[#allocation343_spill] sm:$0xff] }
 0x683   :  { %5212 = vmatpush2.bf16.msra.mxu1 %v10687_v62  ;;  %v4963_v58 = vpack.c.bf16 %v4955_v7, %v4955_v7  ;;  %v9122_v3 = vrot.slane %v4962_v25, 2  ;;  %v11044_v62 = vld [vmem:[#allocation289_spill] sm:$0xff]  ;;  %v11090_v7 = vld [vmem:[#allocation344_spill] sm:$0xff]  ;;  %v11091_v25 = vld [vmem:[#allocation323_spill] sm:$0xff] }
 0x684   :  { %5213 = vmatprep.subr.bf16.mxu1 %v10688_v18  ;;  %v11043_v18 = vld [vmem:[#allocation311_spill] sm:$0xff] }
 0x685   :  { %v9120_v52 = vrot.slane %v4963_v58, 2  ;;  %v11092_v58 = vld [vmem:[#allocation345_spill] sm:$0xff] }
 0x687   :  { %5214 = vmatpush2.bf16.msra.mxu1 %v10689_v57  ;;  %5010 = vmatprep.mubr.bf16.mxu0 %v9120_v52  ;;  %v11046_v57 = vld [vmem:[#allocation291_spill] sm:$0xff] }
 0x688   :  { %5011 = vmatmul.mubr.bf16.vlgmr.msra.gmra.mxu0 %v9122_v3  ;;  %5265 = vmatprep.subr.bf16.mxu1 %v10690_v29  ;;  %v11048_v29 = vld [vmem:[#allocation293_spill] sm:$0xff] }
 0x689   :  { %5061 = vmatpush1.bf16.msra.mxu0 %v7639_v4  ;;  %5092 = vmatprep.mubr.bf16.mxu0 %v9120_v52  ;;  %v11045_v4 = vld [vmem:[#allocation315_spill] sm:$0xff] }
 0x68a   :  { %5216 = vmatmul.mubr.bf16.vlgmr.msra.gmra.mxu1 %v9041_v31  ;;  %5062 = vmatprep.subr.bf16.mxu0 %v11042_v36 }
 0x68b   :  { %5266 = vmatpush1.bf16.msra.mxu1 %v10691_v2  ;;  %5297 = vmatprep.mubr.bf16.mxu1 %v9039_v38  ;;  %v11049_v2 = vld [vmem:[#allocation322_spill] sm:$0xff]  ;;  %v11059_v38 = vld [vmem:[#allocation300_spill] sm:$0xff] }
 0x68c   :  { %5267 = vmatprep.subr.bf16.mxu1 %v10692_v24  ;;  %v11050_v24 = vld [vmem:[#allocation295_spill] sm:$0xff] }
 0x68d   :  { %5063 = vmatpush1.bf16.msra.mxu0 %v11043_v18  ;;  %v11093_v18 = vld [vmem:[#allocation346_spill] sm:$0xff] }
 0x68e   :  { %5064 = vmatprep.subr.bf16.mxu0 %v10693_v14  ;;  %v11051_v14 = vld [vmem:[#allocation324_spill] sm:$0xff] }
 0x68f   :  { %5268 = vmatpush1.bf16.msra.mxu1 %v10694_v10  ;;  %v11052_v10 = vld [vmem:[#allocation297_spill] sm:$0xff] }
 0x690   :  { %5269 = vmatprep.subr.bf16.mxu1 %v11044_v62 }
 0x691   :  { %5065 = vmatpush1.bf16.msra.mxu0 %v11045_v4  ;;  %v11094_v4 = vld [vmem:[#allocation347_spill] sm:$0xff] }
 0x692   :  { %5066 = vmatprep.subr.bf16.mxu0 %v10696_v47  ;;  %v11054_v47 = vld [vmem:[#allocation326_spill] sm:$0xff] }
 0x693   :  { %5270 = vmatpush1.bf16.msra.mxu1 %v10697_v12  ;;  %v11055_v12 = vld [vmem:[#allocation298_spill] sm:$0xff] }
 0x694   :  { %5271 = vmatprep.subr.bf16.mxu1 %v11046_v57 }
 0x695   :  { %5067 = vmatpush1.bf16.msra.mxu0 %v11047_v0  ;;  %v11095_v0 = vld [vmem:[#allocation348_spill] sm:$0xff] }
 0x696   :  { %5068 = vmatprep.subr.bf16.mxu0 %v7969_v20  ;;  %v11053_v20 = vld [vmem:[#allocation325_spill] sm:$0xff] }
 0x697   :  { %5272 = vmatpush1.bf16.msra.mxu1 %v10699_v26  ;;  %v11056_v26 = vld [vmem:[#allocation299_spill] sm:$0xff] }
 0x698   :  { %5273 = vmatprep.subr.bf16.mxu1 %v11048_v29 }
 0x699   :  { %5069 = vmatpush1.bf16.msra.mxu0 %v11049_v2  ;;  %v11096_v2 = vld [vmem:[#allocation349_spill] sm:$0xff] }
 0x69a   :  { %5070 = vmatprep.subr.bf16.mxu0 %v7981_v39  ;;  %v11057_v39 = vld [vmem:[#allocation327_spill] sm:$0xff] }
 0x69b   :  { %5274 = vmatpush1.bf16.msra.mxu1 %v10701_v50  ;;  %v11058_v50 = vld [vmem:[#allocation328_spill] sm:$0xff] }
 0x69c   :  { %5275 = vmatprep.subr.bf16.mxu1 %v11050_v24  ;;  %v11097_v24 = vld [vmem:[#allocation350_spill] sm:$0xff] }
 0x69d   :  { %5071 = vmatpush1.bf16.msra.mxu0 %v11051_v14  ;;  %v11098_v14 = vld [vmem:[#allocation351_spill] sm:$0xff] }
 0x69e   :  { %5072 = vmatprep.subr.bf16.mxu0 %v7991_v37  ;;  %v11061_v37 = vld [vmem:[#allocation329_spill] sm:$0xff] }
 0x69f   :  { %5276 = vmatpush1.bf16.msra.mxu1 %v10703_v6  ;;  %v11062_v6 = vld [vmem:[#allocation330_spill] sm:$0xff] }
 0x6a0   :  { %5277 = vmatprep.subr.bf16.mxu1 %v11052_v10  ;;  %v11099_v10 = vld [vmem:[#allocation352_spill] sm:$0xff] }
 0x6a1   :  { %5073 = vmatpush1.bf16.msra.mxu0 %v11053_v20  ;;  %v11101_v20 = vld [vmem:[#allocation354_spill] sm:$0xff] }
 0x6a2   :  { %5074 = vmatprep.subr.bf16.mxu0 %v11054_v47  ;;  %v11102_v47 = vld [vmem:[#allocation355_spill] sm:$0xff] }
 0x6a3   :  { %5278 = vmatpush1.bf16.msra.mxu1 %v11055_v12  ;;  %v11103_v12 = vld [vmem:[#allocation356_spill] sm:$0xff] }
 0x6a4   :  { %5279 = vmatprep.subr.bf16.mxu1 %v11056_v26  ;;  %v11104_v26 = vld [vmem:[#allocation357_spill] sm:$0xff] }
 0x6a5   :  { %5075 = vmatpush1.bf16.msra.mxu0 %v11057_v39  ;;  %v11105_v39 = vld [vmem:[#allocation358_spill] sm:$0xff] }
 0x6a6   :  { %5076 = vmatprep.subr.bf16.mxu0 %v11058_v50  ;;  %v11106_v50 = vld [vmem:[#allocation359_spill] sm:$0xff] }
 0x6a7   :  { %5280 = vmatpush1.bf16.msra.mxu1 %v11059_v38  ;;  %v11107_v38 = vld [vmem:[#allocation360_spill] sm:$0xff] }
 0x6a8   :  { %5281 = vmatprep.subr.bf16.mxu1 %v11060_v53  ;;  %v11108_v53 = vld [vmem:[#allocation361_spill] sm:$0xff] }
 0x6a9   :  { %5077 = vmatpush2.bf16.msra.mxu0 %v11061_v37  ;;  %v11109_v37 = vld [vmem:[#allocation362_spill] sm:$0xff] }
 0x6aa   :  { %5078 = vmatprep.subr.bf16.mxu0 %v11062_v6  ;;  %v11110_v6 = vld [vmem:[#allocation363_spill] sm:$0xff] }
 0x6ab   :  { %5282 = vmatpush2.bf16.msra.mxu1 %v11063_v23  ;;  %v11111_v23 = vld [vmem:[#allocation364_spill] sm:$0xff] }
 0x6ac   :  { %5283 = vmatprep.subr.bf16.mxu1 %v11064_v49  ;;  %v11112_v49 = vld [vmem:[#allocation365_spill] sm:$0xff] }
 0x6ad   :  { %5079 = vmatpush2.bf16.msra.mxu0 %v11065_v51  ;;  %v11113_v51 = vld [vmem:[#allocation366_spill] sm:$0xff] }
 0x6ae   :  { %5080 = vmatprep.subr.bf16.mxu0 %v11066_v32  ;;  %v11114_v32 = vld [vmem:[#allocation367_spill] sm:$0xff] }
 0x6af   :  { %5284 = vmatpush2.bf16.msra.mxu1 %v11067_v19  ;;  %v11115_v19 = vld [vmem:[#allocation368_spill] sm:$0xff] }
 0x6b0   :  { %5285 = vmatprep.subr.bf16.mxu1 %v11068_v34  ;;  %v11116_v34 = vld [vmem:[#allocation369_spill] sm:$0xff] }
 0x6b1   :  { %5081 = vmatpush2.bf16.msra.mxu0 %v11069_v22  ;;  %v11117_v22 = vld [vmem:[#allocation370_spill] sm:$0xff] }
 0x6b2   :  { %5082 = vmatprep.subr.bf16.mxu0 %v11070_v16  ;;  %v11118_v16 = vld [vmem:[#allocation371_spill] sm:$0xff] }
 0x6b3   :  { %5286 = vmatpush2.bf16.msra.mxu1 %v11071_v55  ;;  %v11119_v55 = vld [vmem:[#allocation372_spill] sm:$0xff] }
 0x6b4   :  { %5287 = vmatprep.subr.bf16.mxu1 %v11072_v28  ;;  %v11120_v28 = vld [vmem:[#allocation373_spill] sm:$0xff] }
 0x6b5   :  { %5083 = vmatpush2.bf16.msra.mxu0 %v11073_v27  ;;  %v11121_v27 = vld [vmem:[#allocation374_spill] sm:$0xff] }
 0x6b6   :  { %5084 = vmatprep.subr.bf16.mxu0 %v11074_v42  ;;  %v11122_v42 = vld [vmem:[#allocation375_spill] sm:$0xff] }
 0x6b7   :  { %5288 = vmatpush2.bf16.msra.mxu1 %v11075_v21  ;;  %v11123_v21 = vld [vmem:[#allocation376_spill] sm:$0xff] }
 0x6b8   :  { %5289 = vmatprep.subr.bf16.mxu1 %v11076_v5  ;;  %v11124_v5 = vld [vmem:[#allocation377_spill] sm:$0xff] }
 0x6b9   :  { %5085 = vmatpush2.bf16.msra.mxu0 %v11077_v30 }
 0x6ba   :  { %5086 = vmatprep.subr.bf16.mxu0 %v11078_v43  ;;  %v11125_v43 = vld [vmem:[#allocation378_spill] sm:$0xff] }
 0x6bb   :  { %5290 = vmatpush2.bf16.msra.mxu1 %v11079_v9 }
 0x6bc   :  { %5291 = vmatprep.subr.bf16.mxu1 %v11080_v13  ;;  %v11126_v13 = vld [vmem:[#allocation379_spill] sm:$0xff] }
 0x6bd   :  { %5087 = vmatpush2.bf16.msra.mxu0 %v11081_v40 }
 0x6be   :  { %5088 = vmatprep.subr.bf16.mxu0 %v11082_v45  ;;  %v11127_v45 = vld [vmem:[#allocation380_spill] sm:$0xff] }
 0x6bf   :  { %5292 = vmatpush2.bf16.msra.mxu1 %v11083_v44 }
 0x6c0   :  { %5293 = vmatprep.subr.bf16.mxu1 %v11084_v8  ;;  %v11128_v8 = vld [vmem:[#allocation381_spill] sm:$0xff] }
 0x6c1   :  { %5089 = vmatpush2.bf16.msra.mxu0 %v11085_v35  ;;  %v11129_v35 = vld [vmem:[#allocation382_spill] sm:$0xff] }
 0x6c2   :  { %5090 = vmatprep.subr.bf16.mxu0 %v11086_v48  ;;  %v11130_v48 = vld [vmem:[#allocation383_spill] sm:$0xff] }
 0x6c3   :  { %5294 = vmatpush2.bf16.msra.mxu1 %v11087_v1  ;;  %v11131_v1 = vld [vmem:[#allocation384_spill] sm:$0xff] }
 0x6c4   :  { %5295 = vmatprep.subr.bf16.mxu1 %v11088_v15  ;;  %v11133_v15 = vld [vmem:[#allocation386_spill] sm:$0xff] }
 0x6c5   :  { %5091 = vmatpush2.bf16.msra.mxu0 %v11089_v59  ;;  %v11134_v59 = vld [vmem:[#allocation387_spill] sm:$0xff] }
 0x6c6   :  { %5142 = vmatprep.subr.bf16.mxu0 %v11090_v7  ;;  %v11135_v7 = vld [vmem:[#allocation388_spill] sm:$0xff] }
 0x6c7   :  { %5296 = vmatpush2.bf16.msra.mxu1 %v11091_v25  ;;  %v11136_v25 = vld [vmem:[#allocation389_spill] sm:$0xff] }
 0x6c8   :  { %5093 = vmatmul.mubr.bf16.vlgmr.msra.gmra.mxu0 %v9122_v3 }
 0x6c9   :  { %5143 = vmatpush1.bf16.msra.mxu0 %v11092_v58  ;;  %5174 = vmatprep.mubr.bf16.mxu0 %v9120_v52  ;;  %v11137_v58 = vld [vmem:[#allocation390_spill] sm:$0xff] }
 0x6ca   :  { %5298 = vmatmul.mubr.bf16.vlgmr.msra.gmra.mxu1 %v9041_v31  ;;  %v9198_v36 = vpop.f32.mrf.mxu1  ;;  %5144 = vmatprep.subr.bf16.mxu0 %v11093_v18  ;;  %v11100_v31 = vld [vmem:[#allocation353_spill] sm:$0xff]  ;;  %v11138_v18 = vld [vmem:[#allocation391_spill] sm:$0xff] }
 0x6cc   :  { %v9201_v62 = vpop.f32.mrf.mxu1 }
 0x6cd   :  { %5145 = vmatpush1.bf16.msra.mxu0 %v11094_v4  ;;  %v11139_v4 = vld [vmem:[#allocation392_spill] sm:$0xff] }
 0x6ce   :  { %v5057_v57 = vpop.f32.mrf.mxu1  ;;  %5146 = vmatprep.subr.bf16.mxu0 %v11095_v0  ;;  %v11141_v0 = vld [vmem:[#allocation394_spill] sm:$0xff] }
 0x6cf   :  { %v11140_v57 = vld [vmem:[#allocation393_spill] sm:$0xff] }
 0x6d0   :  { %v5058_v29 = vpop.f32.mrf.mxu1 }
 0x6d1   :  { %5147 = vmatpush1.bf16.msra.mxu0 %v11096_v2  ;;  %v11142_v29 = vld [vmem:[#allocation395_spill] sm:$0xff]  ;;  %v11143_v2 = vld [vmem:[#allocation396_spill] sm:$0xff] }
 0x6d2   :  { %5148 = vmatprep.subr.bf16.mxu0 %v11097_v24  ;;  %v11144_v24 = vld [vmem:[#allocation397_spill] sm:$0xff] }
 0x6d5   :  { %5149 = vmatpush1.bf16.msra.mxu0 %v11098_v14  ;;  %v11145_v14 = vld [vmem:[#allocation398_spill] sm:$0xff] }
 0x6d6   :  { %5150 = vmatprep.subr.bf16.mxu0 %v11099_v10  ;;  %v11146_v10 = vld [vmem:[#allocation399_spill] sm:$0xff] }
 0x6d9   :  { %5151 = vmatpush1.bf16.msra.mxu0 %v11100_v31  ;;  %v11147_v31 = vld [vmem:[#allocation400_spill] sm:$0xff] }
 0x6da   :  { %5152 = vmatprep.subr.bf16.mxu0 %v11101_v20  ;;  %v11148_v20 = vld [vmem:[#allocation401_spill] sm:$0xff] }
 0x6dd   :  { %5153 = vmatpush1.bf16.msra.mxu0 %v11102_v47  ;;  %v11149_v47 = vld [vmem:[#allocation402_spill] sm:$0xff] }
 0x6de   :  { %5154 = vmatprep.subr.bf16.mxu0 %v11103_v12  ;;  %v11150_v12 = vld [vmem:[#allocation403_spill] sm:$0xff] }
 0x6e1   :  { %5155 = vmatpush1.bf16.msra.mxu0 %v11104_v26  ;;  %v11151_v26 = vld [vmem:[#allocation404_spill] sm:$0xff] }
 0x6e2   :  { %5156 = vmatprep.subr.bf16.mxu0 %v11105_v39  ;;  %v11152_v39 = vld [vmem:[#allocation405_spill] sm:$0xff] }
 0x6e5   :  { %5157 = vmatpush1.bf16.msra.mxu0 %v11106_v50  ;;  %v11153_v50 = vld [vmem:[#allocation406_spill] sm:$0xff] }
 0x6e6   :  { %5158 = vmatprep.subr.bf16.mxu0 %v11107_v38  ;;  %v11154_v38 = vld [vmem:[#allocation407_spill] sm:$0xff] }
 0x6e9   :  { %5159 = vmatpush2.bf16.msra.mxu0 %v11108_v53 }
 0x6ea   :  { %5160 = vmatprep.subr.bf16.mxu0 %v11109_v37 }
 0x6ed   :  { %5161 = vmatpush2.bf16.msra.mxu0 %v11110_v6 }
 0x6ee   :  { %5162 = vmatprep.subr.bf16.mxu0 %v11111_v23 }
 0x6f1   :  { %5163 = vmatpush2.bf16.msra.mxu0 %v11112_v49 }
 0x6f2   :  { %5164 = vmatprep.subr.bf16.mxu0 %v11113_v51 }
 0x6f5   :  { %5165 = vmatpush2.bf16.msra.mxu0 %v11114_v32 }
 0x6f6   :  { %5166 = vmatprep.subr.bf16.mxu0 %v11115_v19 }
 0x6f9   :  { %5167 = vmatpush2.bf16.msra.mxu0 %v11116_v34  ;;  %v6454_v34 = vld [vmem:[#allocation10 + $0xa8] ss:$12 sps:$4 sm:$0xff]  }
 0x6fa   :  { %5168 = vmatprep.subr.bf16.mxu0 %v11117_v22  ;;  %v6456_v22 = vld [vmem:[#allocation10 + $0xac] ss:$12 sps:$4 sm:$0xff]  }
 0x6fd   :  { %5169 = vmatpush2.bf16.msra.mxu0 %v11118_v16  ;;  %v6459_v16 = vld [vmem:[#allocation10 + $0x94] ss:$12 sps:$4 sm:$0xff]  }
 0x6fe   :  { %5170 = vmatprep.subr.bf16.mxu0 %v11119_v55  ;;  %v6457_v55 = vld [vmem:[#allocation10 + $0x90] ss:$12 sps:$4 sm:$0xff]  }
 0x701   :  { %5171 = vmatpush2.bf16.msra.mxu0 %v11120_v28  ;;  %v6460_v28 = vld [vmem:[#allocation10 + $0x78] ss:$12 sps:$4 sm:$0xff]  }
 0x702   :  { %5172 = vmatprep.subr.bf16.mxu0 %v11121_v27  ;;  %v6465_v27 = vld [vmem:[#allocation10 + $0x64] ss:$12 sps:$4 sm:$0xff]  }
 0x705   :  { %5173 = vmatpush2.bf16.msra.mxu0 %v11122_v42  ;;  %v6463_v42 = vld [vmem:[#allocation10 + $0x60] ss:$12 sps:$4 sm:$0xff]  }
 0x706   :  { %5224 = vmatprep.subr.bf16.mxu0 %v11123_v21  ;;  %v6468_v21 = vld [vmem:[#allocation10 + $0x4c] ss:$12 sps:$4 sm:$0xff]  }
 0x708   :  { %5175 = vmatmul.mubr.bf16.vlgmr.msra.gmra.mxu0 %v9122_v3 }
 0x709   :  { %5225 = vmatpush1.bf16.msra.mxu0 %v11124_v5  ;;  %5256 = vmatprep.mubr.bf16.mxu0 %v9120_v52  ;;  %v11132_v52 = vld [vmem:[#allocation385_spill] sm:$0xff] }
 0x70a   :  { %v9236_v30 = vpop.f32.mrf.mxu1  ;;  %5226 = vmatprep.subr.bf16.mxu0 %v11125_v43  ;;  %v6466_v5 = vld [vmem:[#allocation10 + $0x48] ss:$12 sps:$4 sm:$0xff]  }
 0x70b   :  { %v6471_v43 = vld [vmem:[#allocation10 + $0x34] ss:$12 sps:$4 sm:$0xff]  }
 0x70c   :  { %v9239_v9 = vpop.f32.mrf.mxu1 }
 0x70d   :  { %5227 = vmatpush1.bf16.msra.mxu0 %v11126_v13  ;;  %v6469_v13 = vld [vmem:[#allocation10 + $0x30] ss:$12 sps:$4 sm:$0xff]  }
 0x70e   :  { %v5139_v40 = vpop.f32.mrf.mxu1  ;;  %5228 = vmatprep.subr.bf16.mxu0 %v11127_v45 }
 0x710   :  { %v5140_v44 = vpop.f32.mrf.mxu1 }
 0x711   :  { %5229 = vmatpush1.bf16.msra.mxu0 %v11128_v8  ;;  %v6474_v8 = vld [vmem:[#allocation10 + $0x1c] ss:$12 sps:$4 sm:$0xff]  }
 0x712   :  { %5230 = vmatprep.subr.bf16.mxu0 %v11129_v35  ;;  %v6472_v35 = vld [vmem:[#allocation10 + $0x18] ss:$12 sps:$4 sm:$0xff]  }
 0x715   :  { %5231 = vmatpush1.bf16.msra.mxu0 %v11130_v48 }
 0x716   :  { %5232 = vmatprep.subr.bf16.mxu0 %v11131_v1 }
 0x719   :  { %5233 = vmatpush1.bf16.msra.mxu0 %v11132_v52 }
 0x71a   :  { %5234 = vmatprep.subr.bf16.mxu0 %v11133_v15 }
 0x71d   :  { %5235 = vmatpush1.bf16.msra.mxu0 %v11134_v59  ;;  %v6477_v59 = vld [vmem:[#allocation10 + $0x4] ss:$12 sps:$4 sm:$0xff]  }
 0x71e   :  { %5236 = vmatprep.subr.bf16.mxu0 %v11135_v7  ;;  %v6475_v7 = vld [vmem:[#allocation10] ss:$12 sps:$4 sm:$0xff]  }
 0x721   :  { %5237 = vmatpush1.bf16.msra.mxu0 %v11136_v25 }
 0x722   :  { %5238 = vmatprep.subr.bf16.mxu0 %v11137_v58  ;;  %v6480_v58 = vld [vmem:[#allocation10 + $0x16c] ss:$12 sps:$4 sm:$0xff]  }
 0x725   :  { %5239 = vmatpush1.bf16.msra.mxu0 %v11138_v18  ;;  %v6478_v18 = vld [vmem:[#allocation10 + $0x168] ss:$12 sps:$4 sm:$0xff]  }
 0x726   :  { %5240 = vmatprep.subr.bf16.mxu0 %v11139_v4  ;;  %v6483_v4 = vld [vmem:[#allocation10 + $0x154] ss:$12 sps:$4 sm:$0xff]  }
 0x729   :  { %5241 = vmatpush2.bf16.msra.mxu0 %v11140_v57  ;;  %v6481_v57 = vld [vmem:[#allocation10 + $0x150] ss:$12 sps:$4 sm:$0xff]  }
 0x72a   :  { %5242 = vmatprep.subr.bf16.mxu0 %v11141_v0  ;;  %v6486_v0 = vld [vmem:[#allocation10 + $0x13c] ss:$12 sps:$4 sm:$0xff]  }
 0x72d   :  { %5243 = vmatpush2.bf16.msra.mxu0 %v11142_v29  ;;  %v6484_v29 = vld [vmem:[#allocation10 + $0x138] ss:$12 sps:$4 sm:$0xff]  }
 0x72e   :  { %5244 = vmatprep.subr.bf16.mxu0 %v11143_v2  ;;  %v6489_v2 = vld [vmem:[#allocation10 + $0x124] ss:$12 sps:$4 sm:$0xff]  }
 0x731   :  { %5245 = vmatpush2.bf16.msra.mxu0 %v11144_v24  ;;  %v6487_v24 = vld [vmem:[#allocation10 + $0x120] ss:$12 sps:$4 sm:$0xff]  }
 0x732   :  { %5246 = vmatprep.subr.bf16.mxu0 %v11145_v14  ;;  %v6490_v14 = vld [vmem:[#allocation10 + $0x108] ss:$12 sps:$4 sm:$0xff]  }
 0x735   :  { %5247 = vmatpush2.bf16.msra.mxu0 %v11146_v10  ;;  %v6492_v10 = vld [vmem:[#allocation10 + $0x10c] ss:$12 sps:$4 sm:$0xff]  }
 0x736   :  { %5248 = vmatprep.subr.bf16.mxu0 %v11147_v31  ;;  %v6495_v31 = vld [vmem:[#allocation10 + $0xf4] ss:$12 sps:$4 sm:$0xff]  }
 0x739   :  { %5249 = vmatpush2.bf16.msra.mxu0 %v11148_v20  ;;  %v6493_v20 = vld [vmem:[#allocation10 + $0xf0] ss:$12 sps:$4 sm:$0xff]  }
 0x73a   :  { %5250 = vmatprep.subr.bf16.mxu0 %v11149_v47  ;;  %v6498_v47 = vld [vmem:[#allocation10 + $0xdc] ss:$12 sps:$4 sm:$0xff]  }
 0x73d   :  { %5251 = vmatpush2.bf16.msra.mxu0 %v11150_v12  ;;  %v6496_v12 = vld [vmem:[#allocation10 + $0xd8] ss:$12 sps:$4 sm:$0xff]  }
 0x73e   :  { %5252 = vmatprep.subr.bf16.mxu0 %v11151_v26 }
 0x741   :  { %5253 = vmatpush2.bf16.msra.mxu0 %v11152_v39  ;;  %v6501_v39 = vld [vmem:[#allocation10 + $0xc4] ss:$12 sps:$4 sm:$0xff]  }
 0x742   :  { %5254 = vmatprep.subr.bf16.mxu0 %v11153_v50 }
 0x745   :  { %5255 = vmatpush2.bf16.msra.mxu0 %v11154_v38 }
 0x746   :  { %5561 = vmatprep.subr.bf16.mxu0 %v6456_v22 }
 0x748   :  { %5257 = vmatmul.mubr.bf16.vlgmr.msra.gmra.mxu0 %v9122_v3  ;;  %v9271_v53 = vpop.f32.mrf.mxu0  ;;  %v6462_v3 = vld [vmem:[#allocation10 + $0x7c] ss:$12 sps:$4 sm:$0xff]  }
 0x749   :  { %5562 = vmatpush1.bf16.msra.mxu0 %v6454_v34  ;;  %v5013_v26 = vadd.f32 %v9271_v53, %v10935_v63 }
 0x74a   :  { %v9273_v37 = vpop.f32.mrf.mxu1  ;;  %v9275_v6 = vpop.f32.mrf.mxu0  ;;  %5563 = vmatprep.subr.bf16.mxu0 %v6459_v16  ;;  %v6502_v16 = vld [vmem:[#allocation10 + $0x170] ss:$12 sps:$4 sm:$0xff]  }
 0x74b   :  { %6418 = vmatprep.subr.bf16.mxu1 %v6502_v16  ;;  %v6515_v16 = vld [vmem:[#allocation10 + $0x20] ss:$12 sps:$4 sm:$0xff]  }
 0x74c   :  { %v9277_v23 = vpop.f32.mrf.mxu1  ;;  %v5016_v49 = vpop.f32.mrf.mxu0 }
 0x74d   :  { %5564 = vmatpush1.bf16.msra.mxu0 %v6457_v55  ;;  %v6499_v49 = vld [vmem:[#allocation10 + $0xc0] ss:$12 sps:$4 sm:$0xff]   ;;  %v6504_v55 = vld [vmem:[#allocation10 + $0x158] ss:$12 sps:$4 sm:$0xff]  }
 0x74e   :  { %v5221_v51 = vpop.f32.mrf.mxu1  ;;  %v5017_v32 = vpop.f32.mrf.mxu0  ;;  %5565 = vmatprep.subr.bf16.mxu0 %v6462_v3 }
 0x74f   :  { %v5054_v51 = vadd.f32 %v9198_v36, %v5013_v26  ;;  %v5015_v32 = vadd.f32 %v9275_v6, %v8447_v17  ;;  %v6505_v17 = vld [vmem:[#allocation10 + $0x98] ss:$12 sps:$4 sm:$0xff]   ;;  %v6506_v36 = vld [vmem:[#allocation10 + $0x140] ss:$12 sps:$4 sm:$0xff]   ;;  %v6510_v6 = vld [vmem:[#allocation10 + $0x110] ss:$12 sps:$4 sm:$0xff]  }
 0x750   :  { %v5222_v19 = vpop.f32.mrf.mxu1 }
 0x751   :  { %5566 = vmatpush1.bf16.msra.mxu0 %v6460_v28  ;;  %v6363_v63 = vmul.f32 -1.442695, %v5054_v51  ;;  %v5056_v53 = vadd.f32 %v9201_v62, %v5015_v32  ;;  %v6509_v62 = vld [vmem:[#allocation10 + $0x68] ss:$12 sps:$4 sm:$0xff]  }
 0x752   :  { %5567 = vmatprep.subr.bf16.mxu0 %v6465_v27  ;;  %v6511_v27 = vld [vmem:[#allocation10 + $0x50] ss:$12 sps:$4 sm:$0xff]  }
 0x753   :  { %6678 = vpow2.f32 %v6363_v63  ;;  %v6364_v3 = vmul.f32 -1.442695, %v5056_v53 }
 0x755   :  { %5568 = vmatpush1.bf16.msra.mxu0 %v6463_v42 }
 0x756   :  { %5569 = vmatprep.subr.bf16.mxu0 %v6468_v21  ;;  %v6512_v21 = vld [vmem:[#allocation10 + $0xf8] ss:$12 sps:$4 sm:$0xff]  }
 0x759   :  { %5570 = vmatpush1.bf16.msra.mxu0 %v6466_v5 }
 0x75a   :  { %5571 = vmatprep.subr.bf16.mxu0 %v6471_v43 }
 0x75d   :  { %5572 = vmatpush1.bf16.msra.mxu0 %v6469_v13 }
 0x75e   :  { %5573 = vmatprep.subr.bf16.mxu0 %v6474_v8 }
 0x760   :  { %v6679_v28 = vpop.eup %6678 }
 0x761   :  { %5574 = vmatpush1.bf16.msra.mxu0 %v6472_v35  ;;  %v5312_v43 = vadd.f32 1.0, %v6679_v28 }
 0x762   :  { %5575 = vmatprep.subr.bf16.mxu0 %v6477_v59 }
 0x765   :  { %5576 = vmatpush1.bf16.msra.mxu0 %v6475_v7 }
 0x766   :  { %5577 = vmatprep.subr.bf16.mxu0 %v6480_v58 }
 0x769   :  { %5578 = vmatpush2.bf16.msra.mxu0 %v6478_v18 }
 0x76a   :  { %5579 = vmatprep.subr.bf16.mxu0 %v6483_v4 }
 0x76d   :  { %5580 = vmatpush2.bf16.msra.mxu0 %v6481_v57 }
 0x76e   :  { %5581 = vmatprep.subr.bf16.mxu0 %v6486_v0 }
 0x771   :  { %5582 = vmatpush2.bf16.msra.mxu0 %v6484_v29 }
 0x772   :  { %5583 = vmatprep.subr.bf16.mxu0 %v6489_v2 }
 0x775   :  { %5584 = vmatpush2.bf16.msra.mxu0 %v6487_v24 }
 0x776   :  { %5585 = vmatprep.subr.bf16.mxu0 %v6492_v10 }
 0x779   :  { %5586 = vmatpush2.bf16.msra.mxu0 %v6490_v14 }
 0x77a   :  { %5587 = vmatprep.subr.bf16.mxu0 %v6495_v31 }
 0x77d   :  { %5588 = vmatpush2.bf16.msra.mxu0 %v6493_v20 }
 0x77e   :  { %5589 = vmatprep.subr.bf16.mxu0 %v6498_v47 }
 0x781   :  { %5590 = vmatpush2.bf16.msra.mxu0 %v6496_v12 }
 0x782   :  { %5591 = vmatprep.subr.bf16.mxu0 %v6501_v39 }
 0x785   :  { %5592 = vmatpush2.bf16.msra.mxu0 %v6499_v49 }
 0x788   :  { %v5094_v40 = vpop.f32.mrf.mxu0 }
 0x789   :  { %v5095_v50 = vadd.f32 %v5094_v40, %v10936_v60 }
 0x78a   :  { %v5096_v45 = vpop.f32.mrf.mxu0  ;;  %v9279_v44 = vpop.f32.mrf.mxu1 }
 0x78b   :  { %v5097_v38 = vadd.f32 %v5096_v45, %v10937_v33  ;;  %v5136_v19 = vadd.f32 %v9236_v30, %v5095_v50  ;;  %v6503_v33 = vld [vmem:[#allocation10 + $0xb0] ss:$12 sps:$4 sm:$0xff]   ;;  %v6507_v30 = vld [vmem:[#allocation10 + $0x80] ss:$12 sps:$4 sm:$0xff]   ;;  %v6513_v45 = vld [vmem:[#allocation10 + $0x38] ss:$12 sps:$4 sm:$0xff]  }
 0x78c   :  { %v5098_v48 = vpop.f32.mrf.mxu0  ;;  %v9281_v1 = vpop.f32.mrf.mxu1  ;;  %6419 = vmatpush3.bf16.msra.mxu1 %v6503_v33  ;;  %v6516_v33 = vld [vmem:[#allocation10 + $0xc8] ss:$12 sps:$4 sm:$0xff]  }
 0x78d   :  { %v5138_v34 = vadd.f32 %v9239_v9, %v5097_v38  ;;  %v6365_v22 = vmul.f32 -1.442695, %v5136_v19  ;;  %6420 = vmatprep.subr.bf16.mxu1 %v6504_v55  ;;  %v6508_v9 = vld [vmem:[#allocation10 + $0x128] ss:$12 sps:$4 sm:$0xff]  }
 0x78e   :  { %v5099_v52 = vpop.f32.mrf.mxu0  ;;  %v5303_v15 = vpop.f32.mrf.mxu1  ;;  %v6517_v55 = vld [vmem:[#allocation10 + $0x8] ss:$12 sps:$4 sm:$0xff]  }
 0x78f   :  { %v6366_v60 = vmul.f32 -1.442695, %v5138_v34  ;;  %6680 = vpow2.f32 %v6365_v22 }
 0x790   :  { %v5304_v25 = vpop.f32.mrf.mxu1  ;;  %6421 = vmatpush3.bf16.msra.mxu1 %v6505_v17  ;;  %v11155_v17 = vld [vmem:[#allocation259_spill] sm:$0xff] }
 0x791   :  { %6682 = vpow2.f32 %v6366_v60  ;;  %6422 = vmatprep.subr.bf16.mxu1 %v6506_v36  ;;  %v6514_v60 = vld [vmem:[#allocation10 + $0xe0] ss:$12 sps:$4 sm:$0xff]  }
 0x792   :  { %6684 = vpow2.f32 %v6364_v3  ;;  %v5389_v3 = vld [vmem:[#allocation11 + $0x2] ss:$4 sm:$0x3] }
 0x793   :  { %6686 = vrcp.f32 %v5312_v43  ;;  %v5394_v36 = vrot.slane %v5389_v3, %v11155_v17 }
 0x794   :  { %6423 = vmatpush3.bf16.msra.mxu1 %v6507_v30  ;;  %v11156_v30 = vld [vmem:[#allocation262_spill] sm:$0xff] }
 0x795   :  { %6424 = vmatprep.subr.bf16.mxu1 %v6508_v9  ;;  %v5398_v9 = vrot.slane %v5389_v3, %v11156_v30 }
 0x798   :  { %6425 = vmatpush3.bf16.msra.mxu1 %v6509_v62 }
 0x799   :  { %6426 = vmatprep.subr.bf16.mxu1 %v6510_v6 }
 0x79c   :  { %v6681_v42 = vpop.eup %6680  ;;  %6427 = vmatpush3.bf16.msra.mxu1 %v6511_v27 }
 0x79d   :  { %v5324_v40 = vadd.f32 1.0, %v6681_v42  ;;  %6428 = vmatprep.subr.bf16.mxu1 %v6512_v21 }
 0x79e   :  { %v6683_v5 = vpop.eup %6682 }
 0x79f   :  { %v6685_v13 = vpop.eup %6684  ;;  %v5325_v8 = vadd.f32 1.0, %v6683_v5  ;;  %6688 = vrcp.f32 %v5324_v40 }
 0x7a0   :  { %v5313_v52 = vadd.f32 1.0, %v6685_v13  ;;  %6429 = vmatpush3.bf16.msra.mxu1 %v6513_v45  ;;  %v6687_v4 = vpop.eup %6686 }
 0x7a1   :  { %6690 = vrcp.f32 %v5325_v8  ;;  %6430 = vmatprep.subr.bf16.mxu1 %v6514_v60 }
 0x7a4   :  { %6431 = vmatpush3.bf16.msra.mxu1 %v6515_v16 }
 0x7a5   :  { %6432 = vmatprep.subr.bf16.mxu1 %v6516_v33 }
 0x7a8   :  { %6433 = vmatpush3.bf16.msra.mxu1 %v6517_v55 }
 0x7ac   :  { %v6689_v57 = vpop.eup %6688 }
 0x7ad   :  { %v5344_v2 = vmul.f32 %v6689_v57, %v8996_v56 }
 0x7c8   :  { %v5176_v35 = vpop.f32.mrf.mxu0 }
 0x7c9   :  { %v5177_v48 = vadd.f32 %v5176_v35, %v8478_v41  ;;  %v6691_v41 = vpop.eup %6690  ;;  %v6401_v35 = vld [vmem:[#allocation11 + $0x3] ss:$0 sm:$0xff] }
 0x7ca   :  { %v5178_v15 = vpop.f32.mrf.mxu0  ;;  %v5345_v10 = vmul.f32 %v6691_v41, %v9001_v54 }
 0x7cb   :  { %v5218_v59 = vadd.f32 %v9273_v37, %v5177_v48  ;;  %v5179_v7 = vadd.f32 %v5178_v15, %v10950_v61 }
 0x7cc   :  { %v5180_v25 = vpop.f32.mrf.mxu0 }
 0x7cd   :  { %6692 = vtanh.f32 %v5218_v59  ;;  %v5220_v58 = vadd.f32 %v9277_v23, %v5179_v7 }
 0x7ce   :  { %6694 = vrcp.f32 %v5313_v52  ;;  %v5181_v18 = vpop.f32.mrf.mxu0 }
 0x7cf   :  { %6696 = vtanh.f32 %v5220_v58 }
 0x7da   :  { %v6693_v0 = vpop.eup %6692 }
 0x7db   :  { %v6695_v29 = vpop.eup %6694  ;;  %v5346_v24 = vmul.f32 %v6693_v0, %v6687_v4 }
 0x7dc   :  { %v6697_v37 = vpop.eup %6696 }
 0x7dd   :  { %v5348_v14 = vadd.f32 %v5346_v24, %v5344_v2  ;;  %v5347_v61 = vmul.f32 %v6697_v37, %v6695_v29 }
 0x7df   :  { %v5349_v31 = vadd.f32 %v5347_v61, %v5345_v10 }
 0x808   :  { %v5258_v20 = vpop.f32.mrf.mxu0 }
 0x809   :  { %v5259_v23 = vadd.f32 %v5258_v20, %v10984_v11 }
 0x80a   :  { %v5260_v47 = vpop.f32.mrf.mxu0 }
 0x80b   :  { %v5300_v12 = vadd.f32 %v9279_v44, %v5259_v23  ;;  %v5261_v26 = vadd.f32 %v5260_v47, %v10985_v46 }
 0x80c   :  { %v5262_v39 = vpop.f32.mrf.mxu0 }
 0x80d   :  { %v6367_v50 = vmul.f32 -1.442695, %v5300_v12  ;;  %v5302_v38 = vadd.f32 %v9281_v1, %v5261_v26 }
 0x80e   :  { %v5263_v56 = vpop.f32.mrf.mxu0 }
 0x80f   :  { %6698 = vpow2.f32 %v6367_v50  ;;  %v6368_v49 = vmul.f32 -1.442695, %v5302_v38 }
 0x811   :  { %6700 = vpow2.f32 %v6368_v49 }
 0x812   :  { %6702 = vtanh.f32 %v5348_v14 }
 0x81c   :  { %v6699_v51 = vpop.eup %6698 }
 0x81d   :  { %v5338_v32 = vadd.f32 1.0, %v6699_v51 }
 0x81e   :  { %v6701_v54 = vpop.eup %6700 }
 0x81f   :  { %6704 = vrcp.f32 %v5338_v32  ;;  %v5339_v19 = vadd.f32 1.0, %v6701_v54  ;;  %v6703_v11 = vpop.eup %6702 }
 0x820   :  { %6706 = vtanh.f32 %v5349_v31 }
 0x821   :  { %6708 = vrcp.f32 %v5339_v19 }
 0x82c   :  { %v6705_v44 = vpop.eup %6704 }
 0x82d   :  { %v6707_v34 = vpop.eup %6706  ;;  %v5352_v63 = vmul.f32 %v6705_v44, %v6703_v11 }
 0x82e   :  { %v6709_v46 = vpop.eup %6708 }
 0x82f   :  { %v5353_v53 = vmul.f32 %v6709_v46, %v6707_v34  ;;  %v5354_v1 = vpack.c.bf16 %v5352_v63, %v5352_v63 }
 0x831   :  { %v5355_v22 = vpack.c.bf16 %v5353_v53, %v5353_v53 }
 0x833   :  { %5593 = vmatprep.mubr.bf16.mxu0 %v5355_v22 }
 0x834   :  { %5594 = vmatmul.mubr.bf16.vlgmr.msra.gmra.mxu0 %v5354_v1 }
 0x8f4   :  { %v5595_v62 = vpop.f32.mrf.mxu0 }
 0x8f5   :  { %v5596_v6 = vadd.f32 %v5595_v62, %v5394_v36 }
 0x8f6   :  { %v5597_v28 = vpop.f32.mrf.mxu0 }
 0x8f7   :  { %v5598_v27 = vadd.f32 %v5597_v28, %v5398_v9  ;;  %v5602_v42 = vmax.f32 %v5596_v6, 0.0 }
 0x8f8   :  { %v5599_v21 = vpop.f32.mrf.mxu0 }
 0x8f9   :  { %v5603_v5 = vmax.f32 %v5598_v27, 0.0  ;;  %v5604_v40 = vpack.c.bf16 %v5602_v42, %v5602_v42 }
 0x8fa   :  { %v5600_v43 = vpop.f32.mrf.mxu0 }
 0x8fb   :  { %v5605_v13 = vpack.c.bf16 %v5603_v5, %v5603_v5 }
 0x8fd   :  { %5771 = vmatprep.mubr.bf16.mxu1 %v5605_v13 }
 0x8fe   :  { %5772 = vmatmul.mubr.bf16.vlgmr.msra.gmra.mxu1 %v5604_v40 }
 0x9be   :  { %v6434_v45 = vpop.f32.mrf.mxu1 }
 0x9c0   :  { %v6435_v8 = vpop.f32.mrf.mxu1 }
 0x9c1   :  { %v6436_v48 = vadd.f32 %v6435_v8, %v6434_v45 }
 0x9c2   :  { %v6437_v52 = vpop.f32.mrf.mxu1 }
 0x9c3   :  { %v5774_v15 = vadd.f32 %v6436_v48, %v6401_v35 }
 0x9c4   :  { %v6438_v59 = vpop.f32.mrf.mxu1 }
 0x9c5   :  { %5779 = vst [vmem:[#allocation13] sm:$0x3] %v5774_v15 }
 0x9c6   :  { %6809 = shalt.err (!%p6806_p10)
}
 0x9c7   :  { %5789 = dma.vmem_to_hbm [thread:$0]  %s5787_s15, 32, %s9313_s5, [#allocation5]  }
 0x9c8   :  { %6826 = dma.done.wait [#allocation5], 32  }
 0x9c9   :  { %6827 = vsyncadd [#allocation5], 4294967264 }
 0x9ca   :  { %5793 = vsyncpa [#allocation4], 1 }
 0x9cb   :  { %5794 = vsyncpa [#allocation9], 1 }
 0x9cc   :  { %5795 = vsyncpa [#allocation12], 1 }
 0x9cd   :  { %5796 = vsyncpa [#allocation5], 1 }
 0x9ce   :  { %5797 = vsyncpa [#allocation6], 1 }

</bundles_post_ra>
